<compile_context>
chip_gen: v7x
topology: tpu7x:2x2x1
jax: 0.10.0
libtpu: 0.0.40
codegen_flags: <defaults>
</compile_context>

<pallas_src>
import functools

import jax
import jax.numpy as jnp
from jax.experimental import pallas as pl
from jax.experimental.pallas import tpu as pltpu

N_BLOCK = 5
HIDDEN = 128
NODE_IN = 1422            # residue/atom/record/rdkit one-hots + esm_embedding
NODE_IN_PAD = 1536        # next multiple of 128 -> clean MXU K tiling
EDGE_IN = 8               # distance_fourier features
TILE_N = 256              # node-row tile for the pipelined embedding matmul
VMEM_LIMIT = 64 * 1024 * 1024


def _round_up(x, m):
    return ((x + m - 1) // m) * m


# --------------------------------------------------------------------------- #
# Kernel 1: node embedding  h = relu(x @ W_node + b_node), tiled over node rows
# --------------------------------------------------------------------------- #
def _embed_kernel(x_ref, w_ref, b_ref, h_ref):
    h_ref[...] = jnp.maximum(
        jnp.dot(x_ref[...], w_ref[...], preferred_element_type=jnp.float32)
        + b_ref[...],
        0.0)


def _node_embedding(x_bf16, w_bf16, b_f32):
    n_pad = x_bf16.shape[0]
    grid = (n_pad // TILE_N,)
    flops = 2 * n_pad * NODE_IN_PAD * HIDDEN
    bytes_accessed = (n_pad * NODE_IN_PAD * 2 + NODE_IN_PAD * HIDDEN * 2
                      + HIDDEN * 4 + n_pad * HIDDEN * 4)
    return pl.pallas_call(
        _embed_kernel,
        out_shape=jax.ShapeDtypeStruct((n_pad, HIDDEN), jnp.float32),
        grid=grid,
        in_specs=[
            pl.BlockSpec((TILE_N, NODE_IN_PAD), lambda i: (i, 0)),
            pl.BlockSpec((NODE_IN_PAD, HIDDEN), lambda i: (0, 0)),
            pl.BlockSpec((1, HIDDEN), lambda i: (0, 0)),
        ],
        out_specs=pl.BlockSpec((TILE_N, HIDDEN), lambda i: (i, 0)),
        compiler_params=pltpu.CompilerParams(
            dimension_semantics=("parallel",),
            vmem_limit_bytes=VMEM_LIMIT),
        cost_estimate=pl.CostEstimate(
            flops=flops, transcendentals=0, bytes_accessed=bytes_accessed),
    )(x_bf16, w_bf16, b_f32)


# --------------------------------------------------------------------------- #
# Kernel 2: edge embedding + 5 residual MPNN blocks + Linear(128,1) + Sigmoid
# --------------------------------------------------------------------------- #
def _mpnn_kernel(h0_ref, ef_ref, src_ref, dst_ref,
                 we_ref, be_ref, wm_ref, bm_ref, wu_ref, bu_ref,
                 wo_ref, bo_ref, out_ref):
    f32 = jnp.float32
    bf16 = jnp.bfloat16

    h = h0_ref[...]                                              # (Np, H) f32
    e = jnp.maximum(
        jnp.dot(ef_ref[...], we_ref[...], preferred_element_type=f32)
        + be_ref[...],
        0.0)                                                     # (Ep, H)

    n_pad = h.shape[0]
    e_pad = e.shape[0]

    # Build one-hot gather / scatter-add operators in-kernel from int32 indices
    # (no O(N*E) HBM traffic); bf16 is exact for 0/1 values.  Padded edges have
    # index -1 and therefore match no node.
    col_ids = jax.lax.broadcasted_iota(jnp.int32, (e_pad, n_pad), 1)
    gsrc = (col_ids == src_ref[...]).astype(bf16)                # (Ep, Np)
    row_ids = jax.lax.broadcasted_iota(jnp.int32, (n_pad, e_pad), 0)
    sdst = (row_ids == dst_ref[...]).astype(bf16)                # (Np, Ep)

    for k in range(N_BLOCK):
        # gather source-node states along edges: h_src[e] = h[src[e]]
        h_src = jnp.dot(gsrc, h.astype(bf16), preferred_element_type=f32)
        msg = jnp.maximum(
            jnp.dot(h_src + e, wm_ref[k], preferred_element_type=f32)
            + bm_ref[k],
            0.0)
        # scatter-add messages to destination nodes
        agg = jnp.dot(sdst, msg.astype(bf16), preferred_element_type=f32)
        h = jnp.maximum(
            jnp.dot(h + agg, wu_ref[k], preferred_element_type=f32)
            + bu_ref[k],
            0.0) + h

    # output layer, lane-dense: keep N on the lane axis -> (1, Np) row of scores
    h_t = h.T                                                    # (H, Np) XLU transpose
    logits = jnp.dot(wo_ref[...], h_t, preferred_element_type=f32) + bo_ref[...]
    out_ref[...] = jax.nn.sigmoid(logits)                        # (1, Np)


def _message_passing(h0, edge_feat, src_col, dst_row, params):
    n_pad = h0.shape[0]
    e_pad = edge_feat.shape[0]
    H = HIDDEN
    flops = (2 * e_pad * EDGE_IN * H
             + N_BLOCK * (2 * e_pad * n_pad * H + 2 * e_pad * H * H
                          + 2 * n_pad * e_pad * H + 2 * n_pad * H * H)
             + 2 * n_pad * H)
    inputs = (h0, edge_feat, src_col, dst_row,
              params["w_edge"], params["b_edge"],
              params["w_msg"], params["b_msg"],
              params["w_upd"], params["b_upd"],
              params["w_out_row"], params["b_out"])
    bytes_accessed = int(sum(int(a.size) * a.dtype.itemsize for a in inputs)
                         + n_pad * 4)

    vmem = functools.partial(pl.BlockSpec, memory_space=pltpu.MemorySpace.VMEM)
    return pl.pallas_call(
        _mpnn_kernel,
        out_shape=jax.ShapeDtypeStruct((1, n_pad), jnp.float32),
        in_specs=[vmem() for _ in inputs],
        out_specs=vmem(),
        compiler_params=pltpu.CompilerParams(vmem_limit_bytes=VMEM_LIMIT),
        cost_estimate=pl.CostEstimate(
            flops=flops, transcendentals=n_pad, bytes_accessed=bytes_accessed),
    )(*inputs)


# --------------------------------------------------------------------------- #
# Wrapper: padding / dtype glue + the two pallas_calls
# --------------------------------------------------------------------------- #
@jax.jit
def scoring_forward(atom_feature, distance_fourier, edge_index, b_factor, params):
    n_nodes = atom_feature.shape[0]
    n_edges = distance_fourier.shape[0]
    n_pad = _round_up(max(n_nodes, 1), TILE_N)
    e_pad = _round_up(max(n_edges, 1), 128)

    # pad NODE_IN 1422 -> 1536 and nodes -> TILE_N multiple; cast to bf16 (f32 acc)
    x = jnp.pad(atom_feature,
                ((0, n_pad - n_nodes), (0, NODE_IN_PAD - NODE_IN))).astype(jnp.bfloat16)
    w_node = jnp.pad(params["w_node"],
                     ((0, NODE_IN_PAD - NODE_IN), (0, 0))).astype(jnp.bfloat16)

    h0 = _node_embedding(x, w_node, params["b_node"])            # (n_pad, 128) f32

    edge_feat = jnp.pad(distance_fourier, ((0, e_pad - n_edges), (0, 0)))
    # padded edges -> index -1: they match no node in the in-kernel one-hots
    src = jnp.pad(edge_index[0].astype(jnp.int32), (0, e_pad - n_edges),
                  constant_values=-1).reshape(e_pad, 1)
    dst = jnp.pad(edge_index[1].astype(jnp.int32), (0, e_pad - n_edges),
                  constant_values=-1).reshape(1, e_pad)

    kparams = dict(params)
    kparams["w_out_row"] = params["w_out"].T                     # (1, 128)

    out_row = _message_passing(h0, edge_feat, src, dst, kparams)  # (1, n_pad)

    output = out_row[0, :n_nodes]            # .squeeze()
    labels = jnp.squeeze(b_factor)           # g.b_factor.squeeze()
    return output, labels


def init_params(key):
    """Deterministic synthetic parameters matching the module's layer shapes."""
    ks = jax.random.split(key, 8)

    def lin(k, fan_in, fan_out):
        scale = 1.0 / jnp.sqrt(jnp.float32(fan_in))
        return jax.random.uniform(k, (fan_in, fan_out), jnp.float32, -scale, scale)

    return {
        # GraphEmbeddingModel(1422, 8, 0, 128, 0, n_block=5)
        "w_node": lin(ks[0], NODE_IN, HIDDEN),
        "b_node": jnp.zeros((1, HIDDEN), jnp.float32),
        "w_edge": lin(ks[1], EDGE_IN, HIDDEN),
        "b_edge": jnp.zeros((1, HIDDEN), jnp.float32),
        "w_msg": jax.random.normal(ks[2], (N_BLOCK, HIDDEN, HIDDEN), jnp.float32)
                 * (1.0 / jnp.sqrt(jnp.float32(HIDDEN))),
        "b_msg": jnp.zeros((N_BLOCK, 1, HIDDEN), jnp.float32),
        "w_upd": jax.random.normal(ks[3], (N_BLOCK, HIDDEN, HIDDEN), jnp.float32)
                 * (1.0 / jnp.sqrt(jnp.float32(HIDDEN))),
        "b_upd": jnp.zeros((N_BLOCK, 1, HIDDEN), jnp.float32),
        # output_layer = Linear(128, 1)
        "w_out": lin(ks[4], HIDDEN, 1),
        "b_out": jnp.zeros((1, 1), jnp.float32),
    }


if __name__ == "__main__":
    key = jax.random.PRNGKey(0)
    k_feat, k_edge, k_esm, k_bf, k_param, k_bond = jax.random.split(key, 6)

    n_nodes = 16   # atoms in the (single) protein pocket graph
    n_edges = 32

    # atom_feature = concat([residue_name_one_hot, atom_type_one_hot,
    #                        record_symbol_one_hot, rdkit_atom_feature_onehot,
    #                        esm_embedding])  -> total 1422 features
    sizes = (38, 60, 3, 41)  # one-hot blocks; esm_embedding fills the rest (1280)
    ks = jax.random.split(k_feat, len(sizes))
    onehots = [jax.nn.one_hot(jax.random.randint(k, (n_nodes,), 0, s), s,
                              dtype=jnp.float32)
               for k, s in zip(ks, sizes)]
    esm_embedding = jax.random.normal(k_esm, (n_nodes, NODE_IN - sum(sizes)),
                                      jnp.float32)
    atom_feature = jnp.concatenate(onehots + [esm_embedding], axis=-1)
    assert atom_feature.shape == (n_nodes, NODE_IN)

    edge_index = jax.random.randint(k_edge, (2, n_edges), 0, n_nodes, dtype=jnp.int32)
    distance_fourier = jax.random.normal(k_bond, (n_edges, EDGE_IN), jnp.float32)
    b_factor = jax.random.uniform(k_bf, (n_nodes, 1), jnp.float32)

    params = init_params(k_param)

    output, labels = scoring_forward(atom_feature, distance_fourier, edge_index,
                                     b_factor, params)
    jax.block_until_ready((output, labels))
    assert output.shape == (n_nodes,) and labels.shape == (n_nodes,)
    assert bool(jnp.all(jnp.isfinite(output)))
    assert bool(jnp.all((output >= 0.0) & (output <= 1.0)))
    print("KERNEL_OK")
</pallas_src>

<mosaic_0001>
module attributes {stable_mosaic.version = 11 : i64} {
  func.func @_embed_kernel(%arg0: i32, %arg1: memref<256x1536xbf16, #tpu.memory_space<vmem>>, %arg2: memref<1536x128xbf16, #tpu.memory_space<vmem>>, %arg3: memref<1x128xf32, #tpu.memory_space<vmem>>, %arg4: memref<256x128xf32, #tpu.memory_space<vmem>>) attributes {dimension_semantics = [#tpu.dimension_semantics<parallel>], iteration_bounds = array<i64: 1>, scalar_prefetch = 0 : i64, scratch_operands = 0 : i64, tpu.core_type = #tpu.core_type<tc>, window_params = [{transform_indices = @transform_0, window_bounds = array<i64: 256, 1536>}, {pipeline_mode = #tpu.pipeline_mode<synchronous>, transform_indices = @transform_1, window_bounds = array<i64: 1536, 128>}, {pipeline_mode = #tpu.pipeline_mode<synchronous>, transform_indices = @transform_2, window_bounds = array<i64: 1, 128>}, {transform_indices = @transform_3, window_bounds = array<i64: 256, 128>}]} {
    %c0 = arith.constant 0 : index
    %c0_0 = arith.constant 0 : index
    %0 = vector.load %arg1[%c0, %c0_0] : memref<256x1536xbf16, #tpu.memory_space<vmem>>, vector<256x1536xbf16>
    %c0_1 = arith.constant 0 : index
    %c0_2 = arith.constant 0 : index
    %1 = vector.load %arg2[%c0_1, %c0_2] : memref<1536x128xbf16, #tpu.memory_space<vmem>>, vector<1536x128xbf16>
    %cst = arith.constant dense<0.000000e+00> : vector<256x128xf32>
    %2 = tpu.matmul %0, %1, %cst {dimension_numbers = #tpu.dot_dimension_numbers<[1], [0], [0], [1], [0, 0, 1, 1], [], []>} : vector<256x1536xbf16>, vector<1536x128xbf16>, vector<256x128xf32> -> vector<256x128xf32>
    %c0_3 = arith.constant 0 : index
    %c0_4 = arith.constant 0 : index
    %3 = vector.load %arg3[%c0_3, %c0_4] : memref<1x128xf32, #tpu.memory_space<vmem>>, vector<1x128xf32>
    %4 = vector.broadcast %3 : vector<1x128xf32> to vector<256x128xf32>
    %5 = arith.addf %2, %4 : vector<256x128xf32>
    %cst_5 = arith.constant 0.000000e+00 : f32
    %6 = vector.broadcast %cst_5 : f32 to vector<256x128xf32>
    %7 = arith.maximumf %5, %6 : vector<256x128xf32>
    %c0_6 = arith.constant 0 : index
    %c0_7 = arith.constant 0 : index
    %8 = vector.load %arg4[%c0_6, %c0_7] : memref<256x128xf32, #tpu.memory_space<vmem>>, vector<256x128xf32>
    tpu.vector_store %arg4[%c0_6, %c0_7], %7 {strides = array<i32>} : memref<256x128xf32, #tpu.memory_space<vmem>>, vector<256x128xf32>,
    return
  }
  func.func @transform_0(%arg0: i32) -> (i32, i32) {
    %c0_i32 = arith.constant 0 : i32
    %c0_i32_0 = arith.constant 0 : i32
    return %arg0, %c0_i32 : i32, i32
  }
  func.func @transform_1(%arg0: i32) -> (i32, i32) {
    %c0_i32 = arith.constant 0 : i32
    %c0_i32_0 = arith.constant 0 : i32
    %c0_i32_1 = arith.constant 0 : i32
    return %c0_i32, %c0_i32_0 : i32, i32
  }
  func.func @transform_2(%arg0: i32) -> (i32, i32) {
    %c0_i32 = arith.constant 0 : i32
    %c0_i32_0 = arith.constant 0 : i32
    %c0_i32_1 = arith.constant 0 : i32
    return %c0_i32, %c0_i32_0 : i32, i32
  }
  func.func @transform_3(%arg0: i32) -> (i32, i32) {
    %c0_i32 = arith.constant 0 : i32
    %c0_i32_0 = arith.constant 0 : i32
    return %arg0, %c0_i32 : i32, i32
  }
}

module attributes {stable_mosaic.version = 11 : i64} {
  func.func @_mpnn_kernel(%arg0: memref<256x128xf32, #tpu.memory_space<vmem>>, %arg1: memref<128x8xf32, #tpu.memory_space<vmem>>, %arg2: memref<128x1xi32, #tpu.memory_space<vmem>>, %arg3: memref<1x128xi32, #tpu.memory_space<vmem>>, %arg4: memref<8x128xf32, #tpu.memory_space<vmem>>, %arg5: memref<1x128xf32, #tpu.memory_space<vmem>>, %arg6: memref<5x128x128xf32, #tpu.memory_space<vmem>>, %arg7: memref<5x1x128xf32, #tpu.memory_space<vmem>>, %arg8: memref<5x128x128xf32, #tpu.memory_space<vmem>>, %arg9: memref<5x1x128xf32, #tpu.memory_space<vmem>>, %arg10: memref<1x128xf32, #tpu.memory_space<vmem>>, %arg11: memref<1x1xf32, #tpu.memory_space<vmem>>, %arg12: memref<1x256xf32, #tpu.memory_space<vmem>>) attributes {dimension_semantics = [], scalar_prefetch = 0 : i64, scratch_operands = 0 : i64, tpu.core_type = #tpu.core_type<tc>} {
    %c0 = arith.constant 0 : index
    %c0_0 = arith.constant 0 : index
    %0 = vector.load %arg0[%c0, %c0_0] : memref<256x128xf32, #tpu.memory_space<vmem>>, vector<256x128xf32>
    %c0_1 = arith.constant 0 : index
    %c0_2 = arith.constant 0 : index
    %1 = vector.load %arg1[%c0_1, %c0_2] : memref<128x8xf32, #tpu.memory_space<vmem>>, vector<128x8xf32>
    %c0_3 = arith.constant 0 : index
    %c0_4 = arith.constant 0 : index
    %2 = vector.load %arg4[%c0_3, %c0_4] : memref<8x128xf32, #tpu.memory_space<vmem>>, vector<8x128xf32>
    %cst = arith.constant dense<0.000000e+00> : vector<128x128xf32>
    %3 = tpu.matmul %1, %2, %cst {dimension_numbers = #tpu.dot_dimension_numbers<[1], [0], [0], [1], [0, 0, 1, 1], [], []>} : vector<128x8xf32>, vector<8x128xf32>, vector<128x128xf32> -> vector<128x128xf32>
    %c0_5 = arith.constant 0 : index
    %c0_6 = arith.constant 0 : index
    %4 = vector.load %arg5[%c0_5, %c0_6] : memref<1x128xf32, #tpu.memory_space<vmem>>, vector<1x128xf32>
    %5 = vector.broadcast %4 : vector<1x128xf32> to vector<128x128xf32>
    %6 = arith.addf %3, %5 : vector<128x128xf32>
    %cst_7 = arith.constant 0.000000e+00 : f32
    %7 = vector.broadcast %cst_7 : f32 to vector<128x128xf32>
    %8 = arith.maximumf %6, %7 : vector<128x128xf32>
    %9 = tpu.iota {dimensions = array<i32: 1>} : vector<128x256xi32>
    %c0_8 = arith.constant 0 : index
    %c0_9 = arith.constant 0 : index
    %10 = vector.load %arg2[%c0_8, %c0_9] : memref<128x1xi32, #tpu.memory_space<vmem>>, vector<128x1xi32>
    %11 = vector.broadcast %10 : vector<128x1xi32> to vector<128x256xi32>
    %12 = arith.cmpi eq, %9, %11 : vector<128x256xi32>
    %13 = arith.extui %12 : vector<128x256xi1> to vector<128x256xi32>
    %14 = arith.sitofp %13 : vector<128x256xi32> to vector<128x256xf32>
    %15 = arith.truncf %14 : vector<128x256xf32> to vector<128x256xbf16>
    %16 = tpu.iota {dimensions = array<i32: 0>} : vector<256x128xi32>
    %c0_10 = arith.constant 0 : index
    %c0_11 = arith.constant 0 : index
    %17 = vector.load %arg3[%c0_10, %c0_11] : memref<1x128xi32, #tpu.memory_space<vmem>>, vector<1x128xi32>
    %18 = vector.broadcast %17 : vector<1x128xi32> to vector<256x128xi32>
    %19 = arith.cmpi eq, %16, %18 : vector<256x128xi32>
    %20 = arith.extui %19 : vector<256x128xi1> to vector<256x128xi32>
    %21 = arith.sitofp %20 : vector<256x128xi32> to vector<256x128xf32>
    %22 = arith.truncf %21 : vector<256x128xf32> to vector<256x128xbf16>
    %23 = arith.truncf %0 : vector<256x128xf32> to vector<256x128xbf16>
    %cst_12 = arith.constant dense<0.000000e+00> : vector<128x128xf32>
    %24 = tpu.matmul %15, %23, %cst_12 {dimension_numbers = #tpu.dot_dimension_numbers<[1], [0], [0], [1], [0, 0, 1, 1], [], []>} : vector<128x256xbf16>, vector<256x128xbf16>, vector<128x128xf32> -> vector<128x128xf32>
    %25 = arith.addf %24, %8 : vector<128x128xf32>
    %c0_13 = arith.constant 0 : index
    %c0_14 = arith.constant 0 : index
    %c0_15 = arith.constant 0 : index
    %26 = vector.load %arg6[%c0_13, %c0_14, %c0_15] : memref<5x128x128xf32, #tpu.memory_space<vmem>>, vector<1x128x128xf32>
    %27 = vector.shape_cast %26 : vector<1x128x128xf32> to vector<128x128xf32>
    %cst_16 = arith.constant dense<0.000000e+00> : vector<128x128xf32>
    %28 = tpu.matmul %25, %27, %cst_16 {dimension_numbers = #tpu.dot_dimension_numbers<[1], [0], [0], [1], [0, 0, 1, 1], [], []>} : vector<128x128xf32>, vector<128x128xf32>, vector<128x128xf32> -> vector<128x128xf32>
    %c0_17 = arith.constant 0 : index
    %c0_18 = arith.constant 0 : index
    %c0_19 = arith.constant 0 : index
    %29 = vector.load %arg7[%c0_17, %c0_18, %c0_19] : memref<5x1x128xf32, #tpu.memory_space<vmem>>, vector<1x1x128xf32>
    %30 = vector.shape_cast %29 : vector<1x1x128xf32> to vector<1x128xf32>
    %31 = vector.broadcast %30 : vector<1x128xf32> to vector<128x128xf32>
    %32 = arith.addf %28, %31 : vector<128x128xf32>
    %cst_20 = arith.constant 0.000000e+00 : f32
    %33 = vector.broadcast %cst_20 : f32 to vector<128x128xf32>
    %34 = arith.maximumf %32, %33 : vector<128x128xf32>
    %35 = arith.truncf %34 : vector<128x128xf32> to vector<128x128xbf16>
    %cst_21 = arith.constant dense<0.000000e+00> : vector<256x128xf32>
    %36 = tpu.matmul %22, %35, %cst_21 {dimension_numbers = #tpu.dot_dimension_numbers<[1], [0], [0], [1], [0, 0, 1, 1], [], []>} : vector<256x128xbf16>, vector<128x128xbf16>, vector<256x128xf32> -> vector<256x128xf32>
    %37 = arith.addf %0, %36 : vector<256x128xf32>
    %c0_22 = arith.constant 0 : index
    %c0_23 = arith.constant 0 : index
    %c0_24 = arith.constant 0 : index
    %38 = vector.load %arg8[%c0_22, %c0_23, %c0_24] : memref<5x128x128xf32, #tpu.memory_space<vmem>>, vector<1x128x128xf32>
    %39 = vector.shape_cast %38 : vector<1x128x128xf32> to vector<128x128xf32>
    %cst_25 = arith.constant dense<0.000000e+00> : vector<256x128xf32>
    %40 = tpu.matmul %37, %39, %cst_25 {dimension_numbers = #tpu.dot_dimension_numbers<[1], [0], [0], [1], [0, 0, 1, 1], [], []>} : vector<256x128xf32>, vector<128x128xf32>, vector<256x128xf32> -> vector<256x128xf32>
    %c0_26 = arith.constant 0 : index
    %c0_27 = arith.constant 0 : index
    %c0_28 = arith.constant 0 : index
    %41 = vector.load %arg9[%c0_26, %c0_27, %c0_28] : memref<5x1x128xf32, #tpu.memory_space<vmem>>, vector<1x1x128xf32>
    %42 = vector.shape_cast %41 : vector<1x1x128xf32> to vector<1x128xf32>
    %43 = vector.broadcast %42 : vector<1x128xf32> to vector<256x128xf32>
    %44 = arith.addf %40, %43 : vector<256x128xf32>
    %cst_29 = arith.constant 0.000000e+00 : f32
    %45 = vector.broadcast %cst_29 : f32 to vector<256x128xf32>
    %46 = arith.maximumf %44, %45 : vector<256x128xf32>
    %47 = arith.addf %46, %0 : vector<256x128xf32>
    %48 = arith.truncf %47 : vector<256x128xf32> to vector<256x128xbf16>
    %cst_30 = arith.constant dense<0.000000e+00> : vector<128x128xf32>
    %49 = tpu.matmul %15, %48, %cst_30 {dimension_numbers = #tpu.dot_dimension_numbers<[1], [0], [0], [1], [0, 0, 1, 1], [], []>} : vector<128x256xbf16>, vector<256x128xbf16>, vector<128x128xf32> -> vector<128x128xf32>
    %50 = arith.addf %49, %8 : vector<128x128xf32>
    %c1 = arith.constant 1 : index
    %c0_31 = arith.constant 0 : index
    %c0_32 = arith.constant 0 : index
    %51 = vector.load %arg6[%c1, %c0_31, %c0_32] : memref<5x128x128xf32, #tpu.memory_space<vmem>>, vector<1x128x128xf32>
    %52 = vector.shape_cast %51 : vector<1x128x128xf32> to vector<128x128xf32>
    %cst_33 = arith.constant dense<0.000000e+00> : vector<128x128xf32>
    %53 = tpu.matmul %50, %52, %cst_33 {dimension_numbers = #tpu.dot_dimension_numbers<[1], [0], [0], [1], [0, 0, 1, 1], [], []>} : vector<128x128xf32>, vector<128x128xf32>, vector<128x128xf32> -> vector<128x128xf32>
    %c1_34 = arith.constant 1 : index
    %c0_35 = arith.constant 0 : index
    %c0_36 = arith.constant 0 : index
    %54 = vector.load %arg7[%c1_34, %c0_35, %c0_36] : memref<5x1x128xf32, #tpu.memory_space<vmem>>, vector<1x1x128xf32>
    %55 = vector.shape_cast %54 : vector<1x1x128xf32> to vector<1x128xf32>
    %56 = vector.broadcast %55 : vector<1x128xf32> to vector<128x128xf32>
    %57 = arith.addf %53, %56 : vector<128x128xf32>
    %cst_37 = arith.constant 0.000000e+00 : f32
    %58 = vector.broadcast %cst_37 : f32 to vector<128x128xf32>
    %59 = arith.maximumf %57, %58 : vector<128x128xf32>
    %60 = arith.truncf %59 : vector<128x128xf32> to vector<128x128xbf16>
    %cst_38 = arith.constant dense<0.000000e+00> : vector<256x128xf32>
    %61 = tpu.matmul %22, %60, %cst_38 {dimension_numbers = #tpu.dot_dimension_numbers<[1], [0], [0], [1], [0, 0, 1, 1], [], []>} : vector<256x128xbf16>, vector<128x128xbf16>, vector<256x128xf32> -> vector<256x128xf32>
    %62 = arith.addf %47, %61 : vector<256x128xf32>
    %c1_39 = arith.constant 1 : index
    %c0_40 = arith.constant 0 : index
    %c0_41 = arith.constant 0 : index
    %63 = vector.load %arg8[%c1_39, %c0_40, %c0_41] : memref<5x128x128xf32, #tpu.memory_space<vmem>>, vector<1x128x128xf32>
    %64 = vector.shape_cast %63 : vector<1x128x128xf32> to vector<128x128xf32>
    %cst_42 = arith.constant dense<0.000000e+00> : vector<256x128xf32>
    %65 = tpu.matmul %62, %64, %cst_42 {dimension_numbers = #tpu.dot_dimension_numbers<[1], [0], [0], [1], [0, 0, 1, 1], [], []>} : vector<256x128xf32>, vector<128x128xf32>, vector<256x128xf32> -> vector<256x128xf32>
    %c1_43 = arith.constant 1 : index
    %c0_44 = arith.constant 0 : index
    %c0_45 = arith.constant 0 : index
    %66 = vector.load %arg9[%c1_43, %c0_44, %c0_45] : memref<5x1x128xf32, #tpu.memory_space<vmem>>, vector<1x1x128xf32>
    %67 = vector.shape_cast %66 : vector<1x1x128xf32> to vector<1x128xf32>
    %68 = vector.broadcast %67 : vector<1x128xf32> to vector<256x128xf32>
    %69 = arith.addf %65, %68 : vector<256x128xf32>
    %cst_46 = arith.constant 0.000000e+00 : f32
    %70 = vector.broadcast %cst_46 : f32 to vector<256x128xf32>
    %71 = arith.maximumf %69, %70 : vector<256x128xf32>
    %72 = arith.addf %71, %47 : vector<256x128xf32>
    %73 = arith.truncf %72 : vector<256x128xf32> to vector<256x128xbf16>
    %cst_47 = arith.constant dense<0.000000e+00> : vector<128x128xf32>
    %74 = tpu.matmul %15, %73, %cst_47 {dimension_numbers = #tpu.dot_dimension_numbers<[1], [0], [0], [1], [0, 0, 1, 1], [], []>} : vector<128x256xbf16>, vector<256x128xbf16>, vector<128x128xf32> -> vector<128x128xf32>
    %75 = arith.addf %74, %8 : vector<128x128xf32>
    %c2 = arith.constant 2 : index
    %c0_48 = arith.constant 0 : index
    %c0_49 = arith.constant 0 : index
    %76 = vector.load %arg6[%c2, %c0_48, %c0_49] : memref<5x128x128xf32, #tpu.memory_space<vmem>>, vector<1x128x128xf32>
    %77 = vector.shape_cast %76 : vector<1x128x128xf32> to vector<128x128xf32>
    %cst_50 = arith.constant dense<0.000000e+00> : vector<128x128xf32>
    %78 = tpu.matmul %75, %77, %cst_50 {dimension_numbers = #tpu.dot_dimension_numbers<[1], [0], [0], [1], [0, 0, 1, 1], [], []>} : vector<128x128xf32>, vector<128x128xf32>, vector<128x128xf32> -> vector<128x128xf32>
    %c2_51 = arith.constant 2 : index
    %c0_52 = arith.constant 0 : index
    %c0_53 = arith.constant 0 : index
    %79 = vector.load %arg7[%c2_51, %c0_52, %c0_53] : memref<5x1x128xf32, #tpu.memory_space<vmem>>, vector<1x1x128xf32>
    %80 = vector.shape_cast %79 : vector<1x1x128xf32> to vector<1x128xf32>
    %81 = vector.broadcast %80 : vector<1x128xf32> to vector<128x128xf32>
    %82 = arith.addf %78, %81 : vector<128x128xf32>
    %cst_54 = arith.constant 0.000000e+00 : f32
    %83 = vector.broadcast %cst_54 : f32 to vector<128x128xf32>
    %84 = arith.maximumf %82, %83 : vector<128x128xf32>
    %85 = arith.truncf %84 : vector<128x128xf32> to vector<128x128xbf16>
    %cst_55 = arith.constant dense<0.000000e+00> : vector<256x128xf32>
    %86 = tpu.matmul %22, %85, %cst_55 {dimension_numbers = #tpu.dot_dimension_numbers<[1], [0], [0], [1], [0, 0, 1, 1], [], []>} : vector<256x128xbf16>, vector<128x128xbf16>, vector<256x128xf32> -> vector<256x128xf32>
    %87 = arith.addf %72, %86 : vector<256x128xf32>
    %c2_56 = arith.constant 2 : index
    %c0_57 = arith.constant 0 : index
    %c0_58 = arith.constant 0 : index
    %88 = vector.load %arg8[%c2_56, %c0_57, %c0_58] : memref<5x128x128xf32, #tpu.memory_space<vmem>>, vector<1x128x128xf32>
    %89 = vector.shape_cast %88 : vector<1x128x128xf32> to vector<128x128xf32>
    %cst_59 = arith.constant dense<0.000000e+00> : vector<256x128xf32>
    %90 = tpu.matmul %87, %89, %cst_59 {dimension_numbers = #tpu.dot_dimension_numbers<[1], [0], [0], [1], [0, 0, 1, 1], [], []>} : vector<256x128xf32>, vector<128x128xf32>, vector<256x128xf32> -> vector<256x128xf32>
    %c2_60 = arith.constant 2 : index
    %c0_61 = arith.constant 0 : index
    %c0_62 = arith.constant 0 : index
    %91 = vector.load %arg9[%c2_60, %c0_61, %c0_62] : memref<5x1x128xf32, #tpu.memory_space<vmem>>, vector<1x1x128xf32>
    %92 = vector.shape_cast %91 : vector<1x1x128xf32> to vector<1x128xf32>
    %93 = vector.broadcast %92 : vector<1x128xf32> to vector<256x128xf32>
    %94 = arith.addf %90, %93 : vector<256x128xf32>
    %cst_63 = arith.constant 0.000000e+00 : f32
    %95 = vector.broadcast %cst_63 : f32 to vector<256x128xf32>
    %96 = arith.maximumf %94, %95 : vector<256x128xf32>
    %97 = arith.addf %96, %72 : vector<256x128xf32>
    %98 = arith.truncf %97 : vector<256x128xf32> to vector<256x128xbf16>
    %cst_64 = arith.constant dense<0.000000e+00> : vector<128x128xf32>
    %99 = tpu.matmul %15, %98, %cst_64 {dimension_numbers = #tpu.dot_dimension_numbers<[1], [0], [0], [1], [0, 0, 1, 1], [], []>} : vector<128x256xbf16>, vector<256x128xbf16>, vector<128x128xf32> -> vector<128x128xf32>
    %100 = arith.addf %99, %8 : vector<128x128xf32>
    %c3 = arith.constant 3 : index
    %c0_65 = arith.constant 0 : index
    %c0_66 = arith.constant 0 : index
    %101 = vector.load %arg6[%c3, %c0_65, %c0_66] : memref<5x128x128xf32, #tpu.memory_space<vmem>>, vector<1x128x128xf32>
    %102 = vector.shape_cast %101 : vector<1x128x128xf32> to vector<128x128xf32>
    %cst_67 = arith.constant dense<0.000000e+00> : vector<128x128xf32>
    %103 = tpu.matmul %100, %102, %cst_67 {dimension_numbers = #tpu.dot_dimension_numbers<[1], [0], [0], [1], [0, 0, 1, 1], [], []>} : vector<128x128xf32>, vector<128x128xf32>, vector<128x128xf32> -> vector<128x128xf32>
    %c3_68 = arith.constant 3 : index
    %c0_69 = arith.constant 0 : index
    %c0_70 = arith.constant 0 : index
    %104 = vector.load %arg7[%c3_68, %c0_69, %c0_70] : memref<5x1x128xf32, #tpu.memory_space<vmem>>, vector<1x1x128xf32>
    %105 = vector.shape_cast %104 : vector<1x1x128xf32> to vector<1x128xf32>
    %106 = vector.broadcast %105 : vector<1x128xf32> to vector<128x128xf32>
    %107 = arith.addf %103, %106 : vector<128x128xf32>
    %cst_71 = arith.constant 0.000000e+00 : f32
    %108 = vector.broadcast %cst_71 : f32 to vector<128x128xf32>
    %109 = arith.maximumf %107, %108 : vector<128x128xf32>
    %110 = arith.truncf %109 : vector<128x128xf32> to vector<128x128xbf16>
    %cst_72 = arith.constant dense<0.000000e+00> : vector<256x128xf32>
    %111 = tpu.matmul %22, %110, %cst_72 {dimension_numbers = #tpu.dot_dimension_numbers<[1], [0], [0], [1], [0, 0, 1, 1], [], []>} : vector<256x128xbf16>, vector<128x128xbf16>, vector<256x128xf32> -> vector<256x128xf32>
    %112 = arith.addf %97, %111 : vector<256x128xf32>
    %c3_73 = arith.constant 3 : index
    %c0_74 = arith.constant 0 : index
    %c0_75 = arith.constant 0 : index
    %113 = vector.load %arg8[%c3_73, %c0_74, %c0_75] : memref<5x128x128xf32, #tpu.memory_space<vmem>>, vector<1x128x128xf32>
    %114 = vector.shape_cast %113 : vector<1x128x128xf32> to vector<128x128xf32>
    %cst_76 = arith.constant dense<0.000000e+00> : vector<256x128xf32>
    %115 = tpu.matmul %112, %114, %cst_76 {dimension_numbers = #tpu.dot_dimension_numbers<[1], [0], [0], [1], [0, 0, 1, 1], [], []>} : vector<256x128xf32>, vector<128x128xf32>, vector<256x128xf32> -> vector<256x128xf32>
    %c3_77 = arith.constant 3 : index
    %c0_78 = arith.constant 0 : index
    %c0_79 = arith.constant 0 : index
    %116 = vector.load %arg9[%c3_77, %c0_78, %c0_79] : memref<5x1x128xf32, #tpu.memory_space<vmem>>, vector<1x1x128xf32>
    %117 = vector.shape_cast %116 : vector<1x1x128xf32> to vector<1x128xf32>
    %118 = vector.broadcast %117 : vector<1x128xf32> to vector<256x128xf32>
    %119 = arith.addf %115, %118 : vector<256x128xf32>
    %cst_80 = arith.constant 0.000000e+00 : f32
    %120 = vector.broadcast %cst_80 : f32 to vector<256x128xf32>
    %121 = arith.maximumf %119, %120 : vector<256x128xf32>
    %122 = arith.addf %121, %97 : vector<256x128xf32>
    %123 = arith.truncf %122 : vector<256x128xf32> to vector<256x128xbf16>
    %cst_81 = arith.constant dense<0.000000e+00> : vector<128x128xf32>
    %124 = tpu.matmul %15, %123, %cst_81 {dimension_numbers = #tpu.dot_dimension_numbers<[1], [0], [0], [1], [0, 0, 1, 1], [], []>} : vector<128x256xbf16>, vector<256x128xbf16>, vector<128x128xf32> -> vector<128x128xf32>
    %125 = arith.addf %124, %8 : vector<128x128xf32>
    %c4 = arith.constant 4 : index
    %c0_82 = arith.constant 0 : index
    %c0_83 = arith.constant 0 : index
    %126 = vector.load %arg6[%c4, %c0_82, %c0_83] : memref<5x128x128xf32, #tpu.memory_space<vmem>>, vector<1x128x128xf32>
    %127 = vector.shape_cast %126 : vector<1x128x128xf32> to vector<128x128xf32>
    %cst_84 = arith.constant dense<0.000000e+00> : vector<128x128xf32>
    %128 = tpu.matmul %125, %127, %cst_84 {dimension_numbers = #tpu.dot_dimension_numbers<[1], [0], [0], [1], [0, 0, 1, 1], [], []>} : vector<128x128xf32>, vector<128x128xf32>, vector<128x128xf32> -> vector<128x128xf32>
    %c4_85 = arith.constant 4 : index
    %c0_86 = arith.constant 0 : index
    %c0_87 = arith.constant 0 : index
    %129 = vector.load %arg7[%c4_85, %c0_86, %c0_87] : memref<5x1x128xf32, #tpu.memory_space<vmem>>, vector<1x1x128xf32>
    %130 = vector.shape_cast %129 : vector<1x1x128xf32> to vector<1x128xf32>
    %131 = vector.broadcast %130 : vector<1x128xf32> to vector<128x128xf32>
    %132 = arith.addf %128, %131 : vector<128x128xf32>
    %cst_88 = arith.constant 0.000000e+00 : f32
    %133 = vector.broadcast %cst_88 : f32 to vector<128x128xf32>
    %134 = arith.maximumf %132, %133 : vector<128x128xf32>
    %135 = arith.truncf %134 : vector<128x128xf32> to vector<128x128xbf16>
    %cst_89 = arith.constant dense<0.000000e+00> : vector<256x128xf32>
    %136 = tpu.matmul %22, %135, %cst_89 {dimension_numbers = #tpu.dot_dimension_numbers<[1], [0], [0], [1], [0, 0, 1, 1], [], []>} : vector<256x128xbf16>, vector<128x128xbf16>, vector<256x128xf32> -> vector<256x128xf32>
    %137 = arith.addf %122, %136 : vector<256x128xf32>
    %c4_90 = arith.constant 4 : index
    %c0_91 = arith.constant 0 : index
    %c0_92 = arith.constant 0 : index
    %138 = vector.load %arg8[%c4_90, %c0_91, %c0_92] : memref<5x128x128xf32, #tpu.memory_space<vmem>>, vector<1x128x128xf32>
    %139 = vector.shape_cast %138 : vector<1x128x128xf32> to vector<128x128xf32>
    %cst_93 = arith.constant dense<0.000000e+00> : vector<256x128xf32>
    %140 = tpu.matmul %137, %139, %cst_93 {dimension_numbers = #tpu.dot_dimension_numbers<[1], [0], [0], [1], [0, 0, 1, 1], [], []>} : vector<256x128xf32>, vector<128x128xf32>, vector<256x128xf32> -> vector<256x128xf32>
    %c4_94 = arith.constant 4 : index
    %c0_95 = arith.constant 0 : index
    %c0_96 = arith.constant 0 : index
    %141 = vector.load %arg9[%c4_94, %c0_95, %c0_96] : memref<5x1x128xf32, #tpu.memory_space<vmem>>, vector<1x1x128xf32>
    %142 = vector.shape_cast %141 : vector<1x1x128xf32> to vector<1x128xf32>
    %143 = vector.broadcast %142 : vector<1x128xf32> to vector<256x128xf32>
    %144 = arith.addf %140, %143 : vector<256x128xf32>
    %cst_97 = arith.constant 0.000000e+00 : f32
    %145 = vector.broadcast %cst_97 : f32 to vector<256x128xf32>
    %146 = arith.maximumf %144, %145 : vector<256x128xf32>
    %147 = arith.addf %146, %122 : vector<256x128xf32>
    %148 = tpu.transpose %147, [1, 0] : vector<256x128xf32> -> vector<128x256xf32>
    %c0_98 = arith.constant 0 : index
    %c0_99 = arith.constant 0 : index
    %149 = vector.load %arg10[%c0_98, %c0_99] : memref<1x128xf32, #tpu.memory_space<vmem>>, vector<1x128xf32>
    %cst_100 = arith.constant dense<0.000000e+00> : vector<1x256xf32>
    %150 = tpu.matmul %149, %148, %cst_100 {dimension_numbers = #tpu.dot_dimension_numbers<[1], [0], [0], [1], [0, 0, 1, 1], [], []>} : vector<1x128xf32>, vector<128x256xf32>, vector<1x256xf32> -> vector<1x256xf32>
    %c0_101 = arith.constant 0 : index
    %c0_102 = arith.constant 0 : index
    %151 = vector.load %arg11[%c0_101, %c0_102] : memref<1x1xf32, #tpu.memory_space<vmem>>, vector<1x1xf32>
    %152 = vector.broadcast %151 : vector<1x1xf32> to vector<1x256xf32>
    %153 = arith.addf %150, %152 : vector<1x256xf32>
    %154 = arith.negf %153 : vector<1x256xf32>
    %155 = math.exp %154 : vector<1x256xf32>
    %cst_103 = arith.constant 1.000000e+00 : f32
    %156 = vector.broadcast %cst_103 : f32 to vector<1x256xf32>
    %157 = arith.addf %156, %155 : vector<1x256xf32>
    %158 = arith.divf %156, %157 : vector<1x256xf32>
    %c0_104 = arith.constant 0 : index
    %c0_105 = arith.constant 0 : index
    %159 = vector.load %arg12[%c0_104, %c0_105] : memref<1x256xf32, #tpu.memory_space<vmem>>, vector<1x256xf32>
    tpu.vector_store %arg12[%c0_104, %c0_105], %158 {strides = array<i32>} : memref<1x256xf32, #tpu.memory_space<vmem>>, vector<1x256xf32>,
    return
  }
}

</mosaic_0001>

<bundles_post_ra>
// kernel: scoring_forward.2
= control target key start
LH: loop header
LB: loop body
LE: loop exit
PB: predicated region body
PF: predicated region fallthrough
CT: control target
= control target key end

     0   :  { %8 = vsyncpa [#allocation3], 0  ;;  %s4783_s0 = inlined_call_operand.hbm [shape: bf16[256,1536], index: 0, kind: input, shape index: {}]   ;;  %s4784_s1 = inlined_call_operand.hbm [shape: bf16[1536,128], index: 1, kind: input, shape index: {}]   ;;  %s4785_s2 = inlined_call_operand.hbm [shape: f32[1,128], index: 2, kind: input, shape index: {}]   ;;  %s4786_s3 = inlined_call_operand.hbm [shape: f32[256,128], index: 3, kind: output, shape index: {}]  }
   0x1   :  { %9 = vsyncpa [#allocation6], 0 }
   0x2   :  { %10 = vsyncpa [#allocation4], 0  ;;  %s4479_s12 = smov [#allocation5]   ;;  %s4385_s16 = scalar_lea.hbm %s4784_s1, 12288 }
   0x3   :  { %s28_s13 = sshll.u32 %s4479_s12, 4  ;;  %p4386_p0 = scmp.ne.s32.totalorder %s4784_s1, %s4385_s16  ;;  %s29_s13 = int_to_ptr.vmem [resolvable:$true] %s28_s13 }
   0x4   :  { %p4389_p1 = scmp.lt.u32.totalorder %s4385_s16, %s4784_s1 }
   0x6   :  { %p4391_p2 = pnand %p4389_p1, %p4386_p0 }
   0x8   :  { %4394 = shalt.err (!%p4391_p2)
}
   0x9   :  { %s4395_s21 = scalar_lea.vmem %s29_s13, 12288  ;;  %p4400_p4 = scmp.lt.s32.totalorder %s29_s13, %s29_s13 }
   0xa   :  { %p4396_p3 = scmp.ne.s32.totalorder %s29_s13, %s4395_s21  ;;  %p4401_p5 = scmp.lt.s32.totalorder %s4395_s21, %s4395_s21 }
   0xc   :  { %p4402_p6 = por %p4401_p5, %p4400_p4 }
   0xe   :  { %p4403_p7 = pnand %p4402_p6, %p4396_p3 }
  0x10   :  { %4406 = shalt.err (!%p4403_p7)
}
  0x11   :  { %s4480_s22 = smov 64   ;;  %s4481_s23 = smov 4  }
  0x12   :  { %34 = dma.hbm_to_vmem [thread:$0]  %s4784_s1, 12288, %s29_s13, [#allocation6], %s4480_s22, %s4480_s22, %s4481_s23  }
  0x13   :  { %s4482_s26 = smov [#allocation2]   ;;  %s4407_s30 = scalar_lea.hbm %s4783_s0, 24576 }
  0x14   :  { %s16_s27 = sshll.u32 %s4482_s26, 4  ;;  %p4408_p8 = scmp.ne.s32.totalorder %s4783_s0, %s4407_s30  ;;  %s17_s27 = int_to_ptr.vmem [resolvable:$true] %s16_s27 }
  0x15   :  { %p4411_p9 = scmp.lt.u32.totalorder %s4407_s30, %s4783_s0 }
  0x17   :  { %p4413_p10 = pnand %p4411_p9, %p4408_p8 }
  0x19   :  { %4416 = shalt.err (!%p4413_p10)
}
  0x1a   :  { %s4417_s8 = scalar_lea.vmem %s17_s27, 24576  ;;  %p4422_p12 = scmp.lt.s32.totalorder %s17_s27, %s17_s27 }
  0x1b   :  { %p4418_p11 = scmp.ne.s32.totalorder %s17_s27, %s4417_s8  ;;  %p4423_p13 = scmp.lt.s32.totalorder %s4417_s8, %s4417_s8 }
  0x1d   :  { %p4424_p0 = por %p4423_p13, %p4422_p12 }
  0x1f   :  { %p4425_p1 = pnand %p4424_p0, %p4418_p11 }
  0x21   :  { %4428 = shalt.err (!%p4425_p1)
}
  0x22   :  { %s4483_s1 = smov 768   ;;  %s4484_s9 = smov 48  }
  0x23   :  { %22 = dma.hbm_to_vmem [thread:$0]  %s4783_s0, 24576, %s17_s27, [#allocation3], %s4483_s1, %s4483_s1, %s4484_s9  }
  0x24   :  { %s4485_s12 = smov [#allocation7]   ;;  %s4429_s16 = scalar_lea.hbm %s4785_s2, 16 }
  0x25   :  { %s41_s13 = sshll.u32 %s4485_s12, 4  ;;  %p4430_p2 = scmp.ne.s32.totalorder %s4785_s2, %s4429_s16  ;;  %s42_s13 = int_to_ptr.vmem [resolvable:$true] %s41_s13 }
  0x26   :  { %p4433_p3 = scmp.lt.u32.totalorder %s4429_s16, %s4785_s2 }
  0x28   :  { %p4435_p4 = pnand %p4433_p3, %p4430_p2 }
  0x2a   :  { %4438 = shalt.err (!%p4435_p4)
}
  0x2b   :  { %s4439_s21 = scalar_lea.vmem %s42_s13, 16  ;;  %s4443_s0 = scalar_lea.vmem %s42_s13, 32 }
  0x2c   :  { %p4440_p5 = scmp.ne.s32.totalorder %s42_s13, %s4439_s21  ;;  %p4444_p6 = scmp.lt.s32.totalorder %s42_s13, %s42_s13 }
  0x2d   :  { %p4445_p7 = scmp.lt.s32.totalorder %s4443_s0, %s4439_s21 }
  0x2f   :  { %p4446_p8 = por %p4445_p7, %p4444_p6 }
  0x31   :  { %p4447_p9 = pnand %p4446_p8, %p4440_p5 }
  0x33   :  { %4450 = shalt.err (!%p4447_p9)
}
  0x34   :  { %44 = dma.hbm_to_vmem [thread:$0]  %s4785_s2, 16, %s42_s13, [#allocation6]  }
  0x35   :  { %4473 = dma.done.wait [#allocation3], 24576  }
  0x36   :  { %4474 = vsyncadd [#allocation3], 4294942720 }
  0x37   :  { %4475 = dma.done.wait [#allocation6], 12304  }
  0x38   :  { %4476 = vsyncadd [#allocation6], 4294954992  ;;  %v4001_v0 = vld [vmem:[#allocation5 + $0x40] sm:$0xff]   ;;  %v4005_v4 = vld [vmem:[#allocation5 + $0x48] sm:$0xff]   ;;  %s4486_s2 = smov [#allocation8]  }
  0x39   :  { %v4002_v1 = vld [vmem:[#allocation5 + $0xc0] sm:$0xff]   ;;  %3319 = vmatprep.subr.bf16.mxu0 %v4001_v0  ;;  %v4006_v5 = vld [vmem:[#allocation5 + $0xc8] sm:$0xff]   ;;  %v4009_v8 = vld [vmem:[#allocation5 + $0x50] sm:$0xff]   ;;  %s3017_s24 = sshll.u32 %s4486_s2, 4  ;;  %s3018_s24 = int_to_ptr.vmem [resolvable:$true] %s3017_s24 }
  0x3a   :  { %v4003_v2 = vld [vmem:[#allocation5] sm:$0xff]   ;;  %3431 = vmatprep.subr.bf16.mxu1 %v4002_v1  ;;  %v4007_v6 = vld [vmem:[#allocation5 + $0x8] sm:$0xff]   ;;  %v4010_v9 = vld [vmem:[#allocation5 + $0xd0] sm:$0xff]   ;;  %s4451_s25 = scalar_lea.vmem %s3018_s24, 4096  ;;  %p4456_p11 = scmp.lt.s32.totalorder %s3018_s24, %s3018_s24 }
  0x3b   :  { %v4004_v3 = vld [vmem:[#allocation5 + $0x80] sm:$0xff]   ;;  %3320 = vmatpush3.bf16.msra.mxu0 %v4003_v2  ;;  %v4008_v7 = vld [vmem:[#allocation5 + $0x88] sm:$0xff]   ;;  %v4011_v10 = vld [vmem:[#allocation5 + $0x10] sm:$0xff]   ;;  %p4452_p10 = scmp.ne.s32.totalorder %s3018_s24, %s4451_s25  ;;  %p4457_p12 = scmp.lt.s32.totalorder %s4451_s25, %s4451_s25 }
  0x3c   :  { %3432 = vmatpush3.bf16.msra.mxu1 %v4004_v3  ;;  %3321 = vmatprep.subr.bf16.mxu0 %v4005_v4  ;;  %v4012_v11 = vld [vmem:[#allocation5 + $0x90] sm:$0xff]   ;;  %v4013_v12 = vld [vmem:[#allocation5 + $0x58] sm:$0xff]   ;;  %v4017_v16 = vld [vmem:[#allocation5 + $0x60] sm:$0xff]  }
  0x3d   :  { %3433 = vmatprep.subr.bf16.mxu1 %v4006_v5  ;;  %v4014_v13 = vld [vmem:[#allocation5 + $0xd8] sm:$0xff]   ;;  %v4018_v17 = vld [vmem:[#allocation5 + $0xe0] sm:$0xff]   ;;  %v4021_v20 = vld [vmem:[#allocation5 + $0x68] sm:$0xff]   ;;  %p4458_p13 = por %p4457_p12, %p4456_p11 }
  0x3e   :  { %v4015_v14 = vld [vmem:[#allocation5 + $0x18] sm:$0xff]   ;;  %v4019_v18 = vld [vmem:[#allocation5 + $0x20] sm:$0xff]   ;;  %v4022_v21 = vld [vmem:[#allocation5 + $0xe8] sm:$0xff]  }
  0x3f   :  { %3322 = vmatpush3.bf16.msra.mxu0 %v4007_v6  ;;  %v4016_v15 = vld [vmem:[#allocation5 + $0x98] sm:$0xff]   ;;  %v4020_v19 = vld [vmem:[#allocation5 + $0xa0] sm:$0xff]   ;;  %v4023_v22 = vld [vmem:[#allocation5 + $0x28] sm:$0xff]   ;;  %p4459_p0 = pnand %p4458_p13, %p4452_p10 }
  0x40   :  { %3434 = vmatpush3.bf16.msra.mxu1 %v4008_v7  ;;  %3323 = vmatprep.subr.bf16.mxu0 %v4009_v8  ;;  %v4024_v23 = vld [vmem:[#allocation5 + $0xa8] sm:$0xff]   ;;  %v4025_v24 = vld [vmem:[#allocation5 + $0x70] sm:$0xff]   ;;  %v4029_v28 = vld [vmem:[#allocation5 + $0x78] sm:$0xff]  }
  0x41   :  { %3435 = vmatprep.subr.bf16.mxu1 %v4010_v9  ;;  %v4026_v25 = vld [vmem:[#allocation5 + $0xf0] sm:$0xff]   ;;  %v4030_v29 = vld [vmem:[#allocation5 + $0xf8] sm:$0xff]   ;;  %v4039_v36 = vld [vmem:[#allocation5 + $0x140] sm:$0xff]  }
  0x42   :  { %v4027_v26 = vld [vmem:[#allocation5 + $0x30] sm:$0xff]   ;;  %v4031_v30 = vld [vmem:[#allocation5 + $0x38] sm:$0xff]   ;;  %v4040_v37 = vld [vmem:[#allocation5 + $0x100] sm:$0xff]  }
  0x43   :  { %3324 = vmatpush3.bf16.msra.mxu0 %v4011_v10  ;;  %v4028_v27 = vld [vmem:[#allocation5 + $0xb0] sm:$0xff]   ;;  %v4032_v31 = vld [vmem:[#allocation5 + $0xb8] sm:$0xff]   ;;  %v4041_v38 = vld [vmem:[#allocation5 + $0x1c0] sm:$0xff]  }
  0x44   :  { %3436 = vmatpush3.bf16.msra.mxu1 %v4012_v11  ;;  %3325 = vmatprep.subr.bf16.mxu0 %v4013_v12  ;;  %v4033_v32 = vld [vmem:[#allocation2] ss:$48 sps:$4 sm:$0xff]   ;;  %v4035_v33 = vld [vmem:[#allocation2 + $0x4] ss:$48 sps:$4 sm:$0xff]   ;;  %v4036_v34 = vld [vmem:[#allocation2 + $0x8] ss:$48 sps:$4 sm:$0xff]  }
  0x45   :  { %3437 = vmatprep.subr.bf16.mxu1 %v4014_v13  ;;  %v4038_v35 = vld [vmem:[#allocation2 + $0xc] ss:$48 sps:$4 sm:$0xff]   ;;  %2014 = vmatprep.mubr.bf16.mxu0 %v4035_v33  ;;  %v4042_v39 = vld [vmem:[#allocation5 + $0x180] sm:$0xff]   ;;  %v4048_v43 = vld [vmem:[#allocation2 + $0x68] ss:$48 sps:$4 sm:$0xff]  }
  0x46   :  { %2175 = vmatprep.mubr.bf16.mxu1 %v4038_v35  ;;  %v4043_v40 = vld [vmem:[#allocation2 + $0x64] ss:$48 sps:$4 sm:$0xff]   ;;  %v4045_v41 = vld [vmem:[#allocation2 + $0x6c] ss:$48 sps:$4 sm:$0xff]   ;;  %v4047_v42 = vld [vmem:[#allocation2 + $0x60] ss:$48 sps:$4 sm:$0xff]  }
  0x47   :  { %3326 = vmatpush3.bf16.msra.mxu0 %v4015_v14  ;;  %v4049_v44 = vld [vmem:[#allocation2 + $0xc4] ss:$48 sps:$4 sm:$0xff]   ;;  %v4051_v45 = vld [vmem:[#allocation2 + $0xcc] ss:$48 sps:$4 sm:$0xff]   ;;  %v4053_v48 = vld [vmem:[#allocation2 + $0xc0] ss:$48 sps:$4 sm:$0xff]  }
  0x48   :  { %3438 = vmatpush3.bf16.msra.mxu1 %v4016_v15  ;;  %3327 = vmatprep.subr.bf16.mxu0 %v4017_v16  ;;  %v4055_v46 = vld [vmem:[#allocation5 + $0x148] sm:$0xff]   ;;  %v4059_v52 = vld [vmem:[#allocation2 + $0x124] ss:$48 sps:$4 sm:$0xff]   ;;  %v4063_v54 = vld [vmem:[#allocation2 + $0x120] ss:$48 sps:$4 sm:$0xff]  }
  0x49   :  { %3439 = vmatprep.subr.bf16.mxu1 %v4018_v17  ;;  %v4056_v47 = vld [vmem:[#allocation5 + $0x108] sm:$0xff]   ;;  %v4071_v55 = vld [vmem:[#allocation5 + $0x150] sm:$0xff]   ;;  %v4087_v1 = vld [vmem:[#allocation5 + $0x158] sm:$0xff]  }
  0x4a   :  { %v4057_v49 = vld [vmem:[#allocation5 + $0x1c8] sm:$0xff]   ;;  %v4065_v57 = vld [vmem:[#allocation2 + $0x184] ss:$48 sps:$4 sm:$0xff]   ;;  %v4069_v62 = vld [vmem:[#allocation2 + $0x180] ss:$48 sps:$4 sm:$0xff]  }
  0x4b   :  { %3328 = vmatpush3.bf16.msra.mxu0 %v4019_v18  ;;  %v4058_v50 = vld [vmem:[#allocation5 + $0x188] sm:$0xff]   ;;  %v4072_v58 = vld [vmem:[#allocation5 + $0x110] sm:$0xff]   ;;  %v4088_v3 = vld [vmem:[#allocation5 + $0x118] sm:$0xff]  }
  0x4c   :  { %3440 = vmatpush3.bf16.msra.mxu1 %v4020_v19  ;;  %3329 = vmatprep.subr.bf16.mxu0 %v4021_v20  ;;  %v4054_v51 = vld [vmem:[#allocation2 + $0xc8] ss:$48 sps:$4 sm:$0xff]   ;;  %v4061_v53 = vld [vmem:[#allocation2 + $0x12c] ss:$48 sps:$4 sm:$0xff]   ;;  %v4073_v59 = vld [vmem:[#allocation5 + $0x1d0] sm:$0xff]  }
  0x4d   :  { %3441 = vmatprep.subr.bf16.mxu1 %v4022_v21  ;;  %v4064_v56 = vld [vmem:[#allocation2 + $0x128] ss:$48 sps:$4 sm:$0xff]   ;;  %v4074_v60 = vld [vmem:[#allocation5 + $0x190] sm:$0xff]   ;;  %v4067_v61 = vld [vmem:[#allocation2 + $0x18c] ss:$48 sps:$4 sm:$0xff]  }
  0x4e   :  { %v4070_v63 = vld [vmem:[#allocation2 + $0x188] ss:$48 sps:$4 sm:$0xff]   ;;  %v4075_v0 = vld [vmem:[#allocation2 + $0x1e4] ss:$48 sps:$4 sm:$0xff]   ;;  %v4077_v2 = vld [vmem:[#allocation2 + $0x1ec] ss:$48 sps:$4 sm:$0xff]  }
  0x4f   :  { %3330 = vmatpush3.bf16.msra.mxu0 %v4023_v22  ;;  %v4089_v4 = vld [vmem:[#allocation5 + $0x1d8] sm:$0xff]   ;;  %v4079_v6 = vld [vmem:[#allocation2 + $0x1e0] ss:$48 sps:$4 sm:$0xff]   ;;  %v4081_v8 = vld [vmem:[#allocation2 + $0x244] ss:$48 sps:$4 sm:$0xff]  }
  0x50   :  { %3442 = vmatpush3.bf16.msra.mxu1 %v4024_v23  ;;  %3331 = vmatprep.subr.bf16.mxu0 %v4025_v24  ;;  %v4090_v5 = vld [vmem:[#allocation5 + $0x198] sm:$0xff]   ;;  %v4103_v10 = vld [vmem:[#allocation5 + $0x160] sm:$0xff]   ;;  %v4119_v18 = vld [vmem:[#allocation5 + $0x168] sm:$0xff]  }
  0x51   :  { %3443 = vmatprep.subr.bf16.mxu1 %v4026_v25  ;;  %v4080_v7 = vld [vmem:[#allocation2 + $0x1e8] ss:$48 sps:$4 sm:$0xff]   ;;  %v4083_v9 = vld [vmem:[#allocation2 + $0x24c] ss:$48 sps:$4 sm:$0xff]   ;;  %v4104_v11 = vld [vmem:[#allocation5 + $0x120] sm:$0xff]  }
  0x52   :  { %v4105_v12 = vld [vmem:[#allocation5 + $0x1e0] sm:$0xff]   ;;  %v4086_v15 = vld [vmem:[#allocation2 + $0x248] ss:$48 sps:$4 sm:$0xff]   ;;  %v4093_v17 = vld [vmem:[#allocation2 + $0x2ac] ss:$48 sps:$4 sm:$0xff]  }
  0x53   :  { %3332 = vmatpush3.bf16.msra.mxu0 %v4027_v26  ;;  %v4106_v13 = vld [vmem:[#allocation5 + $0x1a0] sm:$0xff]   ;;  %v4120_v19 = vld [vmem:[#allocation5 + $0x128] sm:$0xff]   ;;  %v4135_v26 = vld [vmem:[#allocation5 + $0x170] sm:$0xff]  }
  0x54   :  { %3444 = vmatpush3.bf16.msra.mxu1 %v4028_v27  ;;  %3333 = vmatprep.subr.bf16.mxu0 %v4029_v28  ;;  %v4085_v14 = vld [vmem:[#allocation2 + $0x240] ss:$48 sps:$4 sm:$0xff]   ;;  %v4091_v16 = vld [vmem:[#allocation2 + $0x2a4] ss:$48 sps:$4 sm:$0xff]   ;;  %v4121_v20 = vld [vmem:[#allocation5 + $0x1e8] sm:$0xff]  }
  0x55   :  { %3445 = vmatprep.subr.bf16.mxu1 %v4030_v29  ;;  %v4122_v21 = vld [vmem:[#allocation5 + $0x1a8] sm:$0xff]   ;;  %v4095_v22 = vld [vmem:[#allocation2 + $0x2a0] ss:$48 sps:$4 sm:$0xff]   ;;  %v4097_v24 = vld [vmem:[#allocation2 + $0x304] ss:$48 sps:$4 sm:$0xff]  }
  0x56   :  { %v4096_v23 = vld [vmem:[#allocation2 + $0x2a8] ss:$48 sps:$4 sm:$0xff]   ;;  %v4099_v25 = vld [vmem:[#allocation2 + $0x30c] ss:$48 sps:$4 sm:$0xff]   ;;  %v4136_v27 = vld [vmem:[#allocation5 + $0x130] sm:$0xff]  }
  0x57   :  { %3334 = vmatpush3.bf16.msra.mxu0 %v4031_v30  ;;  %v4137_v28 = vld [vmem:[#allocation5 + $0x1f0] sm:$0xff]   ;;  %v4109_v33 = vld [vmem:[#allocation2 + $0x36c] ss:$48 sps:$4 sm:$0xff]  }
  0x58   :  { %3446 = vmatpush3.bf16.msra.mxu1 %v4032_v31  ;;  %3543 = vmatprep.subr.bf16.mxu0 %v4039_v36  ;;  %v4138_v29 = vld [vmem:[#allocation5 + $0x1b0] sm:$0xff]   ;;  %v4102_v31 = vld [vmem:[#allocation2 + $0x308] ss:$48 sps:$4 sm:$0xff]  }
  0x59   :  { %3655 = vmatprep.subr.bf16.mxu1 %v4041_v38  ;;  %v4101_v30 = vld [vmem:[#allocation2 + $0x300] ss:$48 sps:$4 sm:$0xff]   ;;  %v4152_v35 = vld [vmem:[#allocation5 + $0x138] sm:$0xff]  }
  0x5a   :  { %2015 = vmatmul.mubr.bf16.vlgmr.msra.gmra.mrb[0].mxu0 %v4033_v32  ;;  %v4107_v32 = vld [vmem:[#allocation2 + $0x364] ss:$48 sps:$4 sm:$0xff]   ;;  %v4111_v36 = vld [vmem:[#allocation2 + $0x360] ss:$48 sps:$4 sm:$0xff]   ;;  %v4154_v38 = vld [vmem:[#allocation5 + $0x1b8] sm:$0xff]  }
  0x5b   :  { %2176 = vmatmul.mubr.bf16.vlgmr.msra.gmra.mrb[0].mxu1 %v4036_v34  ;;  %3544 = vmatpush3.bf16.msra.mxu0 %v4040_v37  ;;  %v4151_v34 = vld [vmem:[#allocation5 + $0x178] sm:$0xff]  }
  0x5c   :  { %3656 = vmatpush3.bf16.msra.mxu1 %v4042_v39  ;;  %2022 = vmatprep.mubr.bf16.mxu0 %v4043_v40  ;;  %v4153_v37 = vld [vmem:[#allocation5 + $0x1f8] sm:$0xff]   ;;  %v4113_v40 = vld [vmem:[#allocation2 + $0x3c4] ss:$48 sps:$4 sm:$0xff]  }
  0x5d   :  { %2183 = vmatprep.mubr.bf16.mxu1 %v4045_v41  ;;  %3545 = vmatprep.subr.bf16.mxu0 %v4055_v46  ;;  %v4112_v39 = vld [vmem:[#allocation2 + $0x368] ss:$48 sps:$4 sm:$0xff]   ;;  %v4115_v41 = vld [vmem:[#allocation2 + $0x3cc] ss:$48 sps:$4 sm:$0xff]   ;;  %v4123_v46 = vld [vmem:[#allocation2 + $0x424] ss:$48 sps:$4 sm:$0xff]  }
  0x5e   :  { %3657 = vmatprep.subr.bf16.mxu1 %v4057_v49  ;;  %v4128_v49 = vld [vmem:[#allocation2 + $0x428] ss:$48 sps:$4 sm:$0xff]  }
  0x5f   :  { %3546 = vmatpush3.bf16.msra.mxu0 %v4056_v47  ;;  %v4125_v47 = vld [vmem:[#allocation2 + $0x42c] ss:$48 sps:$4 sm:$0xff]  }
  0x60   :  { %3658 = vmatpush3.bf16.msra.mxu1 %v4058_v50  ;;  %3547 = vmatprep.subr.bf16.mxu0 %v4071_v55  ;;  %v4129_v50 = vld [vmem:[#allocation2 + $0x484] ss:$48 sps:$4 sm:$0xff]   ;;  %v4141_v55 = vld [vmem:[#allocation2 + $0x4ec] ss:$48 sps:$4 sm:$0xff]  }
  0x61   :  { %3659 = vmatprep.subr.bf16.mxu1 %v4073_v59  ;;  %v4147_v59 = vld [vmem:[#allocation2 + $0x54c] ss:$48 sps:$4 sm:$0xff]  }
  0x62   :  { %2023 = vmatmul.mubr.bf16.gmra.mrb[4].mxu0 %v4047_v42  ;;  %v4117_v42 = vld [vmem:[#allocation2 + $0x3c0] ss:$48 sps:$4 sm:$0xff]  }
  0x63   :  { %2184 = vmatmul.mubr.bf16.gmra.mrb[4].mxu1 %v4048_v43  ;;  %2030 = vmatprep.mubr.bf16.mxu0 %v4049_v44  ;;  %v4167_v43 = vld [vmem:[#allocation5 + $0x240] sm:$0xff]   ;;  %v4118_v44 = vld [vmem:[#allocation2 + $0x3c8] ss:$48 sps:$4 sm:$0xff]  }
  0x64   :  { %2191 = vmatprep.mubr.bf16.mxu1 %v4051_v45  ;;  %3548 = vmatpush3.bf16.msra.mxu0 %v4072_v58  ;;  %v4169_v45 = vld [vmem:[#allocation5 + $0x2c0] sm:$0xff]  }
  0x65   :  { %3660 = vmatpush3.bf16.msra.mxu1 %v4074_v60  ;;  %3549 = vmatprep.subr.bf16.mxu0 %v4087_v1  ;;  %v4145_v58 = vld [vmem:[#allocation2 + $0x544] ss:$48 sps:$4 sm:$0xff]   ;;  %v4149_v60 = vld [vmem:[#allocation2 + $0x540] ss:$48 sps:$4 sm:$0xff]   ;;  %v4160_v1 = vld [vmem:[#allocation2 + $0x5a8] ss:$48 sps:$4 sm:$0xff]  }
  0x66   :  { %3661 = vmatprep.subr.bf16.mxu1 %v4089_v4  ;;  %v4161_v4 = vld [vmem:[#allocation2 + $0x10] ss:$48 sps:$4 sm:$0xff]  }
  0x68   :  { %3550 = vmatpush3.bf16.msra.mxu0 %v4088_v3  ;;  %v4166_v3 = vld [vmem:[#allocation2 + $0x1c] ss:$48 sps:$4 sm:$0xff]  }
  0x69   :  { %3662 = vmatpush3.bf16.msra.mxu1 %v4090_v5  ;;  %3551 = vmatprep.subr.bf16.mxu0 %v4103_v10  ;;  %v4164_v5 = vld [vmem:[#allocation2 + $0x18] ss:$48 sps:$4 sm:$0xff]  }
  0x6a   :  { %2031 = vmatmul.mubr.bf16.gmra.mrb[8].mxu0 %v4053_v48  ;;  %3663 = vmatprep.subr.bf16.mxu1 %v4105_v12  ;;  %v4127_v48 = vld [vmem:[#allocation2 + $0x420] ss:$48 sps:$4 sm:$0xff]   ;;  %v4183_v10 = vld [vmem:[#allocation5 + $0x248] sm:$0xff]  }
  0x6b   :  { %2192 = vmatmul.mubr.bf16.gmra.mrb[8].mxu1 %v4054_v51  ;;  %2038 = vmatprep.mubr.bf16.mxu0 %v4059_v52  ;;  %v4131_v51 = vld [vmem:[#allocation2 + $0x48c] ss:$48 sps:$4 sm:$0xff]   ;;  %v4133_v52 = vld [vmem:[#allocation2 + $0x480] ss:$48 sps:$4 sm:$0xff]  }
  0x6c   :  { %2199 = vmatprep.mubr.bf16.mxu1 %v4061_v53  ;;  %3552 = vmatpush3.bf16.msra.mxu0 %v4104_v11  ;;  %v4134_v53 = vld [vmem:[#allocation2 + $0x488] ss:$48 sps:$4 sm:$0xff]  }
  0x6d   :  { %3664 = vmatpush3.bf16.msra.mxu1 %v4106_v13  ;;  %3553 = vmatprep.subr.bf16.mxu0 %v4119_v18  ;;  %v4185_v11 = vld [vmem:[#allocation5 + $0x2c8] sm:$0xff]   ;;  %v4177_v18 = vld [vmem:[#allocation2 + $0xd4] ss:$48 sps:$4 sm:$0xff]  }
  0x6e   :  { %3665 = vmatprep.subr.bf16.mxu1 %v4121_v20  ;;  %v4184_v12 = vld [vmem:[#allocation5 + $0x208] sm:$0xff]   ;;  %v4200_v20 = vld [vmem:[#allocation5 + $0x210] sm:$0xff]  }
  0x6f   :  { %v4186_v13 = vld [vmem:[#allocation5 + $0x288] sm:$0xff]  }
  0x70   :  { %3554 = vmatpush3.bf16.msra.mxu0 %v4120_v19  ;;  %v4179_v19 = vld [vmem:[#allocation2 + $0xdc] ss:$48 sps:$4 sm:$0xff]  }
  0x71   :  { %3666 = vmatpush3.bf16.msra.mxu1 %v4122_v21  ;;  %3555 = vmatprep.subr.bf16.mxu0 %v4135_v26  ;;  %v4202_v21 = vld [vmem:[#allocation5 + $0x290] sm:$0xff]   ;;  %v4218_v26 = vld [vmem:[#allocation5 + $0x298] sm:$0xff]  }
  0x72   :  { %2039 = vmatmul.mubr.bf16.gmra.mrb[12].mxu0 %v4063_v54  ;;  %3667 = vmatprep.subr.bf16.mxu1 %v4137_v28  ;;  %v4139_v54 = vld [vmem:[#allocation2 + $0x4e4] ss:$48 sps:$4 sm:$0xff]  }
  0x73   :  { %2200 = vmatmul.mubr.bf16.gmra.mrb[12].mxu1 %v4064_v56  ;;  %2046 = vmatprep.mubr.bf16.mxu0 %v4065_v57  ;;  %v4143_v56 = vld [vmem:[#allocation2 + $0x4e0] ss:$48 sps:$4 sm:$0xff]   ;;  %v4144_v57 = vld [vmem:[#allocation2 + $0x4e8] ss:$48 sps:$4 sm:$0xff]   ;;  %v4187_v28 = vld [vmem:[#allocation2 + $0x134] ss:$48 sps:$4 sm:$0xff]  }
  0x74   :  { %2207 = vmatprep.mubr.bf16.mxu1 %v4067_v61  ;;  %3556 = vmatpush3.bf16.msra.mxu0 %v4136_v27  ;;  %v4150_v61 = vld [vmem:[#allocation2 + $0x548] ss:$48 sps:$4 sm:$0xff]  }
  0x75   :  { %3668 = vmatpush3.bf16.msra.mxu1 %v4138_v29  ;;  %3557 = vmatprep.subr.bf16.mxu0 %v4151_v34  ;;  %v4182_v27 = vld [vmem:[#allocation2 + $0xd8] ss:$48 sps:$4 sm:$0xff]   ;;  %v4231_v29 = vld [vmem:[#allocation5 + $0x260] sm:$0xff]  }
  0x76   :  { %3669 = vmatprep.subr.bf16.mxu1 %v4153_v37  ;;  %v4247_v34 = vld [vmem:[#allocation5 + $0x268] sm:$0xff]  }
  0x77   :  { %v4248_v37 = vld [vmem:[#allocation5 + $0x228] sm:$0xff]  }
  0x78   :  { %3558 = vmatpush3.bf16.msra.mxu0 %v4152_v35  ;;  %v4249_v35 = vld [vmem:[#allocation5 + $0x2e8] sm:$0xff]  }
  0x79   :  { %3670 = vmatpush3.bf16.msra.mxu1 %v4154_v38  ;;  %3767 = vmatprep.subr.bf16.mxu0 %v4167_v43  ;;  %v4250_v38 = vld [vmem:[#allocation5 + $0x2a8] sm:$0xff]  }
  0x7a   :  { %2047 = vmatmul.mubr.bf16.gmra.mrb[16].mxu0 %v4069_v62  ;;  %3879 = vmatprep.subr.bf16.mxu1 %v4169_v45  ;;  %v4155_v62 = vld [vmem:[#allocation2 + $0x5a4] ss:$48 sps:$4 sm:$0xff]   ;;  %v4195_v43 = vld [vmem:[#allocation2 + $0x19c] ss:$48 sps:$4 sm:$0xff]  }
  0x7b   :  { %2208 = vmatmul.mubr.bf16.gmra.mrb[16].mxu1 %v4070_v63  ;;  %2054 = vmatprep.mubr.bf16.mxu0 %v4075_v0  ;;  %v4157_v63 = vld [vmem:[#allocation2 + $0x5ac] ss:$48 sps:$4 sm:$0xff]   ;;  %v4159_v0 = vld [vmem:[#allocation2 + $0x5a0] ss:$48 sps:$4 sm:$0xff]  }
  0x7c   :  { %2215 = vmatprep.mubr.bf16.mxu1 %v4077_v2  ;;  %v4163_v2 = vld [vmem:[#allocation2 + $0x14] ss:$48 sps:$4 sm:$0xff]  }
  0x7d   :  { %v4266_v45 = vld [vmem:[#allocation5 + $0x2b0] sm:$0xff]  }
  0x82   :  { %2055 = vmatmul.mubr.bf16.gmra.mrb[20].mxu0 %v4079_v6  ;;  %v4168_v6 = vld [vmem:[#allocation5 + $0x200] sm:$0xff]  }
  0x83   :  { %2216 = vmatmul.mubr.bf16.gmra.mrb[20].mxu1 %v4080_v7  ;;  %2062 = vmatprep.mubr.bf16.mxu0 %v4081_v8  ;;  %v4170_v7 = vld [vmem:[#allocation5 + $0x280] sm:$0xff]  }
  0x84   :  { %2223 = vmatprep.mubr.bf16.mxu1 %v4083_v9  ;;  %v4171_v8 = vld [vmem:[#allocation2 + $0x74] ss:$48 sps:$4 sm:$0xff]   ;;  %v4173_v9 = vld [vmem:[#allocation2 + $0x7c] ss:$48 sps:$4 sm:$0xff]  }
  0x8a   :  { %2063 = vmatmul.mubr.bf16.gmra.mrb[24].mxu0 %v4085_v14  ;;  %v4175_v14 = vld [vmem:[#allocation2 + $0x70] ss:$48 sps:$4 sm:$0xff]  }
  0x8b   :  { %2224 = vmatmul.mubr.bf16.gmra.mrb[24].mxu1 %v4086_v15  ;;  %2070 = vmatprep.mubr.bf16.mxu0 %v4091_v16  ;;  %v4199_v15 = vld [vmem:[#allocation5 + $0x250] sm:$0xff]   ;;  %v4176_v16 = vld [vmem:[#allocation2 + $0x78] ss:$48 sps:$4 sm:$0xff]  }
  0x8c   :  { %2231 = vmatprep.mubr.bf16.mxu1 %v4093_v17  ;;  %v4201_v17 = vld [vmem:[#allocation5 + $0x2d0] sm:$0xff]  }
  0x92   :  { %2071 = vmatmul.mubr.bf16.gmra.mrb[28].mxu0 %v4095_v22  ;;  %v4215_v22 = vld [vmem:[#allocation5 + $0x258] sm:$0xff]  }
  0x93   :  { %2232 = vmatmul.mubr.bf16.gmra.mrb[28].mxu1 %v4096_v23  ;;  %2078 = vmatprep.mubr.bf16.mxu0 %v4097_v24  ;;  %v4217_v23 = vld [vmem:[#allocation5 + $0x2d8] sm:$0xff]   ;;  %v4181_v24 = vld [vmem:[#allocation2 + $0xd0] ss:$48 sps:$4 sm:$0xff]  }
  0x94   :  { %2239 = vmatprep.mubr.bf16.mxu1 %v4099_v25  ;;  %v4216_v25 = vld [vmem:[#allocation5 + $0x218] sm:$0xff]  }
  0x9a   :  { %2079 = vmatmul.mubr.bf16.gmra.mrb[32].mxu0 %v4101_v30  ;;  %v4189_v30 = vld [vmem:[#allocation2 + $0x13c] ss:$48 sps:$4 sm:$0xff]  }
  0x9b   :  { %2240 = vmatmul.mubr.bf16.gmra.mrb[32].mxu1 %v4102_v31  ;;  %2086 = vmatprep.mubr.bf16.mxu0 %v4107_v32  ;;  %v4233_v31 = vld [vmem:[#allocation5 + $0x2e0] sm:$0xff]  }
  0x9c   :  { %2247 = vmatprep.mubr.bf16.mxu1 %v4109_v33  ;;  %v4232_v32 = vld [vmem:[#allocation5 + $0x220] sm:$0xff]  }
  0x9d   :  { %v4234_v33 = vld [vmem:[#allocation5 + $0x2a0] sm:$0xff]  }
  0xa2   :  { %2087 = vmatmul.mubr.bf16.gmra.mrb[36].mxu0 %v4111_v36  ;;  %v4191_v36 = vld [vmem:[#allocation2 + $0x130] ss:$48 sps:$4 sm:$0xff]  }
  0xa3   :  { %2248 = vmatmul.mubr.bf16.gmra.mrb[36].mxu1 %v4112_v39  ;;  %2094 = vmatprep.mubr.bf16.mxu0 %v4113_v40  ;;  %v4192_v39 = vld [vmem:[#allocation2 + $0x138] ss:$48 sps:$4 sm:$0xff]   ;;  %v4263_v40 = vld [vmem:[#allocation5 + $0x270] sm:$0xff]  }
  0xa4   :  { %2255 = vmatprep.mubr.bf16.mxu1 %v4115_v41  ;;  %v4265_v41 = vld [vmem:[#allocation5 + $0x2f0] sm:$0xff]  }
  0xaa   :  { %2095 = vmatmul.mubr.bf16.gmra.mrb[40].mxu0 %v4117_v42  ;;  %v4193_v42 = vld [vmem:[#allocation2 + $0x194] ss:$48 sps:$4 sm:$0xff]  }
  0xab   :  { %2256 = vmatmul.mubr.bf16.gmra.mrb[40].mxu1 %v4118_v44  ;;  %2102 = vmatprep.mubr.bf16.mxu0 %v4123_v46  ;;  %v4264_v44 = vld [vmem:[#allocation5 + $0x230] sm:$0xff]   ;;  %v4279_v46 = vld [vmem:[#allocation5 + $0x278] sm:$0xff]  }
  0xac   :  { %2263 = vmatprep.mubr.bf16.mxu1 %v4125_v47  ;;  %v4281_v47 = vld [vmem:[#allocation5 + $0x2f8] sm:$0xff]  }
  0xb2   :  { %2103 = vmatmul.mubr.bf16.gmra.mrb[44].mxu0 %v4127_v48  ;;  %v4197_v48 = vld [vmem:[#allocation2 + $0x190] ss:$48 sps:$4 sm:$0xff]  }
  0xb3   :  { %2264 = vmatmul.mubr.bf16.gmra.mrb[44].mxu1 %v4128_v49  ;;  %2110 = vmatprep.mubr.bf16.mxu0 %v4129_v50  ;;  %v4280_v49 = vld [vmem:[#allocation5 + $0x238] sm:$0xff]  }
  0xb4   :  { %2271 = vmatprep.mubr.bf16.mxu1 %v4131_v51  ;;  %v4198_v50 = vld [vmem:[#allocation2 + $0x198] ss:$48 sps:$4 sm:$0xff]  }
  0xb5   :  { %v4282_v51 = vld [vmem:[#allocation5 + $0x2b8] sm:$0xff]  }
  0xba   :  { %2111 = vmatmul.mubr.bf16.gmra.mrb[48].mxu0 %v4133_v52  ;;  %v4203_v52 = vld [vmem:[#allocation2 + $0x1f4] ss:$48 sps:$4 sm:$0xff]  }
  0xbb   :  { %2272 = vmatmul.mubr.bf16.gmra.mrb[48].mxu1 %v4134_v53  ;;  %2118 = vmatprep.mubr.bf16.mxu0 %v4139_v54  ;;  %v4205_v53 = vld [vmem:[#allocation2 + $0x1fc] ss:$48 sps:$4 sm:$0xff]   ;;  %v4207_v54 = vld [vmem:[#allocation2 + $0x1f0] ss:$48 sps:$4 sm:$0xff]  }
  0xbc   :  { %2279 = vmatprep.mubr.bf16.mxu1 %v4141_v55  ;;  %v4208_v55 = vld [vmem:[#allocation2 + $0x1f8] ss:$48 sps:$4 sm:$0xff]  }
  0xc2   :  { %2119 = vmatmul.mubr.bf16.gmra.mrb[52].mxu0 %v4143_v56  ;;  %v4209_v56 = vld [vmem:[#allocation2 + $0x254] ss:$48 sps:$4 sm:$0xff]  }
  0xc3   :  { %2280 = vmatmul.mubr.bf16.gmra.mrb[52].mxu1 %v4144_v57  ;;  %2126 = vmatprep.mubr.bf16.mxu0 %v4145_v58  ;;  %v4211_v57 = vld [vmem:[#allocation2 + $0x25c] ss:$48 sps:$4 sm:$0xff]   ;;  %v4213_v58 = vld [vmem:[#allocation2 + $0x250] ss:$48 sps:$4 sm:$0xff]  }
  0xc4   :  { %2287 = vmatprep.mubr.bf16.mxu1 %v4147_v59  ;;  %v4214_v59 = vld [vmem:[#allocation2 + $0x258] ss:$48 sps:$4 sm:$0xff]  }
  0xca   :  { %2127 = vmatmul.mubr.bf16.gmra.mrb[56].mxu0 %v4149_v60  ;;  %v4219_v60 = vld [vmem:[#allocation2 + $0x2b4] ss:$48 sps:$4 sm:$0xff]  }
  0xcb   :  { %2288 = vmatmul.mubr.bf16.gmra.mrb[56].mxu1 %v4150_v61  ;;  %2134 = vmatprep.mubr.bf16.mxu0 %v4155_v62  ;;  %v4221_v61 = vld [vmem:[#allocation2 + $0x2bc] ss:$48 sps:$4 sm:$0xff]   ;;  %v4223_v62 = vld [vmem:[#allocation2 + $0x2b0] ss:$48 sps:$4 sm:$0xff]  }
  0xcc   :  { %2295 = vmatprep.mubr.bf16.mxu1 %v4157_v63  ;;  %v4224_v63 = vld [vmem:[#allocation2 + $0x2b8] ss:$48 sps:$4 sm:$0xff]  }
  0xd2   :  { %2135 = vmatmul.mubr.bf16.gmra.mrb[60].mxu0 %v4159_v0  ;;  %v4225_v0 = vld [vmem:[#allocation2 + $0x314] ss:$48 sps:$4 sm:$0xff]  }
  0xd3   :  { %2296 = vmatmul.mubr.bf16.gmra.mrb[60].mxu1 %v4160_v1  ;;  %2336 = vmatprep.mubr.bf16.mxu0 %v4163_v2  ;;  %v4227_v1 = vld [vmem:[#allocation2 + $0x31c] ss:$48 sps:$4 sm:$0xff]   ;;  %v4229_v2 = vld [vmem:[#allocation2 + $0x310] ss:$48 sps:$4 sm:$0xff]  }
  0xd4   :  { %2497 = vmatprep.mubr.bf16.mxu1 %v4166_v3  ;;  %v4230_v3 = vld [vmem:[#allocation2 + $0x318] ss:$48 sps:$4 sm:$0xff]  }
  0xda   :  { %2337 = vmatmul.mubr.bf16.vlgmr.msra.gmra.mrb[64].mxu0 %v4161_v4  ;;  %v4235_v4 = vld [vmem:[#allocation2 + $0x374] ss:$48 sps:$4 sm:$0xff]  }
  0xdb   :  { %2498 = vmatmul.mubr.bf16.vlgmr.msra.gmra.mrb[64].mxu1 %v4164_v5  ;;  %3768 = vmatpush3.bf16.msra.mxu0 %v4168_v6  ;;  %v4237_v5 = vld [vmem:[#allocation2 + $0x37c] ss:$48 sps:$4 sm:$0xff]   ;;  %v4239_v6 = vld [vmem:[#allocation2 + $0x370] ss:$48 sps:$4 sm:$0xff]  }
  0xdc   :  { %3880 = vmatpush3.bf16.msra.mxu1 %v4170_v7  ;;  %2344 = vmatprep.mubr.bf16.mxu0 %v4171_v8  ;;  %v4240_v7 = vld [vmem:[#allocation2 + $0x378] ss:$48 sps:$4 sm:$0xff]   ;;  %v4241_v8 = vld [vmem:[#allocation2 + $0x3d4] ss:$48 sps:$4 sm:$0xff]  }
  0xdd   :  { %2505 = vmatprep.mubr.bf16.mxu1 %v4173_v9  ;;  %3769 = vmatprep.subr.bf16.mxu0 %v4183_v10  ;;  %v4243_v9 = vld [vmem:[#allocation2 + $0x3dc] ss:$48 sps:$4 sm:$0xff]   ;;  %v4245_v10 = vld [vmem:[#allocation2 + $0x3d0] ss:$48 sps:$4 sm:$0xff]  }
  0xde   :  { %3881 = vmatprep.subr.bf16.mxu1 %v4185_v11  ;;  %v4246_v11 = vld [vmem:[#allocation2 + $0x3d8] ss:$48 sps:$4 sm:$0xff]  }
  0xdf   :  { %3770 = vmatpush3.bf16.msra.mxu0 %v4184_v12  ;;  %v4251_v12 = vld [vmem:[#allocation2 + $0x434] ss:$48 sps:$4 sm:$0xff]  }
  0xe0   :  { %3882 = vmatpush3.bf16.msra.mxu1 %v4186_v13  ;;  %3771 = vmatprep.subr.bf16.mxu0 %v4199_v15  ;;  %v4253_v13 = vld [vmem:[#allocation2 + $0x43c] ss:$48 sps:$4 sm:$0xff]  }
  0xe1   :  { %3883 = vmatprep.subr.bf16.mxu1 %v4201_v17 }
  0xe2   :  { %2345 = vmatmul.mubr.bf16.gmra.mrb[68].mxu0 %v4175_v14 }
  0xe3   :  { %2506 = vmatmul.mubr.bf16.gmra.mrb[68].mxu1 %v4176_v16  ;;  %2352 = vmatprep.mubr.bf16.mxu0 %v4177_v18  ;;  %v4545_v16 = vld [vmem:[#allocation7] ss:$0 sm:$0xff] }
  0xe4   :  { %2513 = vmatprep.mubr.bf16.mxu1 %v4179_v19  ;;  %3772 = vmatpush3.bf16.msra.mxu0 %v4200_v20  ;;  %v4255_v18 = vld [vmem:[#allocation2 + $0x430] ss:$48 sps:$4 sm:$0xff]  }
  0xe5   :  { %3884 = vmatpush3.bf16.msra.mxu1 %v4202_v21  ;;  %3773 = vmatprep.subr.bf16.mxu0 %v4215_v22  ;;  %v4256_v22 = vld [vmem:[#allocation2 + $0x438] ss:$48 sps:$4 sm:$0xff]  }
  0xe6   :  { %3885 = vmatprep.subr.bf16.mxu1 %v4217_v23  ;;  %v4257_v23 = vld [vmem:[#allocation2 + $0x494] ss:$48 sps:$4 sm:$0xff]  }
  0xe8   :  { %3774 = vmatpush3.bf16.msra.mxu0 %v4216_v25 }
  0xe9   :  { %3886 = vmatpush3.bf16.msra.mxu1 %v4218_v26  ;;  %3775 = vmatprep.subr.bf16.mxu0 %v4231_v29 }
  0xea   :  { %2353 = vmatmul.mubr.bf16.gmra.mrb[72].mxu0 %v4181_v24  ;;  %3887 = vmatprep.subr.bf16.mxu1 %v4233_v31 }
  0xeb   :  { %2514 = vmatmul.mubr.bf16.gmra.mrb[72].mxu1 %v4182_v27  ;;  %2360 = vmatprep.mubr.bf16.mxu0 %v4187_v28  ;;  %v4259_v27 = vld [vmem:[#allocation2 + $0x49c] ss:$48 sps:$4 sm:$0xff]  }
  0xec   :  { %2521 = vmatprep.mubr.bf16.mxu1 %v4189_v30  ;;  %3776 = vmatpush3.bf16.msra.mxu0 %v4232_v32 }
  0xed   :  { %3888 = vmatpush3.bf16.msra.mxu1 %v4234_v33  ;;  %3777 = vmatprep.subr.bf16.mxu0 %v4247_v34 }
  0xee   :  { %3889 = vmatprep.subr.bf16.mxu1 %v4249_v35 }
  0xf0   :  { %3778 = vmatpush3.bf16.msra.mxu0 %v4248_v37 }
  0xf1   :  { %3890 = vmatpush3.bf16.msra.mxu1 %v4250_v38  ;;  %3779 = vmatprep.subr.bf16.mxu0 %v4263_v40  ;;  %v4261_v38 = vld [vmem:[#allocation2 + $0x490] ss:$48 sps:$4 sm:$0xff]  }
  0xf2   :  { %2361 = vmatmul.mubr.bf16.gmra.mrb[76].mxu0 %v4191_v36  ;;  %3891 = vmatprep.subr.bf16.mxu1 %v4265_v41 }
  0xf3   :  { %2522 = vmatmul.mubr.bf16.gmra.mrb[76].mxu1 %v4192_v39  ;;  %2368 = vmatprep.mubr.bf16.mxu0 %v4193_v42  ;;  %v4262_v42 = vld [vmem:[#allocation2 + $0x498] ss:$48 sps:$4 sm:$0xff]  }
  0xf4   :  { %2529 = vmatprep.mubr.bf16.mxu1 %v4195_v43  ;;  %3780 = vmatpush3.bf16.msra.mxu0 %v4264_v44  ;;  %v4267_v43 = vld [vmem:[#allocation2 + $0x4f4] ss:$48 sps:$4 sm:$0xff]  }
  0xf5   :  { %3892 = vmatpush3.bf16.msra.mxu1 %v4266_v45  ;;  %3781 = vmatprep.subr.bf16.mxu0 %v4279_v46 }
  0xf6   :  { %3893 = vmatprep.subr.bf16.mxu1 %v4281_v47  ;;  %v4269_v47 = vld [vmem:[#allocation2 + $0x4fc] ss:$48 sps:$4 sm:$0xff]  }
  0xf8   :  { %3782 = vmatpush3.bf16.msra.mxu0 %v4280_v49 }
  0xf9   :  { %3894 = vmatpush3.bf16.msra.mxu1 %v4282_v51 }
  0xfa   :  { %2369 = vmatmul.mubr.bf16.gmra.mrb[80].mxu0 %v4197_v48 }
  0xfb   :  { %2530 = vmatmul.mubr.bf16.gmra.mrb[80].mxu1 %v4198_v50  ;;  %2376 = vmatprep.mubr.bf16.mxu0 %v4203_v52 }
  0xfc   :  { %2537 = vmatprep.mubr.bf16.mxu1 %v4205_v53 }
 0x102   :  { %2377 = vmatmul.mubr.bf16.gmra.mrb[84].mxu0 %v4207_v54 }
 0x103   :  { %2538 = vmatmul.mubr.bf16.gmra.mrb[84].mxu1 %v4208_v55  ;;  %2384 = vmatprep.mubr.bf16.mxu0 %v4209_v56 }
 0x104   :  { %2545 = vmatprep.mubr.bf16.mxu1 %v4211_v57 }
 0x10a   :  { %2385 = vmatmul.mubr.bf16.gmra.mrb[88].mxu0 %v4213_v58  ;;  %v4271_v58 = vld [vmem:[#allocation2 + $0x4f0] ss:$48 sps:$4 sm:$0xff]  }
 0x10b   :  { %2546 = vmatmul.mubr.bf16.gmra.mrb[88].mxu1 %v4214_v59  ;;  %2392 = vmatprep.mubr.bf16.mxu0 %v4219_v60 }
 0x10c   :  { %2553 = vmatprep.mubr.bf16.mxu1 %v4221_v61 }
 0x112   :  { %2393 = vmatmul.mubr.bf16.gmra.mrb[92].mxu0 %v4223_v62  ;;  %v4272_v62 = vld [vmem:[#allocation2 + $0x4f8] ss:$48 sps:$4 sm:$0xff]  }
 0x113   :  { %2554 = vmatmul.mubr.bf16.gmra.mrb[92].mxu1 %v4224_v63  ;;  %2400 = vmatprep.mubr.bf16.mxu0 %v4225_v0  ;;  %v4273_v63 = vld [vmem:[#allocation2 + $0x554] ss:$48 sps:$4 sm:$0xff]  }
 0x114   :  { %2561 = vmatprep.mubr.bf16.mxu1 %v4227_v1 }
 0x11a   :  { %2401 = vmatmul.mubr.bf16.gmra.mrb[96].mxu0 %v4229_v2 }
 0x11b   :  { %2562 = vmatmul.mubr.bf16.gmra.mrb[96].mxu1 %v4230_v3  ;;  %2408 = vmatprep.mubr.bf16.mxu0 %v4235_v4  ;;  %v4275_v3 = vld [vmem:[#allocation2 + $0x55c] ss:$48 sps:$4 sm:$0xff]  }
 0x11c   :  { %2569 = vmatprep.mubr.bf16.mxu1 %v4237_v5 }
 0x122   :  { %2409 = vmatmul.mubr.bf16.gmra.mrb[100].mxu0 %v4239_v6 }
 0x123   :  { %2570 = vmatmul.mubr.bf16.gmra.mrb[100].mxu1 %v4240_v7  ;;  %2416 = vmatprep.mubr.bf16.mxu0 %v4241_v8 }
 0x124   :  { %2577 = vmatprep.mubr.bf16.mxu1 %v4243_v9 }
 0x12a   :  { %2417 = vmatmul.mubr.bf16.gmra.mrb[104].mxu0 %v4245_v10 }
 0x12b   :  { %2578 = vmatmul.mubr.bf16.gmra.mrb[104].mxu1 %v4246_v11  ;;  %2424 = vmatprep.mubr.bf16.mxu0 %v4251_v12 }
 0x12c   :  { %2585 = vmatprep.mubr.bf16.mxu1 %v4253_v13 }
 0x12d   :  { %v3335_v14 = vpop.f32.mrb[0].mxu0 }
 0x12e   :  { %v3447_v15 = vpop.f32.mrb[0].mxu1  ;;  %v3336_v17 = vpop.f32.mrb[1].mxu0 }
 0x12f   :  { %v3337_v19 = vadd.f32 %v3336_v17, %v3335_v14  ;;  %v3448_v20 = vpop.f32.mrb[1].mxu1  ;;  %v3338_v21 = vpop.f32.mrb[2].mxu0  ;;  %v4277_v14 = vld [vmem:[#allocation2 + $0x550] ss:$48 sps:$4 sm:$0xff]  }
 0x130   :  { %v3449_v24 = vadd.f32 %v3448_v20, %v3447_v15  ;;  %v3450_v25 = vpop.f32.mrb[2].mxu1  ;;  %v3339_v26 = vpop.f32.mrb[3].mxu0  ;;  %v4283_v20 = vld [vmem:[#allocation2 + $0x5b4] ss:$48 sps:$4 sm:$0xff]  }
 0x131   :  { %v2017_v28 = vadd.f32 %v3337_v19, %v4545_v16  ;;  %v3340_v29 = vadd.f32 %v3339_v26, %v3338_v21  ;;  %v3451_v30 = vpop.f32.mrb[3].mxu1  ;;  %v4278_v19 = vld [vmem:[#allocation2 + $0x558] ss:$48 sps:$4 sm:$0xff]  }
 0x132   :  { %v3452_v31 = vadd.f32 %v3451_v30, %v3450_v25  ;;  %2425 = vmatmul.mubr.bf16.gmra.mrb[108].mxu0 %v4255_v18 }
 0x133   :  { %v4548_v32 = vadd.f32 %v3449_v24, %v2017_v28  ;;  %v2020_v33 = vadd.f32 %v3340_v29, %v4545_v16  ;;  %2586 = vmatmul.mubr.bf16.gmra.mrb[108].mxu1 %v4256_v22  ;;  %2432 = vmatprep.mubr.bf16.mxu0 %v4257_v23  ;;  %v4285_v24 = vld [vmem:[#allocation2 + $0x5bc] ss:$48 sps:$4 sm:$0xff]  }
 0x134   :  { %2593 = vmatprep.mubr.bf16.mxu1 %v4259_v27 }
 0x135   :  { %v4551_v34 = vadd.f32 %v3452_v31, %v2020_v33  ;;  %v3341_v35 = vpop.f32.mrb[4].mxu0 }
 0x136   :  { %v3453_v36 = vpop.f32.mrb[4].mxu1  ;;  %v3342_v37 = vpop.f32.mrb[5].mxu0 }
 0x137   :  { %v3343_v39 = vadd.f32 %v3342_v37, %v3341_v35  ;;  %v3454_v40 = vpop.f32.mrb[5].mxu1  ;;  %v3344_v41 = vpop.f32.mrb[6].mxu0  ;;  %v4287_v37 = vld [vmem:[#allocation2 + $0x5b0] ss:$48 sps:$4 sm:$0xff]  }
 0x138   :  { %v3455_v44 = vadd.f32 %v3454_v40, %v3453_v36  ;;  %v3456_v45 = vpop.f32.mrb[6].mxu1  ;;  %v3345_v46 = vpop.f32.mrb[7].mxu0 }
 0x139   :  { %v2025_v48 = vadd.f32 %v3343_v39, %v4545_v16  ;;  %v3346_v49 = vadd.f32 %v3345_v46, %v3344_v41  ;;  %v3457_v50 = vpop.f32.mrb[7].mxu1  ;;  %v4288_v41 = vld [vmem:[#allocation2 + $0x5b8] ss:$48 sps:$4 sm:$0xff]   ;;  %v4294_v46 = vld [vmem:[#allocation2 + $0x2c] ss:$48 sps:$4 sm:$0xff]  }
 0x13a   :  { %v3458_v51 = vadd.f32 %v3457_v50, %v3456_v45  ;;  %2433 = vmatmul.mubr.bf16.gmra.mrb[112].mxu0 %v4261_v38 }
 0x13b   :  { %v4554_v52 = vadd.f32 %v3455_v44, %v2025_v48  ;;  %v2028_v53 = vadd.f32 %v3346_v49, %v4545_v16  ;;  %2594 = vmatmul.mubr.bf16.gmra.mrb[112].mxu1 %v4262_v42  ;;  %2440 = vmatprep.mubr.bf16.mxu0 %v4267_v43  ;;  %v4291_v42 = vld [vmem:[#allocation2 + $0x24] ss:$48 sps:$4 sm:$0xff]  }
 0x13c   :  { %2601 = vmatprep.mubr.bf16.mxu1 %v4269_v47 }
 0x13d   :  { %v4557_v54 = vadd.f32 %v3458_v51, %v2028_v53  ;;  %v3347_v55 = vpop.f32.mrb[8].mxu0 }
 0x13e   :  { %v3459_v56 = vpop.f32.mrb[8].mxu1  ;;  %v3348_v57 = vpop.f32.mrb[9].mxu0 }
 0x13f   :  { %v3349_v59 = vadd.f32 %v3348_v57, %v3347_v55  ;;  %v3460_v60 = vpop.f32.mrb[9].mxu1  ;;  %v3350_v61 = vpop.f32.mrb[10].mxu0 }
 0x140   :  { %v3461_v0 = vadd.f32 %v3460_v60, %v3459_v56  ;;  %v3462_v1 = vpop.f32.mrb[10].mxu1  ;;  %v3351_v2 = vpop.f32.mrb[11].mxu0 }
 0x141   :  { %v2033_v4 = vadd.f32 %v3349_v59, %v4545_v16  ;;  %v3352_v5 = vadd.f32 %v3351_v2, %v3350_v61  ;;  %v3463_v6 = vpop.f32.mrb[11].mxu1  ;;  %v4289_v59 = vld [vmem:[#allocation2 + $0x20] ss:$48 sps:$4 sm:$0xff]  }
 0x142   :  { %v3464_v7 = vadd.f32 %v3463_v6, %v3462_v1  ;;  %2441 = vmatmul.mubr.bf16.gmra.mrb[116].mxu0 %v4271_v58 }
 0x143   :  { %v4560_v8 = vadd.f32 %v3461_v0, %v2033_v4  ;;  %v2036_v9 = vadd.f32 %v3352_v5, %v4545_v16  ;;  %2602 = vmatmul.mubr.bf16.gmra.mrb[116].mxu1 %v4272_v62  ;;  %2448 = vmatprep.mubr.bf16.mxu0 %v4273_v63  ;;  %v4292_v63 = vld [vmem:[#allocation2 + $0x28] ss:$48 sps:$4 sm:$0xff]   ;;  %v4295_v0 = vld [vmem:[#allocation2 + $0x84] ss:$48 sps:$4 sm:$0xff]   ;;  %v4297_v4 = vld [vmem:[#allocation2 + $0x8c] ss:$48 sps:$4 sm:$0xff]  }
 0x144   :  { %2609 = vmatprep.mubr.bf16.mxu1 %v4275_v3 }
 0x145   :  { %v4563_v10 = vadd.f32 %v3464_v7, %v2036_v9  ;;  %v3353_v11 = vpop.f32.mrb[12].mxu0 }
 0x146   :  { %v3465_v12 = vpop.f32.mrb[12].mxu1  ;;  %v3354_v13 = vpop.f32.mrb[13].mxu0 }
 0x147   :  { %v3355_v15 = vadd.f32 %v3354_v13, %v3353_v11  ;;  %v3466_v17 = vpop.f32.mrb[13].mxu1  ;;  %v3356_v18 = vpop.f32.mrb[14].mxu0 }
 0x148   :  { %v3467_v21 = vadd.f32 %v3466_v17, %v3465_v12  ;;  %v3468_v22 = vpop.f32.mrb[14].mxu1  ;;  %v3357_v23 = vpop.f32.mrb[15].mxu0 }
 0x149   :  { %v2041_v25 = vadd.f32 %v3355_v15, %v4545_v16  ;;  %v3358_v26 = vadd.f32 %v3357_v23, %v3356_v18  ;;  %v3469_v27 = vpop.f32.mrb[15].mxu1  ;;  %v4299_v18 = vld [vmem:[#allocation2 + $0x80] ss:$48 sps:$4 sm:$0xff]   ;;  %v4301_v23 = vld [vmem:[#allocation2 + $0xe4] ss:$48 sps:$4 sm:$0xff]  }
 0x14a   :  { %v3470_v28 = vadd.f32 %v3469_v27, %v3468_v22  ;;  %2449 = vmatmul.mubr.bf16.gmra.mrb[120].mxu0 %v4277_v14  ;;  %v4300_v22 = vld [vmem:[#allocation2 + $0x88] ss:$48 sps:$4 sm:$0xff]   ;;  %v4303_v27 = vld [vmem:[#allocation2 + $0xec] ss:$48 sps:$4 sm:$0xff]  }
 0x14b   :  { %v4566_v29 = vadd.f32 %v3467_v21, %v2041_v25  ;;  %v2044_v30 = vadd.f32 %v3358_v26, %v4545_v16  ;;  %2610 = vmatmul.mubr.bf16.gmra.mrb[120].mxu1 %v4278_v19  ;;  %2456 = vmatprep.mubr.bf16.mxu0 %v4283_v20 }
 0x14c   :  { %2617 = vmatprep.mubr.bf16.mxu1 %v4285_v24 }
 0x14d   :  { %v4569_v31 = vadd.f32 %v3470_v28, %v2044_v30  ;;  %v3359_v33 = vpop.f32.mrb[16].mxu0 }
 0x14e   :  { %v3471_v35 = vpop.f32.mrb[16].mxu1  ;;  %v3360_v36 = vpop.f32.mrb[17].mxu0 }
 0x14f   :  { %v3361_v38 = vadd.f32 %v3360_v36, %v3359_v33  ;;  %v3472_v39 = vpop.f32.mrb[17].mxu1  ;;  %v3362_v40 = vpop.f32.mrb[18].mxu0 }
 0x150   :  { %v3473_v43 = vadd.f32 %v3472_v39, %v3471_v35  ;;  %v3474_v44 = vpop.f32.mrb[18].mxu1  ;;  %v3363_v45 = vpop.f32.mrb[19].mxu0 }
 0x151   :  { %v2049_v47 = vadd.f32 %v3361_v38, %v4545_v16  ;;  %v3364_v48 = vadd.f32 %v3363_v45, %v3362_v40  ;;  %v3475_v49 = vpop.f32.mrb[19].mxu1 }
 0x152   :  { %v3476_v50 = vadd.f32 %v3475_v49, %v3474_v44  ;;  %2457 = vmatmul.mubr.bf16.gmra.mrb[124].mxu0 %v4287_v37 }
 0x153   :  { %v4572_v51 = vadd.f32 %v3473_v43, %v2049_v47  ;;  %v2052_v53 = vadd.f32 %v3364_v48, %v4545_v16  ;;  %2618 = vmatmul.mubr.bf16.gmra.mrb[124].mxu1 %v4288_v41  ;;  %2658 = vmatprep.mubr.bf16.mxu0 %v4291_v42  ;;  %v4305_v42 = vld [vmem:[#allocation2 + $0xe0] ss:$48 sps:$4 sm:$0xff]   ;;  %v4307_v47 = vld [vmem:[#allocation2 + $0x144] ss:$48 sps:$4 sm:$0xff]  }
 0x154   :  { %2819 = vmatprep.mubr.bf16.mxu1 %v4294_v46  ;;  %v4306_v46 = vld [vmem:[#allocation2 + $0xe8] ss:$48 sps:$4 sm:$0xff]  }
 0x155   :  { %v4575_v55 = vadd.f32 %v3476_v50, %v2052_v53  ;;  %v3365_v56 = vpop.f32.mrb[20].mxu0  ;;  %v4309_v53 = vld [vmem:[#allocation2 + $0x14c] ss:$48 sps:$4 sm:$0xff]  }
 0x156   :  { %v3477_v57 = vpop.f32.mrb[20].mxu1  ;;  %v3366_v58 = vpop.f32.mrb[21].mxu0 }
 0x157   :  { %v3367_v60 = vadd.f32 %v3366_v58, %v3365_v56  ;;  %v3478_v61 = vpop.f32.mrb[21].mxu1  ;;  %v3368_v62 = vpop.f32.mrb[22].mxu0 }
 0x158   :  { %v3479_v1 = vadd.f32 %v3478_v61, %v3477_v57  ;;  %v3480_v2 = vpop.f32.mrb[22].mxu1  ;;  %v3369_v3 = vpop.f32.mrb[23].mxu0 }
 0x159   :  { %v2057_v5 = vadd.f32 %v3367_v60, %v4545_v16  ;;  %v3370_v6 = vadd.f32 %v3369_v3, %v3368_v62  ;;  %v3481_v7 = vpop.f32.mrb[23].mxu1 }
 0x15a   :  { %v3482_v9 = vadd.f32 %v3481_v7, %v3480_v2  ;;  %2659 = vmatmul.mubr.bf16.vlgmr.msra.gmra.mrb[128].mxu0 %v4289_v59  ;;  %v4311_v2 = vld [vmem:[#allocation2 + $0x140] ss:$48 sps:$4 sm:$0xff]   ;;  %v4313_v7 = vld [vmem:[#allocation2 + $0x1a4] ss:$48 sps:$4 sm:$0xff]  }
 0x15b   :  { %v4578_v11 = vadd.f32 %v3479_v1, %v2057_v5  ;;  %v2060_v12 = vadd.f32 %v3370_v6, %v4545_v16  ;;  %2820 = vmatmul.mubr.bf16.vlgmr.msra.gmra.mrb[128].mxu1 %v4292_v63  ;;  %2666 = vmatprep.mubr.bf16.mxu0 %v4295_v0  ;;  %v4312_v6 = vld [vmem:[#allocation2 + $0x148] ss:$48 sps:$4 sm:$0xff]  }
 0x15c   :  { %2827 = vmatprep.mubr.bf16.mxu1 %v4297_v4 }
 0x15d   :  { %v4581_v13 = vadd.f32 %v3482_v9, %v2060_v12  ;;  %v3371_v14 = vpop.f32.mrb[24].mxu0 }
 0x15e   :  { %v3483_v15 = vpop.f32.mrb[24].mxu1  ;;  %v3372_v17 = vpop.f32.mrb[25].mxu0 }
 0x15f   :  { %v3373_v19 = vadd.f32 %v3372_v17, %v3371_v14  ;;  %v3484_v20 = vpop.f32.mrb[25].mxu1  ;;  %v3374_v21 = vpop.f32.mrb[26].mxu0 }
 0x160   :  { %v3485_v24 = vadd.f32 %v3484_v20, %v3483_v15  ;;  %v3486_v25 = vpop.f32.mrb[26].mxu1  ;;  %v3375_v26 = vpop.f32.mrb[27].mxu0  ;;  %v4315_v15 = vld [vmem:[#allocation2 + $0x1ac] ss:$48 sps:$4 sm:$0xff]  }
 0x161   :  { %v2065_v28 = vadd.f32 %v3373_v19, %v4545_v16  ;;  %v3376_v30 = vadd.f32 %v3375_v26, %v3374_v21  ;;  %v3487_v33 = vpop.f32.mrb[27].mxu1 }
 0x162   :  { %v3488_v35 = vadd.f32 %v3487_v33, %v3486_v25  ;;  %2667 = vmatmul.mubr.bf16.gmra.mrb[132].mxu0 %v4299_v18 }
 0x163   :  { %v4584_v36 = vadd.f32 %v3485_v24, %v2065_v28  ;;  %v2068_v37 = vadd.f32 %v3376_v30, %v4545_v16  ;;  %2828 = vmatmul.mubr.bf16.gmra.mrb[132].mxu1 %v4300_v22  ;;  %2674 = vmatprep.mubr.bf16.mxu0 %v4301_v23 }
 0x164   :  { %2835 = vmatprep.mubr.bf16.mxu1 %v4303_v27  ;;  %v4317_v27 = vld [vmem:[#allocation2 + $0x1a0] ss:$48 sps:$4 sm:$0xff]  }
 0x165   :  { %v4587_v38 = vadd.f32 %v3488_v35, %v2068_v37  ;;  %v3377_v39 = vpop.f32.mrb[28].mxu0  ;;  %v4318_v35 = vld [vmem:[#allocation2 + $0x1a8] ss:$48 sps:$4 sm:$0xff]   ;;  %v4319_v37 = vld [vmem:[#allocation2 + $0x204] ss:$48 sps:$4 sm:$0xff]  }
 0x166   :  { %v3489_v40 = vpop.f32.mrb[28].mxu1  ;;  %v3378_v41 = vpop.f32.mrb[29].mxu0 }
 0x167   :  { %v3379_v43 = vadd.f32 %v3378_v41, %v3377_v39  ;;  %v3490_v44 = vpop.f32.mrb[29].mxu1  ;;  %v3380_v45 = vpop.f32.mrb[30].mxu0 }
 0x168   :  { %v3491_v48 = vadd.f32 %v3490_v44, %v3489_v40  ;;  %v3492_v49 = vpop.f32.mrb[30].mxu1  ;;  %v3381_v50 = vpop.f32.mrb[31].mxu0 }
 0x169   :  { %v2073_v56 = vadd.f32 %v3379_v43, %v4545_v16  ;;  %v3382_v57 = vadd.f32 %v3381_v50, %v3380_v45  ;;  %v3493_v58 = vpop.f32.mrb[31].mxu1 }
 0x16a   :  { %v3494_v59 = vadd.f32 %v3493_v58, %v3492_v49  ;;  %2675 = vmatmul.mubr.bf16.gmra.mrb[136].mxu0 %v4305_v42  ;;  %v4321_v42 = vld [vmem:[#allocation2 + $0x20c] ss:$48 sps:$4 sm:$0xff]  }
 0x16b   :  { %v4590_v60 = vadd.f32 %v3491_v48, %v2073_v56  ;;  %v2076_v61 = vadd.f32 %v3382_v57, %v4545_v16  ;;  %2836 = vmatmul.mubr.bf16.gmra.mrb[136].mxu1 %v4306_v46  ;;  %2682 = vmatprep.mubr.bf16.mxu0 %v4307_v47  ;;  %v4323_v57 = vld [vmem:[#allocation2 + $0x200] ss:$48 sps:$4 sm:$0xff]  }
 0x16c   :  { %2843 = vmatprep.mubr.bf16.mxu1 %v4309_v53 }
 0x16d   :  { %v4593_v62 = vadd.f32 %v3494_v59, %v2076_v61  ;;  %v3383_v63 = vpop.f32.mrb[32].mxu0 }
 0x16e   :  { %v3495_v0 = vpop.f32.mrb[32].mxu1  ;;  %v3384_v1 = vpop.f32.mrb[33].mxu0 }
 0x16f   :  { %v3385_v3 = vadd.f32 %v3384_v1, %v3383_v63  ;;  %v3496_v4 = vpop.f32.mrb[33].mxu1  ;;  %v3386_v5 = vpop.f32.mrb[34].mxu0  ;;  %v4324_v63 = vld [vmem:[#allocation2 + $0x208] ss:$48 sps:$4 sm:$0xff]  }
 0x170   :  { %v3497_v9 = vadd.f32 %v3496_v4, %v3495_v0  ;;  %v3498_v12 = vpop.f32.mrb[34].mxu1  ;;  %v3387_v14 = vpop.f32.mrb[35].mxu0  ;;  %v4325_v0 = vld [vmem:[#allocation2 + $0x264] ss:$48 sps:$4 sm:$0xff]   ;;  %v4327_v4 = vld [vmem:[#allocation2 + $0x26c] ss:$48 sps:$4 sm:$0xff]  }
 0x171   :  { %v2081_v17 = vadd.f32 %v3385_v3, %v4545_v16  ;;  %v3388_v18 = vadd.f32 %v3387_v14, %v3386_v5  ;;  %v3499_v19 = vpop.f32.mrb[35].mxu1 }
 0x172   :  { %v3500_v20 = vadd.f32 %v3499_v19, %v3498_v12  ;;  %2683 = vmatmul.mubr.bf16.gmra.mrb[140].mxu0 %v4311_v2 }
 0x173   :  { %v4596_v21 = vadd.f32 %v3497_v9, %v2081_v17  ;;  %v2084_v22 = vadd.f32 %v3388_v18, %v4545_v16  ;;  %2844 = vmatmul.mubr.bf16.gmra.mrb[140].mxu1 %v4312_v6  ;;  %2690 = vmatprep.mubr.bf16.mxu0 %v4313_v7 }
 0x174   :  { %2851 = vmatprep.mubr.bf16.mxu1 %v4315_v15 }
 0x175   :  { %v4599_v23 = vadd.f32 %v3500_v20, %v2084_v22  ;;  %v3389_v24 = vpop.f32.mrb[36].mxu0  ;;  %v4329_v20 = vld [vmem:[#allocation2 + $0x260] ss:$48 sps:$4 sm:$0xff]  }
 0x176   :  { %v3501_v25 = vpop.f32.mrb[36].mxu1  ;;  %v3390_v26 = vpop.f32.mrb[37].mxu0 }
 0x177   :  { %v3391_v28 = vadd.f32 %v3390_v26, %v3389_v24  ;;  %v3502_v30 = vpop.f32.mrb[37].mxu1  ;;  %v3392_v33 = vpop.f32.mrb[38].mxu0  ;;  %v4330_v26 = vld [vmem:[#allocation2 + $0x268] ss:$48 sps:$4 sm:$0xff]  }
 0x178   :  { %v3503_v39 = vadd.f32 %v3502_v30, %v3501_v25  ;;  %v3504_v40 = vpop.f32.mrb[38].mxu1  ;;  %v3393_v41 = vpop.f32.mrb[39].mxu0 }
 0x179   :  { %v2089_v43 = vadd.f32 %v3391_v28, %v4545_v16  ;;  %v3394_v44 = vadd.f32 %v3393_v41, %v3392_v33  ;;  %v3505_v45 = vpop.f32.mrb[39].mxu1 }
 0x17a   :  { %v3506_v46 = vadd.f32 %v3505_v45, %v3504_v40  ;;  %2691 = vmatmul.mubr.bf16.gmra.mrb[144].mxu0 %v4317_v27  ;;  %v4331_v27 = vld [vmem:[#allocation2 + $0x2c4] ss:$48 sps:$4 sm:$0xff]  }
 0x17b   :  { %v4602_v47 = vadd.f32 %v3503_v39, %v2089_v43  ;;  %v2092_v48 = vadd.f32 %v3394_v44, %v4545_v16  ;;  %2852 = vmatmul.mubr.bf16.gmra.mrb[144].mxu1 %v4318_v35  ;;  %2698 = vmatprep.mubr.bf16.mxu0 %v4319_v37  ;;  %v4333_v35 = vld [vmem:[#allocation2 + $0x2cc] ss:$48 sps:$4 sm:$0xff]  }
 0x17c   :  { %2859 = vmatprep.mubr.bf16.mxu1 %v4321_v42 }
 0x17d   :  { %v4605_v49 = vadd.f32 %v3506_v46, %v2092_v48  ;;  %v3395_v50 = vpop.f32.mrb[40].mxu0 }
 0x17e   :  { %v3507_v53 = vpop.f32.mrb[40].mxu1  ;;  %v3396_v56 = vpop.f32.mrb[41].mxu0 }
 0x17f   :  { %v3397_v58 = vadd.f32 %v3396_v56, %v3395_v50  ;;  %v3508_v59 = vpop.f32.mrb[41].mxu1  ;;  %v3398_v61 = vpop.f32.mrb[42].mxu0  ;;  %v4335_v50 = vld [vmem:[#allocation2 + $0x2c0] ss:$48 sps:$4 sm:$0xff]  }
 0x180   :  { %v3509_v1 = vadd.f32 %v3508_v59, %v3507_v53  ;;  %v3510_v2 = vpop.f32.mrb[42].mxu1  ;;  %v3399_v3 = vpop.f32.mrb[43].mxu0  ;;  %v4337_v59 = vld [vmem:[#allocation2 + $0x324] ss:$48 sps:$4 sm:$0xff]  }
 0x181   :  { %v2097_v5 = vadd.f32 %v3397_v58, %v4545_v16  ;;  %v3400_v6 = vadd.f32 %v3399_v3, %v3398_v61  ;;  %v3511_v7 = vpop.f32.mrb[43].mxu1  ;;  %v4336_v58 = vld [vmem:[#allocation2 + $0x2c8] ss:$48 sps:$4 sm:$0xff]  }
 0x182   :  { %v3512_v9 = vadd.f32 %v3511_v7, %v3510_v2  ;;  %2699 = vmatmul.mubr.bf16.gmra.mrb[148].mxu0 %v4323_v57 }
 0x183   :  { %v4608_v12 = vadd.f32 %v3509_v1, %v2097_v5  ;;  %v2100_v14 = vadd.f32 %v3400_v6, %v4545_v16  ;;  %2860 = vmatmul.mubr.bf16.gmra.mrb[148].mxu1 %v4324_v63  ;;  %2706 = vmatprep.mubr.bf16.mxu0 %v4325_v0  ;;  %v4339_v1 = vld [vmem:[#allocation2 + $0x32c] ss:$48 sps:$4 sm:$0xff]  }
 0x184   :  { %2867 = vmatprep.mubr.bf16.mxu1 %v4327_v4 }
 0x185   :  { %v4611_v15 = vadd.f32 %v3512_v9, %v2100_v14  ;;  %v3401_v17 = vpop.f32.mrb[44].mxu0 }
 0x186   :  { %v3513_v18 = vpop.f32.mrb[44].mxu1  ;;  %v3402_v19 = vpop.f32.mrb[45].mxu0 }
 0x187   :  { %v3403_v22 = vadd.f32 %v3402_v19, %v3401_v17  ;;  %v3514_v24 = vpop.f32.mrb[45].mxu1  ;;  %v3404_v25 = vpop.f32.mrb[46].mxu0  ;;  %v4341_v19 = vld [vmem:[#allocation2 + $0x320] ss:$48 sps:$4 sm:$0xff]  }
 0x188   :  { %v3515_v28 = vadd.f32 %v3514_v24, %v3513_v18  ;;  %v3516_v30 = vpop.f32.mrb[46].mxu1  ;;  %v3405_v33 = vpop.f32.mrb[47].mxu0 }
 0x189   :  { %v2105_v37 = vadd.f32 %v3403_v22, %v4545_v16  ;;  %v3406_v39 = vadd.f32 %v3405_v33, %v3404_v25  ;;  %v3517_v40 = vpop.f32.mrb[47].mxu1  ;;  %v4342_v25 = vld [vmem:[#allocation2 + $0x328] ss:$48 sps:$4 sm:$0xff]   ;;  %v4345_v33 = vld [vmem:[#allocation2 + $0x38c] ss:$48 sps:$4 sm:$0xff]  }
 0x18a   :  { %v3518_v41 = vadd.f32 %v3517_v40, %v3516_v30  ;;  %2707 = vmatmul.mubr.bf16.gmra.mrb[152].mxu0 %v4329_v20 }
 0x18b   :  { %v4614_v42 = vadd.f32 %v3515_v28, %v2105_v37  ;;  %v2108_v43 = vadd.f32 %v3406_v39, %v4545_v16  ;;  %2868 = vmatmul.mubr.bf16.gmra.mrb[152].mxu1 %v4330_v26  ;;  %2714 = vmatprep.mubr.bf16.mxu0 %v4331_v27  ;;  %v4343_v26 = vld [vmem:[#allocation2 + $0x384] ss:$48 sps:$4 sm:$0xff]  }
 0x18c   :  { %2875 = vmatprep.mubr.bf16.mxu1 %v4333_v35 }
 0x18d   :  { %v4617_v44 = vadd.f32 %v3518_v41, %v2108_v43  ;;  %v3407_v45 = vpop.f32.mrb[48].mxu0 }
 0x18e   :  { %v3519_v46 = vpop.f32.mrb[48].mxu1  ;;  %v3408_v48 = vpop.f32.mrb[49].mxu0 }
 0x18f   :  { %v3409_v53 = vadd.f32 %v3408_v48, %v3407_v45  ;;  %v3520_v56 = vpop.f32.mrb[49].mxu1  ;;  %v3410_v57 = vpop.f32.mrb[50].mxu0 }
 0x190   :  { %v3521_v61 = vadd.f32 %v3520_v56, %v3519_v46  ;;  %v3522_v63 = vpop.f32.mrb[50].mxu1  ;;  %v3411_v0 = vpop.f32.mrb[51].mxu0 }
 0x191   :  { %v2113_v2 = vadd.f32 %v3409_v53, %v4545_v16  ;;  %v3412_v3 = vadd.f32 %v3411_v0, %v3410_v57  ;;  %v3523_v4 = vpop.f32.mrb[51].mxu1  ;;  %v4347_v53 = vld [vmem:[#allocation2 + $0x380] ss:$48 sps:$4 sm:$0xff]  }
 0x192   :  { %v3524_v5 = vadd.f32 %v3523_v4, %v3522_v63  ;;  %2715 = vmatmul.mubr.bf16.gmra.mrb[156].mxu0 %v4335_v50 }
 0x193   :  { %v4620_v6 = vadd.f32 %v3521_v61, %v2113_v2  ;;  %v2116_v7 = vadd.f32 %v3412_v3, %v4545_v16  ;;  %2876 = vmatmul.mubr.bf16.gmra.mrb[156].mxu1 %v4336_v58  ;;  %2722 = vmatprep.mubr.bf16.mxu0 %v4337_v59  ;;  %v4348_v59 = vld [vmem:[#allocation2 + $0x388] ss:$48 sps:$4 sm:$0xff]   ;;  %v4349_v61 = vld [vmem:[#allocation2 + $0x3e4] ss:$48 sps:$4 sm:$0xff]   ;;  %v4351_v2 = vld [vmem:[#allocation2 + $0x3ec] ss:$48 sps:$4 sm:$0xff]  }
 0x194   :  { %2883 = vmatprep.mubr.bf16.mxu1 %v4339_v1 }
 0x195   :  { %v4623_v9 = vadd.f32 %v3524_v5, %v2116_v7  ;;  %v3413_v14 = vpop.f32.mrb[52].mxu0 }
 0x196   :  { %v3525_v17 = vpop.f32.mrb[52].mxu1  ;;  %v3414_v18 = vpop.f32.mrb[53].mxu0 }
 0x197   :  { %v3415_v20 = vadd.f32 %v3414_v18, %v3413_v14  ;;  %v3526_v22 = vpop.f32.mrb[53].mxu1  ;;  %v3416_v24 = vpop.f32.mrb[54].mxu0 }
 0x198   :  { %v3527_v27 = vadd.f32 %v3526_v22, %v3525_v17  ;;  %v3528_v28 = vpop.f32.mrb[54].mxu1  ;;  %v3417_v30 = vpop.f32.mrb[55].mxu0 }
 0x199   :  { %v2121_v35 = vadd.f32 %v3415_v20, %v4545_v16  ;;  %v3418_v37 = vadd.f32 %v3417_v30, %v3416_v24  ;;  %v3529_v39 = vpop.f32.mrb[55].mxu1  ;;  %v4353_v24 = vld [vmem:[#allocation2 + $0x3e0] ss:$48 sps:$4 sm:$0xff]   ;;  %v4355_v30 = vld [vmem:[#allocation2 + $0x444] ss:$48 sps:$4 sm:$0xff]  }
 0x19a   :  { %v3530_v40 = vadd.f32 %v3529_v39, %v3528_v28  ;;  %2723 = vmatmul.mubr.bf16.gmra.mrb[160].mxu0 %v4341_v19  ;;  %v4354_v28 = vld [vmem:[#allocation2 + $0x3e8] ss:$48 sps:$4 sm:$0xff]   ;;  %v4357_v39 = vld [vmem:[#allocation2 + $0x44c] ss:$48 sps:$4 sm:$0xff]  }
 0x19b   :  { %v4626_v41 = vadd.f32 %v3527_v27, %v2121_v35  ;;  %v2124_v43 = vadd.f32 %v3418_v37, %v4545_v16  ;;  %2884 = vmatmul.mubr.bf16.gmra.mrb[160].mxu1 %v4342_v25  ;;  %2730 = vmatprep.mubr.bf16.mxu0 %v4343_v26 }
 0x19c   :  { %2891 = vmatprep.mubr.bf16.mxu1 %v4345_v33 }
 0x19d   :  { %v4629_v45 = vadd.f32 %v3530_v40, %v2124_v43  ;;  %v3419_v46 = vpop.f32.mrb[56].mxu0 }
 0x19e   :  { %v3531_v48 = vpop.f32.mrb[56].mxu1  ;;  %v3420_v50 = vpop.f32.mrb[57].mxu0 }
 0x19f   :  { %v3421_v56 = vadd.f32 %v3420_v50, %v3419_v46  ;;  %v3532_v57 = vpop.f32.mrb[57].mxu1  ;;  %v3422_v58 = vpop.f32.mrb[58].mxu0 }
 0x1a0   :  { %v3533_v63 = vadd.f32 %v3532_v57, %v3531_v48  ;;  %v3534_v0 = vpop.f32.mrb[58].mxu1  ;;  %v3423_v1 = vpop.f32.mrb[59].mxu0 }
 0x1a1   :  { %v2129_v3 = vadd.f32 %v3421_v56, %v4545_v16  ;;  %v3424_v4 = vadd.f32 %v3423_v1, %v3422_v58  ;;  %v3535_v5 = vpop.f32.mrb[59].mxu1 }
 0x1a2   :  { %v3536_v7 = vadd.f32 %v3535_v5, %v3534_v0  ;;  %2731 = vmatmul.mubr.bf16.gmra.mrb[164].mxu0 %v4347_v53 }
 0x1a3   :  { %v4632_v14 = vadd.f32 %v3533_v63, %v2129_v3  ;;  %v2132_v17 = vadd.f32 %v3424_v4, %v4545_v16  ;;  %2892 = vmatmul.mubr.bf16.gmra.mrb[164].mxu1 %v4348_v59  ;;  %2738 = vmatprep.mubr.bf16.mxu0 %v4349_v61  ;;  %v4359_v61 = vld [vmem:[#allocation2 + $0x440] ss:$48 sps:$4 sm:$0xff]   ;;  %v4361_v3 = vld [vmem:[#allocation2 + $0x4a4] ss:$48 sps:$4 sm:$0xff]  }
 0x1a4   :  { %2899 = vmatprep.mubr.bf16.mxu1 %v4351_v2  ;;  %v4360_v2 = vld [vmem:[#allocation2 + $0x448] ss:$48 sps:$4 sm:$0xff]  }
 0x1a5   :  { %v4635_v18 = vadd.f32 %v3536_v7, %v2132_v17  ;;  %v3425_v19 = vpop.f32.mrb[60].mxu0  ;;  %v4363_v17 = vld [vmem:[#allocation2 + $0x4ac] ss:$48 sps:$4 sm:$0xff]  }
 0x1a6   :  { %v3537_v20 = vpop.f32.mrb[60].mxu1  ;;  %v3426_v22 = vpop.f32.mrb[61].mxu0 }
 0x1a7   :  { %v3427_v25 = vadd.f32 %v3426_v22, %v3425_v19  ;;  %v3538_v26 = vpop.f32.mrb[61].mxu1  ;;  %v3428_v27 = vpop.f32.mrb[62].mxu0 }
 0x1a8   :  { %v3539_v33 = vadd.f32 %v3538_v26, %v3537_v20  ;;  %v3540_v35 = vpop.f32.mrb[62].mxu1  ;;  %v3429_v37 = vpop.f32.mrb[63].mxu0 }
 0x1a9   :  { %v2137_v40 = vadd.f32 %v3427_v25, %v4545_v16  ;;  %v3430_v43 = vadd.f32 %v3429_v37, %v3428_v27  ;;  %v3541_v46 = vpop.f32.mrb[63].mxu1 }
 0x1aa   :  { %v3542_v48 = vadd.f32 %v3541_v46, %v3540_v35  ;;  %2739 = vmatmul.mubr.bf16.gmra.mrb[168].mxu0 %v4353_v24 }
 0x1ab   :  { %v4638_v50 = vadd.f32 %v3539_v33, %v2137_v40  ;;  %v2140_v53 = vadd.f32 %v3430_v43, %v4545_v16  ;;  %2900 = vmatmul.mubr.bf16.gmra.mrb[168].mxu1 %v4354_v28  ;;  %2746 = vmatprep.mubr.bf16.mxu0 %v4355_v30  ;;  %v4365_v33 = vld [vmem:[#allocation2 + $0x4a0] ss:$48 sps:$4 sm:$0xff]   ;;  %v4367_v40 = vld [vmem:[#allocation2 + $0x504] ss:$48 sps:$4 sm:$0xff]  }
 0x1ac   :  { %2907 = vmatprep.mubr.bf16.mxu1 %v4357_v39  ;;  %v4366_v39 = vld [vmem:[#allocation2 + $0x4a8] ss:$48 sps:$4 sm:$0xff]  }
 0x1ad   :  { %v4641_v56 = vadd.f32 %v3542_v48, %v2140_v53  ;;  %v3559_v57 = vpop.f32.mrb[64].mxu0  ;;  %v4369_v53 = vld [vmem:[#allocation2 + $0x50c] ss:$48 sps:$4 sm:$0xff]  }
 0x1ae   :  { %v3671_v58 = vpop.f32.mrb[64].mxu1  ;;  %v3560_v59 = vpop.f32.mrb[65].mxu0 }
 0x1af   :  { %v3561_v63 = vadd.f32 %v3560_v59, %v3559_v57  ;;  %v3672_v0 = vpop.f32.mrb[65].mxu1  ;;  %v3562_v1 = vpop.f32.mrb[66].mxu0 }
 0x1b0   :  { %v3673_v4 = vadd.f32 %v3672_v0, %v3671_v58  ;;  %v3674_v5 = vpop.f32.mrb[66].mxu1  ;;  %v3563_v7 = vpop.f32.mrb[67].mxu0 }
 0x1b1   :  { %v2339_v16 = vadd.f32 %v3561_v63, %v4548_v32  ;;  %v3564_v19 = vadd.f32 %v3563_v7, %v3562_v1  ;;  %v3675_v20 = vpop.f32.mrb[67].mxu1 }
 0x1b2   :  { %v3676_v22 = vadd.f32 %v3675_v20, %v3674_v5  ;;  %2747 = vmatmul.mubr.bf16.gmra.mrb[172].mxu0 %v4359_v61 }
 0x1b3   :  { %v4644_v24 = vadd.f32 %v3673_v4, %v2339_v16  ;;  %v2342_v25 = vadd.f32 %v3564_v19, %v4551_v34  ;;  %2908 = vmatmul.mubr.bf16.gmra.mrb[172].mxu1 %v4360_v2  ;;  %2754 = vmatprep.mubr.bf16.mxu0 %v4361_v3  ;;  %v4371_v4 = vld [vmem:[#allocation2 + $0x500] ss:$48 sps:$4 sm:$0xff]   ;;  %v4373_v16 = vld [vmem:[#allocation2 + $0x564] ss:$48 sps:$4 sm:$0xff]  }
 0x1b4   :  { %2915 = vmatprep.mubr.bf16.mxu1 %v4363_v17  ;;  %v4372_v17 = vld [vmem:[#allocation2 + $0x508] ss:$48 sps:$4 sm:$0xff]  }
 0x1b5   :  { %v4647_v26 = vadd.f32 %v3676_v22, %v2342_v25  ;;  %v3565_v27 = vpop.f32.mrb[68].mxu0  ;;  %v4375_v25 = vld [vmem:[#allocation2 + $0x56c] ss:$48 sps:$4 sm:$0xff]  }
 0x1b6   :  { %v3677_v28 = vpop.f32.mrb[68].mxu1  ;;  %v3566_v30 = vpop.f32.mrb[69].mxu0 }
 0x1b7   :  { %v3567_v35 = vadd.f32 %v3566_v30, %v3565_v27  ;;  %v3678_v37 = vpop.f32.mrb[69].mxu1  ;;  %v3568_v32 = vpop.f32.mrb[70].mxu0 }
 0x1b8   :  { %v3679_v43 = vadd.f32 %v3678_v37, %v3677_v28  ;;  %v3680_v46 = vpop.f32.mrb[70].mxu1  ;;  %v3569_v48 = vpop.f32.mrb[71].mxu0 }
 0x1b9   :  { %v2347_v34 = vadd.f32 %v3567_v35, %v4554_v52  ;;  %v3570_v57 = vadd.f32 %v3569_v48, %v3568_v32  ;;  %v3681_v58 = vpop.f32.mrb[71].mxu1 }
 0x1ba   :  { %v3682_v59 = vadd.f32 %v3681_v58, %v3680_v46  ;;  %2755 = vmatmul.mubr.bf16.gmra.mrb[176].mxu0 %v4365_v33 }
 0x1bb   :  { %v4650_v61 = vadd.f32 %v3679_v43, %v2347_v34  ;;  %v2350_v63 = vadd.f32 %v3570_v57, %v4557_v54  ;;  %2916 = vmatmul.mubr.bf16.gmra.mrb[176].mxu1 %v4366_v39  ;;  %2762 = vmatprep.mubr.bf16.mxu0 %v4367_v40  ;;  %v4377_v43 = vld [vmem:[#allocation2 + $0x560] ss:$48 sps:$4 sm:$0xff]   ;;  %v4379_v34 = vld [vmem:[#allocation2 + $0x5c4] ss:$48 sps:$4 sm:$0xff]  }
 0x1bc   :  { %2923 = vmatprep.mubr.bf16.mxu1 %v4369_v53  ;;  %v4378_v53 = vld [vmem:[#allocation2 + $0x568] ss:$48 sps:$4 sm:$0xff]  }
 0x1bd   :  { %v4653_v0 = vadd.f32 %v3682_v59, %v2350_v63  ;;  %v3571_v1 = vpop.f32.mrb[72].mxu0  ;;  %v4381_v63 = vld [vmem:[#allocation2 + $0x5cc] ss:$48 sps:$4 sm:$0xff]  }
 0x1be   :  { %v3683_v2 = vpop.f32.mrb[72].mxu1  ;;  %v3572_v3 = vpop.f32.mrb[73].mxu0 }
 0x1bf   :  { %v3573_v5 = vadd.f32 %v3572_v3, %v3571_v1  ;;  %v3684_v7 = vpop.f32.mrb[73].mxu1  ;;  %v3574_v52 = vpop.f32.mrb[74].mxu0 }
 0x1c0   :  { %v3685_v19 = vadd.f32 %v3684_v7, %v3683_v2  ;;  %v3686_v20 = vpop.f32.mrb[74].mxu1  ;;  %v3575_v22 = vpop.f32.mrb[75].mxu0 }
 0x1c1   :  { %v2355_v54 = vadd.f32 %v3573_v5, %v4560_v8  ;;  %v3576_v27 = vadd.f32 %v3575_v22, %v3574_v52  ;;  %v3687_v28 = vpop.f32.mrb[75].mxu1 }
 0x1c2   :  { %v3688_v30 = vadd.f32 %v3687_v28, %v3686_v20  ;;  %2763 = vmatmul.mubr.bf16.gmra.mrb[180].mxu0 %v4371_v4 }
 0x1c3   :  { %v4656_v33 = vadd.f32 %v3685_v19, %v2355_v54  ;;  %v2358_v35 = vadd.f32 %v3576_v27, %v4563_v10  ;;  %2924 = vmatmul.mubr.bf16.gmra.mrb[180].mxu1 %v4372_v17  ;;  %2770 = vmatprep.mubr.bf16.mxu0 %v4373_v16  ;;  %v4383_v19 = vld [vmem:[#allocation2 + $0x5c0] ss:$48 sps:$4 sm:$0xff]  }
 0x1c4   :  { %2931 = vmatprep.mubr.bf16.mxu1 %v4375_v25  ;;  %v4384_v25 = vld [vmem:[#allocation2 + $0x5c8] ss:$48 sps:$4 sm:$0xff]  }
 0x1c5   :  { %v4659_v37 = vadd.f32 %v3688_v30, %v2358_v35  ;;  %v3577_v32 = vpop.f32.mrb[76].mxu0 }
 0x1c6   :  { %v3689_v39 = vpop.f32.mrb[76].mxu1  ;;  %v3578_v40 = vpop.f32.mrb[77].mxu0 }
 0x1c7   :  { %v3579_v46 = vadd.f32 %v3578_v40, %v3577_v32  ;;  %v3690_v48 = vpop.f32.mrb[77].mxu1  ;;  %v3580_v8 = vpop.f32.mrb[78].mxu0 }
 0x1c8   :  { %v3691_v57 = vadd.f32 %v3690_v48, %v3689_v39  ;;  %v3692_v58 = vpop.f32.mrb[78].mxu1  ;;  %v3581_v59 = vpop.f32.mrb[79].mxu0 }
 0x1c9   :  { %v2363_v10 = vadd.f32 %v3579_v46, %v4566_v29  ;;  %v3582_v1 = vadd.f32 %v3581_v59, %v3580_v8  ;;  %v3693_v2 = vpop.f32.mrb[79].mxu1 }
 0x1ca   :  { %v3694_v3 = vadd.f32 %v3693_v2, %v3692_v58  ;;  %2771 = vmatmul.mubr.bf16.gmra.mrb[184].mxu0 %v4377_v43 }
 0x1cb   :  { %v4662_v4 = vadd.f32 %v3691_v57, %v2363_v10  ;;  %v2366_v5 = vadd.f32 %v3582_v1, %v4569_v31  ;;  %2932 = vmatmul.mubr.bf16.gmra.mrb[184].mxu1 %v4378_v53  ;;  %2778 = vmatprep.mubr.bf16.mxu0 %v4379_v34 }
 0x1cc   :  { %2939 = vmatprep.mubr.bf16.mxu1 %v4381_v63 }
 0x1cd   :  { %v4665_v7 = vadd.f32 %v3694_v3, %v2366_v5  ;;  %v3583_v52 = vpop.f32.mrb[80].mxu0 }
 0x1ce   :  { %v3695_v17 = vpop.f32.mrb[80].mxu1  ;;  %v3584_v16 = vpop.f32.mrb[81].mxu0 }
 0x1cf   :  { %v3585_v20 = vadd.f32 %v3584_v16, %v3583_v52  ;;  %v3696_v22 = vpop.f32.mrb[81].mxu1  ;;  %v3586_v29 = vpop.f32.mrb[82].mxu0 }
 0x1d0   :  { %v3697_v54 = vadd.f32 %v3696_v22, %v3695_v17  ;;  %v3698_v27 = vpop.f32.mrb[82].mxu1  ;;  %v3587_v28 = vpop.f32.mrb[83].mxu0 }
 0x1d1   :  { %v2371_v30 = vadd.f32 %v3585_v20, %v4572_v51  ;;  %v3588_v35 = vadd.f32 %v3587_v28, %v3586_v29  ;;  %v3699_v31 = vpop.f32.mrb[83].mxu1 }
 0x1d2   :  { %v3700_v32 = vadd.f32 %v3699_v31, %v3698_v27  ;;  %2779 = vmatmul.mubr.bf16.gmra.mrb[188].mxu0 %v4383_v19 }
 0x1d3   :  { %v4668_v39 = vadd.f32 %v3697_v54, %v2371_v30  ;;  %v2374_v40 = vadd.f32 %v3588_v35, %v4575_v55  ;;  %2940 = vmatmul.mubr.bf16.gmra.mrb[188].mxu1 %v4384_v25 }
 0x1d5   :  { %v4671_v43 = vadd.f32 %v3700_v32, %v2374_v40  ;;  %v3589_v46 = vpop.f32.mrb[84].mxu0 }
 0x1d6   :  { %v3701_v48 = vpop.f32.mrb[84].mxu1  ;;  %v3590_v8 = vpop.f32.mrb[85].mxu0 }
 0x1d7   :  { %v3591_v53 = vadd.f32 %v3590_v8, %v3589_v46  ;;  %v3702_v34 = vpop.f32.mrb[85].mxu1  ;;  %v3592_v57 = vpop.f32.mrb[86].mxu0 }
 0x1d8   :  { %v3703_v58 = vadd.f32 %v3702_v34, %v3701_v48  ;;  %v3704_v59 = vpop.f32.mrb[86].mxu1  ;;  %v3593_v51 = vpop.f32.mrb[87].mxu0 }
 0x1d9   :  { %v2379_v63 = vadd.f32 %v3591_v53, %v4578_v11  ;;  %v3594_v10 = vadd.f32 %v3593_v51, %v3592_v57  ;;  %v3705_v1 = vpop.f32.mrb[87].mxu1 }
 0x1da   :  { %v3706_v2 = vadd.f32 %v3705_v1, %v3704_v59 }
 0x1db   :  { %v4674_v3 = vadd.f32 %v3703_v58, %v2379_v63  ;;  %v2382_v55 = vadd.f32 %v3594_v10, %v4581_v13 }
 0x1dd   :  { %v4677_v5 = vadd.f32 %v3706_v2, %v2382_v55  ;;  %v3595_v52 = vpop.f32.mrb[88].mxu0 }
 0x1de   :  { %v3707_v17 = vpop.f32.mrb[88].mxu1  ;;  %v3596_v16 = vpop.f32.mrb[89].mxu0 }
 0x1df   :  { %v3597_v19 = vadd.f32 %v3596_v16, %v3595_v52  ;;  %v3708_v20 = vpop.f32.mrb[89].mxu1  ;;  %v3598_v22 = vpop.f32.mrb[90].mxu0 }
 0x1e0   :  { %v3709_v29 = vadd.f32 %v3708_v20, %v3707_v17  ;;  %v3710_v25 = vpop.f32.mrb[90].mxu1  ;;  %v3599_v54 = vpop.f32.mrb[91].mxu0 }
 0x1e1   :  { %v2387_v11 = vadd.f32 %v3597_v19, %v4584_v36  ;;  %v3600_v27 = vadd.f32 %v3599_v54, %v3598_v22  ;;  %v3711_v28 = vpop.f32.mrb[91].mxu1 }
 0x1e2   :  { %v3712_v30 = vadd.f32 %v3711_v28, %v3710_v25 }
 0x1e3   :  { %v4680_v35 = vadd.f32 %v3709_v29, %v2387_v11  ;;  %v2390_v13 = vadd.f32 %v3600_v27, %v4587_v38 }
 0x1e5   :  { %v4683_v31 = vadd.f32 %v3712_v30, %v2390_v13  ;;  %v3601_v32 = vpop.f32.mrb[92].mxu0 }
 0x1e6   :  { %v3713_v40 = vpop.f32.mrb[92].mxu1  ;;  %v3602_v46 = vpop.f32.mrb[93].mxu0 }
 0x1e7   :  { %v3603_v48 = vadd.f32 %v3602_v46, %v3601_v32  ;;  %v3714_v8 = vpop.f32.mrb[93].mxu1  ;;  %v3604_v53 = vpop.f32.mrb[94].mxu0 }
 0x1e8   :  { %v3715_v34 = vadd.f32 %v3714_v8, %v3713_v40  ;;  %v3716_v57 = vpop.f32.mrb[94].mxu1  ;;  %v3605_v58 = vpop.f32.mrb[95].mxu0 }
 0x1e9   :  { %v2395_v36 = vadd.f32 %v3603_v48, %v4590_v60  ;;  %v3606_v59 = vadd.f32 %v3605_v58, %v3604_v53  ;;  %v3717_v51 = vpop.f32.mrb[95].mxu1 }
 0x1ea   :  { %v3718_v63 = vadd.f32 %v3717_v51, %v3716_v57 }
 0x1eb   :  { %v4686_v10 = vadd.f32 %v3715_v34, %v2395_v36  ;;  %v2398_v38 = vadd.f32 %v3606_v59, %v4593_v62 }
 0x1ed   :  { %v4689_v1 = vadd.f32 %v3718_v63, %v2398_v38  ;;  %v3607_v2 = vpop.f32.mrb[96].mxu0 }
 0x1ee   :  { %v3719_v55 = vpop.f32.mrb[96].mxu1  ;;  %v3608_v52 = vpop.f32.mrb[97].mxu0 }
 0x1ef   :  { %v3609_v17 = vadd.f32 %v3608_v52, %v3607_v2  ;;  %v3720_v16 = vpop.f32.mrb[97].mxu1  ;;  %v3610_v19 = vpop.f32.mrb[98].mxu0 }
 0x1f0   :  { %v3721_v20 = vadd.f32 %v3720_v16, %v3719_v55  ;;  %v3722_v22 = vpop.f32.mrb[98].mxu1  ;;  %v3611_v29 = vpop.f32.mrb[99].mxu0 }
 0x1f1   :  { %v2403_v60 = vadd.f32 %v3609_v17, %v4596_v21  ;;  %v3612_v25 = vadd.f32 %v3611_v29, %v3610_v19  ;;  %v3723_v54 = vpop.f32.mrb[99].mxu1 }
 0x1f2   :  { %v3724_v11 = vadd.f32 %v3723_v54, %v3722_v22 }
 0x1f3   :  { %v4692_v27 = vadd.f32 %v3721_v20, %v2403_v60  ;;  %v2406_v62 = vadd.f32 %v3612_v25, %v4599_v23 }
 0x1f5   :  { %v4695_v28 = vadd.f32 %v3724_v11, %v2406_v62  ;;  %v3613_v30 = vpop.f32.mrb[100].mxu0 }
 0x1f6   :  { %v3725_v13 = vpop.f32.mrb[100].mxu1  ;;  %v3614_v32 = vpop.f32.mrb[101].mxu0 }
 0x1f7   :  { %v3615_v40 = vadd.f32 %v3614_v32, %v3613_v30  ;;  %v3726_v46 = vpop.f32.mrb[101].mxu1  ;;  %v3616_v48 = vpop.f32.mrb[102].mxu0 }
 0x1f8   :  { %v3727_v8 = vadd.f32 %v3726_v46, %v3725_v13  ;;  %v3728_v53 = vpop.f32.mrb[102].mxu1  ;;  %v3617_v34 = vpop.f32.mrb[103].mxu0 }
 0x1f9   :  { %v2411_v21 = vadd.f32 %v3615_v40, %v4602_v47  ;;  %v3618_v57 = vadd.f32 %v3617_v34, %v3616_v48  ;;  %v3729_v58 = vpop.f32.mrb[103].mxu1 }
 0x1fa   :  { %v3730_v36 = vadd.f32 %v3729_v58, %v3728_v53 }
 0x1fb   :  { %v4698_v59 = vadd.f32 %v3727_v8, %v2411_v21  ;;  %v2414_v23 = vadd.f32 %v3618_v57, %v4605_v49 }
 0x1fd   :  { %v4701_v51 = vadd.f32 %v3730_v36, %v2414_v23  ;;  %v3619_v63 = vpop.f32.mrb[104].mxu0 }
 0x1fe   :  { %v3731_v38 = vpop.f32.mrb[104].mxu1  ;;  %v3620_v2 = vpop.f32.mrb[105].mxu0 }
 0x1ff   :  { %v3621_v55 = vadd.f32 %v3620_v2, %v3619_v63  ;;  %v3732_v52 = vpop.f32.mrb[105].mxu1  ;;  %v3622_v17 = vpop.f32.mrb[106].mxu0 }
 0x200   :  { %v3733_v16 = vadd.f32 %v3732_v52, %v3731_v38  ;;  %v3734_v19 = vpop.f32.mrb[106].mxu1  ;;  %v3623_v20 = vpop.f32.mrb[107].mxu0 }
 0x201   :  { %v2419_v47 = vadd.f32 %v3621_v55, %v4608_v12  ;;  %v3624_v22 = vadd.f32 %v3623_v20, %v3622_v17  ;;  %v3735_v29 = vpop.f32.mrb[107].mxu1 }
 0x202   :  { %v3736_v60 = vadd.f32 %v3735_v29, %v3734_v19 }
 0x203   :  { %v4704_v25 = vadd.f32 %v3733_v16, %v2419_v47  ;;  %v2422_v49 = vadd.f32 %v3624_v22, %v4611_v15 }
 0x205   :  { %v4707_v54 = vadd.f32 %v3736_v60, %v2422_v49  ;;  %v3625_v11 = vpop.f32.mrb[108].mxu0 }
 0x206   :  { %v3737_v62 = vpop.f32.mrb[108].mxu1  ;;  %v3626_v30 = vpop.f32.mrb[109].mxu0 }
 0x207   :  { %v3627_v13 = vadd.f32 %v3626_v30, %v3625_v11  ;;  %v3738_v32 = vpop.f32.mrb[109].mxu1  ;;  %v3628_v40 = vpop.f32.mrb[110].mxu0 }
 0x208   :  { %v3739_v46 = vadd.f32 %v3738_v32, %v3737_v62  ;;  %v3740_v48 = vpop.f32.mrb[110].mxu1  ;;  %v3629_v8 = vpop.f32.mrb[111].mxu0 }
 0x209   :  { %v2427_v12 = vadd.f32 %v3627_v13, %v4614_v42  ;;  %v3630_v53 = vadd.f32 %v3629_v8, %v3628_v40  ;;  %v3741_v34 = vpop.f32.mrb[111].mxu1 }
 0x20a   :  { %v3742_v21 = vadd.f32 %v3741_v34, %v3740_v48 }
 0x20b   :  { %v4710_v57 = vadd.f32 %v3739_v46, %v2427_v12  ;;  %v2430_v15 = vadd.f32 %v3630_v53, %v4617_v44 }
 0x20d   :  { %v4713_v58 = vadd.f32 %v3742_v21, %v2430_v15  ;;  %v3631_v36 = vpop.f32.mrb[112].mxu0 }
 0x20e   :  { %v3743_v23 = vpop.f32.mrb[112].mxu1  ;;  %v3632_v63 = vpop.f32.mrb[113].mxu0 }
 0x20f   :  { %v3633_v38 = vadd.f32 %v3632_v63, %v3631_v36  ;;  %v3744_v2 = vpop.f32.mrb[113].mxu1  ;;  %v3634_v55 = vpop.f32.mrb[114].mxu0 }
 0x210   :  { %v3745_v52 = vadd.f32 %v3744_v2, %v3743_v23  ;;  %v3746_v17 = vpop.f32.mrb[114].mxu1  ;;  %v3635_v16 = vpop.f32.mrb[115].mxu0 }
 0x211   :  { %v2435_v42 = vadd.f32 %v3633_v38, %v4620_v6  ;;  %v3636_v19 = vadd.f32 %v3635_v16, %v3634_v55  ;;  %v3747_v20 = vpop.f32.mrb[115].mxu1 }
 0x212   :  { %v3748_v47 = vadd.f32 %v3747_v20, %v3746_v17 }
 0x213   :  { %v4716_v22 = vadd.f32 %v3745_v52, %v2435_v42  ;;  %v2438_v44 = vadd.f32 %v3636_v19, %v4623_v9 }
 0x215   :  { %v4719_v29 = vadd.f32 %v3748_v47, %v2438_v44  ;;  %v3637_v60 = vpop.f32.mrb[116].mxu0 }
 0x216   :  { %v3749_v49 = vpop.f32.mrb[116].mxu1  ;;  %v3638_v11 = vpop.f32.mrb[117].mxu0 }
 0x217   :  { %v3639_v62 = vadd.f32 %v3638_v11, %v3637_v60  ;;  %v3750_v30 = vpop.f32.mrb[117].mxu1  ;;  %v3640_v13 = vpop.f32.mrb[118].mxu0 }
 0x218   :  { %v3751_v32 = vadd.f32 %v3750_v30, %v3749_v49  ;;  %v3752_v40 = vpop.f32.mrb[118].mxu1  ;;  %v3641_v46 = vpop.f32.mrb[119].mxu0 }
 0x219   :  { %v2443_v6 = vadd.f32 %v3639_v62, %v4626_v41  ;;  %v3642_v48 = vadd.f32 %v3641_v46, %v3640_v13  ;;  %v3753_v8 = vpop.f32.mrb[119].mxu1 }
 0x21a   :  { %v3754_v12 = vadd.f32 %v3753_v8, %v3752_v40 }
 0x21b   :  { %v4722_v53 = vadd.f32 %v3751_v32, %v2443_v6  ;;  %v2446_v9 = vadd.f32 %v3642_v48, %v4629_v45 }
 0x21d   :  { %v4725_v34 = vadd.f32 %v3754_v12, %v2446_v9  ;;  %v3643_v21 = vpop.f32.mrb[120].mxu0 }
 0x21e   :  { %v3755_v15 = vpop.f32.mrb[120].mxu1  ;;  %v3644_v36 = vpop.f32.mrb[121].mxu0 }
 0x21f   :  { %v3645_v23 = vadd.f32 %v3644_v36, %v3643_v21  ;;  %v3756_v63 = vpop.f32.mrb[121].mxu1  ;;  %v3646_v38 = vpop.f32.mrb[122].mxu0 }
 0x220   :  { %v3757_v2 = vadd.f32 %v3756_v63, %v3755_v15  ;;  %v3758_v55 = vpop.f32.mrb[122].mxu1  ;;  %v3647_v52 = vpop.f32.mrb[123].mxu0 }
 0x221   :  { %v2451_v41 = vadd.f32 %v3645_v23, %v4632_v14  ;;  %v3648_v17 = vadd.f32 %v3647_v52, %v3646_v38  ;;  %v3759_v16 = vpop.f32.mrb[123].mxu1 }
 0x222   :  { %v3760_v42 = vadd.f32 %v3759_v16, %v3758_v55 }
 0x223   :  { %v4728_v19 = vadd.f32 %v3757_v2, %v2451_v41  ;;  %v2454_v45 = vadd.f32 %v3648_v17, %v4635_v18 }
 0x225   :  { %v4731_v20 = vadd.f32 %v3760_v42, %v2454_v45  ;;  %v3649_v47 = vpop.f32.mrb[124].mxu0 }
 0x226   :  { %v3761_v44 = vpop.f32.mrb[124].mxu1  ;;  %v3650_v60 = vpop.f32.mrb[125].mxu0 }
 0x227   :  { %v3651_v49 = vadd.f32 %v3650_v60, %v3649_v47  ;;  %v3762_v11 = vpop.f32.mrb[125].mxu1  ;;  %v3652_v62 = vpop.f32.mrb[126].mxu0 }
 0x228   :  { %v3763_v30 = vadd.f32 %v3762_v11, %v3761_v44  ;;  %v3764_v13 = vpop.f32.mrb[126].mxu1  ;;  %v3653_v32 = vpop.f32.mrb[127].mxu0 }
 0x229   :  { %v2459_v14 = vadd.f32 %v3651_v49, %v4638_v50  ;;  %v3654_v40 = vadd.f32 %v3653_v32, %v3652_v62  ;;  %v3765_v46 = vpop.f32.mrb[127].mxu1 }
 0x22a   :  { %v3766_v6 = vadd.f32 %v3765_v46, %v3764_v13 }
 0x22b   :  { %v4734_v48 = vadd.f32 %v3763_v30, %v2459_v14  ;;  %v2462_v18 = vadd.f32 %v3654_v40, %v4641_v56 }
 0x22d   :  { %v4737_v8 = vadd.f32 %v3766_v6, %v2462_v18  ;;  %v3783_v12 = vpop.f32.mrb[128].mxu0 }
 0x22e   :  { %v3895_v9 = vpop.f32.mrb[128].mxu1  ;;  %v3784_v21 = vpop.f32.mrb[129].mxu0 }
 0x22f   :  { %v3785_v15 = vadd.f32 %v3784_v21, %v3783_v12  ;;  %v3896_v36 = vpop.f32.mrb[129].mxu1  ;;  %v3786_v23 = vpop.f32.mrb[130].mxu0 }
 0x230   :  { %v3897_v63 = vadd.f32 %v3896_v36, %v3895_v9  ;;  %v3898_v38 = vpop.f32.mrb[130].mxu1  ;;  %v3787_v2 = vpop.f32.mrb[131].mxu0 }
 0x231   :  { %v2661_v50 = vadd.f32 %v3785_v15, %v4644_v24  ;;  %v3788_v55 = vadd.f32 %v3787_v2, %v3786_v23  ;;  %v3899_v52 = vpop.f32.mrb[131].mxu1 }
 0x232   :  { %v3900_v41 = vadd.f32 %v3899_v52, %v3898_v38 }
 0x233   :  { %v2822_v17 = vadd.f32 %v3897_v63, %v2661_v50  ;;  %v2664_v16 = vadd.f32 %v3788_v55, %v4647_v26 }
 0x235   :  { %v2948_v56 = vmax.f32 %v2822_v17, 0.0  ;;  %v2825_v42 = vadd.f32 %v3900_v41, %v2664_v16  ;;  %v3789_v45 = vpop.f32.mrb[132].mxu0 }
 0x236   :  { %v3901_v47 = vpop.f32.mrb[132].mxu1  ;;  %v3790_v44 = vpop.f32.mrb[133].mxu0 }
 0x237   :  { %2980 = vst [vmem:[#allocation8] sm:$0xff] %v2948_v56  ;;  %v2949_v60 = vmax.f32 %v2825_v42, 0.0  ;;  %v3791_v49 = vadd.f32 %v3790_v44, %v3789_v45  ;;  %v3902_v11 = vpop.f32.mrb[133].mxu1  ;;  %v3792_v62 = vpop.f32.mrb[134].mxu0 }
 0x238   :  { %v3903_v30 = vadd.f32 %v3902_v11, %v3901_v47  ;;  %v3904_v13 = vpop.f32.mrb[134].mxu1  ;;  %v3793_v32 = vpop.f32.mrb[135].mxu0 }
 0x239   :  { %2981 = vst [vmem:[#allocation8 + $0x8] sm:$0xff] %v2949_v60  ;;  %v2669_v24 = vadd.f32 %v3791_v49, %v4650_v61  ;;  %v3794_v14 = vadd.f32 %v3793_v32, %v3792_v62  ;;  %v3905_v40 = vpop.f32.mrb[135].mxu1 }
 0x23a   :  { %v3906_v46 = vadd.f32 %v3905_v40, %v3904_v13 }
 0x23b   :  { %v2830_v26 = vadd.f32 %v3903_v30, %v2669_v24  ;;  %v2672_v6 = vadd.f32 %v3794_v14, %v4653_v0 }
 0x23d   :  { %v2950_v18 = vmax.f32 %v2830_v26, 0.0  ;;  %v2833_v12 = vadd.f32 %v3906_v46, %v2672_v6  ;;  %v3795_v9 = vpop.f32.mrb[136].mxu0 }
 0x23e   :  { %v3907_v21 = vpop.f32.mrb[136].mxu1  ;;  %v3796_v15 = vpop.f32.mrb[137].mxu0 }
 0x23f   :  { %2982 = vst [vmem:[#allocation8 + $0x10] sm:$0xff] %v2950_v18  ;;  %v2951_v36 = vmax.f32 %v2833_v12, 0.0  ;;  %v3797_v23 = vadd.f32 %v3796_v15, %v3795_v9  ;;  %v3908_v63 = vpop.f32.mrb[137].mxu1  ;;  %v3798_v38 = vpop.f32.mrb[138].mxu0 }
 0x240   :  { %v3909_v2 = vadd.f32 %v3908_v63, %v3907_v21  ;;  %v3910_v50 = vpop.f32.mrb[138].mxu1  ;;  %v3799_v55 = vpop.f32.mrb[139].mxu0 }
 0x241   :  { %2983 = vst [vmem:[#allocation8 + $0x18] sm:$0xff] %v2951_v36  ;;  %v2677_v61 = vadd.f32 %v3797_v23, %v4656_v33  ;;  %v3800_v52 = vadd.f32 %v3799_v55, %v3798_v38  ;;  %v3911_v41 = vpop.f32.mrb[139].mxu1 }
 0x242   :  { %v3912_v17 = vadd.f32 %v3911_v41, %v3910_v50 }
 0x243   :  { %v2838_v0 = vadd.f32 %v3909_v2, %v2677_v61  ;;  %v2680_v16 = vadd.f32 %v3800_v52, %v4659_v37 }
 0x245   :  { %v2952_v56 = vmax.f32 %v2838_v0, 0.0  ;;  %v2841_v42 = vadd.f32 %v3912_v17, %v2680_v16  ;;  %v3801_v45 = vpop.f32.mrb[140].mxu0 }
 0x246   :  { %v3913_v47 = vpop.f32.mrb[140].mxu1  ;;  %v3802_v44 = vpop.f32.mrb[141].mxu0 }
 0x247   :  { %2984 = vst [vmem:[#allocation8 + $0x20] sm:$0xff] %v2952_v56  ;;  %v2953_v60 = vmax.f32 %v2841_v42, 0.0  ;;  %v3803_v49 = vadd.f32 %v3802_v44, %v3801_v45  ;;  %v3914_v11 = vpop.f32.mrb[141].mxu1  ;;  %v3804_v62 = vpop.f32.mrb[142].mxu0 }
 0x248   :  { %v3915_v30 = vadd.f32 %v3914_v11, %v3913_v47  ;;  %v3916_v13 = vpop.f32.mrb[142].mxu1  ;;  %v3805_v32 = vpop.f32.mrb[143].mxu0 }
 0x249   :  { %2985 = vst [vmem:[#allocation8 + $0x28] sm:$0xff] %v2953_v60  ;;  %v2685_v33 = vadd.f32 %v3803_v49, %v4662_v4  ;;  %v3806_v24 = vadd.f32 %v3805_v32, %v3804_v62  ;;  %v3917_v14 = vpop.f32.mrb[143].mxu1 }
 0x24a   :  { %v3918_v40 = vadd.f32 %v3917_v14, %v3916_v13 }
 0x24b   :  { %v2846_v37 = vadd.f32 %v3915_v30, %v2685_v33  ;;  %v2688_v46 = vadd.f32 %v3806_v24, %v4665_v7 }
 0x24d   :  { %v2954_v26 = vmax.f32 %v2846_v37, 0.0  ;;  %v2849_v6 = vadd.f32 %v3918_v40, %v2688_v46  ;;  %v3807_v18 = vpop.f32.mrb[144].mxu0 }
 0x24e   :  { %v3919_v12 = vpop.f32.mrb[144].mxu1  ;;  %v3808_v9 = vpop.f32.mrb[145].mxu0 }
 0x24f   :  { %2986 = vst [vmem:[#allocation8 + $0x30] sm:$0xff] %v2954_v26  ;;  %v2955_v21 = vmax.f32 %v2849_v6, 0.0  ;;  %v3809_v15 = vadd.f32 %v3808_v9, %v3807_v18  ;;  %v3920_v36 = vpop.f32.mrb[145].mxu1  ;;  %v3810_v23 = vpop.f32.mrb[146].mxu0 }
 0x250   :  { %v3921_v63 = vadd.f32 %v3920_v36, %v3919_v12  ;;  %v3922_v38 = vpop.f32.mrb[146].mxu1  ;;  %v3811_v2 = vpop.f32.mrb[147].mxu0 }
 0x251   :  { %2987 = vst [vmem:[#allocation8 + $0x38] sm:$0xff] %v2955_v21  ;;  %v2693_v4 = vadd.f32 %v3809_v15, %v4668_v39  ;;  %v3812_v50 = vadd.f32 %v3811_v2, %v3810_v23  ;;  %v3923_v55 = vpop.f32.mrb[147].mxu1 }
 0x252   :  { %v3924_v61 = vadd.f32 %v3923_v55, %v3922_v38 }
 0x253   :  { %v2854_v7 = vadd.f32 %v3921_v63, %v2693_v4  ;;  %v2696_v52 = vadd.f32 %v3812_v50, %v4671_v43 }
 0x255   :  { %v2956_v41 = vmax.f32 %v2854_v7, 0.0  ;;  %v2857_v17 = vadd.f32 %v3924_v61, %v2696_v52  ;;  %v3813_v0 = vpop.f32.mrb[148].mxu0 }
 0x256   :  { %v3925_v16 = vpop.f32.mrb[148].mxu1  ;;  %v3814_v56 = vpop.f32.mrb[149].mxu0 }
 0x257   :  { %2988 = vst [vmem:[#allocation8 + $0x40] sm:$0xff] %v2956_v41  ;;  %v2957_v42 = vmax.f32 %v2857_v17, 0.0  ;;  %v3815_v45 = vadd.f32 %v3814_v56, %v3813_v0  ;;  %v3926_v47 = vpop.f32.mrb[149].mxu1  ;;  %v3816_v44 = vpop.f32.mrb[150].mxu0 }
 0x258   :  { %v3927_v60 = vadd.f32 %v3926_v47, %v3925_v16  ;;  %v3928_v49 = vpop.f32.mrb[150].mxu1  ;;  %v3817_v11 = vpop.f32.mrb[151].mxu0 }
 0x259   :  { %2989 = vst [vmem:[#allocation8 + $0x48] sm:$0xff] %v2957_v42  ;;  %v2701_v39 = vadd.f32 %v3815_v45, %v4674_v3  ;;  %v3818_v62 = vadd.f32 %v3817_v11, %v3816_v44  ;;  %v3929_v30 = vpop.f32.mrb[151].mxu1 }
 0x25a   :  { %v3930_v13 = vadd.f32 %v3929_v30, %v3928_v49 }
 0x25b   :  { %v2862_v43 = vadd.f32 %v3927_v60, %v2701_v39  ;;  %v2704_v32 = vadd.f32 %v3818_v62, %v4677_v5 }
 0x25d   :  { %v2958_v33 = vmax.f32 %v2862_v43, 0.0  ;;  %v2865_v24 = vadd.f32 %v3930_v13, %v2704_v32  ;;  %v3819_v14 = vpop.f32.mrb[152].mxu0 }
 0x25e   :  { %v3931_v40 = vpop.f32.mrb[152].mxu1  ;;  %v3820_v37 = vpop.f32.mrb[153].mxu0 }
 0x25f   :  { %2990 = vst [vmem:[#allocation8 + $0x50] sm:$0xff] %v2958_v33  ;;  %v2959_v46 = vmax.f32 %v2865_v24, 0.0  ;;  %v3821_v26 = vadd.f32 %v3820_v37, %v3819_v14  ;;  %v3932_v6 = vpop.f32.mrb[153].mxu1  ;;  %v3822_v18 = vpop.f32.mrb[154].mxu0 }
 0x260   :  { %v3933_v12 = vadd.f32 %v3932_v6, %v3931_v40  ;;  %v3934_v9 = vpop.f32.mrb[154].mxu1  ;;  %v3823_v21 = vpop.f32.mrb[155].mxu0 }
 0x261   :  { %2991 = vst [vmem:[#allocation8 + $0x58] sm:$0xff] %v2959_v46  ;;  %v2709_v3 = vadd.f32 %v3821_v26, %v4680_v35  ;;  %v3824_v15 = vadd.f32 %v3823_v21, %v3822_v18  ;;  %v3935_v36 = vpop.f32.mrb[155].mxu1 }
 0x262   :  { %v3936_v23 = vadd.f32 %v3935_v36, %v3934_v9 }
 0x263   :  { %v2870_v5 = vadd.f32 %v3933_v12, %v2709_v3  ;;  %v2712_v63 = vadd.f32 %v3824_v15, %v4683_v31 }
 0x265   :  { %v2960_v38 = vmax.f32 %v2870_v5, 0.0  ;;  %v2873_v2 = vadd.f32 %v3936_v23, %v2712_v63  ;;  %v3825_v4 = vpop.f32.mrb[156].mxu0 }
 0x266   :  { %v3937_v50 = vpop.f32.mrb[156].mxu1  ;;  %v3826_v55 = vpop.f32.mrb[157].mxu0 }
 0x267   :  { %2992 = vst [vmem:[#allocation8 + $0x60] sm:$0xff] %v2960_v38  ;;  %v2961_v61 = vmax.f32 %v2873_v2, 0.0  ;;  %v3827_v7 = vadd.f32 %v3826_v55, %v3825_v4  ;;  %v3938_v52 = vpop.f32.mrb[157].mxu1  ;;  %v3828_v41 = vpop.f32.mrb[158].mxu0 }
 0x268   :  { %v3939_v17 = vadd.f32 %v3938_v52, %v3937_v50  ;;  %v3940_v0 = vpop.f32.mrb[158].mxu1  ;;  %v3829_v16 = vpop.f32.mrb[159].mxu0 }
 0x269   :  { %2993 = vst [vmem:[#allocation8 + $0x68] sm:$0xff] %v2961_v61  ;;  %v2717_v35 = vadd.f32 %v3827_v7, %v4686_v10  ;;  %v3830_v56 = vadd.f32 %v3829_v16, %v3828_v41  ;;  %v3941_v42 = vpop.f32.mrb[159].mxu1 }
 0x26a   :  { %v3942_v45 = vadd.f32 %v3941_v42, %v3940_v0 }
 0x26b   :  { %v2878_v31 = vadd.f32 %v3939_v17, %v2717_v35  ;;  %v2720_v47 = vadd.f32 %v3830_v56, %v4689_v1 }
 0x26d   :  { %v2962_v44 = vmax.f32 %v2878_v31, 0.0  ;;  %v2881_v60 = vadd.f32 %v3942_v45, %v2720_v47  ;;  %v3831_v49 = vpop.f32.mrb[160].mxu0 }
 0x26e   :  { %v3943_v11 = vpop.f32.mrb[160].mxu1  ;;  %v3832_v39 = vpop.f32.mrb[161].mxu0 }
 0x26f   :  { %2994 = vst [vmem:[#allocation8 + $0x70] sm:$0xff] %v2962_v44  ;;  %v2963_v62 = vmax.f32 %v2881_v60, 0.0  ;;  %v3833_v30 = vadd.f32 %v3832_v39, %v3831_v49  ;;  %v3944_v13 = vpop.f32.mrb[161].mxu1  ;;  %v3834_v43 = vpop.f32.mrb[162].mxu0 }
 0x270   :  { %v3945_v32 = vadd.f32 %v3944_v13, %v3943_v11  ;;  %v3946_v33 = vpop.f32.mrb[162].mxu1  ;;  %v3835_v24 = vpop.f32.mrb[163].mxu0 }
 0x271   :  { %2995 = vst [vmem:[#allocation8 + $0x78] sm:$0xff] %v2963_v62  ;;  %v2725_v10 = vadd.f32 %v3833_v30, %v4692_v27  ;;  %v3836_v14 = vadd.f32 %v3835_v24, %v3834_v43  ;;  %v3947_v40 = vpop.f32.mrb[163].mxu1 }
 0x272   :  { %v3948_v37 = vadd.f32 %v3947_v40, %v3946_v33 }
 0x273   :  { %v2886_v1 = vadd.f32 %v3945_v32, %v2725_v10  ;;  %v2728_v46 = vadd.f32 %v3836_v14, %v4695_v28 }
 0x275   :  { %v2964_v26 = vmax.f32 %v2886_v1, 0.0  ;;  %v2889_v6 = vadd.f32 %v3948_v37, %v2728_v46  ;;  %v3837_v18 = vpop.f32.mrb[164].mxu0 }
 0x276   :  { %v3949_v12 = vpop.f32.mrb[164].mxu1  ;;  %v3838_v9 = vpop.f32.mrb[165].mxu0 }
 0x277   :  { %2996 = vst [vmem:[#allocation8 + $0x80] sm:$0xff] %v2964_v26  ;;  %v2965_v21 = vmax.f32 %v2889_v6, 0.0  ;;  %v3839_v3 = vadd.f32 %v3838_v9, %v3837_v18  ;;  %v3950_v15 = vpop.f32.mrb[165].mxu1  ;;  %v3840_v36 = vpop.f32.mrb[166].mxu0 }
 0x278   :  { %v3951_v23 = vadd.f32 %v3950_v15, %v3949_v12  ;;  %v3952_v5 = vpop.f32.mrb[166].mxu1  ;;  %v3841_v63 = vpop.f32.mrb[167].mxu0 }
 0x279   :  { %2997 = vst [vmem:[#allocation8 + $0x88] sm:$0xff] %v2965_v21  ;;  %v2733_v27 = vadd.f32 %v3839_v3, %v4698_v59  ;;  %v3842_v38 = vadd.f32 %v3841_v63, %v3840_v36  ;;  %v3953_v2 = vpop.f32.mrb[167].mxu1 }
 0x27a   :  { %v3954_v4 = vadd.f32 %v3953_v2, %v3952_v5 }
 0x27b   :  { %v2894_v28 = vadd.f32 %v3951_v23, %v2733_v27  ;;  %v2736_v50 = vadd.f32 %v3842_v38, %v4701_v51 }
 0x27d   :  { %v2966_v55 = vmax.f32 %v2894_v28, 0.0  ;;  %v2897_v61 = vadd.f32 %v3954_v4, %v2736_v50  ;;  %v3843_v7 = vpop.f32.mrb[168].mxu0 }
 0x27e   :  { %v3955_v52 = vpop.f32.mrb[168].mxu1  ;;  %v3844_v41 = vpop.f32.mrb[169].mxu0 }
 0x27f   :  { %2998 = vst [vmem:[#allocation8 + $0x90] sm:$0xff] %v2966_v55  ;;  %v2967_v17 = vmax.f32 %v2897_v61, 0.0  ;;  %v3845_v0 = vadd.f32 %v3844_v41, %v3843_v7  ;;  %v3956_v16 = vpop.f32.mrb[169].mxu1  ;;  %v3846_v35 = vpop.f32.mrb[170].mxu0 }
 0x280   :  { %v3957_v56 = vadd.f32 %v3956_v16, %v3955_v52  ;;  %v3958_v42 = vpop.f32.mrb[170].mxu1  ;;  %v3847_v45 = vpop.f32.mrb[171].mxu0 }
 0x281   :  { %2999 = vst [vmem:[#allocation8 + $0x98] sm:$0xff] %v2967_v17  ;;  %v2741_v59 = vadd.f32 %v3845_v0, %v4704_v25  ;;  %v3848_v31 = vadd.f32 %v3847_v45, %v3846_v35  ;;  %v3959_v47 = vpop.f32.mrb[171].mxu1 }
 0x282   :  { %v3960_v44 = vadd.f32 %v3959_v47, %v3958_v42 }
 0x283   :  { %v2902_v51 = vadd.f32 %v3957_v56, %v2741_v59  ;;  %v2744_v60 = vadd.f32 %v3848_v31, %v4707_v54 }
 0x285   :  { %v2968_v49 = vmax.f32 %v2902_v51, 0.0  ;;  %v2905_v11 = vadd.f32 %v3960_v44, %v2744_v60  ;;  %v3849_v39 = vpop.f32.mrb[172].mxu0 }
 0x286   :  { %v3961_v62 = vpop.f32.mrb[172].mxu1  ;;  %v3850_v30 = vpop.f32.mrb[173].mxu0 }
 0x287   :  { %3000 = vst [vmem:[#allocation8 + $0xa0] sm:$0xff] %v2968_v49  ;;  %v2969_v13 = vmax.f32 %v2905_v11, 0.0  ;;  %v3851_v43 = vadd.f32 %v3850_v30, %v3849_v39  ;;  %v3962_v32 = vpop.f32.mrb[173].mxu1  ;;  %v3852_v33 = vpop.f32.mrb[174].mxu0 }
 0x288   :  { %v3963_v24 = vadd.f32 %v3962_v32, %v3961_v62  ;;  %v3964_v10 = vpop.f32.mrb[174].mxu1  ;;  %v3853_v14 = vpop.f32.mrb[175].mxu0 }
 0x289   :  { %3001 = vst [vmem:[#allocation8 + $0xa8] sm:$0xff] %v2969_v13  ;;  %v2749_v25 = vadd.f32 %v3851_v43, %v4710_v57  ;;  %v3854_v40 = vadd.f32 %v3853_v14, %v3852_v33  ;;  %v3965_v37 = vpop.f32.mrb[175].mxu1 }
 0x28a   :  { %v3966_v1 = vadd.f32 %v3965_v37, %v3964_v10 }
 0x28b   :  { %v2910_v54 = vadd.f32 %v3963_v24, %v2749_v25  ;;  %v2752_v46 = vadd.f32 %v3854_v40, %v4713_v58 }
 0x28d   :  { %v2970_v26 = vmax.f32 %v2910_v54, 0.0  ;;  %v2913_v6 = vadd.f32 %v3966_v1, %v2752_v46  ;;  %v3855_v18 = vpop.f32.mrb[176].mxu0 }
 0x28e   :  { %v3967_v12 = vpop.f32.mrb[176].mxu1  ;;  %v3856_v9 = vpop.f32.mrb[177].mxu0 }
 0x28f   :  { %3002 = vst [vmem:[#allocation8 + $0xb0] sm:$0xff] %v2970_v26  ;;  %v2971_v21 = vmax.f32 %v2913_v6, 0.0  ;;  %v3857_v3 = vadd.f32 %v3856_v9, %v3855_v18  ;;  %v3968_v15 = vpop.f32.mrb[177].mxu1  ;;  %v3858_v36 = vpop.f32.mrb[178].mxu0 }
 0x290   :  { %v3969_v23 = vadd.f32 %v3968_v15, %v3967_v12  ;;  %v3970_v5 = vpop.f32.mrb[178].mxu1  ;;  %v3859_v63 = vpop.f32.mrb[179].mxu0 }
 0x291   :  { %3003 = vst [vmem:[#allocation8 + $0xb8] sm:$0xff] %v2971_v21  ;;  %v2757_v57 = vadd.f32 %v3857_v3, %v4716_v22  ;;  %v3860_v27 = vadd.f32 %v3859_v63, %v3858_v36  ;;  %v3971_v38 = vpop.f32.mrb[179].mxu1 }
 0x292   :  { %v3972_v2 = vadd.f32 %v3971_v38, %v3970_v5 }
 0x293   :  { %v2918_v58 = vadd.f32 %v3969_v23, %v2757_v57  ;;  %v2760_v4 = vadd.f32 %v3860_v27, %v4719_v29 }
 0x295   :  { %v2972_v28 = vmax.f32 %v2918_v58, 0.0  ;;  %v2921_v50 = vadd.f32 %v3972_v2, %v2760_v4  ;;  %v3861_v55 = vpop.f32.mrb[180].mxu0 }
 0x296   :  { %v3973_v61 = vpop.f32.mrb[180].mxu1  ;;  %v3862_v7 = vpop.f32.mrb[181].mxu0 }
 0x297   :  { %3004 = vst [vmem:[#allocation8 + $0xc0] sm:$0xff] %v2972_v28  ;;  %v2973_v52 = vmax.f32 %v2921_v50, 0.0  ;;  %v3863_v41 = vadd.f32 %v3862_v7, %v3861_v55  ;;  %v3974_v17 = vpop.f32.mrb[181].mxu1  ;;  %v3864_v0 = vpop.f32.mrb[182].mxu0 }
 0x298   :  { %v3975_v16 = vadd.f32 %v3974_v17, %v3973_v61  ;;  %v3976_v35 = vpop.f32.mrb[182].mxu1  ;;  %v3865_v56 = vpop.f32.mrb[183].mxu0 }
 0x299   :  { %3005 = vst [vmem:[#allocation8 + $0xc8] sm:$0xff] %v2973_v52  ;;  %v2765_v22 = vadd.f32 %v3863_v41, %v4722_v53  ;;  %v3866_v42 = vadd.f32 %v3865_v56, %v3864_v0  ;;  %v3977_v45 = vpop.f32.mrb[183].mxu1 }
 0x29a   :  { %v3978_v59 = vadd.f32 %v3977_v45, %v3976_v35 }
 0x29b   :  { %v2926_v29 = vadd.f32 %v3975_v16, %v2765_v22  ;;  %v2768_v31 = vadd.f32 %v3866_v42, %v4725_v34 }
 0x29d   :  { %v2974_v47 = vmax.f32 %v2926_v29, 0.0  ;;  %v2929_v44 = vadd.f32 %v3978_v59, %v2768_v31  ;;  %v3867_v51 = vpop.f32.mrb[184].mxu0 }
 0x29e   :  { %v3979_v60 = vpop.f32.mrb[184].mxu1  ;;  %v3868_v49 = vpop.f32.mrb[185].mxu0 }
 0x29f   :  { %3006 = vst [vmem:[#allocation8 + $0xd0] sm:$0xff] %v2974_v47  ;;  %v2975_v11 = vmax.f32 %v2929_v44, 0.0  ;;  %v3869_v39 = vadd.f32 %v3868_v49, %v3867_v51  ;;  %v3980_v62 = vpop.f32.mrb[185].mxu1  ;;  %v3870_v30 = vpop.f32.mrb[186].mxu0 }
 0x2a0   :  { %v3981_v13 = vadd.f32 %v3980_v62, %v3979_v60  ;;  %v3982_v43 = vpop.f32.mrb[186].mxu1  ;;  %v3871_v32 = vpop.f32.mrb[187].mxu0 }
 0x2a1   :  { %3007 = vst [vmem:[#allocation8 + $0xd8] sm:$0xff] %v2975_v11  ;;  %v2773_v53 = vadd.f32 %v3869_v39, %v4728_v19  ;;  %v3872_v33 = vadd.f32 %v3871_v32, %v3870_v30  ;;  %v3983_v24 = vpop.f32.mrb[187].mxu1 }
 0x2a2   :  { %v3984_v10 = vadd.f32 %v3983_v24, %v3982_v43 }
 0x2a3   :  { %v2934_v34 = vadd.f32 %v3981_v13, %v2773_v53  ;;  %v2776_v14 = vadd.f32 %v3872_v33, %v4731_v20 }
 0x2a5   :  { %v2976_v25 = vmax.f32 %v2934_v34, 0.0  ;;  %v2937_v40 = vadd.f32 %v3984_v10, %v2776_v14  ;;  %v3873_v37 = vpop.f32.mrb[188].mxu0 }
 0x2a6   :  { %v3985_v1 = vpop.f32.mrb[188].mxu1  ;;  %v3874_v54 = vpop.f32.mrb[189].mxu0 }
 0x2a7   :  { %3008 = vst [vmem:[#allocation8 + $0xe0] sm:$0xff] %v2976_v25  ;;  %v2977_v46 = vmax.f32 %v2937_v40, 0.0  ;;  %v3875_v26 = vadd.f32 %v3874_v54, %v3873_v37  ;;  %v3986_v6 = vpop.f32.mrb[189].mxu1  ;;  %v3876_v18 = vpop.f32.mrb[190].mxu0 }
 0x2a8   :  { %v3987_v12 = vadd.f32 %v3986_v6, %v3985_v1  ;;  %v3988_v9 = vpop.f32.mrb[190].mxu1  ;;  %v3877_v21 = vpop.f32.mrb[191].mxu0 }
 0x2a9   :  { %3009 = vst [vmem:[#allocation8 + $0xe8] sm:$0xff] %v2977_v46  ;;  %v2781_v19 = vadd.f32 %v3875_v26, %v4734_v48  ;;  %v3878_v3 = vadd.f32 %v3877_v21, %v3876_v18  ;;  %v3989_v15 = vpop.f32.mrb[191].mxu1 }
 0x2aa   :  { %v3990_v36 = vadd.f32 %v3989_v15, %v3988_v9 }
 0x2ab   :  { %v2942_v20 = vadd.f32 %v3987_v12, %v2781_v19  ;;  %v2784_v23 = vadd.f32 %v3878_v3, %v4737_v8 }
 0x2ad   :  { %v2978_v5 = vmax.f32 %v2942_v20, 0.0  ;;  %v2945_v63 = vadd.f32 %v3990_v36, %v2784_v23 }
 0x2af   :  { %3010 = vst [vmem:[#allocation8 + $0xf0] sm:$0xff] %v2978_v5  ;;  %v2979_v57 = vmax.f32 %v2945_v63, 0.0 }
 0x2b1   :  { %3011 = vst [vmem:[#allocation8 + $0xf8] sm:$0xff] %v2979_v57 }
 0x2b2   :  { %4462 = shalt.err (!%p4459_p0)
}
 0x2b3   :  { %s4463_s28 = scalar_lea.hbm %s4786_s3, 4096 }
 0x2b4   :  { %p4464_p1 = scmp.ne.s32.totalorder %s4786_s3, %s4463_s28  ;;  %p4467_p2 = scmp.lt.u32.totalorder %s4463_s28, %s4786_s3 }
 0x2b6   :  { %p4469_p3 = pnand %p4467_p2, %p4464_p1 }
 0x2b8   :  { %4472 = shalt.err (!%p4469_p3)
}
 0x2b9   :  { %s4487_s6 = smov 128   ;;  %s4488_s7 = smov 8  }
 0x2ba   :  { %3023 = dma.vmem_to_hbm [thread:$0]  %s3018_s24, 4096, %s4786_s3, [#allocation4], %s4487_s6, %s4487_s6, %s4488_s7  }
 0x2bb   :  { %4477 = dma.done.wait [#allocation4], 4096  }
 0x2bc   :  { %4478 = vsyncadd [#allocation4], 4294963200 }
 0x2bd   :  { %3027 = vsyncpa [#allocation3], 1 }
 0x2be   :  { %3028 = vsyncpa [#allocation6], 1 }
 0x2bf   :  { %3029 = vsyncpa [#allocation4], 1 }

// kernel: scoring_forward.3
= control target key start
LH: loop header
LB: loop body
LE: loop exit
PB: predicated region body
PF: predicated region fallthrough
CT: control target
= control target key end

     0   :  { %s10263_s0 = inlined_call_operand.hbm [shape: f32[256,128], index: 0, kind: input, shape index: {}]   ;;  %s10264_s1 = inlined_call_operand.hbm [shape: f32[128,8], index: 1, kind: input, shape index: {}]   ;;  %s10265_s2 = inlined_call_operand.hbm [shape: s32[128,1], index: 2, kind: input, shape index: {}]   ;;  %s10266_s3 = inlined_call_operand.hbm [shape: s32[1,128], index: 3, kind: input, shape index: {}]   ;;  %s10267_s4 = inlined_call_operand.hbm [shape: f32[8,128], index: 4, kind: input, shape index: {}]   ;;  %s10268_s5 = inlined_call_operand.hbm [shape: f32[1,128], index: 5, kind: input, shape index: {}]   ;;  %s10269_s6 = inlined_call_operand.hbm [shape: f32[5,128,128], index: 6, kind: input, shape index: {}]   ;;  %s10270_s7 = inlined_call_operand.hbm [shape: f32[5,1,128], index: 7, kind: input, shape index: {}]   ;;  %s10271_s8 = inlined_call_operand.hbm [shape: f32[5,128,128], index: 8, kind: input, shape index: {}]   ;;  %s10272_s9 = inlined_call_operand.hbm [shape: f32[5,1,128], index: 9, kind: input, shape index: {}]   ;;  %s10273_s10 = inlined_call_operand.hbm [shape: f32[1,128], index: 10, kind: input, shape index: {}]   ;;  %s10274_s11 = inlined_call_operand.<no memory space> [shape: f32[1,1], index: 11, kind: input, shape index: {}]   ;;  %s10275_s12 = inlined_call_operand.hbm [shape: f32[1,256], index: 12, kind: output, shape index: {}]  }
   0x1   :  { %v17_v0 = vstv %s10274_s11 }
   0x2   :  { %18 = vst [vmem:[#allocation2] sm:$0x1] %v17_v0 }
   0x3   :  { %19 = vsyncpa [#allocation4], 0 }
   0x4   :  { %20 = vsyncpa [#allocation7], 0 }
   0x5   :  { %21 = vsyncpa [#allocation10], 0 }
   0x6   :  { %22 = vsyncpa [#allocation13], 0 }
   0x7   :  { %23 = vsyncpa [#allocation16], 0 }
   0x8   :  { %24 = vsyncpa [#allocation19], 0 }
   0x9   :  { %25 = vsyncpa [#allocation5], 0  ;;  %s7926_s23 = smov [#allocation6]   ;;  %s7927_s25 = smov [#allocation9]  }
   0xa   :  { %s43_s24 = sshll.u32 %s7926_s23, 4  ;;  %s68_s26 = sshll.u32 %s7927_s25, 4  ;;  %s44_s24 = int_to_ptr.vmem [resolvable:$true] %s43_s24  ;;  %s8013_s26 = int_to_ptr.vmem [resolvable:$true] %s68_s26 }
   0xb   :  { %s7648_s29 = scalar_lea.hbm %s10264_s1, 2048 }
   0xc   :  { %p7649_p0 = scmp.ne.s32.totalorder %s10264_s1, %s7648_s29  ;;  %p7652_p1 = scmp.lt.u32.totalorder %s7648_s29, %s10264_s1 }
   0xe   :  { %p7654_p2 = pnand %p7652_p1, %p7649_p0 }
  0x10   :  { %7657 = shalt.err (!%p7654_p2)
}
  0x11   :  { %s7658_s15 = scalar_lea.vmem %s44_s24, 2048  ;;  %p7663_p4 = scmp.lt.s32.totalorder %s44_s24, %s44_s24 }
  0x12   :  { %p7659_p3 = scmp.ne.s32.totalorder %s44_s24, %s7658_s15  ;;  %p7664_p5 = scmp.lt.s32.totalorder %s7658_s15, %s7658_s15 }
  0x14   :  { %p7665_p6 = por %p7664_p5, %p7663_p4 }
  0x16   :  { %p7666_p7 = pnand %p7665_p6, %p7659_p3 }
  0x18   :  { %7669 = shalt.err (!%p7666_p7)
}
  0x19   :  { %s7928_s16 = smov 128   ;;  %s7929_s17 = smov 8  }
  0x1a   :  { %49 = dma.hbm_to_vmem [thread:$0]  %s10264_s1, 2048, %s44_s24, [#allocation7], %s7928_s16, %s7928_s16, %s7929_s17  }
  0x1b   :  { %s7670_s22 = scalar_lea.hbm %s10266_s3, 16 }
  0x1c   :  { %p7671_p8 = scmp.ne.s32.totalorder %s10266_s3, %s7670_s22  ;;  %p7674_p9 = scmp.lt.u32.totalorder %s7670_s22, %s10266_s3 }
  0x1e   :  { %p7676_p10 = pnand %p7674_p9, %p7671_p8 }
  0x20   :  { %7679 = shalt.err (!%p7676_p10)
}
  0x21   :  { %s7680_s29 = scalar_lea.vmem %s8013_s26, 16  ;;  %s7684_s1 = scalar_lea.vmem %s8013_s26, 32 }
  0x22   :  { %p7681_p11 = scmp.ne.s32.totalorder %s8013_s26, %s7680_s29  ;;  %p7685_p12 = scmp.lt.s32.totalorder %s8013_s26, %s8013_s26 }
  0x23   :  { %p7686_p13 = scmp.lt.s32.totalorder %s7684_s1, %s7680_s29 }
  0x25   :  { %p7687_p0 = por %p7686_p13, %p7685_p12 }
  0x27   :  { %p7688_p1 = pnand %p7687_p0, %p7681_p11 }
  0x29   :  { %7691 = shalt.err (!%p7688_p1)
}
  0x2a   :  { %71 = dma.hbm_to_vmem [thread:$0]  %s10266_s3, 16, %s8013_s26, [#allocation10]  }
  0x2b   :  { %s7930_s30 = smov [#allocation12]   ;;  %s7931_s14 = smov [#allocation15]  }
  0x2c   :  { %s88_s13 = sshll.u32 %s7930_s30, 4  ;;  %s109_s15 = sshll.u32 %s7931_s14, 4  ;;  %s89_s13 = int_to_ptr.vmem [resolvable:$true] %s88_s13  ;;  %s8048_s15 = int_to_ptr.vmem [resolvable:$true] %s109_s15 }
  0x2d   :  { %s7692_s20 = scalar_lea.hbm %s10268_s5, 16 }
  0x2e   :  { %p7693_p2 = scmp.ne.s32.totalorder %s10268_s5, %s7692_s20  ;;  %p7696_p3 = scmp.lt.u32.totalorder %s7692_s20, %s10268_s5 }
  0x30   :  { %p7698_p4 = pnand %p7696_p3, %p7693_p2 }
  0x32   :  { %7701 = shalt.err (!%p7698_p4)
}
  0x33   :  { %s7702_s3 = scalar_lea.vmem %s89_s13, 16  ;;  %s7706_s26 = scalar_lea.vmem %s89_s13, 32 }
  0x34   :  { %p7703_p5 = scmp.ne.s32.totalorder %s89_s13, %s7702_s3  ;;  %p7707_p6 = scmp.lt.s32.totalorder %s89_s13, %s89_s13 }
  0x35   :  { %p7708_p7 = scmp.lt.s32.totalorder %s7706_s26, %s7702_s3 }
  0x37   :  { %p7709_p8 = por %p7708_p7, %p7707_p6 }
  0x39   :  { %p7710_p9 = pnand %p7709_p8, %p7703_p5 }
  0x3b   :  { %7713 = shalt.err (!%p7710_p9)
}
  0x3c   :  { %91 = dma.hbm_to_vmem [thread:$0]  %s10268_s5, 16, %s89_s13, [#allocation13]  }
  0x3d   :  { %s7714_s24 = scalar_lea.hbm %s10270_s7, 80 }
  0x3e   :  { %p7715_p10 = scmp.ne.s32.totalorder %s10270_s7, %s7714_s24  ;;  %p7718_p11 = scmp.lt.u32.totalorder %s7714_s24, %s10270_s7 }
  0x40   :  { %p7720_p12 = pnand %p7718_p11, %p7715_p10 }
  0x42   :  { %7723 = shalt.err (!%p7720_p12)
}
  0x43   :  { %s7724_s19 = scalar_lea.vmem %s8048_s15, 80  ;;  %s7728_s5 = scalar_lea.vmem %s8048_s15, 96 }
  0x44   :  { %p7725_p13 = scmp.ne.s32.totalorder %s8048_s15, %s7724_s19  ;;  %p7729_p0 = scmp.lt.s32.totalorder %s8048_s15, %s8048_s15 }
  0x45   :  { %p7730_p1 = scmp.lt.s32.totalorder %s7728_s5, %s7724_s19 }
  0x47   :  { %p7731_p2 = por %p7730_p1, %p7729_p0 }
  0x49   :  { %p7732_p3 = pnand %p7731_p2, %p7725_p13 }
  0x4b   :  { %7735 = shalt.err (!%p7732_p3)
}
  0x4c   :  { %s7932_s13 = smov 16   ;;  %s7933_s20 = smov 1  }
  0x4d   :  { %115 = dma.hbm_to_vmem [thread:$0]  %s10270_s7, 80, %s8048_s15, [#allocation16], %s7932_s13, %s7932_s13, %s7933_s20  }
  0x4e   :  { %s7934_s23 = smov [#allocation18]   ;;  %s7935_s3 = smov [#allocation3]  }
  0x4f   :  { %s133_s25 = sshll.u32 %s7934_s23, 4  ;;  %s31_s26 = sshll.u32 %s7935_s3, 4  ;;  %s134_s25 = int_to_ptr.vmem [resolvable:$true] %s133_s25  ;;  %s8080_s26 = int_to_ptr.vmem [resolvable:$true] %s31_s26 }
  0x50   :  { %s7736_s29 = scalar_lea.hbm %s10272_s9, 80 }
  0x51   :  { %p7737_p4 = scmp.ne.s32.totalorder %s10272_s9, %s7736_s29  ;;  %p7740_p5 = scmp.lt.u32.totalorder %s7736_s29, %s10272_s9 }
  0x53   :  { %p7742_p6 = pnand %p7740_p5, %p7737_p4 }
  0x55   :  { %7745 = shalt.err (!%p7742_p6)
}
  0x56   :  { %s7746_s7 = scalar_lea.vmem %s134_s25, 80  ;;  %s7750_s15 = scalar_lea.vmem %s134_s25, 96 }
  0x57   :  { %p7747_p7 = scmp.ne.s32.totalorder %s134_s25, %s7746_s7  ;;  %p7751_p8 = scmp.lt.s32.totalorder %s134_s25, %s134_s25 }
  0x58   :  { %p7752_p9 = scmp.lt.s32.totalorder %s7750_s15, %s7746_s7 }
  0x5a   :  { %p7753_p10 = por %p7752_p9, %p7751_p8 }
  0x5c   :  { %p7754_p11 = pnand %p7753_p10, %p7747_p7 }
  0x5e   :  { %7757 = shalt.err (!%p7754_p11)
}
  0x5f   :  { %139 = dma.hbm_to_vmem [thread:$0]  %s10272_s9, 80, %s134_s25, [#allocation19], %s7932_s13, %s7932_s13, %s7933_s20  }
  0x60   :  { %s7758_s21 = scalar_lea.hbm %s10263_s0, 4096 }
  0x61   :  { %p7759_p12 = scmp.ne.s32.totalorder %s10263_s0, %s7758_s21  ;;  %p7762_p13 = scmp.lt.u32.totalorder %s7758_s21, %s10263_s0 }
  0x63   :  { %p7764_p0 = pnand %p7762_p13, %p7759_p12 }
  0x65   :  { %7767 = shalt.err (!%p7764_p0)
}
  0x66   :  { %s7768_s28 = scalar_lea.vmem %s8080_s26, 4096  ;;  %p7773_p2 = scmp.lt.s32.totalorder %s8080_s26, %s8080_s26 }
  0x67   :  { %p7769_p1 = scmp.ne.s32.totalorder %s8080_s26, %s7768_s28  ;;  %p7774_p3 = scmp.lt.s32.totalorder %s7768_s28, %s7768_s28 }
  0x69   :  { %p7775_p4 = por %p7774_p3, %p7773_p2 }
  0x6b   :  { %p7776_p5 = pnand %p7775_p4, %p7769_p1 }
  0x6d   :  { %7779 = shalt.err (!%p7776_p5)
}
  0x6e   :  { %37 = dma.hbm_to_vmem [thread:$0]  %s10263_s0, 4096, %s8080_s26, [#allocation4], %s7928_s16, %s7928_s16, %s7929_s17  }
  0x6f   :  { %s7936_s20 = smov [#allocation8]   ;;  %s7937_s29 = smov [#allocation11]  }
  0x70   :  { %s55_s25 = sshll.u32 %s7936_s20, 4  ;;  %s78_s1 = sshll.u32 %s7937_s29, 4  ;;  %s56_s25 = int_to_ptr.vmem [resolvable:$true] %s55_s25  ;;  %s79_s1 = int_to_ptr.vmem [resolvable:$true] %s78_s1 }
  0x71   :  { %s7780_s30 = scalar_lea.hbm %s10265_s2, 2048 }
  0x72   :  { %p7781_p6 = scmp.ne.s32.totalorder %s10265_s2, %s7780_s30  ;;  %p7784_p7 = scmp.lt.u32.totalorder %s7780_s30, %s10265_s2 }
  0x74   :  { %p7786_p8 = pnand %p7784_p7, %p7781_p6 }
  0x76   :  { %7789 = shalt.err (!%p7786_p8)
}
  0x77   :  { %s7790_s0 = scalar_lea.vmem %s56_s25, 2048  ;;  %p7795_p10 = scmp.lt.s32.totalorder %s56_s25, %s56_s25 }
  0x78   :  { %p7791_p9 = scmp.ne.s32.totalorder %s56_s25, %s7790_s0  ;;  %p7796_p11 = scmp.lt.s32.totalorder %s7790_s0, %s7790_s0 }
  0x7a   :  { %p7797_p12 = por %p7796_p11, %p7795_p10 }
  0x7c   :  { %p7798_p13 = pnand %p7797_p12, %p7791_p9 }
  0x7e   :  { %7801 = shalt.err (!%p7798_p13)
}
  0x7f   :  { %61 = dma.hbm_to_vmem [thread:$0]  %s10265_s2, 2048, %s56_s25, [#allocation7], %s7928_s16, %s7928_s16, %s7929_s17  }
  0x80   :  { %s7802_s22 = scalar_lea.hbm %s10267_s4, 128 }
  0x81   :  { %p7803_p0 = scmp.ne.s32.totalorder %s10267_s4, %s7802_s22  ;;  %p7806_p1 = scmp.lt.u32.totalorder %s7802_s22, %s10267_s4 }
  0x83   :  { %p7808_p2 = pnand %p7806_p1, %p7803_p0 }
  0x85   :  { %7811 = shalt.err (!%p7808_p2)
}
  0x86   :  { %s7812_s9 = scalar_lea.vmem %s79_s1, 128  ;;  %p7817_p4 = scmp.lt.s32.totalorder %s79_s1, %s79_s1 }
  0x87   :  { %p7813_p3 = scmp.ne.s32.totalorder %s79_s1, %s7812_s9  ;;  %p7818_p5 = scmp.lt.s32.totalorder %s7812_s9, %s7812_s9 }
  0x89   :  { %p7819_p6 = por %p7818_p5, %p7817_p4 }
  0x8b   :  { %p7820_p7 = pnand %p7819_p6, %p7813_p3 }
  0x8d   :  { %7823 = shalt.err (!%p7820_p7)
}
  0x8e   :  { %81 = dma.hbm_to_vmem [thread:$0]  %s10267_s4, 128, %s79_s1, [#allocation10]  }
  0x8f   :  { %s7938_s20 = smov [#allocation14]   ;;  %s7939_s29 = smov [#allocation17]  }
  0x90   :  { %s97_s25 = sshll.u32 %s7938_s20, 4  ;;  %s121_s24 = sshll.u32 %s7939_s29, 4  ;;  %s98_s25 = int_to_ptr.vmem [resolvable:$true] %s97_s25  ;;  %s8141_s24 = int_to_ptr.vmem [resolvable:$true] %s121_s24 }
  0x91   :  { %s7824_s7 = scalar_lea.hbm %s10269_s6, 10240 }
  0x92   :  { %p7825_p8 = scmp.ne.s32.totalorder %s10269_s6, %s7824_s7  ;;  %p7828_p9 = scmp.lt.u32.totalorder %s7824_s7, %s10269_s6 }
  0x94   :  { %p7830_p10 = pnand %p7828_p9, %p7825_p8 }
  0x96   :  { %7833 = shalt.err (!%p7830_p10)
}
  0x97   :  { %s7834_s4 = scalar_lea.vmem %s98_s25, 10240  ;;  %p7839_p12 = scmp.lt.s32.totalorder %s98_s25, %s98_s25 }
  0x98   :  { %p7835_p11 = scmp.ne.s32.totalorder %s98_s25, %s7834_s4  ;;  %p7840_p13 = scmp.lt.s32.totalorder %s7834_s4, %s7834_s4 }
  0x9a   :  { %p7841_p0 = por %p7840_p13, %p7839_p12 }
  0x9c   :  { %p7842_p1 = pnand %p7841_p0, %p7835_p11 }
  0x9e   :  { %7845 = shalt.err (!%p7842_p1)
}
  0x9f   :  { %103 = dma.hbm_to_vmem [thread:$0]  %s10269_s6, 10240, %s98_s25, [#allocation13], %s7928_s16, %s7928_s16, %s7929_s17  }
  0xa0   :  { %s7846_s21 = scalar_lea.hbm %s10271_s8, 10240 }
  0xa1   :  { %p7847_p2 = scmp.ne.s32.totalorder %s10271_s8, %s7846_s21  ;;  %p7850_p3 = scmp.lt.u32.totalorder %s7846_s21, %s10271_s8 }
  0xa3   :  { %p7852_p4 = pnand %p7850_p3, %p7847_p2 }
  0xa5   :  { %7855 = shalt.err (!%p7852_p4)
}
  0xa6   :  { %s7856_s28 = scalar_lea.vmem %s8141_s24, 10240  ;;  %p7861_p6 = scmp.lt.s32.totalorder %s8141_s24, %s8141_s24 }
  0xa7   :  { %p7857_p5 = scmp.ne.s32.totalorder %s8141_s24, %s7856_s28  ;;  %p7862_p7 = scmp.lt.s32.totalorder %s7856_s28, %s7856_s28 }
  0xa9   :  { %p7863_p8 = por %p7862_p7, %p7861_p6 }
  0xab   :  { %p7864_p9 = pnand %p7863_p8, %p7857_p5 }
  0xad   :  { %7867 = shalt.err (!%p7864_p9)
}
  0xae   :  { %127 = dma.hbm_to_vmem [thread:$0]  %s10271_s8, 10240, %s8141_s24, [#allocation16], %s7928_s16, %s7928_s16, %s7929_s17  }
  0xaf   :  { %s7940_s2 = smov [#allocation20]   ;;  %s7868_s29 = scalar_lea.hbm %s10273_s10, 16 }
  0xb0   :  { %s146_s13 = sshll.u32 %s7940_s2, 4  ;;  %p7869_p10 = scmp.ne.s32.totalorder %s10273_s10, %s7868_s29  ;;  %s147_s13 = int_to_ptr.vmem [resolvable:$true] %s146_s13 }
  0xb1   :  { %p7872_p11 = scmp.lt.u32.totalorder %s7868_s29, %s10273_s10 }
  0xb3   :  { %p7874_p12 = pnand %p7872_p11, %p7869_p10 }
  0xb5   :  { %7877 = shalt.err (!%p7874_p12)
}
  0xb6   :  { %s7878_s14 = scalar_lea.vmem %s147_s13, 16  ;;  %s7882_s8 = scalar_lea.vmem %s147_s13, 32 }
  0xb7   :  { %p7879_p13 = scmp.ne.s32.totalorder %s147_s13, %s7878_s14  ;;  %p7883_p0 = scmp.lt.s32.totalorder %s147_s13, %s147_s13 }
  0xb8   :  { %p7884_p1 = scmp.lt.s32.totalorder %s7882_s8, %s7878_s14 }
  0xba   :  { %p7885_p2 = por %p7884_p1, %p7883_p0 }
  0xbc   :  { %p7886_p3 = pnand %p7885_p2, %p7879_p13 }
  0xbe   :  { %7889 = shalt.err (!%p7886_p3)
}
  0xbf   :  { %149 = dma.hbm_to_vmem [thread:$0]  %s10273_s10, 16, %s147_s13, [#allocation19]  }
  0xc0   :  { %7912 = dma.done.wait [#allocation4], 4096  }
  0xc1   :  { %7913 = vsyncadd [#allocation4], 4294963200 }
  0xc2   :  { %7914 = dma.done.wait [#allocation7], 4096  }
  0xc3   :  { %7915 = vsyncadd [#allocation7], 4294963200 }
  0xc4   :  { %7916 = dma.done.wait [#allocation10], 144  }
  0xc5   :  { %7917 = vsyncadd [#allocation10], 4294967152 }
  0xc6   :  { %7918 = dma.done.wait [#allocation13], 10256  }
  0xc7   :  { %7919 = vsyncadd [#allocation13], 4294957040 }
  0xc8   :  { %7920 = dma.done.wait [#allocation16], 10320  }
  0xc9   :  { %7921 = vsyncadd [#allocation16], 4294956976 }
  0xca   :  { %7922 = dma.done.wait [#allocation19], 96  }
  0xcb   :  { %7923 = vsyncadd [#allocation19], 4294967200  ;;  %v7941_v1 = vmov 0   ;;  %v457_v2 = vld [vmem:[#allocation8 + $0x10] sm:$0xff]  ;;  %v455_v3 = vld [vmem:[#allocation8] sm:$0xff]  ;;  %vm242_vm0 = vcmask 64512  }
  0xcc   :  { %7607 = vset.pattern.permute.xlu1 %v7941_v1  ;;  %7606 = vset.pattern.permute.xlu0 %v7941_v1  ;;  %v458_v4 = vld [vmem:[#allocation8 + $0x18] sm:$0xff]  ;;  %v456_v5 = vld [vmem:[#allocation8 + $0x8] sm:$0xff]  ;;  %v459_v7 = vld [vmem:[#allocation8 + $0x20] sm:$0xff]  ;;  %s7944_s10 = smov [#allocation21]  }
  0xcd   :  { %478 = vperm.xlu1 %7607, %v457_v2   ;;  %472 = vperm.xlu0 %7606, %v455_v3   ;;  %v460_v6 = vld [vmem:[#allocation8 + $0x28] sm:$0xff]  ;;  %v202_v8 = vld [vmem:[#allocation3 + $0x80] sm:$0xff]  ;;  %v204_v14 = vld [vmem:[#allocation3 + $0x90] sm:$0xff]  ;;  %s4970_s24 = sshll.u32 %s7944_s10, 4  ;;  %s4971_s24 = int_to_ptr.vmem [resolvable:$true] %s4970_s24 }
  0xce   :  { %v203_v9 = vld [vmem:[#allocation3 + $0x88] sm:$0xff]  ;;  %v186_v10 = vld [vmem:[#allocation3] sm:$0xff]  ;;  %v205_v15 = vld [vmem:[#allocation3 + $0x98] sm:$0xff]  ;;  %s7890_s18 = scalar_lea.vmem %s4971_s24, 32  ;;  %p7895_p5 = scmp.lt.s32.totalorder %s4971_s24, %s4971_s24 }
  0xcf   :  { %v187_v11 = vld [vmem:[#allocation3 + $0x8] sm:$0xff]  ;;  %v789_v12 = vpack.c.bf16 %v203_v9, %v202_v8  ;;  %v790_v16 = vpack.c.bf16 %v205_v15, %v204_v14  ;;  %v188_v17 = vld [vmem:[#allocation3 + $0x10] sm:$0xff]  ;;  %v189_v18 = vld [vmem:[#allocation3 + $0x18] sm:$0xff]  ;;  %p7891_p4 = scmp.ne.s32.totalorder %s4971_s24, %s7890_s18  ;;  %p7896_p6 = scmp.lt.s32.totalorder %s7890_s18, %s7890_s18 }
  0xd0   :  { %v781_v13 = vpack.c.bf16 %v187_v11, %v186_v10  ;;  %v206_v19 = vld [vmem:[#allocation3 + $0xa0] sm:$0xff]  ;;  %v207_v20 = vld [vmem:[#allocation3 + $0xa8] sm:$0xff]  ;;  %v462_v21 = vld [vmem:[#allocation8 + $0x38] sm:$0xff]  ;;  %v782_v23 = vpack.c.bf16 %v189_v18, %v188_v17 }
  0xd1   :  { %481 = vperm.xlu1 %7607, %v458_v4   ;;  %475 = vperm.xlu0 %7606, %v456_v5   ;;  %v461_v22 = vld [vmem:[#allocation8 + $0x30] sm:$0xff]  ;;  %v791_v24 = vpack.c.bf16 %v207_v20, %v206_v19  ;;  %v190_v25 = vld [vmem:[#allocation3 + $0x20] sm:$0xff]  ;;  %v191_v26 = vld [vmem:[#allocation3 + $0x28] sm:$0xff]  ;;  %p7897_p7 = por %p7896_p6, %p7895_p5 }
  0xd2   :  { %5415 = vmatprep.subr.bf16.mxu1 %v789_v12  ;;  %v208_v27 = vld [vmem:[#allocation3 + $0xb0] sm:$0xff]  ;;  %v209_v28 = vld [vmem:[#allocation3 + $0xb8] sm:$0xff]  ;;  %v464_v29 = vld [vmem:[#allocation8 + $0x48] sm:$0xff]  ;;  %v783_v31 = vpack.c.bf16 %v191_v26, %v190_v25 }
  0xd3   :  { %5416 = vmatpush3.bf16.msra.mxu1 %v781_v13  ;;  %v463_v30 = vld [vmem:[#allocation8 + $0x40] sm:$0xff]  ;;  %v192_v32 = vld [vmem:[#allocation3 + $0x30] sm:$0xff]  ;;  %v792_v34 = vpack.c.bf16 %v209_v28, %v208_v27  ;;  %v193_v35 = vld [vmem:[#allocation3 + $0x38] sm:$0xff]  ;;  %p7898_p8 = pnand %p7897_p7, %p7891_p4 }
  0xd4   :  { %5417 = vmatprep.subr.bf16.mxu1 %v790_v16  ;;  %v234_v33 = vld [vmem:[#allocation11] sm:$0xff]  ;;  %v220_v40 = vld [vmem:[#allocation6 + $0x10] sm:$0xff]  ;;  %v466_v41 = vld [vmem:[#allocation8 + $0x58] sm:$0xff]  ;;  %v784_v43 = vpack.c.bf16 %v193_v35, %v192_v32 }
  0xd5   :  { %487 = vperm.xlu1 %7607, %v460_v6   ;;  %484 = vperm.xlu0 %7606, %v459_v7   ;;  %v210_v36 = vld [vmem:[#allocation3 + $0xc0] sm:$0xff]  ;;  %v211_v38 = vld [vmem:[#allocation3 + $0xc8] sm:$0xff]  ;;  %v465_v42 = vld [vmem:[#allocation8 + $0x50] sm:$0xff] }
  0xd6   :  { %6289 = vmatprep.subr.mxu0 %v234_v33  ;;  %v218_v37 = vld [vmem:[#allocation6] sm:$0xff]  ;;  %v219_v39 = vld [vmem:[#allocation6 + $0x8] sm:$0xff]  ;;  %v793_v44 = vpack.c.bf16 %v211_v38, %v210_v36  ;;  %v221_v47 = vld [vmem:[#allocation6 + $0x18] sm:$0xff]  ;;  %v10314_v38 = vlaneseq }
  0xd7   :  { %5418 = vmatpush3.bf16.msra.mxu1 %v782_v23  ;;  %6290 = vmatpush3.msra.mxu0 %v234_v33  ;;  %v194_v45 = vld [vmem:[#allocation3 + $0x40] sm:$0xff]  ;;  %v195_v46 = vld [vmem:[#allocation3 + $0x48] sm:$0xff]  ;;  %v212_v48 = vld [vmem:[#allocation3 + $0xd0] sm:$0xff] }
  0xd8   :  { %5419 = vmatprep.subr.bf16.mxu1 %v791_v24  ;;  %6291 = vmatprep.mubr.msk.f32.mxu0 %vm242_vm0, %v218_v37  ;;  %v213_v49 = vld [vmem:[#allocation3 + $0xd8] sm:$0xff]  ;;  %v468_v50 = vld [vmem:[#allocation8 + $0x68] sm:$0xff]  ;;  %v467_v51 = vld [vmem:[#allocation8 + $0x60] sm:$0xff]  ;;  %v785_v52 = vpack.c.bf16 %v195_v46, %v194_v45  ;;  %v10447_v45 = vmov 0  ;;  %v10450_v46 = vmov 0 }
  0xd9   :  { %493 = vperm.xlu1 %7607, %v462_v21   ;;  %490 = vperm.xlu0 %7606, %v461_v22   ;;  %v222_v53 = vld [vmem:[#allocation6 + $0x20] sm:$0xff]  ;;  %v794_v54 = vpack.c.bf16 %v213_v49, %v212_v48  ;;  %v196_v55 = vld [vmem:[#allocation3 + $0x50] sm:$0xff]  ;;  %v197_v56 = vld [vmem:[#allocation3 + $0x58] sm:$0xff]  ;;  %v10315_v48 = vmov 1.0|1.0  }
  0xda   :  { %6292 = vmatmul.mubr.msk.f32.vlgmr.msra.gmra.mrb[0].mxu0 %vm242_vm0, %v219_v39  ;;  %v223_v57 = vld [vmem:[#allocation6 + $0x28] sm:$0xff]  ;;  %v214_v58 = vld [vmem:[#allocation3 + $0xe0] sm:$0xff]  ;;  %v470_v60 = vld [vmem:[#allocation8 + $0x78] sm:$0xff]  ;;  %v786_v62 = vpack.c.bf16 %v197_v56, %v196_v55  ;;  %v8207_v39 = vand.u32 127, %v10314_v38  ;;  %v10461_v55 = vmov 0  ;;  %v10464_v56 = vmov 0 }
  0xdb   :  { %5420 = vmatpush3.bf16.msra.mxu1 %v783_v31  ;;  %6294 = vmatprep.mubr.msk.f32.mxu0 %vm242_vm0, %v220_v40  ;;  %v215_v59 = vld [vmem:[#allocation3 + $0xe8] sm:$0xff]  ;;  %v469_v61 = vld [vmem:[#allocation8 + $0x70] sm:$0xff]  ;;  %v198_v0 = vld [vmem:[#allocation3 + $0x60] sm:$0xff] }
  0xdc   :  { %5421 = vmatprep.subr.bf16.mxu1 %v792_v34  ;;  %v795_v63 = vpack.c.bf16 %v215_v59, %v214_v58  ;;  %v199_v1 = vld [vmem:[#allocation3 + $0x68] sm:$0xff]  ;;  %v216_v2 = vld [vmem:[#allocation3 + $0xf0] sm:$0xff]  ;;  %v217_v3 = vld [vmem:[#allocation3 + $0xf8] sm:$0xff]  ;;  %v10467_v59 = vmov 0 }
  0xdd   :  { %499 = vperm.xlu1 %7607, %v464_v29   ;;  %496 = vperm.xlu0 %7606, %v463_v30   ;;  %v4848_v4 = vld [vmem:[#allocation2] sm:$0x1]  ;;  %v787_v5 = vpack.c.bf16 %v199_v1, %v198_v0  ;;  %v224_v6 = vld [vmem:[#allocation6 + $0x30] sm:$0xff]  ;;  %v796_v8 = vpack.c.bf16 %v217_v3, %v216_v2  ;;  %v226_v12 = vld [vmem:[#allocation6 + $0x40] sm:$0xff]  ;;  %v10476_v0 = vmov 0  ;;  %v10479_v3 = vmov 0 }
  0xde   :  { %6295 = vmatmul.mubr.msk.f32.gmra.mrb[2].mxu0 %vm242_vm0, %v221_v47  ;;  %v225_v7 = vld [vmem:[#allocation6 + $0x38] sm:$0xff]  ;;  %v200_v9 = vld [vmem:[#allocation3 + $0x70] sm:$0xff]  ;;  %v227_v13 = vld [vmem:[#allocation6 + $0x48] sm:$0xff]  ;;  %v10453_v47 = vmov 0 }
  0xdf   :  { %5422 = vmatpush3.bf16.msra.mxu1 %v784_v43  ;;  %6297 = vmatprep.mubr.msk.f32.mxu0 %vm242_vm0, %v222_v53  ;;  %v201_v10 = vld [vmem:[#allocation3 + $0x78] sm:$0xff]  ;;  %v228_v14 = vld [vmem:[#allocation6 + $0x50] sm:$0xff]  ;;  %v230_v16 = vld [vmem:[#allocation6 + $0x60] sm:$0xff] }
  0xe0   :  { %5423 = vmatprep.subr.bf16.mxu1 %v793_v44  ;;  %v788_v11 = vpack.c.bf16 %v201_v10, %v200_v9  ;;  %v229_v15 = vld [vmem:[#allocation6 + $0x58] sm:$0xff]  ;;  %v231_v17 = vld [vmem:[#allocation6 + $0x68] sm:$0xff]  ;;  %v232_v18 = vld [vmem:[#allocation6 + $0x70] sm:$0xff]  ;;  %v10491_v9 = vmov 0 }
  0xe1   :  { %505 = vperm.xlu1 %7607, %v466_v41   ;;  %502 = vperm.xlu0 %7606, %v465_v42   ;;  %v233_v19 = vld [vmem:[#allocation6 + $0x78] sm:$0xff]  ;;  %v894_v20 = vld [vmem:[#allocation14] sm:$0xff]  ;;  %v897_v24 = vld [vmem:[#allocation14 + $0x18] sm:$0xff]  ;;  %v8210_v42 = vadd.s32 128, %v8207_v39 }
  0xe2   :  { %6298 = vmatmul.mubr.msk.f32.gmra.mrb[4].mxu0 %vm242_vm0, %v223_v57  ;;  %v895_v21 = vld [vmem:[#allocation14 + $0x8] sm:$0xff]  ;;  %v896_v22 = vld [vmem:[#allocation14 + $0x10] sm:$0xff]  ;;  %v898_v26 = vld [vmem:[#allocation14 + $0x20] sm:$0xff] }
  0xe3   :  { %5424 = vmatpush3.bf16.msra.mxu1 %v785_v52  ;;  %6300 = vmatprep.mubr.msk.f32.mxu0 %vm242_vm0, %v224_v6  ;;  %v7235_v23 = vpack.c.bf16 %v895_v21, %v894_v20  ;;  %v7239_v25 = vpack.c.bf16 %v897_v24, %v896_v22  ;;  %v899_v27 = vld [vmem:[#allocation14 + $0x28] sm:$0xff]  ;;  %v900_v29 = vld [vmem:[#allocation14 + $0x30] sm:$0xff]  ;;  %v901_v30 = vld [vmem:[#allocation14 + $0x38] sm:$0xff]  ;;  %v10458_v52 = vmov 0 }
  0xe4   :  { %5425 = vmatprep.subr.bf16.mxu1 %v794_v54  ;;  %v7243_v28 = vpack.c.bf16 %v899_v27, %v898_v26  ;;  %v7247_v31 = vpack.c.bf16 %v901_v30, %v900_v29  ;;  %v902_v32 = vld [vmem:[#allocation14 + $0x40] sm:$0xff]  ;;  %v903_v33 = vld [vmem:[#allocation14 + $0x48] sm:$0xff]  ;;  %v904_v35 = vld [vmem:[#allocation14 + $0x50] sm:$0xff] }
  0xe5   :  { %511 = vperm.xlu1 %7607, %v468_v50   ;;  %508 = vperm.xlu0 %7606, %v467_v51   ;;  %v7251_v34 = vpack.c.bf16 %v903_v33, %v902_v32  ;;  %v905_v36 = vld [vmem:[#allocation14 + $0x58] sm:$0xff]  ;;  %v10455_v51 = vmov 0  ;;  %v906_v10 = vld [vmem:[#allocation14 + $0x60] sm:$0xff] }
  0xe6   :  { %6301 = vmatmul.mubr.msk.f32.gmra.mrb[6].mxu0 %vm242_vm0, %v225_v7  ;;  %7236 = vmatprep.subr.bf16.mxu0 %v7235_v23  ;;  %v7255_v37 = vpack.c.bf16 %v905_v36, %v904_v35  ;;  %v10485_v7 = vmov 0  ;;  %v8370_v32 = vld [vmem:[#allocation12] ss:$0 sm:$0xff] }
  0xe7   :  { %5426 = vmatpush3.bf16.msra.mxu1 %v786_v62  ;;  %6303 = vmatprep.mubr.msk.f32.mxu0 %vm242_vm0, %v226_v12 }
  0xe8   :  { %5427 = vmatprep.subr.bf16.mxu1 %v795_v63  ;;  %7238 = vmatpush3.bf16.msra.mxu0 %v7235_v23  ;;  %v10473_v63 = vmov 0 }
  0xe9   :  { %517 = vperm.xlu1 %7607, %v470_v60   ;;  %514 = vperm.xlu0 %7606, %v469_v61   ;;  %v10470_v60 = vmov 0 }
  0xea   :  { %6304 = vmatmul.mubr.msk.f32.gmra.mrb[8].mxu0 %vm242_vm0, %v227_v13  ;;  %7240 = vmatprep.subr.bf16.mxu0 %v7239_v25  ;;  %v908_v13 = vld [vmem:[#allocation14 + $0x70] sm:$0xff] }
  0xeb   :  { %5428 = vmatpush3.bf16.msra.mxu1 %v787_v5  ;;  %6306 = vmatprep.mubr.msk.f32.mxu0 %vm242_vm0, %v228_v14  ;;  %v909_v14 = vld [vmem:[#allocation14 + $0x78] sm:$0xff] }
  0xec   :  { %5429 = vmatprep.subr.bf16.mxu1 %v796_v8  ;;  %7242 = vmatpush3.bf16.msra.mxu0 %v7239_v25  ;;  %v10488_v8 = vmov 0 }
  0xed   :  { %4851 = vperm.xlu0 %7606, %v4848_v4   ;;  %7244 = vmatprep.subr.bf16.mxu0 %v7243_v28  ;;  %v10482_v4 = vmov 0 }
  0xee   :  { %6307 = vmatmul.mubr.msk.f32.gmra.mrb[10].mxu0 %vm242_vm0, %v229_v15  ;;  %v7263_v15 = vpack.c.bf16 %v909_v14, %v908_v13 }
  0xef   :  { %5430 = vmatpush3.bf16.msra.mxu1 %v788_v11  ;;  %6309 = vmatprep.mubr.msk.f32.mxu0 %vm242_vm0, %v230_v16  ;;  %v907_v11 = vld [vmem:[#allocation14 + $0x68] sm:$0xff] }
  0xf0   :  { %7246 = vmatpush3.bf16.msra.mxu0 %v7243_v28  ;;  %v7259_v12 = vpack.c.bf16 %v907_v11, %v906_v10 }
  0xf1   :  { %7248 = vmatprep.subr.bf16.mxu0 %v7247_v31 }
  0xf2   :  { %6310 = vmatmul.mubr.msk.f32.gmra.mrb[12].mxu0 %vm242_vm0, %v231_v17 }
  0xf3   :  { %6312 = vmatprep.mubr.msk.f32.mxu0 %vm242_vm0, %v232_v18 }
  0xf4   :  { %7250 = vmatpush3.bf16.msra.mxu0 %v7247_v31 }
  0xf5   :  { %7252 = vmatprep.subr.bf16.mxu0 %v7251_v34 }
  0xf6   :  { %6313 = vmatmul.mubr.msk.f32.gmra.mrb[14].mxu0 %vm242_vm0, %v233_v19 }
  0xf8   :  { %7254 = vmatpush3.bf16.msra.mxu0 %v7251_v34 }
  0xf9   :  { %7256 = vmatprep.subr.bf16.mxu0 %v7255_v37 }
  0xfc   :  { %7258 = vmatpush3.bf16.msra.mxu0 %v7255_v37 }
  0xfd   :  { %7260 = vmatprep.subr.bf16.mxu0 %v7259_v12 }
 0x100   :  { %7262 = vmatpush3.bf16.msra.mxu0 %v7259_v12 }
 0x101   :  { %7264 = vmatprep.subr.bf16.mxu0 %v7263_v15 }
 0x104   :  { %7266 = vmatpush3.bf16.msra.mxu0 %v7263_v15 }
 0x14c   :  { %v479_v40 = vpop.permute.xlu1 %478  ;;  %v473_v41 = vpop.permute.xlu0 %472 }
 0x14d   :  { %vm524_vm1 = vcmp.eq.s32.totalorder %v8210_v42, %v479_v40  ;;  %vm520_vm5 = vcmp.eq.s32.totalorder %v8210_v42, %v473_v41  ;;  %vm519_vm7 = vcmp.eq.s32.totalorder %v8207_v39, %v473_v41  ;;  %vm523_vm10 = vcmp.eq.s32.totalorder %v8207_v39, %v479_v40 }
 0x150   :  { %v482_v43 = vpop.permute.xlu1 %481  ;;  %v476_v44 = vpop.permute.xlu0 %475 }
 0x151   :  { %vm526_vm2 = vcmp.eq.s32.totalorder %v8210_v42, %v482_v43  ;;  %vm522_vm3 = vcmp.eq.s32.totalorder %v8210_v42, %v476_v44  ;;  %vm521_vm4 = vcmp.eq.s32.totalorder %v8207_v39, %v476_v44  ;;  %vm525_vm11 = vcmp.eq.s32.totalorder %v8207_v39, %v482_v43 }
 0x152   :  { %vm8217_vm6 = vmpackc.low %vm526_vm2, %vm524_vm1 }
 0x153   :  { %v10448_v45 = vsel %vm8217_vm6, 4294967295, %v10447_v45  ;;  %vm8222_vm8 = vmpackc.low %vm522_vm3, %vm520_vm5 }
 0x154   :  { %10449 = vst [vmem:[#allocation29_spill] sm:$0xff] %v10448_v45  ;;  %v10451_v46 = vsel %vm8222_vm8, 4294967295, %v10450_v46  ;;  %vm8226_vm9 = vmpackc.low %vm521_vm4, %vm519_vm7  ;;  %5067 = vmatprep.mubr.msk.bf16.mxu1 %vm8222_vm8, %v10315_v48  ;;  %v488_v49 = vpop.permute.xlu1 %487  ;;  %v485_v50 = vpop.permute.xlu0 %484 }
 0x155   :  { %10452 = vst [vmem:[#allocation30_spill] sm:$0xff] %v10451_v46  ;;  %v10454_v47 = vsel %vm8226_vm9, 4294967295, %v10453_v47  ;;  %5069 = vmatmul.mubr.msk.bf16.vlgmr.msra.gmra.mrb[0].mxu1 %vm8226_vm9, %v10315_v48  ;;  %vm530_vm12 = vcmp.eq.s32.totalorder %v8210_v42, %v488_v49  ;;  %vm528_vm13 = vcmp.eq.s32.totalorder %v8210_v42, %v485_v50  ;;  %vm8243_vm14 = vmpackc.low %vm525_vm11, %vm523_vm10  ;;  %vm529_vm0 = vcmp.eq.s32.totalorder %v8207_v39, %v488_v49 }
 0x156   :  { %5071 = vmatprep.mubr.msk.bf16.mxu1 %vm8217_vm6, %v10315_v48  ;;  %v10456_v51 = vsel %vm8243_vm14, 4294967295, %v10455_v51  ;;  %vm8247_vm15 = vmpackc.low %vm530_vm12, %vm528_vm13  ;;  %vm527_vm1 = vcmp.eq.s32.totalorder %v8207_v39, %v485_v50 }
 0x157   :  { %10457 = vst [vmem:[#allocation31_spill] sm:$0xff] %v10456_v51  ;;  %v10459_v52 = vsel %vm8247_vm15, 4294967295, %v10458_v52  ;;  %vm8261_vm4 = vmpackc.low %vm529_vm0, %vm527_vm1 }
 0x158   :  { %10460 = vst [vmem:[#allocation32_spill] sm:$0xff] %v10459_v52  ;;  %v494_v53 = vpop.permute.xlu1 %493  ;;  %v491_v54 = vpop.permute.xlu0 %490  ;;  %v10462_v55 = vsel %vm8261_vm4, 4294967295, %v10461_v55 }
 0x159   :  { %vm534_vm2 = vcmp.eq.s32.totalorder %v8210_v42, %v494_v53  ;;  %vm532_vm3 = vcmp.eq.s32.totalorder %v8210_v42, %v491_v54  ;;  %10463 = vst [vmem:[#allocation33_spill] sm:$0xff] %v10462_v55  ;;  %vm533_vm7 = vcmp.eq.s32.totalorder %v8207_v39, %v494_v53  ;;  %vm531_vm10 = vcmp.eq.s32.totalorder %v8207_v39, %v491_v54 }
 0x15a   :  { %vm8265_vm5 = vmpackc.low %vm534_vm2, %vm532_vm3 }
 0x15b   :  { %v10465_v56 = vsel %vm8265_vm5, 4294967295, %v10464_v56  ;;  %vm8279_vm13 = vmpackc.low %vm533_vm7, %vm531_vm10 }
 0x15c   :  { %10466 = vst [vmem:[#allocation34_spill] sm:$0xff] %v10465_v56  ;;  %v500_v57 = vpop.permute.xlu1 %499  ;;  %v497_v58 = vpop.permute.xlu0 %496  ;;  %v10468_v59 = vsel %vm8279_vm13, 4294967295, %v10467_v59 }
 0x15d   :  { %5073 = vmatmul.mubr.msk.bf16.gmra.mrb[4].mxu1 %vm8243_vm14, %v10315_v48  ;;  %vm538_vm11 = vcmp.eq.s32.totalorder %v8210_v42, %v500_v57  ;;  %vm536_vm12 = vcmp.eq.s32.totalorder %v8210_v42, %v497_v58  ;;  %10469 = vst [vmem:[#allocation35_spill] sm:$0xff] %v10468_v59  ;;  %vm537_vm1 = vcmp.eq.s32.totalorder %v8207_v39, %v500_v57 }
 0x15e   :  { %5075 = vmatprep.mubr.msk.bf16.mxu1 %vm8247_vm15, %v10315_v48  ;;  %vm8283_vm0 = vmpackc.low %vm538_vm11, %vm536_vm12  ;;  %vm535_vm2 = vcmp.eq.s32.totalorder %v8207_v39, %v497_v58 }
 0x15f   :  { %v10471_v60 = vsel %vm8283_vm0, 4294967295, %v10470_v60  ;;  %vm8297_vm10 = vmpackc.low %vm537_vm1, %vm535_vm2 }
 0x160   :  { %10472 = vst [vmem:[#allocation36_spill] sm:$0xff] %v10471_v60  ;;  %v506_v61 = vpop.permute.xlu1 %505  ;;  %v503_v62 = vpop.permute.xlu0 %502  ;;  %v10474_v63 = vsel %vm8297_vm10, 4294967295, %v10473_v63 }
 0x161   :  { %vm542_vm3 = vcmp.eq.s32.totalorder %v8210_v42, %v506_v61  ;;  %vm540_vm7 = vcmp.eq.s32.totalorder %v8210_v42, %v503_v62  ;;  %10475 = vst [vmem:[#allocation37_spill] sm:$0xff] %v10474_v63  ;;  %vm541_vm12 = vcmp.eq.s32.totalorder %v8207_v39, %v506_v61  ;;  %vm539_vm1 = vcmp.eq.s32.totalorder %v8207_v39, %v503_v62 }
 0x162   :  { %vm8301_vm11 = vmpackc.low %vm542_vm3, %vm540_vm7 }
 0x163   :  { %v10477_v0 = vsel %vm8301_vm11, 4294967295, %v10476_v0  ;;  %vm8315_vm7 = vmpackc.low %vm541_vm12, %vm539_vm1 }
 0x164   :  { %10478 = vst [vmem:[#allocation38_spill] sm:$0xff] %v10477_v0  ;;  %v512_v1 = vpop.permute.xlu1 %511  ;;  %v509_v2 = vpop.permute.xlu0 %508  ;;  %v10480_v3 = vsel %vm8315_vm7, 4294967295, %v10479_v3 }
 0x165   :  { %5077 = vmatmul.mubr.msk.bf16.gmra.mrb[8].mxu1 %vm8261_vm4, %v10315_v48  ;;  %vm546_vm2 = vcmp.eq.s32.totalorder %v8210_v42, %v512_v1  ;;  %vm544_vm3 = vcmp.eq.s32.totalorder %v8210_v42, %v509_v2  ;;  %10481 = vst [vmem:[#allocation39_spill] sm:$0xff] %v10480_v3  ;;  %vm543_vm12 = vcmp.eq.s32.totalorder %v8207_v39, %v509_v2  ;;  %v1716_v3 = vld [vmem:[#allocation14 + $0xd8] sm:$0xff] }
 0x166   :  { %5079 = vmatprep.mubr.msk.bf16.mxu1 %vm8265_vm5, %v10315_v48 }
 0x168   :  { %v518_v5 = vpop.permute.xlu1 %517  ;;  %v515_v6 = vpop.permute.xlu0 %514 }
 0x169   :  { %vm550_vm1 = vcmp.eq.s32.totalorder %v8210_v42, %v518_v5 }
 0x16d   :  { %5081 = vmatmul.mubr.msk.bf16.gmra.mrb[12].mxu1 %vm8279_vm13, %v10315_v48 }
 0x16e   :  { %5083 = vmatprep.mubr.msk.bf16.mxu1 %vm8283_vm0, %v10315_v48  ;;  %vm8319_vm0 = vmpackc.low %vm546_vm2, %vm544_vm3  ;;  %vm548_vm2 = vcmp.eq.s32.totalorder %v8210_v42, %v515_v6 }
 0x16f   :  { %v10483_v4 = vsel %vm8319_vm0, 4294967295, %v10482_v4 }
 0x170   :  { %10484 = vst [vmem:[#allocation40_spill] sm:$0xff] %v10483_v4  ;;  %v1715_v4 = vld [vmem:[#allocation14 + $0xd0] sm:$0xff] }
 0x175   :  { %5085 = vmatmul.mubr.msk.bf16.gmra.mrb[16].mxu1 %vm8297_vm10, %v10315_v48  ;;  %vm8337_vm10 = vmpackc.low %vm550_vm1, %vm548_vm2 }
 0x176   :  { %5087 = vmatprep.mubr.msk.bf16.mxu1 %vm8301_vm11, %v10315_v48  ;;  %vm545_vm11 = vcmp.eq.s32.totalorder %v8207_v39, %v512_v1  ;;  %v10489_v8 = vsel %vm8337_vm10, 4294967295, %v10488_v8 }
 0x177   :  { %vm8333_vm3 = vmpackc.low %vm545_vm11, %vm543_vm12  ;;  %10490 = vst [vmem:[#allocation42_spill] sm:$0xff] %v10489_v8 }
 0x178   :  { %v10486_v7 = vsel %vm8333_vm3, 4294967295, %v10485_v7 }
 0x179   :  { %10487 = vst [vmem:[#allocation41_spill] sm:$0xff] %v10486_v7  ;;  %v1713_v7 = vld [vmem:[#allocation14 + $0xc0] sm:$0xff] }
 0x17d   :  { %5089 = vmatmul.mubr.msk.bf16.gmra.mrb[20].mxu1 %vm8315_vm7, %v10315_v48  ;;  %vm547_vm7 = vcmp.eq.s32.totalorder %v8207_v39, %v515_v6 }
 0x17e   :  { %5091 = vmatprep.mubr.msk.bf16.mxu1 %vm8319_vm0, %v10315_v48  ;;  %vm549_vm0 = vcmp.eq.s32.totalorder %v8207_v39, %v518_v5 }
 0x17f   :  { %vm8349_vm11 = vmpackc.low %vm549_vm0, %vm547_vm7 }
 0x180   :  { %v10492_v9 = vsel %vm8349_vm11, 4294967295, %v10491_v9 }
 0x181   :  { %10493 = vst [vmem:[#allocation43_spill] sm:$0xff] %v10492_v9 }
 0x185   :  { %5093 = vmatmul.mubr.msk.bf16.gmra.mrb[24].mxu1 %vm8333_vm3, %v10315_v48 }
 0x186   :  { %5095 = vmatprep.mubr.msk.bf16.mxu1 %vm8337_vm10, %v10315_v48 }
 0x18d   :  { %5097 = vmatmul.mubr.msk.bf16.gmra.mrb[28].mxu1 %vm8349_vm11, %v10315_v48 }
 0x1ad   :  { %v6293_v16 = vpop.f32.mrb[0].mxu0 }
 0x1ae   :  { %v357_v17 = vpop.f32.mrb[1].mxu0  ;;  %v363_v34 = vadd.f32 %v6293_v16, %v8370_v32 }
 0x1af   :  { %v358_v33 = vadd.f32 %v8370_v32, %v357_v17 }
 0x1b0   :  { %v8376_v39 = vmax.f32 %v363_v34, 0.0 }
 0x1b1   :  { %v6296_v18 = vpop.f32.mrb[2].mxu0  ;;  %v8374_v35 = vmax.f32 %v358_v33, 0.0 }
 0x1b2   :  { %v367_v19 = vpop.f32.mrb[3].mxu0  ;;  %10495 = vst [vmem:[#allocation45_spill] sm:$0xff] %v8376_v39  ;;  %v373_v53 = vadd.f32 %v6296_v18, %v8370_v32 }
 0x1b3   :  { %10494 = vst [vmem:[#allocation44_spill] sm:$0xff] %v8374_v35  ;;  %v368_v49 = vadd.f32 %v8370_v32, %v367_v19 }
 0x1b4   :  { %v8384_v61 = vmax.f32 %v373_v53, 0.0 }
 0x1b5   :  { %v6299_v20 = vpop.f32.mrb[4].mxu0  ;;  %v8382_v54 = vmax.f32 %v368_v49, 0.0 }
 0x1b6   :  { %v377_v21 = vpop.f32.mrb[5].mxu0  ;;  %10497 = vst [vmem:[#allocation47_spill] sm:$0xff] %v8384_v61  ;;  %v383_v11 = vadd.f32 %v6299_v20, %v8370_v32 }
 0x1b7   :  { %10496 = vst [vmem:[#allocation46_spill] sm:$0xff] %v8382_v54  ;;  %v378_v10 = vadd.f32 %v8370_v32, %v377_v21 }
 0x1b8   :  { %v8392_v16 = vmax.f32 %v383_v11, 0.0 }
 0x1b9   :  { %v6302_v22 = vpop.f32.mrb[6].mxu0  ;;  %v8390_v13 = vmax.f32 %v378_v10, 0.0 }
 0x1ba   :  { %v387_v23 = vpop.f32.mrb[7].mxu0  ;;  %10499 = vst [vmem:[#allocation49_spill] sm:$0xff] %v8392_v16  ;;  %v393_v20 = vadd.f32 %v6302_v22, %v8370_v32 }
 0x1bb   :  { %10498 = vst [vmem:[#allocation48_spill] sm:$0xff] %v8390_v13  ;;  %v388_v21 = vadd.f32 %v8370_v32, %v387_v23 }
 0x1bd   :  { %v8356_v24 = vpop.f32.mrb[8].mxu0 }
 0x1be   :  { %v397_v25 = vpop.f32.mrb[9].mxu0  ;;  %v403_v22 = vadd.f32 %v8356_v24, %v8370_v32 }
 0x1bf   :  { %v398_v23 = vadd.f32 %v8370_v32, %v397_v25 }
 0x1c1   :  { %v8358_v26 = vpop.f32.mrb[10].mxu0 }
 0x1c2   :  { %v8360_v27 = vpop.f32.mrb[11].mxu0  ;;  %v413_v24 = vadd.f32 %v8358_v26, %v8370_v32 }
 0x1c3   :  { %v408_v25 = vadd.f32 %v8370_v32, %v8360_v27 }
 0x1c5   :  { %v8362_v28 = vpop.f32.mrb[12].mxu0 }
 0x1c6   :  { %v8364_v29 = vpop.f32.mrb[13].mxu0  ;;  %v423_v26 = vadd.f32 %v8362_v28, %v8370_v32 }
 0x1c7   :  { %v418_v27 = vadd.f32 %v8370_v32, %v8364_v29 }
 0x1c9   :  { %v8366_v30 = vpop.f32.mrb[14].mxu0 }
 0x1ca   :  { %v8368_v31 = vpop.f32.mrb[15].mxu0 }
 0x1cb   :  { %v428_v29 = vadd.f32 %v8370_v32, %v8368_v31 }
 0x228   :  { %v5431_v36 = vpop.f32.mrb[0].mxu1 }
 0x229   :  { %v5432_v37 = vpop.f32.mrb[1].mxu1 }
 0x22a   :  { %v5433_v40 = vadd.f32 %v5432_v37, %v5431_v36  ;;  %v5434_v41 = vpop.f32.mrb[2].mxu1  ;;  %v8398_v37 = vmax.f32 %v388_v21, 0.0 }
 0x22b   :  { %v5435_v42 = vpop.f32.mrb[3].mxu1 }
 0x22c   :  { %v5436_v43 = vadd.f32 %v5435_v42, %v5434_v41  ;;  %v832_v44 = vadd.f32 %v5433_v40, %v8374_v35  ;;  %10500 = vst [vmem:[#allocation50_spill] sm:$0xff] %v8398_v37  ;;  %v8400_v42 = vmax.f32 %v393_v20, 0.0 }
 0x22e   :  { %v835_v50 = vadd.f32 %v5436_v43, %v8376_v39  ;;  %6347 = vmatprep.mubr.f32.mxu0 %v832_v44  ;;  %10501 = vst [vmem:[#allocation51_spill] sm:$0xff] %v8400_v42  ;;  %v1710_v39 = vld [vmem:[#allocation14 + $0xa8] sm:$0xff] }
 0x230   :  { %v5437_v57 = vpop.f32.mrb[4].mxu1  ;;  %6348 = vmatmul.mubr.f32.vlgmr.msra.gmra.mrb[16].mxu0 %v835_v50 }
 0x231   :  { %v5438_v58 = vpop.f32.mrb[5].mxu1 }
 0x232   :  { %v5439_v62 = vadd.f32 %v5438_v58, %v5437_v57  ;;  %v5440_v1 = vpop.f32.mrb[6].mxu1  ;;  %v8407_v58 = vmax.f32 %v398_v23, 0.0 }
 0x233   :  { %v5441_v2 = vpop.f32.mrb[7].mxu1 }
 0x234   :  { %v5442_v5 = vadd.f32 %v5441_v2, %v5440_v1  ;;  %v840_v6 = vadd.f32 %v5439_v62, %v8382_v54  ;;  %10502 = vst [vmem:[#allocation52_spill] sm:$0xff] %v8407_v58  ;;  %v8409_v2 = vmax.f32 %v403_v22, 0.0  ;;  %v1709_v54 = vld [vmem:[#allocation14 + $0xa0] sm:$0xff] }
 0x236   :  { %6350 = vmatprep.mubr.f32.mxu0 %v840_v6  ;;  %v843_v12 = vadd.f32 %v5442_v5, %v8384_v61  ;;  %10503 = vst [vmem:[#allocation53_spill] sm:$0xff] %v8409_v2  ;;  %v1708_v61 = vld [vmem:[#allocation14 + $0x98] sm:$0xff] }
 0x238   :  { %v5443_v14 = vpop.f32.mrb[8].mxu1  ;;  %6351 = vmatmul.mubr.f32.gmra.mrb[18].mxu0 %v843_v12 }
 0x239   :  { %v5444_v15 = vpop.f32.mrb[9].mxu1 }
 0x23a   :  { %v5445_v17 = vadd.f32 %v5444_v15, %v5443_v14  ;;  %v5446_v18 = vpop.f32.mrb[10].mxu1  ;;  %v8417_v15 = vmax.f32 %v408_v25, 0.0 }
 0x23b   :  { %v5447_v19 = vpop.f32.mrb[11].mxu1 }
 0x23c   :  { %v5448_v33 = vadd.f32 %v5447_v19, %v5446_v18  ;;  %v848_v34 = vadd.f32 %v5445_v17, %v8390_v13  ;;  %10504 = vst [vmem:[#allocation54_spill] sm:$0xff] %v8417_v15  ;;  %v8419_v19 = vmax.f32 %v413_v24, 0.0 }
 0x23e   :  { %6353 = vmatprep.mubr.f32.mxu0 %v848_v34  ;;  %v851_v36 = vadd.f32 %v5448_v33, %v8392_v16  ;;  %10505 = vst [vmem:[#allocation55_spill] sm:$0xff] %v8419_v19  ;;  %v1707_v16 = vld [vmem:[#allocation14 + $0x90] sm:$0xff] }
 0x240   :  { %v5449_v40 = vpop.f32.mrb[12].mxu1  ;;  %6354 = vmatmul.mubr.f32.gmra.mrb[20].mxu0 %v851_v36 }
 0x241   :  { %v5450_v41 = vpop.f32.mrb[13].mxu1 }
 0x242   :  { %v5451_v43 = vadd.f32 %v5450_v41, %v5449_v40  ;;  %v5452_v44 = vpop.f32.mrb[14].mxu1  ;;  %v8427_v41 = vmax.f32 %v418_v27, 0.0  ;;  %v1282_v27 = vld [vmem:[#allocation17 + $0x18] sm:$0xff] }
 0x243   :  { %v5453_v49 = vpop.f32.mrb[15].mxu1 }
 0x244   :  { %v5454_v50 = vadd.f32 %v5453_v49, %v5452_v44  ;;  %v856_v53 = vadd.f32 %v5451_v43, %v8398_v37  ;;  %10506 = vst [vmem:[#allocation56_spill] sm:$0xff] %v8427_v41  ;;  %v8429_v49 = vmax.f32 %v423_v26, 0.0  ;;  %v1706_v37 = vld [vmem:[#allocation14 + $0x88] sm:$0xff] }
 0x246   :  { %6356 = vmatprep.mubr.f32.mxu0 %v856_v53  ;;  %v859_v57 = vadd.f32 %v5454_v50, %v8400_v42  ;;  %10507 = vst [vmem:[#allocation57_spill] sm:$0xff] %v8429_v49 }
 0x248   :  { %v5455_v62 = vpop.f32.mrb[16].mxu1  ;;  %6357 = vmatmul.mubr.f32.gmra.mrb[22].mxu0 %v859_v57 }
 0x249   :  { %v5456_v1 = vpop.f32.mrb[17].mxu1 }
 0x24a   :  { %v5457_v5 = vadd.f32 %v5456_v1, %v5455_v62  ;;  %v5458_v6 = vpop.f32.mrb[18].mxu1  ;;  %v433_v62 = vadd.f32 %v8366_v30, %v8370_v32  ;;  %v8437_v1 = vmax.f32 %v428_v29, 0.0  ;;  %v8447_v32 = vld [vmem:[#allocation9] ss:$0 sm:$0xff]  ;;  %v1285_v29 = vld [vmem:[#allocation17 + $0x30] sm:$0xff] }
 0x24b   :  { %v5459_v10 = vpop.f32.mrb[19].mxu1 }
 0x24c   :  { %v5460_v11 = vadd.f32 %v5459_v10, %v5458_v6  ;;  %v864_v12 = vadd.f32 %v5457_v5, %v8407_v58  ;;  %10508 = vst [vmem:[#allocation58_spill] sm:$0xff] %v8437_v1  ;;  %v8439_v25 = vmax.f32 %v433_v62, 0.0 }
 0x24e   :  { %6359 = vmatprep.mubr.f32.mxu0 %v864_v12  ;;  %v867_v14 = vadd.f32 %v5460_v11, %v8409_v2  ;;  %10509 = vst [vmem:[#allocation59_spill] sm:$0xff] %v8439_v25 }
 0x250   :  { %v5461_v17 = vpop.f32.mrb[20].mxu1  ;;  %6360 = vmatmul.mubr.f32.gmra.mrb[24].mxu0 %v867_v14 }
 0x251   :  { %v5462_v18 = vpop.f32.mrb[21].mxu1 }
 0x252   :  { %v5463_v33 = vadd.f32 %v5462_v18, %v5461_v17  ;;  %v5464_v34 = vpop.f32.mrb[22].mxu1  ;;  %v8444_v17 = vshrl.u32 %v10314_v38, 7  ;;  %v10511_v18 = vmov 0 }
 0x253   :  { %v5465_v21 = vpop.f32.mrb[23].mxu1 }
 0x254   :  { %v5466_v20 = vadd.f32 %v5465_v21, %v5464_v34  ;;  %v872_v36 = vadd.f32 %v5463_v33, %v8417_v15  ;;  %10510 = vst [vmem:[#allocation60_spill] sm:$0xff] %v8444_v17  ;;  %v633_v30 = vadd.s32 8, %v8444_v17  ;;  %vm669_vm0 = vcmp.eq.s32.totalorder %v8444_v17, %v8447_v32  ;;  %v1279_v33 = vld [vmem:[#allocation17] sm:$0xff]  ;;  %v1280_v34 = vld [vmem:[#allocation17 + $0x8] sm:$0xff]  ;;  %v1281_v21 = vld [vmem:[#allocation17 + $0x10] sm:$0xff] }
 0x255   :  { %v7271_v26 = vpack.c.bf16 %v1282_v27, %v1281_v21  ;;  %v1290_v21 = vld [vmem:[#allocation17 + $0x58] sm:$0xff]  ;;  %v8729_v15 = vld [vmem:[#allocation3 + $0xe0] sm:$0xff] }
 0x256   :  { %6362 = vmatprep.mubr.f32.mxu0 %v872_v36  ;;  %v875_v40 = vadd.f32 %v5466_v20, %v8419_v19  ;;  %vm670_vm7 = vcmp.eq.s32.totalorder %v633_v30, %v8447_v32  ;;  %v8459_v20 = vld [vmem:[#allocation15] ss:$0 sm:$0xff]  ;;  %v7267_v36 = vpack.c.bf16 %v1280_v34, %v1279_v33  ;;  %v1289_v34 = vld [vmem:[#allocation17 + $0x50] sm:$0xff] }
 0x257   :  { %vm8452_vm12 = vmpackc.low %vm670_vm7, %vm669_vm0 }
 0x258   :  { %v5467_v43 = vpop.f32.mrb[24].mxu1  ;;  %6363 = vmatmul.mubr.f32.gmra.mrb[26].mxu0 %v875_v40  ;;  %v10512_v18 = vsel %vm8452_vm12, 4294967295, %v10511_v18  ;;  %v1283_v40 = vld [vmem:[#allocation17 + $0x20] sm:$0xff]  ;;  %7268 = vmatprep.subr.bf16.mxu1 %v7267_v36 }
 0x259   :  { %v5468_v44 = vpop.f32.mrb[25].mxu1  ;;  %10513 = vst [vmem:[#allocation61_spill] sm:$0xff] %v10512_v18  ;;  %7270 = vmatpush3.bf16.msra.mxu1 %v7267_v36 }
 0x25a   :  { %v5469_v50 = vadd.f32 %v5468_v44, %v5467_v43  ;;  %v5470_v53 = vpop.f32.mrb[26].mxu1  ;;  %v1284_v43 = vld [vmem:[#allocation17 + $0x28] sm:$0xff]  ;;  %7272 = vmatprep.subr.bf16.mxu1 %v7271_v26 }
 0x25b   :  { %v5471_v23 = vpop.f32.mrb[27].mxu1 }
 0x25c   :  { %v5472_v22 = vadd.f32 %v5471_v23, %v5470_v53  ;;  %v880_v57 = vadd.f32 %v5469_v50, %v8427_v41 }
 0x25d   :  { %7274 = vmatpush3.bf16.msra.mxu1 %v7271_v26  ;;  %v7287_v26 = vpack.c.bf16 %v1290_v21, %v1289_v34 }
 0x25e   :  { %6365 = vmatprep.mubr.f32.mxu0 %v880_v57  ;;  %v883_v28 = vadd.f32 %v5472_v22, %v8429_v49  ;;  %v7275_v22 = vpack.c.bf16 %v1284_v43, %v1283_v40  ;;  %v1291_v40 = vld [vmem:[#allocation17 + $0x60] sm:$0xff]  ;;  %v1292_v43 = vld [vmem:[#allocation17 + $0x68] sm:$0xff] }
 0x260   :  { %v5473_v5 = vpop.f32.mrb[28].mxu1  ;;  %6366 = vmatmul.mubr.f32.gmra.mrb[28].mxu0 %v883_v28  ;;  %v1286_v28 = vld [vmem:[#allocation17 + $0x38] sm:$0xff]  ;;  %7276 = vmatprep.subr.bf16.mxu1 %v7275_v22 }
 0x261   :  { %v5474_v6 = vpop.f32.mrb[29].mxu1  ;;  %7278 = vmatpush3.bf16.msra.mxu1 %v7275_v22  ;;  %v7291_v22 = vpack.c.bf16 %v1292_v43, %v1291_v40 }
 0x262   :  { %v5475_v10 = vadd.f32 %v5474_v6, %v5473_v5  ;;  %v5476_v11 = vpop.f32.mrb[30].mxu1  ;;  %v7279_v6 = vpack.c.bf16 %v1286_v28, %v1285_v29 }
 0x263   :  { %v5477_v12 = vpop.f32.mrb[31].mxu1 }
 0x264   :  { %v5478_v24 = vadd.f32 %v5477_v12, %v5476_v11  ;;  %v888_v14 = vadd.f32 %v5475_v10, %v8437_v1  ;;  %v1287_v10 = vld [vmem:[#allocation17 + $0x40] sm:$0xff]  ;;  %v1288_v11 = vld [vmem:[#allocation17 + $0x48] sm:$0xff]  ;;  %7280 = vmatprep.subr.bf16.mxu1 %v7279_v6 }
 0x265   :  { %v7283_v30 = vpack.c.bf16 %v1288_v11, %v1287_v10  ;;  %7282 = vmatpush3.bf16.msra.mxu1 %v7279_v6  ;;  %v8717_v1 = vld [vmem:[#allocation3 + $0xc0] sm:$0xff] }
 0x266   :  { %6368 = vmatprep.mubr.f32.mxu0 %v888_v14  ;;  %v891_v31 = vadd.f32 %v5478_v24, %v8439_v25 }
 0x267   :  { %7284 = vmatprep.subr.bf16.mxu1 %v7283_v30 }
 0x268   :  { %6369 = vmatmul.mubr.f32.gmra.mrb[30].mxu0 %v891_v31 }
 0x269   :  { %6387 = vmatprep.mubr.msk.bf16.mxu0 %vm8452_vm12, %v10315_v48  ;;  %7286 = vmatpush3.bf16.msra.mxu1 %v7283_v30 }
 0x26a   :  { %7288 = vmatprep.subr.bf16.mxu1 %v7287_v26 }
 0x26d   :  { %7290 = vmatpush3.bf16.msra.mxu1 %v7287_v26 }
 0x26e   :  { %7292 = vmatprep.subr.bf16.mxu1 %v7291_v22 }
 0x271   :  { %7294 = vmatpush3.bf16.msra.mxu1 %v7291_v22 }
 0x303   :  { %v6349_v44 = vpop.f32.mrb[16].mxu0 }
 0x304   :  { %v989_v50 = vadd.f32 %v6349_v44, %v8459_v20  ;;  %v983_v53 = vpop.f32.mrb[17].mxu0 }
 0x305   :  { %v984_v23 = vadd.f32 %v8459_v20, %v983_v53 }
 0x306   :  { %v1063_v57 = vmax.f32 %v989_v50, 0.0 }
 0x307   :  { %v1062_v62 = vmax.f32 %v984_v23, 0.0 }
 0x309   :  { %v1078_v5 = vpack.c.bf16 %v1063_v57, %v1062_v62 }
 0x30b   :  { %v6352_v12 = vpop.f32.mrb[18].mxu0  ;;  %6371 = vmatprep.subr.bf16.mxu0 %v1078_v5 }
 0x30c   :  { %v999_v24 = vadd.f32 %v6352_v12, %v8459_v20  ;;  %v993_v14 = vpop.f32.mrb[19].mxu0  ;;  %6372 = vmatpush3.bf16.msra.mxu0 %v1078_v5 }
 0x30d   :  { %v994_v31 = vadd.f32 %v8459_v20, %v993_v14 }
 0x30e   :  { %v1065_v33 = vmax.f32 %v999_v24, 0.0 }
 0x30f   :  { %v1064_v36 = vmax.f32 %v994_v31, 0.0 }
 0x311   :  { %v1079_v27 = vpack.c.bf16 %v1065_v33, %v1064_v36 }
 0x313   :  { %v6355_v44 = vpop.f32.mrb[20].mxu0  ;;  %6373 = vmatprep.subr.bf16.mxu0 %v1079_v27 }
 0x314   :  { %v1009_v50 = vadd.f32 %v6355_v44, %v8459_v20  ;;  %v1003_v53 = vpop.f32.mrb[21].mxu0  ;;  %6374 = vmatpush3.bf16.msra.mxu0 %v1079_v27 }
 0x315   :  { %v1004_v23 = vadd.f32 %v8459_v20, %v1003_v53 }
 0x316   :  { %v1067_v57 = vmax.f32 %v1009_v50, 0.0 }
 0x317   :  { %v1066_v29 = vmax.f32 %v1004_v23, 0.0 }
 0x319   :  { %v1080_v28 = vpack.c.bf16 %v1067_v57, %v1066_v29 }
 0x31b   :  { %v6358_v62 = vpop.f32.mrb[22].mxu0  ;;  %6375 = vmatprep.subr.bf16.mxu0 %v1080_v28 }
 0x31c   :  { %v1019_v5 = vadd.f32 %v6358_v62, %v8459_v20  ;;  %v1013_v6 = vpop.f32.mrb[23].mxu0  ;;  %6376 = vmatpush3.bf16.msra.mxu0 %v1080_v28 }
 0x31d   :  { %v1014_v10 = vadd.f32 %v8459_v20, %v1013_v6 }
 0x31e   :  { %v1069_v11 = vmax.f32 %v1019_v5, 0.0 }
 0x31f   :  { %v1068_v12 = vmax.f32 %v1014_v10, 0.0 }
 0x321   :  { %v1081_v24 = vpack.c.bf16 %v1069_v11, %v1068_v12 }
 0x323   :  { %v6361_v14 = vpop.f32.mrb[24].mxu0  ;;  %6377 = vmatprep.subr.bf16.mxu0 %v1081_v24 }
 0x324   :  { %v1029_v31 = vadd.f32 %v6361_v14, %v8459_v20  ;;  %v1023_v30 = vpop.f32.mrb[25].mxu0  ;;  %6378 = vmatpush3.bf16.msra.mxu0 %v1081_v24  ;;  %v634_v24 = vadd.s32 16, %v8444_v17  ;;  %v635_v14 = vadd.s32 24, %v8444_v17 }
 0x325   :  { %v1024_v33 = vadd.f32 %v8459_v20, %v1023_v30  ;;  %v636_v30 = vadd.s32 32, %v8444_v17 }
 0x326   :  { %v1071_v34 = vmax.f32 %v1029_v31, 0.0  ;;  %vm671_vm1 = vcmp.eq.s32.totalorder %v634_v24, %v8447_v32  ;;  %vm672_vm2 = vcmp.eq.s32.totalorder %v635_v14, %v8447_v32  ;;  %v650_v24 = vadd.s32 144, %v8444_v17 }
 0x327   :  { %v1070_v21 = vmax.f32 %v1024_v33, 0.0  ;;  %v637_v33 = vadd.s32 40, %v8444_v17  ;;  %vm673_vm0 = vcmp.eq.s32.totalorder %v636_v30, %v8447_v32  ;;  %vm8485_vm12 = vmpackc.low %vm672_vm2, %vm671_vm1  ;;  %v651_v14 = vadd.s32 152, %v8444_v17 }
 0x328   :  { %v653_v30 = vadd.s32 168, %v8444_v17 }
 0x329   :  { %v1082_v36 = vpack.c.bf16 %v1071_v34, %v1070_v21  ;;  %vm674_vm7 = vcmp.eq.s32.totalorder %v637_v33, %v8447_v32  ;;  %v10538_v33 = vmov 0 }
 0x32a   :  { %vm8489_vm11 = vmpackc.low %vm674_vm7, %vm673_vm0 }
 0x32b   :  { %v6364_v27 = vpop.f32.mrb[26].mxu0  ;;  %6379 = vmatprep.subr.bf16.mxu0 %v1082_v36 }
 0x32c   :  { %v1039_v26 = vadd.f32 %v6364_v27, %v8459_v20  ;;  %v1033_v40 = vpop.f32.mrb[27].mxu0  ;;  %6380 = vmatpush3.bf16.msra.mxu0 %v1082_v36  ;;  %v10517_v36 = vmov 0  ;;  %v638_v27 = vadd.s32 48, %v8444_v17 }
 0x32d   :  { %v1034_v43 = vadd.f32 %v8459_v20, %v1033_v40  ;;  %v10518_v36 = vsel %vm8489_vm11, 4294967295, %v10517_v36  ;;  %v640_v40 = vadd.s32 64, %v8444_v17 }
 0x32e   :  { %v1073_v44 = vmax.f32 %v1039_v26, 0.0  ;;  %10519 = vst [vmem:[#allocation63_spill] sm:$0xff] %v10518_v36  ;;  %v639_v26 = vadd.s32 56, %v8444_v17  ;;  %vm675_vm1 = vcmp.eq.s32.totalorder %v638_v27, %v8447_v32  ;;  %v655_v27 = vadd.s32 184, %v8444_v17  ;;  %v8705_v36 = vld [vmem:[#allocation3 + $0xa0] sm:$0xff] }
 0x32f   :  { %v1072_v50 = vmax.f32 %v1034_v43, 0.0  ;;  %v641_v43 = vadd.s32 72, %v8444_v17  ;;  %vm677_vm0 = vcmp.eq.s32.totalorder %v640_v40, %v8447_v32  ;;  %v657_v40 = vadd.s32 200, %v8444_v17 }
 0x330   :  { %vm676_vm2 = vcmp.eq.s32.totalorder %v639_v26, %v8447_v32  ;;  %v656_v26 = vadd.s32 192, %v8444_v17 }
 0x331   :  { %v1083_v53 = vpack.c.bf16 %v1073_v44, %v1072_v50  ;;  %vm678_vm7 = vcmp.eq.s32.totalorder %v641_v43, %v8447_v32  ;;  %vm8507_vm10 = vmpackc.low %vm676_vm2, %vm675_vm1  ;;  %v10520_v44 = vmov 0  ;;  %v10523_v50 = vmov 0 }
 0x332   :  { %v10521_v44 = vsel %vm8507_vm10, 4294967295, %v10520_v44  ;;  %vm8511_vm3 = vmpackc.low %vm678_vm7, %vm677_vm0  ;;  %v10544_v43 = vmov 0 }
 0x333   :  { %v6367_v23 = vpop.f32.mrb[28].mxu0  ;;  %6381 = vmatprep.subr.bf16.mxu0 %v1083_v53  ;;  %10522 = vst [vmem:[#allocation64_spill] sm:$0xff] %v10521_v44  ;;  %v10524_v50 = vsel %vm8511_vm3, 4294967295, %v10523_v50 }
 0x334   :  { %v1049_v22 = vadd.f32 %v6367_v23, %v8459_v20  ;;  %v1043_v57 = vpop.f32.mrb[29].mxu0  ;;  %6382 = vmatpush3.bf16.msra.mxu0 %v1083_v53  ;;  %10525 = vst [vmem:[#allocation65_spill] sm:$0xff] %v10524_v50  ;;  %v642_v53 = vadd.s32 80, %v8444_v17  ;;  %v643_v23 = vadd.s32 88, %v8444_v17 }
 0x335   :  { %v1044_v29 = vadd.f32 %v8459_v20, %v1043_v57  ;;  %v645_v57 = vadd.s32 104, %v8444_v17 }
 0x336   :  { %v1075_v28 = vmax.f32 %v1049_v22, 0.0  ;;  %v644_v22 = vadd.s32 96, %v8444_v17  ;;  %vm679_vm1 = vcmp.eq.s32.totalorder %v642_v53, %v8447_v32  ;;  %vm680_vm2 = vcmp.eq.s32.totalorder %v643_v23, %v8447_v32 }
 0x337   :  { %v1074_v62 = vmax.f32 %v1044_v29, 0.0  ;;  %vm682_vm7 = vcmp.eq.s32.totalorder %v645_v57, %v8447_v32  ;;  %v10526_v29 = vmov 0  ;;  %v10547_v53 = vmov 0 }
 0x338   :  { %vm681_vm0 = vcmp.eq.s32.totalorder %v644_v22, %v8447_v32  ;;  %v658_v23 = vadd.s32 208, %v8444_v17  ;;  %v659_v22 = vadd.s32 216, %v8444_v17  ;;  %v660_v57 = vadd.s32 224, %v8444_v17 }
 0x339   :  { %v1084_v5 = vpack.c.bf16 %v1075_v28, %v1074_v62  ;;  %v10529_v28 = vmov 0  ;;  %v646_v62 = vadd.s32 112, %v8444_v17 }
 0x33b   :  { %v6370_v6 = vpop.f32.mrb[30].mxu0  ;;  %6383 = vmatprep.subr.bf16.mxu0 %v1084_v5 }
 0x33c   :  { %v1059_v10 = vadd.f32 %v6370_v6, %v8459_v20  ;;  %v1053_v11 = vpop.f32.mrb[31].mxu0  ;;  %6384 = vmatpush3.bf16.msra.mxu0 %v1084_v5  ;;  %v647_v5 = vadd.s32 120, %v8444_v17  ;;  %v648_v6 = vadd.s32 128, %v8444_v17 }
 0x33d   :  { %v1054_v12 = vadd.f32 %v8459_v20, %v1053_v11  ;;  %v10514_v20 = vmov 0  ;;  %v10532_v11 = vmov 0 }
 0x33e   :  { %v1077_v31 = vmax.f32 %v1059_v10, 0.0  ;;  %v10515_v20 = vsel %vm8485_vm12, 4294967295, %v10514_v20  ;;  %v649_v10 = vadd.s32 136, %v8444_v17 }
 0x33f   :  { %v1076_v34 = vmax.f32 %v1054_v12, 0.0  ;;  %10516 = vst [vmem:[#allocation62_spill] sm:$0xff] %v10515_v20  ;;  %v10535_v12 = vmov 0 }
 0x341   :  { %v1085_v21 = vpack.c.bf16 %v1077_v31, %v1076_v34  ;;  %v652_v31 = vadd.s32 160, %v8444_v17  ;;  %v10541_v34 = vmov 0 }
 0x343   :  { %6385 = vmatprep.subr.bf16.mxu0 %v1085_v21 }
 0x344   :  { %6386 = vmatpush3.bf16.msra.mxu0 %v1085_v21  ;;  %v654_v21 = vadd.s32 176, %v8444_v17 }
 0x347   :  { %6388 = vmatmul.mubr.msk.bf16.vlgmr.msra.gmra.mrb[32].mxu0 %vm8485_vm12, %v10315_v48  ;;  %vm8533_vm12 = vmpackc.low %vm682_vm7, %vm681_vm0  ;;  %vm685_vm0 = vcmp.eq.s32.totalorder %v648_v6, %v8447_v32  ;;  %vm686_vm7 = vcmp.eq.s32.totalorder %v649_v10, %v8447_v32  ;;  %v10553_v6 = vmov 0  ;;  %v662_v10 = vadd.s32 240, %v8444_v17 }
 0x348   :  { %6391 = vmatprep.mubr.msk.bf16.mxu0 %vm8489_vm11, %v10315_v48  ;;  %vm8529_vm11 = vmpackc.low %vm680_vm2, %vm679_vm1  ;;  %v10530_v28 = vsel %vm8533_vm12, 4294967295, %v10529_v28  ;;  %vm683_vm1 = vcmp.eq.s32.totalorder %v646_v62, %v8447_v32  ;;  %vm684_vm2 = vcmp.eq.s32.totalorder %v647_v5, %v8447_v32  ;;  %v661_v62 = vadd.s32 232, %v8444_v17 }
 0x349   :  { %v10527_v29 = vsel %vm8529_vm11, 4294967295, %v10526_v29  ;;  %10531 = vst [vmem:[#allocation67_spill] sm:$0xff] %v10530_v28  ;;  %v10550_v5 = vmov 0  ;;  %v8693_v28 = vld [vmem:[#allocation3 + $0x80] sm:$0xff] }
 0x34a   :  { %10528 = vst [vmem:[#allocation66_spill] sm:$0xff] %v10527_v29 }
 0x34f   :  { %6392 = vmatmul.mubr.msk.bf16.gmra.mrb[36].mxu0 %vm8507_vm10, %v10315_v48  ;;  %vm8555_vm10 = vmpackc.low %vm686_vm7, %vm685_vm0  ;;  %vm689_vm0 = vcmp.eq.s32.totalorder %v652_v31, %v8447_v32  ;;  %vm690_vm7 = vcmp.eq.s32.totalorder %v653_v30, %v8447_v32  ;;  %v1293_v31 = vld [vmem:[#allocation17 + $0x70] sm:$0xff]  ;;  %v1294_v30 = vld [vmem:[#allocation17 + $0x78] sm:$0xff] }
 0x350   :  { %6395 = vmatprep.mubr.msk.bf16.mxu0 %vm8511_vm3, %v10315_v48  ;;  %vm8551_vm3 = vmpackc.low %vm684_vm2, %vm683_vm1  ;;  %v10536_v12 = vsel %vm8555_vm10, 4294967295, %v10535_v12  ;;  %vm687_vm1 = vcmp.eq.s32.totalorder %v650_v24, %v8447_v32  ;;  %vm688_vm2 = vcmp.eq.s32.totalorder %v651_v14, %v8447_v32  ;;  %v663_v24 = vadd.s32 248, %v8444_v17 }
 0x351   :  { %v10533_v11 = vsel %vm8551_vm3, 4294967295, %v10532_v11  ;;  %10537 = vst [vmem:[#allocation69_spill] sm:$0xff] %v10536_v12  ;;  %v10556_v14 = vmov 0 }
 0x352   :  { %10534 = vst [vmem:[#allocation68_spill] sm:$0xff] %v10533_v11 }
 0x357   :  { %6396 = vmatmul.mubr.msk.bf16.gmra.mrb[40].mxu0 %vm8529_vm11, %v10315_v48  ;;  %vm8577_vm11 = vmpackc.low %vm690_vm7, %vm689_vm0  ;;  %vm693_vm0 = vcmp.eq.s32.totalorder %v656_v26, %v8447_v32  ;;  %vm694_vm7 = vcmp.eq.s32.totalorder %v657_v40, %v8447_v32 }
 0x358   :  { %6399 = vmatprep.mubr.msk.bf16.mxu0 %vm8533_vm12, %v10315_v48  ;;  %vm8573_vm12 = vmpackc.low %vm688_vm2, %vm687_vm1  ;;  %v10542_v34 = vsel %vm8577_vm11, 4294967295, %v10541_v34  ;;  %vm691_vm1 = vcmp.eq.s32.totalorder %v654_v21, %v8447_v32  ;;  %vm692_vm2 = vcmp.eq.s32.totalorder %v655_v27, %v8447_v32  ;;  %v7295_v21 = vpack.c.bf16 %v1294_v30, %v1293_v31  ;;  %v8654_v31 = vld [vmem:[#allocation3 + $0x18] sm:$0xff] }
 0x359   :  { %v10539_v33 = vsel %vm8573_vm12, 4294967295, %v10538_v33  ;;  %10543 = vst [vmem:[#allocation71_spill] sm:$0xff] %v10542_v34  ;;  %v8681_v34 = vld [vmem:[#allocation3 + $0x60] sm:$0xff] }
 0x35a   :  { %10540 = vst [vmem:[#allocation70_spill] sm:$0xff] %v10539_v33  ;;  %7296 = vmatprep.subr.bf16.mxu1 %v7295_v21 }
 0x35b   :  { %7298 = vmatpush3.bf16.msra.mxu1 %v7295_v21 }
 0x35f   :  { %6400 = vmatmul.mubr.msk.bf16.gmra.mrb[44].mxu0 %vm8551_vm3, %v10315_v48  ;;  %vm8599_vm3 = vmpackc.low %vm694_vm7, %vm693_vm0  ;;  %vm697_vm0 = vcmp.eq.s32.totalorder %v660_v57, %v8447_v32  ;;  %vm698_vm7 = vcmp.eq.s32.totalorder %v661_v62, %v8447_v32  ;;  %v8648_v57 = vld [vmem:[#allocation3 + $0x8] sm:$0xff] }
 0x360   :  { %6403 = vmatprep.mubr.msk.bf16.mxu0 %vm8555_vm10, %v10315_v48  ;;  %vm8595_vm10 = vmpackc.low %vm692_vm2, %vm691_vm1  ;;  %v10548_v53 = vsel %vm8599_vm3, 4294967295, %v10547_v53  ;;  %vm695_vm1 = vcmp.eq.s32.totalorder %v658_v23, %v8447_v32  ;;  %vm696_vm2 = vcmp.eq.s32.totalorder %v659_v22, %v8447_v32 }
 0x361   :  { %v10545_v43 = vsel %vm8595_vm10, 4294967295, %v10544_v43  ;;  %10549 = vst [vmem:[#allocation73_spill] sm:$0xff] %v10548_v53 }
 0x362   :  { %10546 = vst [vmem:[#allocation72_spill] sm:$0xff] %v10545_v43 }
 0x367   :  { %6404 = vmatmul.mubr.msk.bf16.gmra.mrb[48].mxu0 %vm8573_vm12, %v10315_v48  ;;  %vm8621_vm12 = vmpackc.low %vm698_vm7, %vm697_vm0 }
 0x368   :  { %6407 = vmatprep.mubr.msk.bf16.mxu0 %vm8577_vm11, %v10315_v48  ;;  %vm8617_vm11 = vmpackc.low %vm696_vm2, %vm695_vm1  ;;  %v10554_v6 = vsel %vm8621_vm12, 4294967295, %v10553_v6  ;;  %vm699_vm1 = vcmp.eq.s32.totalorder %v662_v10, %v8447_v32  ;;  %vm700_vm2 = vcmp.eq.s32.totalorder %v663_v24, %v8447_v32  ;;  %v8645_v32 = vld [vmem:[#allocation3] sm:$0xff]  ;;  %v8651_v10 = vld [vmem:[#allocation3 + $0x10] sm:$0xff] }
 0x369   :  { %v10551_v5 = vsel %vm8617_vm11, 4294967295, %v10550_v5  ;;  %10555 = vst [vmem:[#allocation75_spill] sm:$0xff] %v10554_v6  ;;  %vm8635_vm0 = vmpackc.low %vm700_vm2, %vm699_vm1  ;;  %v8669_v6 = vld [vmem:[#allocation3 + $0x40] sm:$0xff] }
 0x36a   :  { %10552 = vst [vmem:[#allocation74_spill] sm:$0xff] %v10551_v5  ;;  %v10557_v14 = vsel %vm8635_vm0, 4294967295, %v10556_v14 }
 0x36b   :  { %10558 = vst [vmem:[#allocation76_spill] sm:$0xff] %v10557_v14 }
 0x36f   :  { %6408 = vmatmul.mubr.msk.bf16.gmra.mrb[52].mxu0 %vm8595_vm10, %v10315_v48 }
 0x370   :  { %6411 = vmatprep.mubr.msk.bf16.mxu0 %vm8599_vm3, %v10315_v48 }
 0x377   :  { %6412 = vmatmul.mubr.msk.bf16.gmra.mrb[56].mxu0 %vm8617_vm11, %v10315_v48 }
 0x378   :  { %6415 = vmatprep.mubr.msk.bf16.mxu0 %vm8621_vm12, %v10315_v48 }
 0x37f   :  { %6416 = vmatmul.mubr.msk.bf16.gmra.mrb[60].mxu0 %vm8635_vm0, %v10315_v48 }
 0x380   :  { %5133 = vmatprep.mubr.msk.bf16.mxu0 %vm8222_vm8, %v10315_v48 }
 0x41a   :  { %v6389_v27 = vpop.f32.mrb[32].mxu0 }
 0x41b   :  { %v1120_v26 = vpop.f32.mrb[33].mxu0  ;;  %v1249_v24 = vadd.f32 %v8651_v10, %v6389_v27  ;;  %v8663_v27 = vld [vmem:[#allocation3 + $0x30] sm:$0xff] }
 0x41c   :  { %v1247_v40 = vadd.f32 %v8645_v32, %v1120_v26  ;;  %v6390_v23 = vpop.f32.mrb[34].mxu0  ;;  %v8657_v26 = vld [vmem:[#allocation3 + $0x20] sm:$0xff] }
 0x41d   :  { %v1123_v22 = vpop.f32.mrb[35].mxu0  ;;  %v1250_v30 = vadd.f32 %v8654_v31, %v6390_v23  ;;  %v8666_v23 = vld [vmem:[#allocation3 + $0x38] sm:$0xff] }
 0x41e   :  { %v1248_v62 = vadd.f32 %v8648_v57, %v1123_v22  ;;  %6451 = vmatprep.mubr.f32.mxu1 %v1247_v40  ;;  %v8660_v40 = vld [vmem:[#allocation3 + $0x28] sm:$0xff] }
 0x420   :  { %6452 = vmatmul.mubr.f32.vlgmr.msra.gmra.mrb[32].mxu1 %v1248_v62 }
 0x421   :  { %6454 = vmatprep.mubr.f32.mxu1 %v1249_v24 }
 0x422   :  { %v6393_v21 = vpop.f32.mrb[36].mxu0 }
 0x423   :  { %v1136_v38 = vpop.f32.mrb[37].mxu0  ;;  %v1253_v62 = vadd.f32 %v8663_v27, %v6393_v21 }
 0x424   :  { %v1251_v48 = vadd.f32 %v8657_v26, %v1136_v38  ;;  %v6394_v17 = vpop.f32.mrb[38].mxu0  ;;  %6455 = vmatmul.mubr.f32.gmra.mrb[34].mxu1 %v1250_v30 }
 0x425   :  { %v1139_v22 = vpop.f32.mrb[39].mxu0  ;;  %v1254_v24 = vadd.f32 %v8666_v23, %v6394_v17  ;;  %v8678_v17 = vld [vmem:[#allocation3 + $0x58] sm:$0xff] }
 0x426   :  { %v1252_v46 = vadd.f32 %v8660_v40, %v1139_v22  ;;  %6457 = vmatprep.mubr.f32.mxu1 %v1251_v48  ;;  %v8672_v48 = vld [vmem:[#allocation3 + $0x48] sm:$0xff] }
 0x428   :  { %6458 = vmatmul.mubr.f32.gmra.mrb[36].mxu1 %v1252_v46  ;;  %v8675_v46 = vld [vmem:[#allocation3 + $0x50] sm:$0xff] }
 0x429   :  { %6460 = vmatprep.mubr.f32.mxu1 %v1253_v62 }
 0x42a   :  { %v6397_v14 = vpop.f32.mrb[40].mxu0 }
 0x42b   :  { %v1152_v38 = vpop.f32.mrb[41].mxu0  ;;  %v1257_v21 = vadd.f32 %v8675_v46, %v6397_v14 }
 0x42c   :  { %v1255_v30 = vadd.f32 %v8669_v6, %v1152_v38  ;;  %v6398_v5 = vpop.f32.mrb[42].mxu0  ;;  %6461 = vmatmul.mubr.f32.gmra.mrb[38].mxu1 %v1254_v24 }
 0x42d   :  { %v1155_v22 = vpop.f32.mrb[43].mxu0  ;;  %v1258_v62 = vadd.f32 %v8678_v17, %v6398_v5  ;;  %v8690_v5 = vld [vmem:[#allocation3 + $0x78] sm:$0xff] }
 0x42e   :  { %v1256_v53 = vadd.f32 %v8672_v48, %v1155_v22  ;;  %6463 = vmatprep.mubr.f32.mxu1 %v1255_v30  ;;  %v8684_v30 = vld [vmem:[#allocation3 + $0x68] sm:$0xff] }
 0x430   :  { %6464 = vmatmul.mubr.f32.gmra.mrb[40].mxu1 %v1256_v53  ;;  %v8687_v53 = vld [vmem:[#allocation3 + $0x70] sm:$0xff] }
 0x431   :  { %6466 = vmatprep.mubr.f32.mxu1 %v1257_v21 }
 0x432   :  { %v6401_v43 = vpop.f32.mrb[44].mxu0 }
 0x433   :  { %v1168_v38 = vpop.f32.mrb[45].mxu0  ;;  %v1261_v14 = vadd.f32 %v8687_v53, %v6401_v43 }
 0x434   :  { %v1259_v24 = vadd.f32 %v8681_v34, %v1168_v38  ;;  %v6402_v33 = vpop.f32.mrb[46].mxu0  ;;  %6467 = vmatmul.mubr.f32.gmra.mrb[42].mxu1 %v1258_v62 }
 0x435   :  { %v1171_v22 = vpop.f32.mrb[47].mxu0  ;;  %v1262_v21 = vadd.f32 %v8690_v5, %v6402_v33  ;;  %v8702_v33 = vld [vmem:[#allocation3 + $0x98] sm:$0xff] }
 0x436   :  { %v1260_v12 = vadd.f32 %v8684_v30, %v1171_v22  ;;  %6469 = vmatprep.mubr.f32.mxu1 %v1259_v24  ;;  %v8696_v24 = vld [vmem:[#allocation3 + $0x88] sm:$0xff] }
 0x438   :  { %6470 = vmatmul.mubr.f32.gmra.mrb[44].mxu1 %v1260_v12  ;;  %v8699_v12 = vld [vmem:[#allocation3 + $0x90] sm:$0xff] }
 0x439   :  { %6472 = vmatprep.mubr.f32.mxu1 %v1261_v14 }
 0x43a   :  { %v6405_v11 = vpop.f32.mrb[48].mxu0 }
 0x43b   :  { %v1184_v38 = vpop.f32.mrb[49].mxu0  ;;  %v1265_v43 = vadd.f32 %v8699_v12, %v6405_v11 }
 0x43c   :  { %v1263_v62 = vadd.f32 %v8693_v28, %v1184_v38  ;;  %v6406_v29 = vpop.f32.mrb[50].mxu0  ;;  %6473 = vmatmul.mubr.f32.gmra.mrb[46].mxu1 %v1262_v21 }
 0x43d   :  { %v1187_v22 = vpop.f32.mrb[51].mxu0  ;;  %v1266_v14 = vadd.f32 %v8702_v33, %v6406_v29  ;;  %v8714_v29 = vld [vmem:[#allocation3 + $0xb8] sm:$0xff] }
 0x43e   :  { %v1264_v50 = vadd.f32 %v8696_v24, %v1187_v22  ;;  %6475 = vmatprep.mubr.f32.mxu1 %v1263_v62  ;;  %v8708_v62 = vld [vmem:[#allocation3 + $0xa8] sm:$0xff] }
 0x440   :  { %6476 = vmatmul.mubr.f32.gmra.mrb[48].mxu1 %v1264_v50  ;;  %v8711_v50 = vld [vmem:[#allocation3 + $0xb0] sm:$0xff] }
 0x441   :  { %6478 = vmatprep.mubr.f32.mxu1 %v1265_v43 }
 0x442   :  { %v6409_v44 = vpop.f32.mrb[52].mxu0 }
 0x443   :  { %v1200_v38 = vpop.f32.mrb[53].mxu0  ;;  %v1269_v11 = vadd.f32 %v8711_v50, %v6409_v44 }
 0x444   :  { %v1267_v21 = vadd.f32 %v8705_v36, %v1200_v38  ;;  %v6410_v20 = vpop.f32.mrb[54].mxu0  ;;  %6479 = vmatmul.mubr.f32.gmra.mrb[50].mxu1 %v1266_v14 }
 0x445   :  { %v1203_v22 = vpop.f32.mrb[55].mxu0  ;;  %v1270_v43 = vadd.f32 %v8714_v29, %v6410_v20  ;;  %v8726_v20 = vld [vmem:[#allocation3 + $0xd8] sm:$0xff] }
 0x446   :  { %v1268_v18 = vadd.f32 %v8708_v62, %v1203_v22  ;;  %6481 = vmatprep.mubr.f32.mxu1 %v1267_v21  ;;  %v8720_v21 = vld [vmem:[#allocation3 + $0xc8] sm:$0xff] }
 0x448   :  { %6482 = vmatmul.mubr.f32.gmra.mrb[52].mxu1 %v1268_v18  ;;  %v8723_v18 = vld [vmem:[#allocation3 + $0xd0] sm:$0xff] }
 0x449   :  { %6484 = vmatprep.mubr.f32.mxu1 %v1269_v11 }
 0x44a   :  { %v6413_v25 = vpop.f32.mrb[56].mxu0 }
 0x44b   :  { %v1216_v38 = vpop.f32.mrb[57].mxu0  ;;  %v1273_v44 = vadd.f32 %v8723_v18, %v6413_v25 }
 0x44c   :  { %v1271_v14 = vadd.f32 %v8717_v1, %v1216_v38  ;;  %v6414_v49 = vpop.f32.mrb[58].mxu0  ;;  %6485 = vmatmul.mubr.f32.gmra.mrb[54].mxu1 %v1270_v43 }
 0x44d   :  { %v1219_v22 = vpop.f32.mrb[59].mxu0  ;;  %v1274_v11 = vadd.f32 %v8726_v20, %v6414_v49  ;;  %v8738_v49 = vld [vmem:[#allocation3 + $0xf8] sm:$0xff] }
 0x44e   :  { %v1272_v41 = vadd.f32 %v8720_v21, %v1219_v22  ;;  %6487 = vmatprep.mubr.f32.mxu1 %v1271_v14  ;;  %v8732_v14 = vld [vmem:[#allocation3 + $0xe8] sm:$0xff] }
 0x450   :  { %6488 = vmatmul.mubr.f32.gmra.mrb[56].mxu1 %v1272_v41  ;;  %v8735_v41 = vld [vmem:[#allocation3 + $0xf0] sm:$0xff] }
 0x451   :  { %6490 = vmatprep.mubr.f32.mxu1 %v1273_v44 }
 0x452   :  { %v6417_v19 = vpop.f32.mrb[60].mxu0 }
 0x453   :  { %v1232_v38 = vpop.f32.mrb[61].mxu0  ;;  %v1277_v25 = vadd.f32 %v8735_v41, %v6417_v19 }
 0x454   :  { %v1275_v43 = vadd.f32 %v8729_v15, %v1232_v38  ;;  %v6418_v2 = vpop.f32.mrb[62].mxu0  ;;  %6491 = vmatmul.mubr.f32.gmra.mrb[58].mxu1 %v1274_v11  ;;  %v1705_v11 = vld [vmem:[#allocation14 + $0x80] sm:$0xff] }
 0x455   :  { %v1235_v22 = vpop.f32.mrb[63].mxu0  ;;  %v1278_v44 = vadd.f32 %v8738_v49, %v6418_v2  ;;  %v7299_v13 = vpack.c.bf16 %v1706_v37, %v1705_v11  ;;  %v1712_v2 = vld [vmem:[#allocation14 + $0xb8] sm:$0xff]  ;;  %v1714_v37 = vld [vmem:[#allocation14 + $0xc8] sm:$0xff] }
 0x456   :  { %v1276_v58 = vadd.f32 %v8732_v14, %v1235_v22  ;;  %6493 = vmatprep.mubr.f32.mxu1 %v1275_v43  ;;  %v7303_v43 = vpack.c.bf16 %v1708_v61, %v1707_v16  ;;  %v7315_v61 = vpack.c.bf16 %v1714_v37, %v1713_v7 }
 0x457   :  { %7300 = vmatprep.subr.bf16.mxu1 %v7299_v13 }
 0x458   :  { %6494 = vmatmul.mubr.f32.gmra.mrb[60].mxu1 %v1276_v58  ;;  %v7307_v58 = vpack.c.bf16 %v1710_v39, %v1709_v54  ;;  %v7319_v39 = vpack.c.bf16 %v1716_v3, %v1715_v4 }
 0x459   :  { %6496 = vmatprep.mubr.f32.mxu1 %v1277_v25  ;;  %7302 = vmatpush3.bf16.msra.mxu1 %v7299_v13  ;;  %v1711_v25 = vld [vmem:[#allocation14 + $0xb0] sm:$0xff] }
 0x45a   :  { %7304 = vmatprep.subr.bf16.mxu1 %v7303_v43  ;;  %v7311_v9 = vpack.c.bf16 %v1712_v2, %v1711_v25 }
 0x45c   :  { %6497 = vmatmul.mubr.f32.gmra.mrb[62].mxu1 %v1278_v44 }
 0x45d   :  { %7306 = vmatpush3.bf16.msra.mxu1 %v7303_v43  ;;  %v8745_v43 = vld [vmem:[#allocation18] ss:$0 sm:$0xff] }
 0x45e   :  { %7308 = vmatprep.subr.bf16.mxu1 %v7307_v58 }
 0x461   :  { %7310 = vmatpush3.bf16.msra.mxu1 %v7307_v58 }
 0x462   :  { %7312 = vmatprep.subr.bf16.mxu1 %v7311_v9 }
 0x465   :  { %7314 = vmatpush3.bf16.msra.mxu1 %v7311_v9 }
 0x466   :  { %7316 = vmatprep.subr.bf16.mxu1 %v7315_v61 }
 0x469   :  { %7318 = vmatpush3.bf16.msra.mxu1 %v7315_v61 }
 0x46a   :  { %7320 = vmatprep.subr.bf16.mxu1 %v7319_v39 }
 0x46d   :  { %7322 = vmatpush3.bf16.msra.mxu1 %v7319_v39 }
 0x4f3   :  { %v6453_v38 = vpop.f32.mrb[32].mxu1 }
 0x4f4   :  { %v1368_v42 = vpop.f32.mrb[33].mxu1  ;;  %v1374_v7 = vadd.f32 %v6453_v38, %v8745_v43 }
 0x4f5   :  { %v1369_v2 = vadd.f32 %v8745_v43, %v1368_v42 }
 0x4f6   :  { %v1528_v4 = vmax.f32 %v1374_v7, 0.0 }
 0x4f7   :  { %v6456_v22 = vpop.f32.mrb[34].mxu1  ;;  %v1527_v37 = vmax.f32 %v1369_v2, 0.0 }
 0x4f8   :  { %v1378_v35 = vpop.f32.mrb[35].mxu1  ;;  %v1384_v61 = vadd.f32 %v6456_v22, %v8745_v43  ;;  %v8761_v55 = vadd.f32 %v8648_v57, %v1528_v4 }
 0x4f9   :  { %v1379_v63 = vadd.f32 %v8745_v43, %v1378_v35  ;;  %v8765_v42 = vadd.f32 %v8645_v32, %v1527_v37 }
 0x4fa   :  { %v1530_v39 = vmax.f32 %v1384_v61, 0.0 }
 0x4fb   :  { %v6459_v19 = vpop.f32.mrb[36].mxu1  ;;  %v1529_v52 = vmax.f32 %v1379_v63, 0.0 }
 0x4fc   :  { %v1388_v44 = vpop.f32.mrb[37].mxu1  ;;  %v1394_v2 = vadd.f32 %v6459_v19, %v8745_v43  ;;  %v8778_v63 = vadd.f32 %v8654_v31, %v1530_v39 }
 0x4fd   :  { %v1389_v22 = vadd.f32 %v8745_v43, %v1388_v44  ;;  %v1591_v44 = vpack.c.bf16 %v8761_v55, %v8765_v42 }
 0x4ff   :  { %v6462_v8 = vpop.f32.mrb[38].mxu1  ;;  %v1531_v37 = vmax.f32 %v1389_v22, 0.0 }
 0x500   :  { %v1398_v11 = vpop.f32.mrb[39].mxu1 }
 0x503   :  { %v6465_v16 = vpop.f32.mrb[40].mxu1 }
 0x504   :  { %v1408_v13 = vpop.f32.mrb[41].mxu1  ;;  %v1414_v39 = vadd.f32 %v6465_v16, %v8745_v43 }
 0x507   :  { %v8741_v54 = vpop.f32.mrb[42].mxu1 }
 0x508   :  { %v8743_v0 = vpop.f32.mrb[43].mxu1 }
 0x50b   :  { %v8747_v25 = vpop.f32.mrb[44].mxu1 }
 0x50c   :  { %v8749_v58 = vpop.f32.mrb[45].mxu1 }
 0x50f   :  { %v8753_v9 = vpop.f32.mrb[46].mxu1 }
 0x510   :  { %v8755_v3 = vpop.f32.mrb[47].mxu1 }
 0x513   :  { %v6477_v60 = vpop.f32.mrb[48].mxu1 }
 0x514   :  { %v1454_v59 = vadd.f32 %v6477_v60, %v8745_v43  ;;  %v1448_v56 = vpop.f32.mrb[49].mxu1 }
 0x515   :  { %v1449_v38 = vadd.f32 %v8745_v43, %v1448_v56 }
 0x516   :  { %v1544_v7 = vmax.f32 %v1454_v59, 0.0  ;;  %v8781_v59 = vadd.f32 %v8651_v10, %v1529_v52 }
 0x517   :  { %v1543_v35 = vmax.f32 %v1449_v38, 0.0  ;;  %v6480_v51 = vpop.f32.mrb[50].mxu1  ;;  %v1404_v38 = vadd.f32 %v6462_v8, %v8745_v43 }
 0x518   :  { %v8770_v60 = vadd.f32 %v8696_v24, %v1544_v7  ;;  %v1464_v57 = vadd.f32 %v6480_v51, %v8745_v43  ;;  %v1458_v4 = vpop.f32.mrb[51].mxu1  ;;  %v1532_v24 = vmax.f32 %v1394_v2, 0.0  ;;  %v1399_v7 = vadd.f32 %v8745_v43, %v1398_v11 }
 0x519   :  { %v8774_v56 = vadd.f32 %v8693_v28, %v1543_v35  ;;  %v1459_v32 = vadd.f32 %v8745_v43, %v1458_v4  ;;  %v1409_v35 = vadd.f32 %v8745_v43, %v1408_v13  ;;  %v1592_v8 = vpack.c.bf16 %v8778_v63, %v8781_v59 }
 0x51a   :  { %v1546_v19 = vmax.f32 %v1464_v57, 0.0  ;;  %v8805_v11 = vadd.f32 %v8657_v26, %v1531_v37  ;;  %v1424_v37 = vadd.f32 %v8741_v54, %v8745_v43 }
 0x51b   :  { %v1545_v61 = vmax.f32 %v1459_v32, 0.0  ;;  %v6483_v51 = vpop.f32.mrb[52].mxu1  ;;  %v1599_v28 = vpack.c.bf16 %v8770_v60, %v8774_v56  ;;  %v1534_v32 = vmax.f32 %v1404_v38, 0.0 }
 0x51c   :  { %v8790_v31 = vadd.f32 %v8702_v33, %v1546_v19  ;;  %v1474_v52 = vadd.f32 %v6483_v51, %v8745_v43  ;;  %v1468_v10 = vpop.f32.mrb[53].mxu1  ;;  %v8802_v33 = vadd.f32 %v8660_v40, %v1532_v24  ;;  %v1533_v19 = vmax.f32 %v1399_v7, 0.0 }
 0x51d   :  { %v8795_v2 = vadd.f32 %v8699_v12, %v1545_v61  ;;  %v1469_v22 = vadd.f32 %v8745_v43, %v1468_v10  ;;  %5583 = vmatprep.subr.bf16.mxu0 %v1599_v28  ;;  %v1536_v51 = vmax.f32 %v1414_v39, 0.0  ;;  %v1535_v24 = vmax.f32 %v1409_v35, 0.0 }
 0x51e   :  { %v1548_v57 = vmax.f32 %v1474_v52, 0.0  ;;  %5584 = vmatpush3.bf16.msra.mxu0 %v1591_v44  ;;  %v1419_v28 = vadd.f32 %v8745_v43, %v8743_v0  ;;  %v8826_v10 = vadd.f32 %v8666_v23, %v1534_v32  ;;  %v8829_v39 = vadd.f32 %v8663_v27, %v1533_v19 }
 0x51f   :  { %v1547_v16 = vmax.f32 %v1469_v22, 0.0  ;;  %v6486_v4 = vpop.f32.mrb[54].mxu1  ;;  %v1600_v12 = vpack.c.bf16 %v8790_v31, %v8795_v2  ;;  %v8836_v35 = vadd.f32 %v8672_v48, %v1536_v51  ;;  %v8843_v23 = vadd.f32 %v8669_v6, %v1535_v24 }
 0x520   :  { %v8810_v13 = vadd.f32 %v8708_v62, %v1548_v57  ;;  %v1484_v44 = vadd.f32 %v6486_v4, %v8745_v43  ;;  %v1478_v61 = vpop.f32.mrb[55].mxu1  ;;  %v1538_v27 = vmax.f32 %v1424_v37, 0.0  ;;  %v1429_v48 = vadd.f32 %v8745_v43, %v8749_v58 }
 0x521   :  { %v8814_v40 = vadd.f32 %v8705_v36, %v1547_v16  ;;  %v1479_v26 = vadd.f32 %v8745_v43, %v1478_v61  ;;  %5585 = vmatprep.subr.bf16.mxu0 %v1600_v12  ;;  %v1593_v36 = vpack.c.bf16 %v8802_v33, %v8805_v11  ;;  %v1537_v16 = vmax.f32 %v1419_v28, 0.0 }
 0x522   :  { %v1550_v38 = vmax.f32 %v1484_v44, 0.0  ;;  %5586 = vmatpush3.bf16.msra.mxu0 %v1592_v8  ;;  %v1594_v61 = vpack.c.bf16 %v8826_v10, %v8829_v39  ;;  %v8862_v58 = vadd.f32 %v8678_v17, %v1538_v27  ;;  %v1595_v24 = vpack.c.bf16 %v8836_v35, %v8843_v23 }
 0x523   :  { %v1549_v62 = vmax.f32 %v1479_v26, 0.0  ;;  %v6489_v7 = vpop.f32.mrb[56].mxu1  ;;  %v1601_v52 = vpack.c.bf16 %v8810_v13, %v8814_v40  ;;  %v8865_v26 = vadd.f32 %v8675_v46, %v1537_v16  ;;  %v1539_v28 = vmax.f32 %v1429_v48, 0.0 }
 0x524   :  { %v8832_v54 = vadd.f32 %v8714_v29, %v1550_v38  ;;  %v1494_v0 = vadd.f32 %v6489_v7, %v8745_v43  ;;  %v1488_v22 = vpop.f32.mrb[57].mxu1  ;;  %v1434_v29 = vadd.f32 %v8747_v25, %v8745_v43  ;;  %v1444_v7 = vadd.f32 %v8753_v9, %v8745_v43 }
 0x525   :  { %v8839_v57 = vadd.f32 %v8711_v50, %v1549_v62  ;;  %v1489_v8 = vadd.f32 %v8745_v43, %v1488_v22  ;;  %5587 = vmatprep.subr.bf16.mxu0 %v1601_v52  ;;  %v1439_v17 = vadd.f32 %v8745_v43, %v8755_v3  ;;  %v1596_v9 = vpack.c.bf16 %v8862_v58, %v8865_v26 }
 0x526   :  { %v1552_v4 = vmax.f32 %v1494_v0, 0.0  ;;  %5588 = vmatpush3.bf16.msra.mxu0 %v1593_v36  ;;  %v1540_v37 = vmax.f32 %v1434_v29, 0.0 }
 0x527   :  { %v1551_v12 = vmax.f32 %v1489_v8, 0.0  ;;  %v6492_v32 = vpop.f32.mrb[58].mxu1  ;;  %v1602_v50 = vpack.c.bf16 %v8832_v54, %v8839_v57  ;;  %v1541_v29 = vmax.f32 %v1439_v17, 0.0  ;;  %v10573_v17 = vld [vmem:[#allocation40_spill] sm:$0xff] }
 0x528   :  { %v8852_v19 = vadd.f32 %v8720_v21, %v1552_v4  ;;  %v1504_v6 = vadd.f32 %v6492_v32, %v8745_v43  ;;  %v1498_v44 = vpop.f32.mrb[59].mxu1  ;;  %v8886_v27 = vadd.f32 %v8684_v30, %v1540_v37  ;;  %v1542_v4 = vmax.f32 %v1444_v7, 0.0  ;;  %v10571_v7 = vld [vmem:[#allocation39_spill] sm:$0xff] }
 0x529   :  { %v8858_v51 = vadd.f32 %v8717_v1, %v1551_v12  ;;  %v1499_v25 = vadd.f32 %v8745_v43, %v1498_v44  ;;  %5589 = vmatprep.subr.bf16.mxu0 %v1602_v50 }
 0x52a   :  { %v1554_v21 = vmax.f32 %v1504_v6, 0.0  ;;  %5590 = vmatpush3.bf16.msra.mxu0 %v1594_v61  ;;  %v8904_v61 = vadd.f32 %v8690_v5, %v1542_v4 }
 0x52b   :  { %v1553_v38 = vmax.f32 %v1499_v25, 0.0  ;;  %v6495_v62 = vpop.f32.mrb[60].mxu1  ;;  %v1603_v1 = vpack.c.bf16 %v8852_v19, %v8858_v51 }
 0x52c   :  { %v8876_v46 = vadd.f32 %v8726_v20, %v1554_v21  ;;  %v1514_v52 = vadd.f32 %v6495_v62, %v8745_v43  ;;  %v1508_v36 = vpop.f32.mrb[61].mxu1  ;;  %v8889_v20 = vadd.f32 %v8681_v34, %v1539_v28  ;;  %v10567_v62 = vld [vmem:[#allocation37_spill] sm:$0xff] }
 0x52d   :  { %v8880_v0 = vadd.f32 %v8723_v18, %v1553_v38  ;;  %v1509_v22 = vadd.f32 %v8745_v43, %v1508_v36  ;;  %5591 = vmatprep.subr.bf16.mxu0 %v1603_v1  ;;  %v10565_v38 = vld [vmem:[#allocation36_spill] sm:$0xff]  ;;  %vm10568_vm1 = vnez %v10567_v62  ;;  %v10569_v1 = vld [vmem:[#allocation38_spill] sm:$0xff] }
 0x52e   :  { %v1556_v8 = vmax.f32 %v1514_v52, 0.0  ;;  %5592 = vmatpush3.bf16.msra.mxu0 %v1595_v24  ;;  %vm10566_vm7 = vnez %v10565_v38  ;;  %vm10570_vm2 = vnez %v10569_v1  ;;  %v10575_v52 = vld [vmem:[#allocation41_spill] sm:$0xff]  ;;  %v10577_v36 = vld [vmem:[#allocation42_spill] sm:$0xff] }
 0x52f   :  { %v1555_v3 = vmax.f32 %v1509_v22, 0.0  ;;  %v6498_v16 = vpop.f32.mrb[62].mxu1  ;;  %v1604_v18 = vpack.c.bf16 %v8876_v46, %v8880_v0  ;;  %v10579_v22 = vld [vmem:[#allocation43_spill] sm:$0xff]  ;;  %v2530_v1 = vld [vmem:[#allocation14 + $0x158] sm:$0xff] }
 0x530   :  { %v8894_v48 = vadd.f32 %v8732_v14, %v1556_v8  ;;  %v1524_v12 = vadd.f32 %v6498_v16, %v8745_v43  ;;  %v1518_v32 = vpop.f32.mrb[63].mxu1  ;;  %v8907_v14 = vadd.f32 %v8687_v53, %v1541_v29  ;;  %v10559_v53 = vmov 1.0|1.0   ;;  %v1717_v8 = vld [vmem:[#allocation14 + $0xe0] sm:$0xff]  ;;  %v1719_v16 = vld [vmem:[#allocation14 + $0xf0] sm:$0xff] }
 0x531   :  { %v8898_v50 = vadd.f32 %v8729_v15, %v1555_v3  ;;  %v1519_v30 = vadd.f32 %v8745_v43, %v1518_v32  ;;  %5593 = vmatprep.subr.bf16.mxu0 %v1604_v18  ;;  %v1597_v15 = vpack.c.bf16 %v8886_v27, %v8889_v20  ;;  %v1720_v18 = vld [vmem:[#allocation14 + $0xf8] sm:$0xff] }
 0x532   :  { %v1558_v34 = vmax.f32 %v1524_v12, 0.0  ;;  %5594 = vmatpush3.bf16.msra.mxu0 %v1596_v9  ;;  %v1598_v5 = vpack.c.bf16 %v8904_v61, %v8907_v14  ;;  %v1718_v9 = vld [vmem:[#allocation14 + $0xe8] sm:$0xff]  ;;  %v7327_v4 = vpack.c.bf16 %v1720_v18, %v1719_v16  ;;  %v10583_v16 = vld [vmem:[#allocation46_spill] sm:$0xff] }
 0x533   :  { %v1557_v6 = vmax.f32 %v1519_v30, 0.0  ;;  %v1605_v44 = vpack.c.bf16 %v8894_v48, %v8898_v50  ;;  %v7323_v3 = vpack.c.bf16 %v1718_v9, %v1717_v8 }
 0x534   :  { %v8910_v25 = vadd.f32 %v8738_v49, %v1558_v34 }
 0x535   :  { %v8915_v43 = vadd.f32 %v8735_v41, %v1557_v6  ;;  %5595 = vmatprep.subr.bf16.mxu0 %v1605_v44  ;;  %7324 = vmatprep.subr.bf16.mxu1 %v7323_v3  ;;  %v10581_v6 = vld [vmem:[#allocation44_spill] sm:$0xff] }
 0x536   :  { %5596 = vmatpush3.bf16.msra.mxu0 %v1597_v15  ;;  %7326 = vmatpush3.bf16.msra.mxu1 %v7323_v3 }
 0x537   :  { %v1606_v21 = vpack.c.bf16 %v8910_v25, %v8915_v43  ;;  %7328 = vmatprep.subr.bf16.mxu1 %v7327_v4 }
 0x539   :  { %5597 = vmatprep.subr.bf16.mxu0 %v1606_v21  ;;  %v10582_v21 = vld [vmem:[#allocation45_spill] sm:$0xff] }
 0x53a   :  { %5598 = vmatpush3.bf16.msra.mxu0 %v1598_v5  ;;  %7330 = vmatpush3.bf16.msra.mxu1 %v7327_v4 }
 0x53d   :  { %5135 = vmatmul.mubr.msk.bf16.vlgmr.msra.gmra.mrb[64].mxu0 %vm8226_vm9, %v10559_v53 }
 0x53e   :  { %5137 = vmatprep.mubr.msk.bf16.mxu0 %vm8217_vm6, %v10559_v53 }
 0x545   :  { %5139 = vmatmul.mubr.msk.bf16.gmra.mrb[68].mxu0 %vm8243_vm14, %v10559_v53 }
 0x546   :  { %5141 = vmatprep.mubr.msk.bf16.mxu0 %vm8247_vm15, %v10559_v53 }
 0x54d   :  { %5143 = vmatmul.mubr.msk.bf16.gmra.mrb[72].mxu0 %vm8261_vm4, %v10559_v53  ;;  %vm10572_vm4 = vnez %v10571_v7  ;;  %v2529_v7 = vld [vmem:[#allocation14 + $0x150] sm:$0xff] }
 0x54e   :  { %5145 = vmatprep.mubr.msk.bf16.mxu0 %vm8265_vm5, %v10559_v53  ;;  %vm10574_vm5 = vnez %v10573_v17 }
 0x555   :  { %5147 = vmatmul.mubr.msk.bf16.gmra.mrb[76].mxu0 %vm8279_vm13, %v10559_v53  ;;  %vm10576_vm13 = vnez %v10575_v52  ;;  %v10584_v52 = vld [vmem:[#allocation47_spill] sm:$0xff] }
 0x556   :  { %5149 = vmatprep.mubr.msk.bf16.mxu0 %vm10566_vm7, %v10559_v53  ;;  %vm10578_vm7 = vnez %v10577_v36 }
 0x55d   :  { %5151 = vmatmul.mubr.msk.bf16.gmra.mrb[80].mxu0 %vm10568_vm1, %v10559_v53  ;;  %vm10580_vm1 = vnez %v10579_v22 }
 0x55e   :  { %5153 = vmatprep.mubr.msk.bf16.mxu0 %vm10570_vm2, %v10559_v53 }
 0x565   :  { %5155 = vmatmul.mubr.msk.bf16.gmra.mrb[84].mxu0 %vm10572_vm4, %v10559_v53 }
 0x566   :  { %5157 = vmatprep.mubr.msk.bf16.mxu0 %vm10574_vm5, %v10559_v53 }
 0x56d   :  { %5159 = vmatmul.mubr.msk.bf16.gmra.mrb[88].mxu0 %vm10576_vm13, %v10559_v53 }
 0x56e   :  { %5161 = vmatprep.mubr.msk.bf16.mxu0 %vm10578_vm7, %v10559_v53 }
 0x575   :  { %5163 = vmatmul.mubr.msk.bf16.gmra.mrb[92].mxu0 %vm10580_vm1, %v10559_v53 }
 0x610   :  { %v5599_v29 = vpop.f32.mrb[64].mxu0 }
 0x611   :  { %v5600_v12 = vpop.f32.mrb[65].mxu0 }
 0x612   :  { %v5601_v32 = vadd.f32 %v5600_v12, %v5599_v29  ;;  %v5602_v30 = vpop.f32.mrb[66].mxu0 }
 0x613   :  { %v5603_v34 = vpop.f32.mrb[67].mxu0 }
 0x614   :  { %v1642_v44 = vadd.f32 %v5601_v32, %v10581_v6  ;;  %v5604_v15 = vadd.f32 %v5603_v34, %v5602_v30 }
 0x616   :  { %v1645_v5 = vadd.f32 %v5604_v15, %v10582_v21  ;;  %6531 = vmatprep.mubr.f32.mxu1 %v1642_v44  ;;  %v10585_v15 = vld [vmem:[#allocation48_spill] sm:$0xff] }
 0x618   :  { %v5605_v22 = vpop.f32.mrb[68].mxu0  ;;  %6532 = vmatmul.mubr.f32.vlgmr.msra.gmra.mrb[64].mxu1 %v1645_v5  ;;  %v10586_v5 = vld [vmem:[#allocation49_spill] sm:$0xff] }
 0x619   :  { %v5606_v8 = vpop.f32.mrb[69].mxu0 }
 0x61a   :  { %v5607_v9 = vadd.f32 %v5606_v8, %v5605_v22  ;;  %v5608_v3 = vpop.f32.mrb[70].mxu0 }
 0x61b   :  { %v5609_v36 = vpop.f32.mrb[71].mxu0 }
 0x61c   :  { %v1650_v18 = vadd.f32 %v5607_v9, %v10583_v16  ;;  %v5610_v4 = vadd.f32 %v5609_v36, %v5608_v3 }
 0x61e   :  { %v1653_v17 = vadd.f32 %v5610_v4, %v10584_v52  ;;  %6534 = vmatprep.mubr.f32.mxu1 %v1650_v18  ;;  %v10587_v4 = vld [vmem:[#allocation50_spill] sm:$0xff] }
 0x620   :  { %v5611_v29 = vpop.f32.mrb[72].mxu0  ;;  %6535 = vmatmul.mubr.f32.gmra.mrb[66].mxu1 %v1653_v17  ;;  %v10588_v17 = vld [vmem:[#allocation51_spill] sm:$0xff] }
 0x621   :  { %v5612_v12 = vpop.f32.mrb[73].mxu0 }
 0x622   :  { %v5613_v32 = vadd.f32 %v5612_v12, %v5611_v29  ;;  %v5614_v30 = vpop.f32.mrb[74].mxu0 }
 0x623   :  { %v5615_v34 = vpop.f32.mrb[75].mxu0 }
 0x624   :  { %v1658_v44 = vadd.f32 %v5613_v32, %v10585_v15  ;;  %v5616_v21 = vadd.f32 %v5615_v34, %v5614_v30 }
 0x626   :  { %v1661_v6 = vadd.f32 %v5616_v21, %v10586_v5  ;;  %6537 = vmatprep.mubr.f32.mxu1 %v1658_v44  ;;  %v10589_v21 = vld [vmem:[#allocation52_spill] sm:$0xff] }
 0x628   :  { %v5617_v22 = vpop.f32.mrb[76].mxu0  ;;  %6538 = vmatmul.mubr.f32.gmra.mrb[68].mxu1 %v1661_v6  ;;  %v10590_v6 = vld [vmem:[#allocation53_spill] sm:$0xff] }
 0x629   :  { %v5618_v8 = vpop.f32.mrb[77].mxu0 }
 0x62a   :  { %v5619_v9 = vadd.f32 %v5618_v8, %v5617_v22  ;;  %v5620_v36 = vpop.f32.mrb[78].mxu0 }
 0x62b   :  { %v5621_v3 = vpop.f32.mrb[79].mxu0 }
 0x62c   :  { %v1666_v18 = vadd.f32 %v5619_v9, %v10587_v4  ;;  %v5622_v52 = vadd.f32 %v5621_v3, %v5620_v36 }
 0x62e   :  { %v1669_v16 = vadd.f32 %v5622_v52, %v10588_v17  ;;  %6540 = vmatprep.mubr.f32.mxu1 %v1666_v18  ;;  %v10591_v52 = vld [vmem:[#allocation54_spill] sm:$0xff] }
 0x630   :  { %v5623_v29 = vpop.f32.mrb[80].mxu0  ;;  %6541 = vmatmul.mubr.f32.gmra.mrb[70].mxu1 %v1669_v16  ;;  %v10592_v16 = vld [vmem:[#allocation55_spill] sm:$0xff] }
 0x631   :  { %v5624_v12 = vpop.f32.mrb[81].mxu0 }
 0x632   :  { %v5625_v32 = vadd.f32 %v5624_v12, %v5623_v29  ;;  %v5626_v30 = vpop.f32.mrb[82].mxu0 }
 0x633   :  { %v5627_v34 = vpop.f32.mrb[83].mxu0 }
 0x634   :  { %v1674_v44 = vadd.f32 %v5625_v32, %v10589_v21  ;;  %v5628_v5 = vadd.f32 %v5627_v34, %v5626_v30 }
 0x636   :  { %v1677_v15 = vadd.f32 %v5628_v5, %v10590_v6  ;;  %6543 = vmatprep.mubr.f32.mxu1 %v1674_v44  ;;  %v10593_v5 = vld [vmem:[#allocation56_spill] sm:$0xff] }
 0x638   :  { %v5629_v22 = vpop.f32.mrb[84].mxu0  ;;  %6544 = vmatmul.mubr.f32.gmra.mrb[72].mxu1 %v1677_v15  ;;  %v10594_v15 = vld [vmem:[#allocation57_spill] sm:$0xff] }
 0x639   :  { %v5630_v8 = vpop.f32.mrb[85].mxu0 }
 0x63a   :  { %v5631_v9 = vadd.f32 %v5630_v8, %v5629_v22  ;;  %v5632_v36 = vpop.f32.mrb[86].mxu0 }
 0x63b   :  { %v5633_v3 = vpop.f32.mrb[87].mxu0 }
 0x63c   :  { %v1682_v18 = vadd.f32 %v5631_v9, %v10591_v52  ;;  %v5634_v17 = vadd.f32 %v5633_v3, %v5632_v36 }
 0x63e   :  { %v1685_v4 = vadd.f32 %v5634_v17, %v10592_v16  ;;  %6546 = vmatprep.mubr.f32.mxu1 %v1682_v18  ;;  %v10595_v17 = vld [vmem:[#allocation58_spill] sm:$0xff] }
 0x640   :  { %v5635_v29 = vpop.f32.mrb[88].mxu0  ;;  %6547 = vmatmul.mubr.f32.gmra.mrb[74].mxu1 %v1685_v4  ;;  %v10596_v4 = vld [vmem:[#allocation59_spill] sm:$0xff] }
 0x641   :  { %v5636_v12 = vpop.f32.mrb[89].mxu0 }
 0x642   :  { %v5637_v32 = vadd.f32 %v5636_v12, %v5635_v29  ;;  %v5638_v30 = vpop.f32.mrb[90].mxu0  ;;  %v10597_v29 = vld [vmem:[#allocation61_spill] sm:$0xff]  ;;  %v2092_v12 = vld [vmem:[#allocation17 + $0x80] sm:$0xff] }
 0x643   :  { %v5639_v34 = vpop.f32.mrb[91].mxu0  ;;  %vm10598_vm1 = vnez %v10597_v29  ;;  %v2098_v29 = vld [vmem:[#allocation17 + $0xb0] sm:$0xff] }
 0x644   :  { %v1690_v44 = vadd.f32 %v5637_v32, %v10593_v5  ;;  %v5640_v6 = vadd.f32 %v5639_v34, %v5638_v30  ;;  %v2094_v32 = vld [vmem:[#allocation17 + $0x90] sm:$0xff]  ;;  %v8985_v30 = vld [vmem:[#allocation15 + $0x1] ss:$0 sm:$0xff] }
 0x645   :  { %v2095_v34 = vld [vmem:[#allocation17 + $0x98] sm:$0xff] }
 0x646   :  { %v1693_v21 = vadd.f32 %v5640_v6, %v10594_v15  ;;  %6549 = vmatprep.mubr.f32.mxu1 %v1690_v44  ;;  %v2093_v6 = vld [vmem:[#allocation17 + $0x88] sm:$0xff]  ;;  %v7335_v44 = vpack.c.bf16 %v2095_v34, %v2094_v32  ;;  %v2100_v32 = vld [vmem:[#allocation17 + $0xc0] sm:$0xff] }
 0x647   :  { %v2101_v34 = vld [vmem:[#allocation17 + $0xc8] sm:$0xff] }
 0x648   :  { %v5641_v22 = vpop.f32.mrb[92].mxu0  ;;  %6550 = vmatmul.mubr.f32.gmra.mrb[76].mxu1 %v1693_v21  ;;  %v7331_v21 = vpack.c.bf16 %v2093_v6, %v2092_v12 }
 0x649   :  { %v5642_v8 = vpop.f32.mrb[93].mxu0 }
 0x64a   :  { %v5643_v9 = vadd.f32 %v5642_v8, %v5641_v22  ;;  %v5644_v36 = vpop.f32.mrb[94].mxu0  ;;  %v2096_v22 = vld [vmem:[#allocation17 + $0xa0] sm:$0xff]  ;;  %v2097_v8 = vld [vmem:[#allocation17 + $0xa8] sm:$0xff]  ;;  %7332 = vmatprep.subr.bf16.mxu0 %v7331_v21 }
 0x64b   :  { %v5645_v3 = vpop.f32.mrb[95].mxu0  ;;  %7334 = vmatpush3.bf16.msra.mxu0 %v7331_v21 }
 0x64c   :  { %v1698_v18 = vadd.f32 %v5643_v9, %v10595_v17  ;;  %v5646_v16 = vadd.f32 %v5645_v3, %v5644_v36  ;;  %7336 = vmatprep.subr.bf16.mxu0 %v7335_v44  ;;  %v7339_v3 = vpack.c.bf16 %v2097_v8, %v2096_v22  ;;  %v7347_v22 = vpack.c.bf16 %v2101_v34, %v2100_v32 }
 0x64e   :  { %v1701_v52 = vadd.f32 %v5646_v16, %v10596_v4  ;;  %6552 = vmatprep.mubr.f32.mxu1 %v1698_v18  ;;  %v2099_v4 = vld [vmem:[#allocation17 + $0xb8] sm:$0xff] }
 0x64f   :  { %7338 = vmatpush3.bf16.msra.mxu0 %v7335_v44  ;;  %v7343_v6 = vpack.c.bf16 %v2099_v4, %v2098_v29  ;;  %v2104_v29 = vld [vmem:[#allocation17 + $0xe0] sm:$0xff] }
 0x650   :  { %6553 = vmatmul.mubr.f32.gmra.mrb[78].mxu1 %v1701_v52  ;;  %7340 = vmatprep.subr.bf16.mxu0 %v7339_v3 }
 0x651   :  { %6571 = vmatprep.mubr.msk.bf16.mxu1 %vm10598_vm1, %v10559_v53 }
 0x653   :  { %7342 = vmatpush3.bf16.msra.mxu0 %v7339_v3 }
 0x654   :  { %7344 = vmatprep.subr.bf16.mxu0 %v7343_v6 }
 0x657   :  { %7346 = vmatpush3.bf16.msra.mxu0 %v7343_v6 }
 0x658   :  { %7348 = vmatprep.subr.bf16.mxu0 %v7347_v22 }
 0x65b   :  { %7350 = vmatpush3.bf16.msra.mxu0 %v7347_v22 }
 0x6eb   :  { %v6533_v9 = vpop.f32.mrb[64].mxu1 }
 0x6ec   :  { %v1801_v16 = vadd.f32 %v6533_v9, %v8985_v30  ;;  %v1795_v36 = vpop.f32.mrb[65].mxu1 }
 0x6ed   :  { %v1796_v52 = vadd.f32 %v8985_v30, %v1795_v36  ;;  %v2103_v36 = vld [vmem:[#allocation17 + $0xd8] sm:$0xff] }
 0x6ee   :  { %v1875_v18 = vmax.f32 %v1801_v16, 0.0  ;;  %v2102_v16 = vld [vmem:[#allocation17 + $0xd0] sm:$0xff] }
 0x6ef   :  { %v1874_v17 = vmax.f32 %v1796_v52, 0.0  ;;  %v7351_v4 = vpack.c.bf16 %v2103_v36, %v2102_v16  ;;  %v2105_v52 = vld [vmem:[#allocation17 + $0xe8] sm:$0xff] }
 0x6f0   :  { %v7355_v3 = vpack.c.bf16 %v2105_v52, %v2104_v29 }
 0x6f1   :  { %v1890_v12 = vpack.c.bf16 %v1875_v18, %v1874_v17  ;;  %7352 = vmatprep.subr.bf16.mxu0 %v7351_v4 }
 0x6f2   :  { %7354 = vmatpush3.bf16.msra.mxu0 %v7351_v4 }
 0x6f3   :  { %v6536_v15 = vpop.f32.mrb[66].mxu1  ;;  %6555 = vmatprep.subr.bf16.mxu1 %v1890_v12  ;;  %7356 = vmatprep.subr.bf16.mxu0 %v7355_v3 }
 0x6f4   :  { %v1811_v9 = vadd.f32 %v6536_v15, %v8985_v30  ;;  %v1805_v5 = vpop.f32.mrb[67].mxu1  ;;  %6556 = vmatpush3.bf16.msra.mxu1 %v1890_v12 }
 0x6f5   :  { %v1806_v21 = vadd.f32 %v8985_v30, %v1805_v5 }
 0x6f6   :  { %v1877_v8 = vmax.f32 %v1811_v9, 0.0  ;;  %7358 = vmatpush3.bf16.msra.mxu0 %v7355_v3 }
 0x6f7   :  { %v1876_v44 = vmax.f32 %v1806_v21, 0.0 }
 0x6f9   :  { %v1891_v17 = vpack.c.bf16 %v1877_v8, %v1876_v44 }
 0x6fb   :  { %v6539_v18 = vpop.f32.mrb[68].mxu1  ;;  %6557 = vmatprep.subr.bf16.mxu1 %v1891_v17 }
 0x6fc   :  { %v1821_v15 = vadd.f32 %v6539_v18, %v8985_v30  ;;  %v1815_v12 = vpop.f32.mrb[69].mxu1  ;;  %6558 = vmatpush3.bf16.msra.mxu1 %v1891_v17 }
 0x6fd   :  { %v1816_v5 = vadd.f32 %v8985_v30, %v1815_v12 }
 0x6fe   :  { %v1879_v32 = vmax.f32 %v1821_v15, 0.0 }
 0x6ff   :  { %v1878_v34 = vmax.f32 %v1816_v5, 0.0 }
 0x701   :  { %v1892_v6 = vpack.c.bf16 %v1879_v32, %v1878_v34 }
 0x703   :  { %v6542_v9 = vpop.f32.mrb[70].mxu1  ;;  %6559 = vmatprep.subr.bf16.mxu1 %v1892_v6 }
 0x704   :  { %v1831_v21 = vadd.f32 %v6542_v9, %v8985_v30  ;;  %v1825_v8 = vpop.f32.mrb[71].mxu1  ;;  %6560 = vmatpush3.bf16.msra.mxu1 %v1892_v6 }
 0x705   :  { %v1826_v16 = vadd.f32 %v8985_v30, %v1825_v8 }
 0x706   :  { %v1881_v36 = vmax.f32 %v1831_v21, 0.0 }
 0x707   :  { %v1880_v22 = vmax.f32 %v1826_v16, 0.0 }
 0x709   :  { %v1893_v44 = vpack.c.bf16 %v1881_v36, %v1880_v22 }
 0x70b   :  { %v6545_v17 = vpop.f32.mrb[72].mxu1  ;;  %6561 = vmatprep.subr.bf16.mxu1 %v1893_v44 }
 0x70c   :  { %v1841_v29 = vadd.f32 %v6545_v17, %v8985_v30  ;;  %v1835_v52 = vpop.f32.mrb[73].mxu1  ;;  %6562 = vmatpush3.bf16.msra.mxu1 %v1893_v44 }
 0x70d   :  { %v1836_v4 = vadd.f32 %v8985_v30, %v1835_v52 }
 0x70e   :  { %v1883_v18 = vmax.f32 %v1841_v29, 0.0 }
 0x70f   :  { %v1882_v15 = vmax.f32 %v1836_v4, 0.0 }
 0x711   :  { %v1894_v12 = vpack.c.bf16 %v1883_v18, %v1882_v15 }
 0x713   :  { %v6548_v5 = vpop.f32.mrb[74].mxu1  ;;  %6563 = vmatprep.subr.bf16.mxu1 %v1894_v12 }
 0x714   :  { %v1851_v3 = vadd.f32 %v6548_v5, %v8985_v30  ;;  %v1845_v32 = vpop.f32.mrb[75].mxu1  ;;  %6564 = vmatpush3.bf16.msra.mxu1 %v1894_v12 }
 0x715   :  { %v1846_v34 = vadd.f32 %v8985_v30, %v1845_v32  ;;  %v10599_v32 = vld [vmem:[#allocation62_spill] sm:$0xff] }
 0x716   :  { %v1885_v6 = vmax.f32 %v1851_v3, 0.0  ;;  %vm10600_vm1 = vnez %v10599_v32  ;;  %v2527_v32 = vld [vmem:[#allocation14 + $0x140] sm:$0xff] }
 0x717   :  { %v1884_v9 = vmax.f32 %v1846_v34, 0.0  ;;  %v10601_v34 = vld [vmem:[#allocation63_spill] sm:$0xff] }
 0x718   :  { %vm10602_vm7 = vnez %v10601_v34 }
 0x719   :  { %v1895_v21 = vpack.c.bf16 %v1885_v6, %v1884_v9  ;;  %v10603_v6 = vld [vmem:[#allocation64_spill] sm:$0xff]  ;;  %v10605_v9 = vld [vmem:[#allocation65_spill] sm:$0xff] }
 0x71a   :  { %vm10604_vm13 = vnez %v10603_v6  ;;  %vm10606_vm5 = vnez %v10605_v9  ;;  %v2523_v9 = vld [vmem:[#allocation14 + $0x120] sm:$0xff]  ;;  %v2524_v6 = vld [vmem:[#allocation14 + $0x128] sm:$0xff] }
 0x71b   :  { %v6551_v8 = vpop.f32.mrb[76].mxu1  ;;  %6565 = vmatprep.subr.bf16.mxu1 %v1895_v21 }
 0x71c   :  { %v1861_v16 = vadd.f32 %v6551_v8, %v8985_v30  ;;  %v1855_v36 = vpop.f32.mrb[77].mxu1  ;;  %6566 = vmatpush3.bf16.msra.mxu1 %v1895_v21  ;;  %v10609_v21 = vld [vmem:[#allocation67_spill] sm:$0xff]  ;;  %v10611_v8 = vld [vmem:[#allocation68_spill] sm:$0xff] }
 0x71d   :  { %v1856_v22 = vadd.f32 %v8985_v30, %v1855_v36  ;;  %vm10610_vm2 = vnez %v10609_v21  ;;  %v10615_v36 = vld [vmem:[#allocation70_spill] sm:$0xff] }
 0x71e   :  { %v1887_v44 = vmax.f32 %v1861_v16, 0.0  ;;  %v10613_v16 = vld [vmem:[#allocation69_spill] sm:$0xff] }
 0x71f   :  { %v1886_v17 = vmax.f32 %v1856_v22, 0.0  ;;  %v10617_v22 = vld [vmem:[#allocation71_spill] sm:$0xff] }
 0x721   :  { %v1896_v29 = vpack.c.bf16 %v1887_v44, %v1886_v17 }
 0x723   :  { %v6554_v52 = vpop.f32.mrb[78].mxu1  ;;  %6567 = vmatprep.subr.bf16.mxu1 %v1896_v29 }
 0x724   :  { %v1871_v4 = vadd.f32 %v6554_v52, %v8985_v30  ;;  %v1865_v18 = vpop.f32.mrb[79].mxu1  ;;  %6568 = vmatpush3.bf16.msra.mxu1 %v1896_v29 }
 0x725   :  { %v1866_v15 = vadd.f32 %v8985_v30, %v1865_v18  ;;  %v10607_v30 = vld [vmem:[#allocation66_spill] sm:$0xff] }
 0x726   :  { %v1889_v12 = vmax.f32 %v1871_v4, 0.0  ;;  %vm10608_vm4 = vnez %v10607_v30 }
 0x727   :  { %v1888_v5 = vmax.f32 %v1866_v15, 0.0  ;;  %v2106_v15 = vld [vmem:[#allocation17 + $0xf0] sm:$0xff] }
 0x729   :  { %v1897_v3 = vpack.c.bf16 %v1889_v12, %v1888_v5  ;;  %v2107_v12 = vld [vmem:[#allocation17 + $0xf8] sm:$0xff] }
 0x72a   :  { %v7359_v5 = vpack.c.bf16 %v2107_v12, %v2106_v15 }
 0x72b   :  { %6569 = vmatprep.subr.bf16.mxu1 %v1897_v3 }
 0x72c   :  { %6570 = vmatpush3.bf16.msra.mxu1 %v1897_v3  ;;  %7360 = vmatprep.subr.bf16.mxu0 %v7359_v5 }
 0x72d   :  { %7362 = vmatpush3.bf16.msra.mxu0 %v7359_v5 }
 0x72f   :  { %6572 = vmatmul.mubr.msk.bf16.vlgmr.msra.gmra.mrb[80].mxu1 %vm10600_vm1, %v10559_v53  ;;  %vm10612_vm1 = vnez %v10611_v8 }
 0x730   :  { %6575 = vmatprep.mubr.msk.bf16.mxu1 %vm10602_vm7, %v10559_v53  ;;  %vm10614_vm7 = vnez %v10613_v16 }
 0x737   :  { %6576 = vmatmul.mubr.msk.bf16.gmra.mrb[84].mxu1 %vm10604_vm13, %v10559_v53  ;;  %vm10616_vm13 = vnez %v10615_v36 }
 0x738   :  { %6579 = vmatprep.mubr.msk.bf16.mxu1 %vm10606_vm5, %v10559_v53  ;;  %vm10618_vm5 = vnez %v10617_v22 }
 0x73f   :  { %6580 = vmatmul.mubr.msk.bf16.gmra.mrb[88].mxu1 %vm10608_vm4, %v10559_v53 }
 0x740   :  { %6583 = vmatprep.mubr.msk.bf16.mxu1 %vm10610_vm2, %v10559_v53 }
 0x747   :  { %6584 = vmatmul.mubr.msk.bf16.gmra.mrb[92].mxu1 %vm10612_vm1, %v10559_v53 }
 0x748   :  { %6587 = vmatprep.mubr.msk.bf16.mxu1 %vm10614_vm7, %v10559_v53 }
 0x74f   :  { %6588 = vmatmul.mubr.msk.bf16.gmra.mrb[96].mxu1 %vm10616_vm13, %v10559_v53 }
 0x750   :  { %6591 = vmatprep.mubr.msk.bf16.mxu1 %vm10618_vm5, %v10559_v53 }
 0x757   :  { %6592 = vmatmul.mubr.msk.bf16.gmra.mrb[100].mxu1 %vm8595_vm10, %v10559_v53 }
 0x758   :  { %6595 = vmatprep.mubr.msk.bf16.mxu1 %vm8599_vm3, %v10559_v53 }
 0x75f   :  { %6596 = vmatmul.mubr.msk.bf16.gmra.mrb[104].mxu1 %vm8617_vm11, %v10559_v53 }
 0x760   :  { %6599 = vmatprep.mubr.msk.bf16.mxu1 %vm8621_vm12, %v10559_v53 }
 0x767   :  { %6600 = vmatmul.mubr.msk.bf16.gmra.mrb[108].mxu1 %vm8635_vm0, %v10559_v53 }
 0x768   :  { %5199 = vmatprep.mubr.msk.bf16.mxu1 %vm8222_vm8, %v10559_v53 }
 0x802   :  { %v6573_v3 = vpop.f32.mrb[80].mxu1 }
 0x803   :  { %v1932_v29 = vpop.f32.mrb[81].mxu1  ;;  %v2061_v4 = vadd.f32 %v6573_v3, %v8781_v59 }
 0x804   :  { %v2059_v17 = vadd.f32 %v1932_v29, %v8765_v42  ;;  %v6574_v44 = vpop.f32.mrb[82].mxu1 }
 0x805   :  { %v1935_v52 = vpop.f32.mrb[83].mxu1  ;;  %v2062_v18 = vadd.f32 %v6574_v44, %v8778_v63 }
 0x806   :  { %v2060_v22 = vadd.f32 %v1935_v52, %v8761_v55  ;;  %6635 = vmatprep.mubr.f32.mxu0 %v2059_v17 }
 0x808   :  { %6636 = vmatmul.mubr.f32.vlgmr.msra.gmra.mrb[96].mxu0 %v2060_v22 }
 0x809   :  { %6638 = vmatprep.mubr.f32.mxu0 %v2061_v4 }
 0x80a   :  { %v6577_v36 = vpop.f32.mrb[84].mxu1 }
 0x80b   :  { %v1948_v16 = vpop.f32.mrb[85].mxu1  ;;  %v2065_v8 = vadd.f32 %v6577_v36, %v8829_v39 }
 0x80c   :  { %v2063_v15 = vadd.f32 %v1948_v16, %v8805_v11  ;;  %v6578_v12 = vpop.f32.mrb[86].mxu1  ;;  %6639 = vmatmul.mubr.f32.gmra.mrb[98].mxu0 %v2062_v18 }
 0x80d   :  { %v1951_v5 = vpop.f32.mrb[87].mxu1  ;;  %v2066_v17 = vadd.f32 %v6578_v12, %v8826_v10 }
 0x80e   :  { %v2064_v29 = vadd.f32 %v1951_v5, %v8802_v33  ;;  %6641 = vmatprep.mubr.f32.mxu0 %v2063_v15 }
 0x810   :  { %6642 = vmatmul.mubr.f32.gmra.mrb[100].mxu0 %v2064_v29 }
 0x811   :  { %6644 = vmatprep.mubr.f32.mxu0 %v2065_v8 }
 0x812   :  { %v6581_v22 = vpop.f32.mrb[88].mxu1 }
 0x813   :  { %v1964_v52 = vpop.f32.mrb[89].mxu1  ;;  %v2069_v18 = vadd.f32 %v6581_v22, %v8865_v26 }
 0x814   :  { %v2067_v44 = vadd.f32 %v1964_v52, %v8843_v23  ;;  %v6582_v4 = vpop.f32.mrb[90].mxu1  ;;  %6645 = vmatmul.mubr.f32.gmra.mrb[102].mxu0 %v2066_v17 }
 0x815   :  { %v1967_v3 = vpop.f32.mrb[91].mxu1  ;;  %v2070_v36 = vadd.f32 %v6582_v4, %v8862_v58 }
 0x816   :  { %v2068_v16 = vadd.f32 %v1967_v3, %v8836_v35  ;;  %6647 = vmatprep.mubr.f32.mxu0 %v2067_v44 }
 0x818   :  { %6648 = vmatmul.mubr.f32.gmra.mrb[104].mxu0 %v2068_v16 }
 0x819   :  { %6650 = vmatprep.mubr.f32.mxu0 %v2069_v18 }
 0x81a   :  { %v6585_v15 = vpop.f32.mrb[92].mxu1 }
 0x81b   :  { %v1980_v8 = vpop.f32.mrb[93].mxu1  ;;  %v2073_v17 = vadd.f32 %v6585_v15, %v8907_v14 }
 0x81c   :  { %v2071_v12 = vadd.f32 %v1980_v8, %v8889_v20  ;;  %v6586_v5 = vpop.f32.mrb[94].mxu1  ;;  %6651 = vmatmul.mubr.f32.gmra.mrb[106].mxu0 %v2070_v36 }
 0x81d   :  { %v1983_v29 = vpop.f32.mrb[95].mxu1  ;;  %v2074_v22 = vadd.f32 %v6586_v5, %v8904_v61 }
 0x81e   :  { %v2072_v52 = vadd.f32 %v1983_v29, %v8886_v27  ;;  %6653 = vmatprep.mubr.f32.mxu0 %v2071_v12 }
 0x820   :  { %6654 = vmatmul.mubr.f32.gmra.mrb[108].mxu0 %v2072_v52 }
 0x821   :  { %6656 = vmatprep.mubr.f32.mxu0 %v2073_v17 }
 0x822   :  { %v6589_v44 = vpop.f32.mrb[96].mxu1 }
 0x823   :  { %v1996_v3 = vpop.f32.mrb[97].mxu1  ;;  %v2077_v36 = vadd.f32 %v6589_v44, %v8795_v2 }
 0x824   :  { %v2075_v4 = vadd.f32 %v1996_v3, %v8774_v56  ;;  %v6590_v16 = vpop.f32.mrb[98].mxu1  ;;  %6657 = vmatmul.mubr.f32.gmra.mrb[110].mxu0 %v2074_v22 }
 0x825   :  { %v1999_v18 = vpop.f32.mrb[99].mxu1  ;;  %v2078_v15 = vadd.f32 %v6590_v16, %v8790_v31 }
 0x826   :  { %v2076_v8 = vadd.f32 %v1999_v18, %v8770_v60  ;;  %6659 = vmatprep.mubr.f32.mxu0 %v2075_v4 }
 0x828   :  { %6660 = vmatmul.mubr.f32.gmra.mrb[112].mxu0 %v2076_v8 }
 0x829   :  { %6662 = vmatprep.mubr.f32.mxu0 %v2077_v36 }
 0x82a   :  { %v6593_v12 = vpop.f32.mrb[100].mxu1 }
 0x82b   :  { %v2012_v29 = vpop.f32.mrb[101].mxu1  ;;  %v2081_v22 = vadd.f32 %v6593_v12, %v8839_v57 }
 0x82c   :  { %v2079_v5 = vadd.f32 %v2012_v29, %v8814_v40  ;;  %v6594_v52 = vpop.f32.mrb[102].mxu1  ;;  %6663 = vmatmul.mubr.f32.gmra.mrb[114].mxu0 %v2078_v15 }
 0x82d   :  { %v2015_v17 = vpop.f32.mrb[103].mxu1  ;;  %v2082_v44 = vadd.f32 %v6594_v52, %v8832_v54 }
 0x82e   :  { %v2080_v3 = vadd.f32 %v2015_v17, %v8810_v13  ;;  %6665 = vmatprep.mubr.f32.mxu0 %v2079_v5 }
 0x830   :  { %6666 = vmatmul.mubr.f32.gmra.mrb[116].mxu0 %v2080_v3 }
 0x831   :  { %6668 = vmatprep.mubr.f32.mxu0 %v2081_v22 }
 0x832   :  { %v6597_v4 = vpop.f32.mrb[104].mxu1 }
 0x833   :  { %v2028_v18 = vpop.f32.mrb[105].mxu1  ;;  %v2085_v15 = vadd.f32 %v6597_v4, %v8880_v0 }
 0x834   :  { %v2083_v16 = vadd.f32 %v2028_v18, %v8858_v51  ;;  %v6598_v8 = vpop.f32.mrb[106].mxu1  ;;  %6669 = vmatmul.mubr.f32.gmra.mrb[118].mxu0 %v2082_v44 }
 0x835   :  { %v2031_v36 = vpop.f32.mrb[107].mxu1  ;;  %v2086_v12 = vadd.f32 %v6598_v8, %v8876_v46  ;;  %v2519_v8 = vld [vmem:[#allocation14 + $0x100] sm:$0xff] }
 0x836   :  { %v2084_v29 = vadd.f32 %v2031_v36, %v8852_v19  ;;  %6671 = vmatprep.mubr.f32.mxu0 %v2083_v16 }
 0x838   :  { %6672 = vmatmul.mubr.f32.gmra.mrb[120].mxu0 %v2084_v29  ;;  %v2520_v29 = vld [vmem:[#allocation14 + $0x108] sm:$0xff] }
 0x839   :  { %6674 = vmatprep.mubr.f32.mxu0 %v2085_v15  ;;  %v2521_v15 = vld [vmem:[#allocation14 + $0x110] sm:$0xff]  ;;  %v7363_v21 = vpack.c.bf16 %v2520_v29, %v2519_v8  ;;  %v2528_v8 = vld [vmem:[#allocation14 + $0x148] sm:$0xff] }
 0x83a   :  { %v6601_v5 = vpop.f32.mrb[108].mxu1 }
 0x83b   :  { %v2044_v17 = vpop.f32.mrb[109].mxu1  ;;  %v2089_v44 = vadd.f32 %v6601_v5, %v8915_v43  ;;  %7364 = vmatprep.subr.bf16.mxu0 %v7363_v21  ;;  %v7371_v5 = vpack.c.bf16 %v2524_v6, %v2523_v9  ;;  %v7383_v6 = vpack.c.bf16 %v2530_v1, %v2529_v7 }
 0x83c   :  { %v2087_v52 = vadd.f32 %v2044_v17, %v8898_v50  ;;  %v6602_v3 = vpop.f32.mrb[110].mxu1  ;;  %6675 = vmatmul.mubr.f32.gmra.mrb[122].mxu0 %v2086_v12  ;;  %v2522_v17 = vld [vmem:[#allocation14 + $0x118] sm:$0xff] }
 0x83d   :  { %v2047_v22 = vpop.f32.mrb[111].mxu1  ;;  %v2090_v4 = vadd.f32 %v6602_v3, %v8910_v25  ;;  %v7367_v12 = vpack.c.bf16 %v2522_v17, %v2521_v15  ;;  %7366 = vmatpush3.bf16.msra.mxu0 %v7363_v21  ;;  %v2526_v3 = vld [vmem:[#allocation14 + $0x138] sm:$0xff]  ;;  %v7379_v15 = vpack.c.bf16 %v2528_v8, %v2527_v32 }
 0x83e   :  { %v2088_v18 = vadd.f32 %v2047_v22, %v8894_v48  ;;  %6677 = vmatprep.mubr.f32.mxu0 %v2087_v52 }
 0x83f   :  { %7368 = vmatprep.subr.bf16.mxu0 %v7367_v12 }
 0x840   :  { %6678 = vmatmul.mubr.f32.gmra.mrb[124].mxu0 %v2088_v18  ;;  %v2525_v18 = vld [vmem:[#allocation14 + $0x130] sm:$0xff] }
 0x841   :  { %6680 = vmatprep.mubr.f32.mxu0 %v2089_v44  ;;  %7370 = vmatpush3.bf16.msra.mxu0 %v7367_v12  ;;  %v9087_v12 = vld [vmem:[#allocation18 + $0x1] ss:$0 sm:$0xff] }
 0x842   :  { %7372 = vmatprep.subr.bf16.mxu0 %v7371_v5 }
 0x844   :  { %6681 = vmatmul.mubr.f32.gmra.mrb[126].mxu0 %v2090_v4  ;;  %v7375_v4 = vpack.c.bf16 %v2526_v3, %v2525_v18 }
 0x845   :  { %7374 = vmatpush3.bf16.msra.mxu0 %v7371_v5 }
 0x846   :  { %7376 = vmatprep.subr.bf16.mxu0 %v7375_v4 }
 0x849   :  { %7378 = vmatpush3.bf16.msra.mxu0 %v7375_v4 }
 0x84a   :  { %7380 = vmatprep.subr.bf16.mxu0 %v7379_v15 }
 0x84d   :  { %7382 = vmatpush3.bf16.msra.mxu0 %v7379_v15 }
 0x84e   :  { %7384 = vmatprep.subr.bf16.mxu0 %v7383_v6 }
 0x851   :  { %7386 = vmatpush3.bf16.msra.mxu0 %v7383_v6 }
 0x8db   :  { %v6637_v16 = vpop.f32.mrb[96].mxu0 }
 0x8dc   :  { %v2182_v36 = vpop.f32.mrb[97].mxu0  ;;  %v2188_v32 = vadd.f32 %v6637_v16, %v9087_v12 }
 0x8dd   :  { %v2183_v3 = vadd.f32 %v9087_v12, %v2182_v36 }
 0x8de   :  { %v2342_v7 = vmax.f32 %v2188_v32, 0.0 }
 0x8df   :  { %v6640_v30 = vpop.f32.mrb[98].mxu0  ;;  %v2341_v8 = vmax.f32 %v2183_v3, 0.0 }
 0x8e0   :  { %v2192_v22 = vpop.f32.mrb[99].mxu0  ;;  %v2198_v15 = vadd.f32 %v6640_v30, %v9087_v12  ;;  %v9103_v49 = vadd.f32 %v2342_v7, %v8761_v55 }
 0x8e1   :  { %v2193_v38 = vadd.f32 %v9087_v12, %v2192_v22  ;;  %v9107_v36 = vadd.f32 %v2341_v8, %v8765_v42 }
 0x8e2   :  { %v2344_v6 = vmax.f32 %v2198_v15, 0.0 }
 0x8e3   :  { %v6643_v52 = vpop.f32.mrb[100].mxu0  ;;  %v2343_v41 = vmax.f32 %v2193_v38, 0.0 }
 0x8e4   :  { %v2202_v44 = vpop.f32.mrb[101].mxu0  ;;  %v2208_v3 = vadd.f32 %v6643_v52, %v9087_v12  ;;  %v9120_v38 = vadd.f32 %v2344_v6, %v8778_v63 }
 0x8e5   :  { %v2203_v30 = vadd.f32 %v9087_v12, %v2202_v44  ;;  %v2405_v44 = vpack.c.bf16 %v9103_v49, %v9107_v36 }
 0x8e7   :  { %v6646_v34 = vpop.f32.mrb[102].mxu0  ;;  %v2345_v8 = vmax.f32 %v2203_v30, 0.0 }
 0x8e8   :  { %v2212_v29 = vpop.f32.mrb[103].mxu0 }
 0x8eb   :  { %v6649_v17 = vpop.f32.mrb[104].mxu0 }
 0x8ec   :  { %v2222_v21 = vpop.f32.mrb[105].mxu0  ;;  %v2228_v6 = vadd.f32 %v6649_v17, %v9087_v12 }
 0x8ef   :  { %v9083_v9 = vpop.f32.mrb[106].mxu0 }
 0x8f0   :  { %v9085_v62 = vpop.f32.mrb[107].mxu0 }
 0x8f3   :  { %v9089_v18 = vpop.f32.mrb[108].mxu0 }
 0x8f4   :  { %v9091_v5 = vpop.f32.mrb[109].mxu0 }
 0x8f7   :  { %v9095_v4 = vpop.f32.mrb[110].mxu0 }
 0x8f8   :  { %v9097_v1 = vpop.f32.mrb[111].mxu0 }
 0x8fb   :  { %v6661_v28 = vpop.f32.mrb[112].mxu0 }
 0x8fc   :  { %v2268_v37 = vadd.f32 %v6661_v28, %v9087_v12  ;;  %v2262_v24 = vpop.f32.mrb[113].mxu0 }
 0x8fd   :  { %v2263_v16 = vadd.f32 %v9087_v12, %v2262_v24 }
 0x8fe   :  { %v2358_v32 = vmax.f32 %v2268_v37, 0.0  ;;  %v9123_v37 = vadd.f32 %v2343_v41, %v8781_v59 }
 0x8ff   :  { %v2357_v22 = vmax.f32 %v2263_v16, 0.0  ;;  %v6664_v45 = vpop.f32.mrb[114].mxu0  ;;  %v2218_v16 = vadd.f32 %v6646_v34, %v9087_v12 }
 0x900   :  { %v9112_v28 = vadd.f32 %v2358_v32, %v8770_v60  ;;  %v2278_v55 = vadd.f32 %v6664_v45, %v9087_v12  ;;  %v2272_v7 = vpop.f32.mrb[115].mxu0  ;;  %v2346_v60 = vmax.f32 %v2208_v3, 0.0  ;;  %v2213_v32 = vadd.f32 %v9087_v12, %v2212_v29 }
 0x901   :  { %v9116_v24 = vadd.f32 %v2357_v22, %v8774_v56  ;;  %v2273_v42 = vadd.f32 %v9087_v12, %v2272_v7  ;;  %v2223_v22 = vadd.f32 %v9087_v12, %v2222_v21  ;;  %v2406_v34 = vpack.c.bf16 %v9120_v38, %v9123_v37 }
 0x902   :  { %v2360_v52 = vmax.f32 %v2278_v55, 0.0  ;;  %v9147_v29 = vadd.f32 %v2345_v8, %v8805_v11  ;;  %v2238_v8 = vadd.f32 %v9083_v9, %v9087_v12 }
 0x903   :  { %v2359_v15 = vmax.f32 %v2273_v42, 0.0  ;;  %v6667_v45 = vpop.f32.mrb[116].mxu0  ;;  %v2413_v56 = vpack.c.bf16 %v9112_v28, %v9116_v24  ;;  %v2348_v42 = vmax.f32 %v2218_v16, 0.0 }
 0x904   :  { %v9132_v63 = vadd.f32 %v2360_v52, %v8790_v31  ;;  %v2288_v59 = vadd.f32 %v6667_v45, %v9087_v12  ;;  %v2282_v41 = vpop.f32.mrb[117].mxu0  ;;  %v9144_v31 = vadd.f32 %v2346_v60, %v8802_v33  ;;  %v2347_v52 = vmax.f32 %v2213_v32, 0.0 }
 0x905   :  { %v9137_v3 = vadd.f32 %v2359_v15, %v8795_v2  ;;  %v2283_v30 = vadd.f32 %v9087_v12, %v2282_v41  ;;  %5751 = vmatprep.subr.bf16.mxu1 %v2413_v56  ;;  %v2350_v45 = vmax.f32 %v2228_v6, 0.0  ;;  %v2349_v60 = vmax.f32 %v2223_v22, 0.0 }
 0x906   :  { %v2362_v55 = vmax.f32 %v2288_v59, 0.0  ;;  %5752 = vmatpush3.bf16.msra.mxu1 %v2405_v44  ;;  %v2233_v56 = vadd.f32 %v9087_v12, %v9085_v62  ;;  %v9168_v41 = vadd.f32 %v2348_v42, %v8826_v10  ;;  %v9171_v6 = vadd.f32 %v2347_v52, %v8829_v39 }
 0x907   :  { %v2361_v17 = vmax.f32 %v2283_v30, 0.0  ;;  %v6670_v7 = vpop.f32.mrb[118].mxu0  ;;  %v2414_v2 = vpack.c.bf16 %v9132_v63, %v9137_v3  ;;  %v9178_v22 = vadd.f32 %v2350_v45, %v8836_v35  ;;  %v9185_v10 = vadd.f32 %v2349_v60, %v8843_v23 }
 0x908   :  { %v9152_v21 = vadd.f32 %v2362_v55, %v8810_v13  ;;  %v2298_v44 = vadd.f32 %v6670_v7, %v9087_v12  ;;  %v2292_v15 = vpop.f32.mrb[119].mxu0  ;;  %v2352_v39 = vmax.f32 %v2238_v8, 0.0  ;;  %v2243_v35 = vadd.f32 %v9087_v12, %v9091_v5 }
 0x909   :  { %v9156_v33 = vadd.f32 %v2361_v17, %v8814_v40  ;;  %v2293_v11 = vadd.f32 %v9087_v12, %v2292_v15  ;;  %5753 = vmatprep.subr.bf16.mxu1 %v2414_v2  ;;  %v2407_v40 = vpack.c.bf16 %v9144_v31, %v9147_v29  ;;  %v2351_v17 = vmax.f32 %v2233_v56, 0.0 }
 0x90a   :  { %v2364_v16 = vmax.f32 %v2298_v44, 0.0  ;;  %5754 = vmatpush3.bf16.msra.mxu1 %v2406_v34  ;;  %v2408_v15 = vpack.c.bf16 %v9168_v41, %v9171_v6  ;;  %v9204_v5 = vadd.f32 %v2352_v39, %v8862_v58  ;;  %v2409_v60 = vpack.c.bf16 %v9178_v22, %v9185_v10 }
 0x90b   :  { %v2363_v13 = vmax.f32 %v2293_v11, 0.0  ;;  %v6673_v32 = vpop.f32.mrb[120].mxu0  ;;  %v2415_v59 = vpack.c.bf16 %v9152_v21, %v9156_v33  ;;  %v9207_v11 = vadd.f32 %v2351_v17, %v8865_v26  ;;  %v2353_v56 = vmax.f32 %v2243_v35, 0.0 }
 0x90c   :  { %v9174_v9 = vadd.f32 %v2364_v16, %v8832_v54  ;;  %v2308_v62 = vadd.f32 %v6673_v32, %v9087_v12  ;;  %v2302_v30 = vpop.f32.mrb[121].mxu0  ;;  %v2248_v54 = vadd.f32 %v9089_v18, %v9087_v12  ;;  %v2258_v32 = vadd.f32 %v9095_v4, %v9087_v12 }
 0x90d   :  { %v9181_v55 = vadd.f32 %v2363_v13, %v8839_v57  ;;  %v2303_v34 = vadd.f32 %v9087_v12, %v2302_v30  ;;  %5755 = vmatprep.subr.bf16.mxu1 %v2415_v59  ;;  %v2253_v58 = vadd.f32 %v9087_v12, %v9097_v1  ;;  %v2410_v4 = vpack.c.bf16 %v9204_v5, %v9207_v11 }
 0x90e   :  { %v2366_v7 = vmax.f32 %v2308_v62, 0.0  ;;  %5756 = vmatpush3.bf16.msra.mxu1 %v2407_v40  ;;  %v2354_v8 = vmax.f32 %v2248_v54, 0.0 }
 0x90f   :  { %v2365_v2 = vmax.f32 %v2303_v34, 0.0  ;;  %v6676_v42 = vpop.f32.mrb[122].mxu0  ;;  %v2416_v57 = vpack.c.bf16 %v9174_v9, %v9181_v55  ;;  %v2355_v54 = vmax.f32 %v2253_v58, 0.0  ;;  %v10642_v58 = vld [vmem:[#allocation40_spill] sm:$0xff] }
 0x910   :  { %v9194_v52 = vadd.f32 %v2366_v7, %v8852_v19  ;;  %v2318_v23 = vadd.f32 %v6676_v42, %v9087_v12  ;;  %v2312_v44 = vpop.f32.mrb[123].mxu0  ;;  %v9228_v39 = vadd.f32 %v2354_v8, %v8886_v27  ;;  %v2356_v7 = vmax.f32 %v2258_v32, 0.0  ;;  %v10630_v8 = vld [vmem:[#allocation34_spill] sm:$0xff]  ;;  %v10640_v32 = vld [vmem:[#allocation39_spill] sm:$0xff] }
 0x911   :  { %v9200_v45 = vadd.f32 %v2365_v2, %v8858_v51  ;;  %v2313_v18 = vadd.f32 %v9087_v12, %v2312_v44  ;;  %5757 = vmatprep.subr.bf16.mxu1 %v2416_v57  ;;  %vm10631_vm0 = vnez %v10630_v8 }
 0x912   :  { %v2368_v19 = vmax.f32 %v2318_v23, 0.0  ;;  %5758 = vmatpush3.bf16.msra.mxu1 %v2408_v15  ;;  %v9246_v15 = vadd.f32 %v2356_v7, %v8904_v61 }
 0x913   :  { %v2367_v16 = vmax.f32 %v2313_v18, 0.0  ;;  %v6679_v13 = vpop.f32.mrb[124].mxu0  ;;  %v2417_v51 = vpack.c.bf16 %v9194_v52, %v9200_v45 }
 0x914   :  { %v9218_v26 = vadd.f32 %v2368_v19, %v8876_v46  ;;  %v2328_v59 = vadd.f32 %v6679_v13, %v9087_v12  ;;  %v2322_v40 = vpop.f32.mrb[125].mxu0  ;;  %v9231_v46 = vadd.f32 %v2353_v56, %v8889_v20  ;;  %v10632_v56 = vld [vmem:[#allocation35_spill] sm:$0xff]  ;;  %v10636_v13 = vld [vmem:[#allocation37_spill] sm:$0xff] }
 0x915   :  { %v9222_v62 = vadd.f32 %v2367_v16, %v8880_v0  ;;  %v2323_v30 = vadd.f32 %v9087_v12, %v2322_v40  ;;  %5759 = vmatprep.subr.bf16.mxu1 %v2417_v51  ;;  %v10634_v16 = vld [vmem:[#allocation36_spill] sm:$0xff]  ;;  %v10638_v51 = vld [vmem:[#allocation38_spill] sm:$0xff] }
 0x916   :  { %v2370_v34 = vmax.f32 %v2328_v59, 0.0  ;;  %5760 = vmatpush3.bf16.msra.mxu1 %v2409_v60  ;;  %v10628_v60 = vld [vmem:[#allocation33_spill] sm:$0xff]  ;;  %v10646_v40 = vld [vmem:[#allocation42_spill] sm:$0xff] }
 0x917   :  { %v2369_v1 = vmax.f32 %v2323_v30, 0.0  ;;  %v6682_v17 = vpop.f32.mrb[126].mxu0  ;;  %v2418_v0 = vpack.c.bf16 %v9218_v26, %v9222_v62  ;;  %vm10629_vm8 = vnez %v10628_v60  ;;  %v10644_v59 = vld [vmem:[#allocation41_spill] sm:$0xff]  ;;  %v10648_v30 = vld [vmem:[#allocation43_spill] sm:$0xff] }
 0x918   :  { %v9236_v35 = vadd.f32 %v2370_v34, %v8894_v48  ;;  %v2338_v2 = vadd.f32 %v6682_v17, %v9087_v12  ;;  %v2332_v42 = vpop.f32.mrb[127].mxu0  ;;  %v9249_v48 = vadd.f32 %v2355_v54, %v8907_v14  ;;  %v2531_v34 = vld [vmem:[#allocation14 + $0x160] sm:$0xff]  ;;  %v2533_v17 = vld [vmem:[#allocation14 + $0x170] sm:$0xff] }
 0x919   :  { %v9240_v57 = vadd.f32 %v2369_v1, %v8898_v50  ;;  %v2333_v27 = vadd.f32 %v9087_v12, %v2332_v42  ;;  %5761 = vmatprep.subr.bf16.mxu1 %v2418_v0  ;;  %v2411_v50 = vpack.c.bf16 %v9228_v39, %v9231_v46  ;;  %v2534_v0 = vld [vmem:[#allocation14 + $0x178] sm:$0xff] }
 0x91a   :  { %v2372_v20 = vmax.f32 %v2338_v2, 0.0  ;;  %5762 = vmatpush3.bf16.msra.mxu1 %v2410_v4  ;;  %v2412_v61 = vpack.c.bf16 %v9246_v15, %v9249_v48  ;;  %v2532_v4 = vld [vmem:[#allocation14 + $0x168] sm:$0xff]  ;;  %v7391_v7 = vpack.c.bf16 %v2534_v0, %v2533_v17  ;;  %v10652_v17 = vld [vmem:[#allocation46_spill] sm:$0xff] }
 0x91b   :  { %v2371_v23 = vmax.f32 %v2333_v27, 0.0  ;;  %v2419_v44 = vpack.c.bf16 %v9236_v35, %v9240_v57  ;;  %v7387_v1 = vpack.c.bf16 %v2532_v4, %v2531_v34 }
 0x91c   :  { %v9252_v18 = vadd.f32 %v2372_v20, %v8910_v25 }
 0x91d   :  { %v9257_v12 = vadd.f32 %v2371_v23, %v8915_v43  ;;  %5763 = vmatprep.subr.bf16.mxu1 %v2419_v44  ;;  %7388 = vmatprep.subr.bf16.mxu0 %v7387_v1  ;;  %v10650_v23 = vld [vmem:[#allocation44_spill] sm:$0xff] }
 0x91e   :  { %5764 = vmatpush3.bf16.msra.mxu1 %v2411_v50  ;;  %7390 = vmatpush3.bf16.msra.mxu0 %v7387_v1 }
 0x91f   :  { %v2420_v19 = vpack.c.bf16 %v9252_v18, %v9257_v12  ;;  %7392 = vmatprep.subr.bf16.mxu0 %v7391_v7 }
 0x921   :  { %5765 = vmatprep.subr.bf16.mxu1 %v2420_v19  ;;  %v10651_v19 = vld [vmem:[#allocation45_spill] sm:$0xff] }
 0x922   :  { %5766 = vmatpush3.bf16.msra.mxu1 %v2412_v61  ;;  %7394 = vmatpush3.bf16.msra.mxu0 %v7391_v7 }
 0x925   :  { %5201 = vmatmul.mubr.msk.bf16.vlgmr.msra.gmra.mrb[112].mxu1 %vm8226_vm9, %v10559_v53  ;;  %vm10633_vm9 = vnez %v10632_v56 }
 0x926   :  { %5203 = vmatprep.mubr.msk.bf16.mxu1 %vm8217_vm6, %v10559_v53  ;;  %vm10635_vm6 = vnez %v10634_v16 }
 0x92d   :  { %5205 = vmatmul.mubr.msk.bf16.gmra.mrb[116].mxu1 %vm8243_vm14, %v10559_v53  ;;  %vm10637_vm14 = vnez %v10636_v13 }
 0x92e   :  { %5207 = vmatprep.mubr.msk.bf16.mxu1 %vm8247_vm15, %v10559_v53  ;;  %vm10639_vm15 = vnez %v10638_v51  ;;  %v3344_v51 = vld [vmem:[#allocation14 + $0x1d8] sm:$0xff] }
 0x935   :  { %5209 = vmatmul.mubr.msk.bf16.gmra.mrb[120].mxu1 %vm10629_vm8, %v10559_v53  ;;  %vm10641_vm8 = vnez %v10640_v32  ;;  %v3343_v32 = vld [vmem:[#allocation14 + $0x1d0] sm:$0xff] }
 0x936   :  { %5211 = vmatprep.mubr.msk.bf16.mxu1 %vm10631_vm0, %v10559_v53  ;;  %vm10643_vm0 = vnez %v10642_v58 }
 0x93d   :  { %5213 = vmatmul.mubr.msk.bf16.gmra.mrb[124].mxu1 %vm10633_vm9, %v10559_v53  ;;  %vm10645_vm9 = vnez %v10644_v59  ;;  %v10653_v59 = vld [vmem:[#allocation47_spill] sm:$0xff] }
 0x93e   :  { %5215 = vmatprep.mubr.msk.bf16.mxu1 %vm10635_vm6, %v10559_v53  ;;  %vm10647_vm6 = vnez %v10646_v40 }
 0x945   :  { %5217 = vmatmul.mubr.msk.bf16.gmra.mrb[128].mxu1 %vm10637_vm14, %v10559_v53  ;;  %vm10649_vm14 = vnez %v10648_v30 }
 0x946   :  { %5219 = vmatprep.mubr.msk.bf16.mxu1 %vm10639_vm15, %v10559_v53 }
 0x94d   :  { %5221 = vmatmul.mubr.msk.bf16.gmra.mrb[132].mxu1 %vm10641_vm8, %v10559_v53 }
 0x94e   :  { %5223 = vmatprep.mubr.msk.bf16.mxu1 %vm10643_vm0, %v10559_v53 }
 0x955   :  { %5225 = vmatmul.mubr.msk.bf16.gmra.mrb[136].mxu1 %vm10645_vm9, %v10559_v53 }
 0x956   :  { %5227 = vmatprep.mubr.msk.bf16.mxu1 %vm10647_vm6, %v10559_v53 }
 0x95d   :  { %5229 = vmatmul.mubr.msk.bf16.gmra.mrb[140].mxu1 %vm10649_vm14, %v10559_v53 }
 0x9f8   :  { %v5767_v54 = vpop.f32.mrb[112].mxu1 }
 0x9f9   :  { %v5768_v2 = vpop.f32.mrb[113].mxu1 }
 0x9fa   :  { %v5769_v42 = vadd.f32 %v5768_v2, %v5767_v54  ;;  %v5770_v27 = vpop.f32.mrb[114].mxu1 }
 0x9fb   :  { %v5771_v20 = vpop.f32.mrb[115].mxu1 }
 0x9fc   :  { %v2456_v44 = vadd.f32 %v5769_v42, %v10650_v23  ;;  %v5772_v50 = vadd.f32 %v5771_v20, %v5770_v27 }
 0x9fe   :  { %v2459_v61 = vadd.f32 %v5772_v50, %v10651_v19  ;;  %6715 = vmatprep.mubr.f32.mxu0 %v2456_v44  ;;  %v10654_v50 = vld [vmem:[#allocation48_spill] sm:$0xff] }
 0xa00   :  { %v5773_v30 = vpop.f32.mrb[116].mxu1  ;;  %6716 = vmatmul.mubr.f32.vlgmr.msra.gmra.mrb[128].mxu0 %v2459_v61  ;;  %v10655_v61 = vld [vmem:[#allocation49_spill] sm:$0xff] }
 0xa01   :  { %v5774_v34 = vpop.f32.mrb[117].mxu1 }
 0xa02   :  { %v5775_v4 = vadd.f32 %v5774_v34, %v5773_v30  ;;  %v5776_v1 = vpop.f32.mrb[118].mxu1 }
 0xa03   :  { %v5777_v40 = vpop.f32.mrb[119].mxu1 }
 0xa04   :  { %v2464_v0 = vadd.f32 %v5775_v4, %v10652_v17  ;;  %v5778_v7 = vadd.f32 %v5777_v40, %v5776_v1 }
 0xa06   :  { %v2467_v58 = vadd.f32 %v5778_v7, %v10653_v59  ;;  %6718 = vmatprep.mubr.f32.mxu0 %v2464_v0  ;;  %v10656_v7 = vld [vmem:[#allocation50_spill] sm:$0xff] }
 0xa08   :  { %v5779_v54 = vpop.f32.mrb[120].mxu1  ;;  %6719 = vmatmul.mubr.f32.gmra.mrb[130].mxu0 %v2467_v58  ;;  %v10657_v58 = vld [vmem:[#allocation51_spill] sm:$0xff] }
 0xa09   :  { %v5780_v2 = vpop.f32.mrb[121].mxu1 }
 0xa0a   :  { %v5781_v42 = vadd.f32 %v5780_v2, %v5779_v54  ;;  %v5782_v27 = vpop.f32.mrb[122].mxu1 }
 0xa0b   :  { %v5783_v20 = vpop.f32.mrb[123].mxu1 }
 0xa0c   :  { %v2472_v44 = vadd.f32 %v5781_v42, %v10654_v50  ;;  %v5784_v19 = vadd.f32 %v5783_v20, %v5782_v27 }
 0xa0e   :  { %v2475_v23 = vadd.f32 %v5784_v19, %v10655_v61  ;;  %6721 = vmatprep.mubr.f32.mxu0 %v2472_v44  ;;  %v10658_v19 = vld [vmem:[#allocation52_spill] sm:$0xff] }
 0xa10   :  { %v5785_v30 = vpop.f32.mrb[124].mxu1  ;;  %6722 = vmatmul.mubr.f32.gmra.mrb[132].mxu0 %v2475_v23  ;;  %v10659_v23 = vld [vmem:[#allocation53_spill] sm:$0xff] }
 0xa11   :  { %v5786_v34 = vpop.f32.mrb[125].mxu1 }
 0xa12   :  { %v5787_v4 = vadd.f32 %v5786_v34, %v5785_v30  ;;  %v5788_v40 = vpop.f32.mrb[126].mxu1 }
 0xa13   :  { %v5789_v1 = vpop.f32.mrb[127].mxu1 }
 0xa14   :  { %v2480_v0 = vadd.f32 %v5787_v4, %v10656_v7  ;;  %v5790_v59 = vadd.f32 %v5789_v1, %v5788_v40 }
 0xa16   :  { %v2483_v17 = vadd.f32 %v5790_v59, %v10657_v58  ;;  %6724 = vmatprep.mubr.f32.mxu0 %v2480_v0  ;;  %v10660_v59 = vld [vmem:[#allocation54_spill] sm:$0xff] }
 0xa18   :  { %v5791_v54 = vpop.f32.mrb[128].mxu1  ;;  %6725 = vmatmul.mubr.f32.gmra.mrb[134].mxu0 %v2483_v17  ;;  %v10661_v17 = vld [vmem:[#allocation55_spill] sm:$0xff] }
 0xa19   :  { %v5792_v2 = vpop.f32.mrb[129].mxu1 }
 0xa1a   :  { %v5793_v42 = vadd.f32 %v5792_v2, %v5791_v54  ;;  %v5794_v27 = vpop.f32.mrb[130].mxu1 }
 0xa1b   :  { %v5795_v20 = vpop.f32.mrb[131].mxu1 }
 0xa1c   :  { %v2488_v44 = vadd.f32 %v5793_v42, %v10658_v19  ;;  %v5796_v61 = vadd.f32 %v5795_v20, %v5794_v27 }
 0xa1e   :  { %v2491_v50 = vadd.f32 %v5796_v61, %v10659_v23  ;;  %6727 = vmatprep.mubr.f32.mxu0 %v2488_v44  ;;  %v10662_v61 = vld [vmem:[#allocation56_spill] sm:$0xff] }
 0xa20   :  { %v5797_v30 = vpop.f32.mrb[132].mxu1  ;;  %6728 = vmatmul.mubr.f32.gmra.mrb[136].mxu0 %v2491_v50  ;;  %v10663_v50 = vld [vmem:[#allocation57_spill] sm:$0xff] }
 0xa21   :  { %v5798_v34 = vpop.f32.mrb[133].mxu1 }
 0xa22   :  { %v5799_v4 = vadd.f32 %v5798_v34, %v5797_v30  ;;  %v5800_v40 = vpop.f32.mrb[134].mxu1 }
 0xa23   :  { %v5801_v1 = vpop.f32.mrb[135].mxu1 }
 0xa24   :  { %v2496_v0 = vadd.f32 %v5799_v4, %v10660_v59  ;;  %v5802_v58 = vadd.f32 %v5801_v1, %v5800_v40 }
 0xa26   :  { %v2499_v7 = vadd.f32 %v5802_v58, %v10661_v17  ;;  %6730 = vmatprep.mubr.f32.mxu0 %v2496_v0  ;;  %v10664_v58 = vld [vmem:[#allocation58_spill] sm:$0xff] }
 0xa28   :  { %v5803_v54 = vpop.f32.mrb[136].mxu1  ;;  %6731 = vmatmul.mubr.f32.gmra.mrb[138].mxu0 %v2499_v7  ;;  %v10665_v7 = vld [vmem:[#allocation59_spill] sm:$0xff] }
 0xa29   :  { %v5804_v2 = vpop.f32.mrb[137].mxu1 }
 0xa2a   :  { %v5805_v42 = vadd.f32 %v5804_v2, %v5803_v54  ;;  %v5806_v27 = vpop.f32.mrb[138].mxu1  ;;  %v10666_v54 = vld [vmem:[#allocation61_spill] sm:$0xff]  ;;  %v2906_v2 = vld [vmem:[#allocation17 + $0x100] sm:$0xff] }
 0xa2b   :  { %v5807_v20 = vpop.f32.mrb[139].mxu1  ;;  %vm10667_vm14 = vnez %v10666_v54  ;;  %v2912_v54 = vld [vmem:[#allocation17 + $0x130] sm:$0xff] }
 0xa2c   :  { %v2504_v44 = vadd.f32 %v5805_v42, %v10662_v61  ;;  %v5808_v23 = vadd.f32 %v5807_v20, %v5806_v27  ;;  %v2908_v42 = vld [vmem:[#allocation17 + $0x110] sm:$0xff]  ;;  %v9327_v27 = vld [vmem:[#allocation15 + $0x2] ss:$0 sm:$0xff] }
 0xa2d   :  { %v2909_v20 = vld [vmem:[#allocation17 + $0x118] sm:$0xff] }
 0xa2e   :  { %v2507_v19 = vadd.f32 %v5808_v23, %v10663_v50  ;;  %6733 = vmatprep.mubr.f32.mxu0 %v2504_v44  ;;  %v2907_v23 = vld [vmem:[#allocation17 + $0x108] sm:$0xff]  ;;  %v7399_v44 = vpack.c.bf16 %v2909_v20, %v2908_v42  ;;  %v2914_v42 = vld [vmem:[#allocation17 + $0x140] sm:$0xff] }
 0xa2f   :  { %v2915_v20 = vld [vmem:[#allocation17 + $0x148] sm:$0xff] }
 0xa30   :  { %v5809_v30 = vpop.f32.mrb[140].mxu1  ;;  %6734 = vmatmul.mubr.f32.gmra.mrb[140].mxu0 %v2507_v19  ;;  %v7395_v19 = vpack.c.bf16 %v2907_v23, %v2906_v2 }
 0xa31   :  { %v5810_v34 = vpop.f32.mrb[141].mxu1 }
 0xa32   :  { %v5811_v4 = vadd.f32 %v5810_v34, %v5809_v30  ;;  %v5812_v40 = vpop.f32.mrb[142].mxu1  ;;  %v2910_v30 = vld [vmem:[#allocation17 + $0x120] sm:$0xff]  ;;  %v2911_v34 = vld [vmem:[#allocation17 + $0x128] sm:$0xff]  ;;  %7396 = vmatprep.subr.bf16.mxu1 %v7395_v19 }
 0xa33   :  { %v5813_v1 = vpop.f32.mrb[143].mxu1  ;;  %7398 = vmatpush3.bf16.msra.mxu1 %v7395_v19 }
 0xa34   :  { %v2512_v0 = vadd.f32 %v5811_v4, %v10664_v58  ;;  %v5814_v17 = vadd.f32 %v5813_v1, %v5812_v40  ;;  %7400 = vmatprep.subr.bf16.mxu1 %v7399_v44  ;;  %v7403_v1 = vpack.c.bf16 %v2911_v34, %v2910_v30  ;;  %v7411_v30 = vpack.c.bf16 %v2915_v20, %v2914_v42 }
 0xa36   :  { %v2515_v59 = vadd.f32 %v5814_v17, %v10665_v7  ;;  %6736 = vmatprep.mubr.f32.mxu0 %v2512_v0  ;;  %v2913_v7 = vld [vmem:[#allocation17 + $0x138] sm:$0xff] }
 0xa37   :  { %7402 = vmatpush3.bf16.msra.mxu1 %v7399_v44  ;;  %v7407_v23 = vpack.c.bf16 %v2913_v7, %v2912_v54  ;;  %v2918_v54 = vld [vmem:[#allocation17 + $0x160] sm:$0xff] }
 0xa38   :  { %6737 = vmatmul.mubr.f32.gmra.mrb[142].mxu0 %v2515_v59  ;;  %7404 = vmatprep.subr.bf16.mxu1 %v7403_v1 }
 0xa39   :  { %6755 = vmatprep.mubr.msk.bf16.mxu0 %vm10667_vm14, %v10559_v53 }
 0xa3b   :  { %7406 = vmatpush3.bf16.msra.mxu1 %v7403_v1 }
 0xa3c   :  { %7408 = vmatprep.subr.bf16.mxu1 %v7407_v23 }
 0xa3f   :  { %7410 = vmatpush3.bf16.msra.mxu1 %v7407_v23 }
 0xa40   :  { %7412 = vmatprep.subr.bf16.mxu1 %v7411_v30 }
 0xa43   :  { %7414 = vmatpush3.bf16.msra.mxu1 %v7411_v30 }
 0xad3   :  { %v6717_v4 = vpop.f32.mrb[128].mxu0 }
 0xad4   :  { %v2615_v17 = vadd.f32 %v6717_v4, %v9327_v27  ;;  %v2609_v40 = vpop.f32.mrb[129].mxu0 }
 0xad5   :  { %v2610_v59 = vadd.f32 %v9327_v27, %v2609_v40  ;;  %v2917_v40 = vld [vmem:[#allocation17 + $0x158] sm:$0xff] }
 0xad6   :  { %v2689_v0 = vmax.f32 %v2615_v17, 0.0  ;;  %v2916_v17 = vld [vmem:[#allocation17 + $0x150] sm:$0xff] }
 0xad7   :  { %v2688_v58 = vmax.f32 %v2610_v59, 0.0  ;;  %v7415_v7 = vpack.c.bf16 %v2917_v40, %v2916_v17  ;;  %v2919_v59 = vld [vmem:[#allocation17 + $0x168] sm:$0xff] }
 0xad8   :  { %v7419_v1 = vpack.c.bf16 %v2919_v59, %v2918_v54 }
 0xad9   :  { %v2704_v2 = vpack.c.bf16 %v2689_v0, %v2688_v58  ;;  %7416 = vmatprep.subr.bf16.mxu1 %v7415_v7 }
 0xada   :  { %7418 = vmatpush3.bf16.msra.mxu1 %v7415_v7 }
 0xadb   :  { %v6720_v50 = vpop.f32.mrb[130].mxu0  ;;  %6739 = vmatprep.subr.bf16.mxu0 %v2704_v2  ;;  %7420 = vmatprep.subr.bf16.mxu1 %v7419_v1 }
 0xadc   :  { %v2625_v4 = vadd.f32 %v6720_v50, %v9327_v27  ;;  %v2619_v61 = vpop.f32.mrb[131].mxu0  ;;  %6740 = vmatpush3.bf16.msra.mxu0 %v2704_v2 }
 0xadd   :  { %v2620_v19 = vadd.f32 %v9327_v27, %v2619_v61 }
 0xade   :  { %v2691_v34 = vmax.f32 %v2625_v4, 0.0  ;;  %7422 = vmatpush3.bf16.msra.mxu1 %v7419_v1 }
 0xadf   :  { %v2690_v44 = vmax.f32 %v2620_v19, 0.0 }
 0xae1   :  { %v2705_v58 = vpack.c.bf16 %v2691_v34, %v2690_v44 }
 0xae3   :  { %v6723_v0 = vpop.f32.mrb[132].mxu0  ;;  %6741 = vmatprep.subr.bf16.mxu0 %v2705_v58 }
 0xae4   :  { %v2635_v50 = vadd.f32 %v6723_v0, %v9327_v27  ;;  %v2629_v2 = vpop.f32.mrb[133].mxu0  ;;  %6742 = vmatpush3.bf16.msra.mxu0 %v2705_v58 }
 0xae5   :  { %v2630_v61 = vadd.f32 %v9327_v27, %v2629_v2 }
 0xae6   :  { %v2693_v42 = vmax.f32 %v2635_v50, 0.0 }
 0xae7   :  { %v2692_v20 = vmax.f32 %v2630_v61, 0.0 }
 0xae9   :  { %v2706_v23 = vpack.c.bf16 %v2693_v42, %v2692_v20 }
 0xaeb   :  { %v6726_v4 = vpop.f32.mrb[134].mxu0  ;;  %6743 = vmatprep.subr.bf16.mxu0 %v2706_v23 }
 0xaec   :  { %v2645_v19 = vadd.f32 %v6726_v4, %v9327_v27  ;;  %v2639_v34 = vpop.f32.mrb[135].mxu0  ;;  %6744 = vmatpush3.bf16.msra.mxu0 %v2706_v23 }
 0xaed   :  { %v2640_v17 = vadd.f32 %v9327_v27, %v2639_v34 }
 0xaee   :  { %v2695_v40 = vmax.f32 %v2645_v19, 0.0 }
 0xaef   :  { %v2694_v30 = vmax.f32 %v2640_v17, 0.0 }
 0xaf1   :  { %v2707_v44 = vpack.c.bf16 %v2695_v40, %v2694_v30 }
 0xaf3   :  { %v6729_v58 = vpop.f32.mrb[136].mxu0  ;;  %6745 = vmatprep.subr.bf16.mxu0 %v2707_v44 }
 0xaf4   :  { %v2655_v54 = vadd.f32 %v6729_v58, %v9327_v27  ;;  %v2649_v59 = vpop.f32.mrb[137].mxu0  ;;  %6746 = vmatpush3.bf16.msra.mxu0 %v2707_v44 }
 0xaf5   :  { %v2650_v7 = vadd.f32 %v9327_v27, %v2649_v59 }
 0xaf6   :  { %v2697_v0 = vmax.f32 %v2655_v54, 0.0 }
 0xaf7   :  { %v2696_v50 = vmax.f32 %v2650_v7, 0.0 }
 0xaf9   :  { %v2708_v2 = vpack.c.bf16 %v2697_v0, %v2696_v50 }
 0xafb   :  { %v6732_v61 = vpop.f32.mrb[138].mxu0  ;;  %6747 = vmatprep.subr.bf16.mxu0 %v2708_v2 }
 0xafc   :  { %v2665_v1 = vadd.f32 %v6732_v61, %v9327_v27  ;;  %v2659_v42 = vpop.f32.mrb[139].mxu0  ;;  %6748 = vmatpush3.bf16.msra.mxu0 %v2708_v2 }
 0xafd   :  { %v2660_v20 = vadd.f32 %v9327_v27, %v2659_v42  ;;  %v10668_v42 = vld [vmem:[#allocation62_spill] sm:$0xff] }
 0xafe   :  { %v2699_v23 = vmax.f32 %v2665_v1, 0.0  ;;  %vm10669_vm14 = vnez %v10668_v42  ;;  %v3341_v42 = vld [vmem:[#allocation14 + $0x1c0] sm:$0xff] }
 0xaff   :  { %v2698_v4 = vmax.f32 %v2660_v20, 0.0  ;;  %v10670_v20 = vld [vmem:[#allocation63_spill] sm:$0xff] }
 0xb00   :  { %vm10671_vm6 = vnez %v10670_v20 }
 0xb01   :  { %v2709_v19 = vpack.c.bf16 %v2699_v23, %v2698_v4  ;;  %v10672_v23 = vld [vmem:[#allocation64_spill] sm:$0xff]  ;;  %v10674_v4 = vld [vmem:[#allocation65_spill] sm:$0xff] }
 0xb02   :  { %vm10673_vm9 = vnez %v10672_v23  ;;  %vm10675_vm0 = vnez %v10674_v4  ;;  %v3337_v4 = vld [vmem:[#allocation14 + $0x1a0] sm:$0xff]  ;;  %v3338_v23 = vld [vmem:[#allocation14 + $0x1a8] sm:$0xff] }
 0xb03   :  { %v6735_v34 = vpop.f32.mrb[140].mxu0  ;;  %6749 = vmatprep.subr.bf16.mxu0 %v2709_v19 }
 0xb04   :  { %v2675_v17 = vadd.f32 %v6735_v34, %v9327_v27  ;;  %v2669_v40 = vpop.f32.mrb[141].mxu0  ;;  %6750 = vmatpush3.bf16.msra.mxu0 %v2709_v19 }
 0xb05   :  { %v2670_v30 = vadd.f32 %v9327_v27, %v2669_v40 }
 0xb06   :  { %v2701_v44 = vmax.f32 %v2675_v17, 0.0 }
 0xb07   :  { %v2700_v58 = vmax.f32 %v2670_v30, 0.0 }
 0xb09   :  { %v2710_v54 = vpack.c.bf16 %v2701_v44, %v2700_v58 }
 0xb0b   :  { %v6738_v59 = vpop.f32.mrb[142].mxu0  ;;  %6751 = vmatprep.subr.bf16.mxu0 %v2710_v54 }
 0xb0c   :  { %v2685_v7 = vadd.f32 %v6738_v59, %v9327_v27  ;;  %v2679_v0 = vpop.f32.mrb[143].mxu0  ;;  %6752 = vmatpush3.bf16.msra.mxu0 %v2710_v54 }
 0xb0d   :  { %v2680_v50 = vadd.f32 %v9327_v27, %v2679_v0  ;;  %v10688_v0 = vld [vmem:[#allocation30_spill] sm:$0xff] }
 0xb0e   :  { %v2703_v2 = vmax.f32 %v2685_v7, 0.0  ;;  %v10686_v7 = vld [vmem:[#allocation76_spill] sm:$0xff] }
 0xb0f   :  { %v2702_v61 = vmax.f32 %v2680_v50, 0.0  ;;  %v2920_v50 = vld [vmem:[#allocation17 + $0x170] sm:$0xff] }
 0xb11   :  { %v2711_v1 = vpack.c.bf16 %v2703_v2, %v2702_v61  ;;  %v2921_v2 = vld [vmem:[#allocation17 + $0x178] sm:$0xff] }
 0xb12   :  { %v7423_v61 = vpack.c.bf16 %v2921_v2, %v2920_v50 }
 0xb13   :  { %6753 = vmatprep.subr.bf16.mxu0 %v2711_v1 }
 0xb14   :  { %6754 = vmatpush3.bf16.msra.mxu0 %v2711_v1  ;;  %7424 = vmatprep.subr.bf16.mxu1 %v7423_v61 }
 0xb15   :  { %7426 = vmatpush3.bf16.msra.mxu1 %v7423_v61 }
 0xb17   :  { %6756 = vmatmul.mubr.msk.bf16.vlgmr.msra.gmra.mrb[144].mxu0 %vm10669_vm14, %v10559_v53 }
 0xb18   :  { %6759 = vmatprep.mubr.msk.bf16.mxu0 %vm10671_vm6, %v10559_v53 }
 0xb1f   :  { %6760 = vmatmul.mubr.msk.bf16.gmra.mrb[148].mxu0 %vm10673_vm9, %v10559_v53 }
 0xb20   :  { %6763 = vmatprep.mubr.msk.bf16.mxu0 %vm10675_vm0, %v10559_v53 }
 0xb27   :  { %6764 = vmatmul.mubr.msk.bf16.gmra.mrb[152].mxu0 %vm10608_vm4, %v10559_v53 }
 0xb28   :  { %6767 = vmatprep.mubr.msk.bf16.mxu0 %vm10610_vm2, %v10559_v53 }
 0xb2f   :  { %6768 = vmatmul.mubr.msk.bf16.gmra.mrb[156].mxu0 %vm10612_vm1, %v10559_v53 }
 0xb30   :  { %6771 = vmatprep.mubr.msk.bf16.mxu0 %vm10614_vm7, %v10559_v53 }
 0xb37   :  { %6772 = vmatmul.mubr.msk.bf16.gmra.mrb[160].mxu0 %vm10616_vm13, %v10559_v53  ;;  %vm10687_vm13 = vnez %v10686_v7 }
 0xb38   :  { %6775 = vmatprep.mubr.msk.bf16.mxu0 %vm10618_vm5, %v10559_v53  ;;  %vm10689_vm5 = vnez %v10688_v0 }
 0xb3f   :  { %6776 = vmatmul.mubr.msk.bf16.gmra.mrb[164].mxu0 %vm8595_vm10, %v10559_v53 }
 0xb40   :  { %6779 = vmatprep.mubr.msk.bf16.mxu0 %vm8599_vm3, %v10559_v53 }
 0xb47   :  { %6780 = vmatmul.mubr.msk.bf16.gmra.mrb[168].mxu0 %vm8617_vm11, %v10559_v53 }
 0xb48   :  { %6783 = vmatprep.mubr.msk.bf16.mxu0 %vm8621_vm12, %v10559_v53 }
 0xb4f   :  { %6784 = vmatmul.mubr.msk.bf16.gmra.mrb[172].mxu0 %vm10687_vm13, %v10559_v53 }
 0xb50   :  { %5265 = vmatprep.mubr.msk.bf16.mxu0 %vm10689_vm5, %v10559_v53  ;;  %vm10690_vm5 = vnez %v10454_v47 }
 0xbea   :  { %v6757_v1 = vpop.f32.mrb[144].mxu0 }
 0xbeb   :  { %v2746_v54 = vpop.f32.mrb[145].mxu0  ;;  %v2875_v7 = vadd.f32 %v6757_v1, %v9123_v37 }
 0xbec   :  { %v2873_v58 = vadd.f32 %v2746_v54, %v9107_v36  ;;  %v6758_v44 = vpop.f32.mrb[146].mxu0 }
 0xbed   :  { %v2749_v59 = vpop.f32.mrb[147].mxu0  ;;  %v2876_v0 = vadd.f32 %v6758_v44, %v9120_v38 }
 0xbee   :  { %v2874_v30 = vadd.f32 %v2749_v59, %v9103_v49  ;;  %6819 = vmatprep.mubr.f32.mxu1 %v2873_v58 }
 0xbf0   :  { %6820 = vmatmul.mubr.f32.vlgmr.msra.gmra.mrb[144].mxu1 %v2874_v30 }
 0xbf1   :  { %6822 = vmatprep.mubr.f32.mxu1 %v2875_v7 }
 0xbf2   :  { %v6761_v40 = vpop.f32.mrb[148].mxu0 }
 0xbf3   :  { %v2762_v17 = vpop.f32.mrb[149].mxu0  ;;  %v2879_v34 = vadd.f32 %v6761_v40, %v9171_v6 }
 0xbf4   :  { %v2877_v50 = vadd.f32 %v2762_v17, %v9147_v29  ;;  %v6762_v2 = vpop.f32.mrb[150].mxu0  ;;  %6823 = vmatmul.mubr.f32.gmra.mrb[146].mxu1 %v2876_v0 }
 0xbf5   :  { %v2765_v61 = vpop.f32.mrb[151].mxu0  ;;  %v2880_v58 = vadd.f32 %v6762_v2, %v9168_v41 }
 0xbf6   :  { %v2878_v54 = vadd.f32 %v2765_v61, %v9144_v31  ;;  %6825 = vmatprep.mubr.f32.mxu1 %v2877_v50 }
 0xbf8   :  { %6826 = vmatmul.mubr.f32.gmra.mrb[148].mxu1 %v2878_v54 }
 0xbf9   :  { %6828 = vmatprep.mubr.f32.mxu1 %v2879_v34 }
 0xbfa   :  { %v6765_v30 = vpop.f32.mrb[152].mxu0 }
 0xbfb   :  { %v2778_v59 = vpop.f32.mrb[153].mxu0  ;;  %v2883_v0 = vadd.f32 %v6765_v30, %v9207_v11 }
 0xbfc   :  { %v2881_v44 = vadd.f32 %v2778_v59, %v9185_v10  ;;  %v6766_v7 = vpop.f32.mrb[154].mxu0  ;;  %6829 = vmatmul.mubr.f32.gmra.mrb[150].mxu1 %v2880_v58 }
 0xbfd   :  { %v2781_v1 = vpop.f32.mrb[155].mxu0  ;;  %v2884_v40 = vadd.f32 %v6766_v7, %v9204_v5 }
 0xbfe   :  { %v2882_v17 = vadd.f32 %v2781_v1, %v9178_v22  ;;  %6831 = vmatprep.mubr.f32.mxu1 %v2881_v44 }
 0xc00   :  { %6832 = vmatmul.mubr.f32.gmra.mrb[152].mxu1 %v2882_v17 }
 0xc01   :  { %6834 = vmatprep.mubr.f32.mxu1 %v2883_v0 }
 0xc02   :  { %v6769_v50 = vpop.f32.mrb[156].mxu0 }
 0xc03   :  { %v2794_v34 = vpop.f32.mrb[157].mxu0  ;;  %v2887_v58 = vadd.f32 %v6769_v50, %v9249_v48 }
 0xc04   :  { %v2885_v2 = vadd.f32 %v2794_v34, %v9231_v46  ;;  %v6770_v61 = vpop.f32.mrb[158].mxu0  ;;  %6835 = vmatmul.mubr.f32.gmra.mrb[154].mxu1 %v2884_v40 }
 0xc05   :  { %v2797_v54 = vpop.f32.mrb[159].mxu0  ;;  %v2888_v30 = vadd.f32 %v6770_v61, %v9246_v15 }
 0xc06   :  { %v2886_v59 = vadd.f32 %v2797_v54, %v9228_v39  ;;  %6837 = vmatprep.mubr.f32.mxu1 %v2885_v2 }
 0xc08   :  { %6838 = vmatmul.mubr.f32.gmra.mrb[156].mxu1 %v2886_v59 }
 0xc09   :  { %6840 = vmatprep.mubr.f32.mxu1 %v2887_v58 }
 0xc0a   :  { %v6773_v44 = vpop.f32.mrb[160].mxu0 }
 0xc0b   :  { %v2810_v1 = vpop.f32.mrb[161].mxu0  ;;  %v2891_v40 = vadd.f32 %v6773_v44, %v9137_v3 }
 0xc0c   :  { %v2889_v7 = vadd.f32 %v2810_v1, %v9116_v24  ;;  %v6774_v17 = vpop.f32.mrb[162].mxu0  ;;  %6841 = vmatmul.mubr.f32.gmra.mrb[158].mxu1 %v2888_v30 }
 0xc0d   :  { %v2813_v0 = vpop.f32.mrb[163].mxu0  ;;  %v2892_v50 = vadd.f32 %v6774_v17, %v9132_v63 }
 0xc0e   :  { %v2890_v34 = vadd.f32 %v2813_v0, %v9112_v28  ;;  %6843 = vmatprep.mubr.f32.mxu1 %v2889_v7 }
 0xc10   :  { %6844 = vmatmul.mubr.f32.gmra.mrb[160].mxu1 %v2890_v34 }
 0xc11   :  { %6846 = vmatprep.mubr.f32.mxu1 %v2891_v40 }
 0xc12   :  { %v6777_v2 = vpop.f32.mrb[164].mxu0 }
 0xc13   :  { %v2826_v54 = vpop.f32.mrb[165].mxu0  ;;  %v2895_v30 = vadd.f32 %v6777_v2, %v9181_v55 }
 0xc14   :  { %v2893_v61 = vadd.f32 %v2826_v54, %v9156_v33  ;;  %v6778_v59 = vpop.f32.mrb[166].mxu0  ;;  %6847 = vmatmul.mubr.f32.gmra.mrb[162].mxu1 %v2892_v50 }
 0xc15   :  { %v2829_v58 = vpop.f32.mrb[167].mxu0  ;;  %v2896_v44 = vadd.f32 %v6778_v59, %v9174_v9 }
 0xc16   :  { %v2894_v1 = vadd.f32 %v2829_v58, %v9152_v21  ;;  %6849 = vmatprep.mubr.f32.mxu1 %v2893_v61 }
 0xc18   :  { %6850 = vmatmul.mubr.f32.gmra.mrb[164].mxu1 %v2894_v1 }
 0xc19   :  { %6852 = vmatprep.mubr.f32.mxu1 %v2895_v30 }
 0xc1a   :  { %v6781_v7 = vpop.f32.mrb[168].mxu0 }
 0xc1b   :  { %v2842_v0 = vpop.f32.mrb[169].mxu0  ;;  %v2899_v50 = vadd.f32 %v6781_v7, %v9222_v62 }
 0xc1c   :  { %v2897_v17 = vadd.f32 %v2842_v0, %v9200_v45  ;;  %v6782_v34 = vpop.f32.mrb[170].mxu0  ;;  %6853 = vmatmul.mubr.f32.gmra.mrb[166].mxu1 %v2896_v44 }
 0xc1d   :  { %v2845_v40 = vpop.f32.mrb[171].mxu0  ;;  %v2900_v2 = vadd.f32 %v6782_v34, %v9218_v26  ;;  %v3333_v34 = vld [vmem:[#allocation14 + $0x180] sm:$0xff] }
 0xc1e   :  { %v2898_v54 = vadd.f32 %v2845_v40, %v9194_v52  ;;  %6855 = vmatprep.mubr.f32.mxu1 %v2897_v17 }
 0xc20   :  { %6856 = vmatmul.mubr.f32.gmra.mrb[168].mxu1 %v2898_v54  ;;  %v3334_v54 = vld [vmem:[#allocation14 + $0x188] sm:$0xff] }
 0xc21   :  { %6858 = vmatprep.mubr.f32.mxu1 %v2899_v50  ;;  %v3335_v50 = vld [vmem:[#allocation14 + $0x190] sm:$0xff]  ;;  %v7427_v19 = vpack.c.bf16 %v3334_v54, %v3333_v34  ;;  %v3342_v34 = vld [vmem:[#allocation14 + $0x1c8] sm:$0xff] }
 0xc22   :  { %v6785_v61 = vpop.f32.mrb[172].mxu0 }
 0xc23   :  { %v2858_v58 = vpop.f32.mrb[173].mxu0  ;;  %v2903_v44 = vadd.f32 %v6785_v61, %v9257_v12  ;;  %7428 = vmatprep.subr.bf16.mxu1 %v7427_v19  ;;  %v7435_v61 = vpack.c.bf16 %v3338_v23, %v3337_v4  ;;  %v7447_v23 = vpack.c.bf16 %v3344_v51, %v3343_v32 }
 0xc24   :  { %v2901_v59 = vadd.f32 %v2858_v58, %v9240_v57  ;;  %v6786_v1 = vpop.f32.mrb[174].mxu0  ;;  %6859 = vmatmul.mubr.f32.gmra.mrb[170].mxu1 %v2900_v2  ;;  %v3336_v58 = vld [vmem:[#allocation14 + $0x198] sm:$0xff] }
 0xc25   :  { %v2861_v30 = vpop.f32.mrb[175].mxu0  ;;  %v2904_v7 = vadd.f32 %v6786_v1, %v9252_v18  ;;  %v7431_v2 = vpack.c.bf16 %v3336_v58, %v3335_v50  ;;  %7430 = vmatpush3.bf16.msra.mxu1 %v7427_v19  ;;  %v3340_v1 = vld [vmem:[#allocation14 + $0x1b8] sm:$0xff]  ;;  %v7443_v50 = vpack.c.bf16 %v3342_v34, %v3341_v42 }
 0xc26   :  { %v2902_v0 = vadd.f32 %v2861_v30, %v9236_v35  ;;  %6861 = vmatprep.mubr.f32.mxu1 %v2901_v59 }
 0xc27   :  { %7432 = vmatprep.subr.bf16.mxu1 %v7431_v2 }
 0xc28   :  { %6862 = vmatmul.mubr.f32.gmra.mrb[172].mxu1 %v2902_v0  ;;  %v3339_v0 = vld [vmem:[#allocation14 + $0x1b0] sm:$0xff] }
 0xc29   :  { %6864 = vmatprep.mubr.f32.mxu1 %v2903_v44  ;;  %7434 = vmatpush3.bf16.msra.mxu1 %v7431_v2  ;;  %v9429_v2 = vld [vmem:[#allocation18 + $0x2] ss:$0 sm:$0xff] }
 0xc2a   :  { %7436 = vmatprep.subr.bf16.mxu1 %v7435_v61 }
 0xc2c   :  { %6865 = vmatmul.mubr.f32.gmra.mrb[174].mxu1 %v2904_v7  ;;  %v7439_v7 = vpack.c.bf16 %v3340_v1, %v3339_v0 }
 0xc2d   :  { %7438 = vmatpush3.bf16.msra.mxu1 %v7435_v61 }
 0xc2e   :  { %7440 = vmatprep.subr.bf16.mxu1 %v7439_v7 }
 0xc31   :  { %7442 = vmatpush3.bf16.msra.mxu1 %v7439_v7 }
 0xc32   :  { %7444 = vmatprep.subr.bf16.mxu1 %v7443_v50 }
 0xc35   :  { %7446 = vmatpush3.bf16.msra.mxu1 %v7443_v50 }
 0xc36   :  { %7448 = vmatprep.subr.bf16.mxu1 %v7447_v23 }
 0xc39   :  { %7450 = vmatpush3.bf16.msra.mxu1 %v7447_v23 }
 0xcc3   :  { %v6821_v17 = vpop.f32.mrb[144].mxu1 }
 0xcc4   :  { %v2996_v40 = vpop.f32.mrb[145].mxu1  ;;  %v3002_v42 = vadd.f32 %v6821_v17, %v9429_v2 }
 0xcc5   :  { %v2997_v1 = vadd.f32 %v9429_v2, %v2996_v40 }
 0xcc6   :  { %v3156_v32 = vmax.f32 %v3002_v42, 0.0 }
 0xcc7   :  { %v6824_v27 = vpop.f32.mrb[146].mxu1  ;;  %v3155_v34 = vmax.f32 %v2997_v1, 0.0 }
 0xcc8   :  { %v3006_v30 = vpop.f32.mrb[147].mxu1  ;;  %v3012_v50 = vadd.f32 %v6824_v27, %v9429_v2  ;;  %v9445_v43 = vadd.f32 %v3156_v32, %v9103_v49 }
 0xcc9   :  { %v3007_v16 = vadd.f32 %v9429_v2, %v3006_v30  ;;  %v9449_v40 = vadd.f32 %v3155_v34, %v9107_v36 }
 0xcca   :  { %v3158_v23 = vmax.f32 %v3012_v50, 0.0 }
 0xccb   :  { %v6827_v59 = vpop.f32.mrb[148].mxu1  ;;  %v3157_v25 = vmax.f32 %v3007_v16, 0.0 }
 0xccc   :  { %v3016_v44 = vpop.f32.mrb[149].mxu1  ;;  %v3022_v1 = vadd.f32 %v6827_v59, %v9429_v2  ;;  %v9462_v16 = vadd.f32 %v3158_v23, %v9120_v38 }
 0xccd   :  { %v3017_v27 = vadd.f32 %v9429_v2, %v3016_v44  ;;  %v3219_v44 = vpack.c.bf16 %v9445_v43, %v9449_v40 }
 0xccf   :  { %v6830_v20 = vpop.f32.mrb[150].mxu1  ;;  %v3159_v34 = vmax.f32 %v3017_v27, 0.0 }
 0xcd0   :  { %v3026_v54 = vpop.f32.mrb[151].mxu1 }
 0xcd3   :  { %v6833_v58 = vpop.f32.mrb[152].mxu1 }
 0xcd4   :  { %v3036_v19 = vpop.f32.mrb[153].mxu1  ;;  %v3042_v23 = vadd.f32 %v6833_v58, %v9429_v2 }
 0xcd7   :  { %v9425_v4 = vpop.f32.mrb[154].mxu1 }
 0xcd8   :  { %v9427_v13 = vpop.f32.mrb[155].mxu1 }
 0xcdb   :  { %v9431_v0 = vpop.f32.mrb[156].mxu1 }
 0xcdc   :  { %v9433_v61 = vpop.f32.mrb[157].mxu1 }
 0xcdf   :  { %v9437_v7 = vpop.f32.mrb[158].mxu1 }
 0xce0   :  { %v9439_v51 = vpop.f32.mrb[159].mxu1 }
 0xce3   :  { %v6845_v56 = vpop.f32.mrb[160].mxu1 }
 0xce4   :  { %v3082_v8 = vadd.f32 %v6845_v56, %v9429_v2  ;;  %v3076_v60 = vpop.f32.mrb[161].mxu1 }
 0xce5   :  { %v3077_v17 = vadd.f32 %v9429_v2, %v3076_v60 }
 0xce6   :  { %v3172_v42 = vmax.f32 %v3082_v8, 0.0  ;;  %v9465_v8 = vadd.f32 %v3157_v25, %v9123_v37 }
 0xce7   :  { %v3171_v30 = vmax.f32 %v3077_v17, 0.0  ;;  %v6848_v14 = vpop.f32.mrb[162].mxu1  ;;  %v3032_v17 = vadd.f32 %v6830_v20, %v9429_v2 }
 0xce8   :  { %v9454_v56 = vadd.f32 %v3172_v42, %v9112_v28  ;;  %v3092_v49 = vadd.f32 %v6848_v14, %v9429_v2  ;;  %v3086_v32 = vpop.f32.mrb[163].mxu1  ;;  %v3160_v28 = vmax.f32 %v3022_v1, 0.0  ;;  %v3027_v42 = vadd.f32 %v9429_v2, %v3026_v54 }
 0xce9   :  { %v9458_v60 = vadd.f32 %v3171_v30, %v9116_v24  ;;  %v3087_v36 = vadd.f32 %v9429_v2, %v3086_v32  ;;  %v3037_v30 = vadd.f32 %v9429_v2, %v3036_v19  ;;  %v3220_v20 = vpack.c.bf16 %v9462_v16, %v9465_v8 }
 0xcea   :  { %v3174_v59 = vmax.f32 %v3092_v49, 0.0  ;;  %v9489_v54 = vadd.f32 %v3159_v34, %v9147_v29  ;;  %v3052_v34 = vadd.f32 %v9425_v4, %v9429_v2 }
 0xceb   :  { %v3173_v50 = vmax.f32 %v3087_v36, 0.0  ;;  %v6851_v14 = vpop.f32.mrb[164].mxu1  ;;  %v3227_v24 = vpack.c.bf16 %v9454_v56, %v9458_v60  ;;  %v3162_v36 = vmax.f32 %v3032_v17, 0.0 }
 0xcec   :  { %v9474_v38 = vadd.f32 %v3174_v59, %v9132_v63  ;;  %v3102_v37 = vadd.f32 %v6851_v14, %v9429_v2  ;;  %v3096_v25 = vpop.f32.mrb[165].mxu1  ;;  %v9486_v63 = vadd.f32 %v3160_v28, %v9144_v31  ;;  %v3161_v59 = vmax.f32 %v3027_v42, 0.0 }
 0xced   :  { %v9479_v1 = vadd.f32 %v3173_v50, %v9137_v3  ;;  %v3097_v27 = vadd.f32 %v9429_v2, %v3096_v25  ;;  %5919 = vmatprep.subr.bf16.mxu0 %v3227_v24  ;;  %v3164_v14 = vmax.f32 %v3042_v23, 0.0  ;;  %v3163_v28 = vmax.f32 %v3037_v30, 0.0 }
 0xcee   :  { %v3176_v49 = vmax.f32 %v3102_v37, 0.0  ;;  %5920 = vmatpush3.bf16.msra.mxu0 %v3219_v44  ;;  %v3047_v24 = vadd.f32 %v9429_v2, %v9427_v13  ;;  %v9510_v25 = vadd.f32 %v3162_v36, %v9168_v41  ;;  %v9513_v23 = vadd.f32 %v3161_v59, %v9171_v6 }
 0xcef   :  { %v3175_v58 = vmax.f32 %v3097_v27, 0.0  ;;  %v6854_v32 = vpop.f32.mrb[166].mxu1  ;;  %v3228_v3 = vpack.c.bf16 %v9474_v38, %v9479_v1  ;;  %v9520_v30 = vadd.f32 %v3164_v14, %v9178_v22  ;;  %v9527_v41 = vadd.f32 %v3163_v28, %v9185_v10 }
 0xcf0   :  { %v9494_v19 = vadd.f32 %v3176_v49, %v9152_v21  ;;  %v3112_v44 = vadd.f32 %v6854_v32, %v9429_v2  ;;  %v3106_v50 = vpop.f32.mrb[167].mxu1  ;;  %v3166_v6 = vmax.f32 %v3052_v34, 0.0  ;;  %v3057_v22 = vadd.f32 %v9429_v2, %v9433_v61 }
 0xcf1   :  { %v9498_v31 = vadd.f32 %v3175_v58, %v9156_v33  ;;  %v3107_v29 = vadd.f32 %v9429_v2, %v3106_v50  ;;  %5921 = vmatprep.subr.bf16.mxu0 %v3228_v3  ;;  %v3221_v33 = vpack.c.bf16 %v9486_v63, %v9489_v54  ;;  %v3165_v58 = vmax.f32 %v3047_v24, 0.0 }
 0xcf2   :  { %v3178_v17 = vmax.f32 %v3112_v44, 0.0  ;;  %5922 = vmatpush3.bf16.msra.mxu0 %v3220_v20  ;;  %v3222_v50 = vpack.c.bf16 %v9510_v25, %v9513_v23  ;;  %v9546_v61 = vadd.f32 %v3166_v6, %v9204_v5  ;;  %v3223_v28 = vpack.c.bf16 %v9520_v30, %v9527_v41 }
 0xcf3   :  { %v3177_v21 = vmax.f32 %v3107_v29, 0.0  ;;  %v6857_v42 = vpop.f32.mrb[168].mxu1  ;;  %v3229_v37 = vpack.c.bf16 %v9494_v19, %v9498_v31  ;;  %v9549_v29 = vadd.f32 %v3165_v58, %v9207_v11  ;;  %v3167_v24 = vmax.f32 %v3057_v22, 0.0 }
 0xcf4   :  { %v9516_v4 = vadd.f32 %v3178_v17, %v9174_v9  ;;  %v3122_v13 = vadd.f32 %v6857_v42, %v9429_v2  ;;  %v3116_v27 = vpop.f32.mrb[169].mxu1  ;;  %v3062_v9 = vadd.f32 %v9431_v0, %v9429_v2  ;;  %v3072_v42 = vadd.f32 %v9437_v7, %v9429_v2 }
 0xcf5   :  { %v9523_v49 = vadd.f32 %v3177_v21, %v9181_v55  ;;  %v3117_v20 = vadd.f32 %v9429_v2, %v3116_v27  ;;  %5923 = vmatprep.subr.bf16.mxu0 %v3229_v37  ;;  %v3067_v5 = vadd.f32 %v9429_v2, %v9439_v51  ;;  %v3224_v7 = vpack.c.bf16 %v9546_v61, %v9549_v29 }
 0xcf6   :  { %v3180_v32 = vmax.f32 %v3122_v13, 0.0  ;;  %5924 = vmatpush3.bf16.msra.mxu0 %v3221_v33  ;;  %v3168_v34 = vmax.f32 %v3062_v9, 0.0 }
 0xcf7   :  { %v3179_v3 = vmax.f32 %v3117_v20, 0.0  ;;  %v6860_v36 = vpop.f32.mrb[170].mxu1  ;;  %v3230_v55 = vpack.c.bf16 %v9516_v4, %v9523_v49  ;;  %v3169_v9 = vmax.f32 %v3067_v5, 0.0  ;;  %v10709_v5 = vld [vmem:[#allocation40_spill] sm:$0xff] }
 0xcf8   :  { %v9536_v59 = vadd.f32 %v3180_v32, %v9194_v52  ;;  %v3132_v10 = vadd.f32 %v6860_v36, %v9429_v2  ;;  %v3126_v44 = vpop.f32.mrb[171].mxu1  ;;  %v9570_v6 = vadd.f32 %v3168_v34, %v9228_v39  ;;  %v3170_v32 = vmax.f32 %v3072_v42, 0.0  ;;  %v10699_v34 = vld [vmem:[#allocation34_spill] sm:$0xff]  ;;  %v4157_v42 = vld [vmem:[#allocation14 + $0x250] sm:$0xff] }
 0xcf9   :  { %v9542_v14 = vadd.f32 %v3179_v3, %v9200_v45  ;;  %v3127_v0 = vadd.f32 %v9429_v2, %v3126_v44  ;;  %5925 = vmatprep.subr.bf16.mxu0 %v3230_v55  ;;  %vm10700_vm10 = vnez %v10699_v34 }
 0xcfa   :  { %v3182_v52 = vmax.f32 %v3132_v10, 0.0  ;;  %5926 = vmatpush3.bf16.msra.mxu0 %v3222_v50  ;;  %v9588_v50 = vadd.f32 %v3170_v32, %v9246_v15 }
 0xcfb   :  { %v3181_v17 = vmax.f32 %v3127_v0, 0.0  ;;  %v6863_v21 = vpop.f32.mrb[172].mxu1  ;;  %v3231_v45 = vpack.c.bf16 %v9536_v59, %v9542_v14 }
 0xcfc   :  { %v9560_v11 = vadd.f32 %v3182_v52, %v9218_v26  ;;  %v3142_v37 = vadd.f32 %v6863_v21, %v9429_v2  ;;  %v3136_v33 = vpop.f32.mrb[173].mxu1  ;;  %v9573_v26 = vadd.f32 %v3167_v24, %v9231_v46  ;;  %v10701_v24 = vld [vmem:[#allocation35_spill] sm:$0xff]  ;;  %v10705_v21 = vld [vmem:[#allocation37_spill] sm:$0xff] }
 0xcfd   :  { %v9564_v13 = vadd.f32 %v3181_v17, %v9222_v62  ;;  %v3137_v27 = vadd.f32 %v9429_v2, %v3136_v33  ;;  %5927 = vmatprep.subr.bf16.mxu0 %v3231_v45  ;;  %v10703_v17 = vld [vmem:[#allocation36_spill] sm:$0xff]  ;;  %v10713_v33 = vld [vmem:[#allocation42_spill] sm:$0xff] }
 0xcfe   :  { %v3184_v20 = vmax.f32 %v3142_v37, 0.0  ;;  %5928 = vmatpush3.bf16.msra.mxu0 %v3223_v28  ;;  %v10697_v28 = vld [vmem:[#allocation33_spill] sm:$0xff]  ;;  %v4158_v45 = vld [vmem:[#allocation14 + $0x258] sm:$0xff] }
 0xcff   :  { %v3183_v51 = vmax.f32 %v3137_v27, 0.0  ;;  %v6866_v58 = vpop.f32.mrb[174].mxu1  ;;  %v3232_v62 = vpack.c.bf16 %v9560_v11, %v9564_v13  ;;  %vm10698_vm3 = vnez %v10697_v28  ;;  %v10711_v37 = vld [vmem:[#allocation41_spill] sm:$0xff]  ;;  %v10715_v27 = vld [vmem:[#allocation43_spill] sm:$0xff] }
 0xd00   :  { %v9578_v22 = vadd.f32 %v3184_v20, %v9236_v35  ;;  %v3152_v3 = vadd.f32 %v6866_v58, %v9429_v2  ;;  %v3146_v36 = vpop.f32.mrb[175].mxu1  ;;  %v9591_v35 = vadd.f32 %v3169_v9, %v9249_v48  ;;  %v10691_v48 = vld [vmem:[#allocation29_spill] sm:$0xff]  ;;  %v3345_v20 = vld [vmem:[#allocation14 + $0x1e0] sm:$0xff] }
 0xd01   :  { %v9582_v55 = vadd.f32 %v3183_v51, %v9240_v57  ;;  %v3147_v39 = vadd.f32 %v9429_v2, %v3146_v36  ;;  %5929 = vmatprep.subr.bf16.mxu0 %v3232_v62  ;;  %v3225_v57 = vpack.c.bf16 %v9570_v6, %v9573_v26  ;;  %vm10692_vm13 = vnez %v10691_v48  ;;  %v3347_v58 = vld [vmem:[#allocation14 + $0x1f0] sm:$0xff]  ;;  %v3348_v62 = vld [vmem:[#allocation14 + $0x1f8] sm:$0xff] }
 0xd02   :  { %v3186_v46 = vmax.f32 %v3152_v3, 0.0  ;;  %5930 = vmatpush3.bf16.msra.mxu0 %v3224_v7  ;;  %v3226_v15 = vpack.c.bf16 %v9588_v50, %v9591_v35  ;;  %v3346_v7 = vld [vmem:[#allocation14 + $0x1e8] sm:$0xff]  ;;  %v7455_v32 = vpack.c.bf16 %v3348_v62, %v3347_v58  ;;  %v10719_v58 = vld [vmem:[#allocation46_spill] sm:$0xff] }
 0xd03   :  { %v3185_v10 = vmax.f32 %v3147_v39, 0.0  ;;  %v3233_v44 = vpack.c.bf16 %v9578_v22, %v9582_v55  ;;  %v7451_v51 = vpack.c.bf16 %v3346_v7, %v3345_v20 }
 0xd04   :  { %v9594_v0 = vadd.f32 %v3186_v46, %v9252_v18  ;;  %v10693_v18 = vld [vmem:[#allocation31_spill] sm:$0xff] }
 0xd05   :  { %v9599_v2 = vadd.f32 %v3185_v10, %v9257_v12  ;;  %5931 = vmatprep.subr.bf16.mxu0 %v3233_v44  ;;  %vm10694_vm12 = vnez %v10693_v18  ;;  %v10695_v12 = vld [vmem:[#allocation32_spill] sm:$0xff]  ;;  %7452 = vmatprep.subr.bf16.mxu1 %v7451_v51 }
 0xd06   :  { %5932 = vmatpush3.bf16.msra.mxu0 %v3225_v57  ;;  %vm10696_vm11 = vnez %v10695_v12  ;;  %7454 = vmatpush3.bf16.msra.mxu1 %v7451_v51  ;;  %v10717_v10 = vld [vmem:[#allocation44_spill] sm:$0xff] }
 0xd07   :  { %v3234_v52 = vpack.c.bf16 %v9594_v0, %v9599_v2  ;;  %7456 = vmatprep.subr.bf16.mxu1 %v7455_v32 }
 0xd09   :  { %5933 = vmatprep.subr.bf16.mxu0 %v3234_v52  ;;  %v10718_v52 = vld [vmem:[#allocation45_spill] sm:$0xff] }
 0xd0a   :  { %5934 = vmatpush3.bf16.msra.mxu0 %v3226_v15  ;;  %7458 = vmatpush3.bf16.msra.mxu1 %v7455_v32 }
 0xd0d   :  { %5267 = vmatmul.mubr.msk.bf16.vlgmr.msra.gmra.mrb[176].mxu0 %vm10690_vm5, %v10559_v53  ;;  %vm10702_vm5 = vnez %v10701_v24 }
 0xd0e   :  { %5269 = vmatprep.mubr.msk.bf16.mxu0 %vm10692_vm13, %v10559_v53  ;;  %vm10704_vm13 = vnez %v10703_v17 }
 0xd15   :  { %5271 = vmatmul.mubr.msk.bf16.gmra.mrb[180].mxu0 %vm10694_vm12, %v10559_v53  ;;  %vm10706_vm12 = vnez %v10705_v21 }
 0xd16   :  { %5273 = vmatprep.mubr.msk.bf16.mxu0 %vm10696_vm11, %v10559_v53 }
 0xd1d   :  { %5275 = vmatmul.mubr.msk.bf16.gmra.mrb[184].mxu0 %vm10698_vm3, %v10559_v53 }
 0xd1e   :  { %5277 = vmatprep.mubr.msk.bf16.mxu0 %vm10700_vm10, %v10559_v53  ;;  %vm10710_vm10 = vnez %v10709_v5 }
 0xd25   :  { %5279 = vmatmul.mubr.msk.bf16.gmra.mrb[188].mxu0 %vm10702_vm5, %v10559_v53  ;;  %vm10712_vm5 = vnez %v10711_v37  ;;  %v10720_v37 = vld [vmem:[#allocation47_spill] sm:$0xff] }
 0xd26   :  { %5281 = vmatprep.mubr.msk.bf16.mxu0 %vm10704_vm13, %v10559_v53  ;;  %vm10714_vm13 = vnez %v10713_v33 }
 0xd2d   :  { %5283 = vmatmul.mubr.msk.bf16.gmra.mrb[192].mxu0 %vm10706_vm12, %v10559_v53  ;;  %vm10716_vm12 = vnez %v10715_v27 }
 0xd2e   :  { %5285 = vmatprep.mubr.msk.bf16.mxu0 %vm10639_vm15, %v10559_v53 }
 0xd35   :  { %5287 = vmatmul.mubr.msk.bf16.gmra.mrb[196].mxu0 %vm10641_vm8, %v10559_v53 }
 0xd36   :  { %5289 = vmatprep.mubr.msk.bf16.mxu0 %vm10710_vm10, %v10559_v53 }
 0xd3d   :  { %5291 = vmatmul.mubr.msk.bf16.gmra.mrb[200].mxu0 %vm10712_vm5, %v10559_v53 }
 0xd3e   :  { %5293 = vmatprep.mubr.msk.bf16.mxu0 %vm10714_vm13, %v10559_v53 }
 0xd45   :  { %5295 = vmatmul.mubr.msk.bf16.gmra.mrb[204].mxu0 %vm10716_vm12, %v10559_v53 }
 0xde0   :  { %v5935_v9 = vpop.f32.mrb[176].mxu0 }
 0xde1   :  { %v5936_v3 = vpop.f32.mrb[177].mxu0 }
 0xde2   :  { %v5937_v36 = vadd.f32 %v5936_v3, %v5935_v9  ;;  %v5938_v39 = vpop.f32.mrb[178].mxu0 }
 0xde3   :  { %v5939_v46 = vpop.f32.mrb[179].mxu0 }
 0xde4   :  { %v3270_v44 = vadd.f32 %v5937_v36, %v10717_v10  ;;  %v5940_v57 = vadd.f32 %v5939_v46, %v5938_v39 }
 0xde6   :  { %v3273_v15 = vadd.f32 %v5940_v57, %v10718_v52  ;;  %6899 = vmatprep.mubr.f32.mxu1 %v3270_v44  ;;  %v10721_v57 = vld [vmem:[#allocation48_spill] sm:$0xff] }
 0xde8   :  { %v5941_v27 = vpop.f32.mrb[180].mxu0  ;;  %6900 = vmatmul.mubr.f32.vlgmr.msra.gmra.mrb[176].mxu1 %v3273_v15  ;;  %v10722_v15 = vld [vmem:[#allocation49_spill] sm:$0xff] }
 0xde9   :  { %v5942_v20 = vpop.f32.mrb[181].mxu0 }
 0xdea   :  { %v5943_v7 = vadd.f32 %v5942_v20, %v5941_v27  ;;  %v5944_v51 = vpop.f32.mrb[182].mxu0 }
 0xdeb   :  { %v5945_v33 = vpop.f32.mrb[183].mxu0 }
 0xdec   :  { %v3278_v62 = vadd.f32 %v5943_v7, %v10719_v58  ;;  %v5946_v32 = vadd.f32 %v5945_v33, %v5944_v51 }
 0xdee   :  { %v3281_v5 = vadd.f32 %v5946_v32, %v10720_v37  ;;  %6902 = vmatprep.mubr.f32.mxu1 %v3278_v62  ;;  %v10723_v32 = vld [vmem:[#allocation50_spill] sm:$0xff] }
 0xdf0   :  { %v5947_v9 = vpop.f32.mrb[184].mxu0  ;;  %6903 = vmatmul.mubr.f32.gmra.mrb[178].mxu1 %v3281_v5  ;;  %v10724_v5 = vld [vmem:[#allocation51_spill] sm:$0xff] }
 0xdf1   :  { %v5948_v3 = vpop.f32.mrb[185].mxu0 }
 0xdf2   :  { %v5949_v36 = vadd.f32 %v5948_v3, %v5947_v9  ;;  %v5950_v39 = vpop.f32.mrb[186].mxu0 }
 0xdf3   :  { %v5951_v46 = vpop.f32.mrb[187].mxu0 }
 0xdf4   :  { %v3286_v44 = vadd.f32 %v5949_v36, %v10721_v57  ;;  %v5952_v52 = vadd.f32 %v5951_v46, %v5950_v39 }
 0xdf6   :  { %v3289_v10 = vadd.f32 %v5952_v52, %v10722_v15  ;;  %6905 = vmatprep.mubr.f32.mxu1 %v3286_v44  ;;  %v10725_v52 = vld [vmem:[#allocation52_spill] sm:$0xff] }
 0xdf8   :  { %v5953_v27 = vpop.f32.mrb[188].mxu0  ;;  %6906 = vmatmul.mubr.f32.gmra.mrb[180].mxu1 %v3289_v10  ;;  %v10726_v10 = vld [vmem:[#allocation53_spill] sm:$0xff] }
 0xdf9   :  { %v5954_v20 = vpop.f32.mrb[189].mxu0 }
 0xdfa   :  { %v5955_v7 = vadd.f32 %v5954_v20, %v5953_v27  ;;  %v5956_v33 = vpop.f32.mrb[190].mxu0 }
 0xdfb   :  { %v5957_v51 = vpop.f32.mrb[191].mxu0 }
 0xdfc   :  { %v3294_v62 = vadd.f32 %v5955_v7, %v10723_v32  ;;  %v5958_v37 = vadd.f32 %v5957_v51, %v5956_v33 }
 0xdfe   :  { %v3297_v58 = vadd.f32 %v5958_v37, %v10724_v5  ;;  %6908 = vmatprep.mubr.f32.mxu1 %v3294_v62  ;;  %v10727_v37 = vld [vmem:[#allocation54_spill] sm:$0xff] }
 0xe00   :  { %v5959_v9 = vpop.f32.mrb[192].mxu0  ;;  %6909 = vmatmul.mubr.f32.gmra.mrb[182].mxu1 %v3297_v58  ;;  %v10728_v58 = vld [vmem:[#allocation55_spill] sm:$0xff] }
 0xe01   :  { %v5960_v3 = vpop.f32.mrb[193].mxu0 }
 0xe02   :  { %v5961_v36 = vadd.f32 %v5960_v3, %v5959_v9  ;;  %v5962_v39 = vpop.f32.mrb[194].mxu0 }
 0xe03   :  { %v5963_v46 = vpop.f32.mrb[195].mxu0 }
 0xe04   :  { %v3302_v44 = vadd.f32 %v5961_v36, %v10725_v52  ;;  %v5964_v15 = vadd.f32 %v5963_v46, %v5962_v39 }
 0xe06   :  { %v3305_v57 = vadd.f32 %v5964_v15, %v10726_v10  ;;  %6911 = vmatprep.mubr.f32.mxu1 %v3302_v44  ;;  %v10729_v15 = vld [vmem:[#allocation56_spill] sm:$0xff] }
 0xe08   :  { %v5965_v27 = vpop.f32.mrb[196].mxu0  ;;  %6912 = vmatmul.mubr.f32.gmra.mrb[184].mxu1 %v3305_v57  ;;  %v10730_v57 = vld [vmem:[#allocation57_spill] sm:$0xff] }
 0xe09   :  { %v5966_v20 = vpop.f32.mrb[197].mxu0 }
 0xe0a   :  { %v5967_v7 = vadd.f32 %v5966_v20, %v5965_v27  ;;  %v5968_v33 = vpop.f32.mrb[198].mxu0 }
 0xe0b   :  { %v5969_v51 = vpop.f32.mrb[199].mxu0 }
 0xe0c   :  { %v3310_v62 = vadd.f32 %v5967_v7, %v10727_v37  ;;  %v5970_v5 = vadd.f32 %v5969_v51, %v5968_v33 }
 0xe0e   :  { %v3313_v32 = vadd.f32 %v5970_v5, %v10728_v58  ;;  %6914 = vmatprep.mubr.f32.mxu1 %v3310_v62  ;;  %v10731_v5 = vld [vmem:[#allocation58_spill] sm:$0xff] }
 0xe10   :  { %v5971_v9 = vpop.f32.mrb[200].mxu0  ;;  %6915 = vmatmul.mubr.f32.gmra.mrb[186].mxu1 %v3313_v32  ;;  %v10732_v32 = vld [vmem:[#allocation59_spill] sm:$0xff] }
 0xe11   :  { %v5972_v3 = vpop.f32.mrb[201].mxu0 }
 0xe12   :  { %v5973_v36 = vadd.f32 %v5972_v3, %v5971_v9  ;;  %v5974_v39 = vpop.f32.mrb[202].mxu0  ;;  %v10733_v9 = vld [vmem:[#allocation61_spill] sm:$0xff]  ;;  %v3720_v3 = vld [vmem:[#allocation17 + $0x180] sm:$0xff] }
 0xe13   :  { %v5975_v46 = vpop.f32.mrb[203].mxu0  ;;  %vm10734_vm12 = vnez %v10733_v9  ;;  %v3726_v9 = vld [vmem:[#allocation17 + $0x1b0] sm:$0xff] }
 0xe14   :  { %v3318_v44 = vadd.f32 %v5973_v36, %v10729_v15  ;;  %v5976_v10 = vadd.f32 %v5975_v46, %v5974_v39  ;;  %v3722_v36 = vld [vmem:[#allocation17 + $0x190] sm:$0xff]  ;;  %v9669_v39 = vld [vmem:[#allocation15 + $0x3] ss:$0 sm:$0xff] }
 0xe15   :  { %v3723_v46 = vld [vmem:[#allocation17 + $0x198] sm:$0xff] }
 0xe16   :  { %v3321_v52 = vadd.f32 %v5976_v10, %v10730_v57  ;;  %6917 = vmatprep.mubr.f32.mxu1 %v3318_v44  ;;  %v3721_v10 = vld [vmem:[#allocation17 + $0x188] sm:$0xff]  ;;  %v7463_v44 = vpack.c.bf16 %v3723_v46, %v3722_v36  ;;  %v3728_v36 = vld [vmem:[#allocation17 + $0x1c0] sm:$0xff] }
 0xe17   :  { %v3729_v46 = vld [vmem:[#allocation17 + $0x1c8] sm:$0xff] }
 0xe18   :  { %v5977_v27 = vpop.f32.mrb[204].mxu0  ;;  %6918 = vmatmul.mubr.f32.gmra.mrb[188].mxu1 %v3321_v52  ;;  %v7459_v52 = vpack.c.bf16 %v3721_v10, %v3720_v3 }
 0xe19   :  { %v5978_v20 = vpop.f32.mrb[205].mxu0 }
 0xe1a   :  { %v5979_v7 = vadd.f32 %v5978_v20, %v5977_v27  ;;  %v5980_v33 = vpop.f32.mrb[206].mxu0  ;;  %v3724_v27 = vld [vmem:[#allocation17 + $0x1a0] sm:$0xff]  ;;  %v3725_v20 = vld [vmem:[#allocation17 + $0x1a8] sm:$0xff]  ;;  %7460 = vmatprep.subr.bf16.mxu0 %v7459_v52 }
 0xe1b   :  { %v5981_v51 = vpop.f32.mrb[207].mxu0  ;;  %7462 = vmatpush3.bf16.msra.mxu0 %v7459_v52 }
 0xe1c   :  { %v3326_v62 = vadd.f32 %v5979_v7, %v10731_v5  ;;  %v5982_v58 = vadd.f32 %v5981_v51, %v5980_v33  ;;  %7464 = vmatprep.subr.bf16.mxu0 %v7463_v44  ;;  %v7467_v51 = vpack.c.bf16 %v3725_v20, %v3724_v27  ;;  %v7475_v27 = vpack.c.bf16 %v3729_v46, %v3728_v36 }
 0xe1e   :  { %v3329_v37 = vadd.f32 %v5982_v58, %v10732_v32  ;;  %6920 = vmatprep.mubr.f32.mxu1 %v3326_v62  ;;  %v3727_v32 = vld [vmem:[#allocation17 + $0x1b8] sm:$0xff] }
 0xe1f   :  { %7466 = vmatpush3.bf16.msra.mxu0 %v7463_v44  ;;  %v7471_v10 = vpack.c.bf16 %v3727_v32, %v3726_v9  ;;  %v3732_v9 = vld [vmem:[#allocation17 + $0x1e0] sm:$0xff] }
 0xe20   :  { %6921 = vmatmul.mubr.f32.gmra.mrb[190].mxu1 %v3329_v37  ;;  %7468 = vmatprep.subr.bf16.mxu0 %v7467_v51 }
 0xe21   :  { %6939 = vmatprep.mubr.msk.bf16.mxu1 %vm10734_vm12, %v10559_v53 }
 0xe23   :  { %7470 = vmatpush3.bf16.msra.mxu0 %v7467_v51 }
 0xe24   :  { %7472 = vmatprep.subr.bf16.mxu0 %v7471_v10 }
 0xe27   :  { %7474 = vmatpush3.bf16.msra.mxu0 %v7471_v10 }
 0xe28   :  { %7476 = vmatprep.subr.bf16.mxu0 %v7475_v27 }
 0xe2b   :  { %7478 = vmatpush3.bf16.msra.mxu0 %v7475_v27 }
 0xebb   :  { %v6901_v7 = vpop.f32.mrb[176].mxu1 }
 0xebc   :  { %v3429_v58 = vadd.f32 %v6901_v7, %v9669_v39  ;;  %v3423_v33 = vpop.f32.mrb[177].mxu1 }
 0xebd   :  { %v3424_v37 = vadd.f32 %v9669_v39, %v3423_v33  ;;  %v3731_v33 = vld [vmem:[#allocation17 + $0x1d8] sm:$0xff] }
 0xebe   :  { %v3503_v62 = vmax.f32 %v3429_v58, 0.0  ;;  %v3730_v58 = vld [vmem:[#allocation17 + $0x1d0] sm:$0xff] }
 0xebf   :  { %v3502_v5 = vmax.f32 %v3424_v37, 0.0  ;;  %v7479_v32 = vpack.c.bf16 %v3731_v33, %v3730_v58  ;;  %v3733_v37 = vld [vmem:[#allocation17 + $0x1e8] sm:$0xff] }
 0xec0   :  { %v7483_v51 = vpack.c.bf16 %v3733_v37, %v3732_v9 }
 0xec1   :  { %v3518_v3 = vpack.c.bf16 %v3503_v62, %v3502_v5  ;;  %7480 = vmatprep.subr.bf16.mxu0 %v7479_v32 }
 0xec2   :  { %7482 = vmatpush3.bf16.msra.mxu0 %v7479_v32 }
 0xec3   :  { %v6904_v57 = vpop.f32.mrb[178].mxu1  ;;  %6923 = vmatprep.subr.bf16.mxu1 %v3518_v3  ;;  %7484 = vmatprep.subr.bf16.mxu0 %v7483_v51 }
 0xec4   :  { %v3439_v7 = vadd.f32 %v6904_v57, %v9669_v39  ;;  %v3433_v15 = vpop.f32.mrb[179].mxu1  ;;  %6924 = vmatpush3.bf16.msra.mxu1 %v3518_v3 }
 0xec5   :  { %v3434_v52 = vadd.f32 %v9669_v39, %v3433_v15 }
 0xec6   :  { %v3505_v20 = vmax.f32 %v3439_v7, 0.0  ;;  %7486 = vmatpush3.bf16.msra.mxu0 %v7483_v51 }
 0xec7   :  { %v3504_v44 = vmax.f32 %v3434_v52, 0.0 }
 0xec9   :  { %v3519_v5 = vpack.c.bf16 %v3505_v20, %v3504_v44 }
 0xecb   :  { %v6907_v62 = vpop.f32.mrb[180].mxu1  ;;  %6925 = vmatprep.subr.bf16.mxu1 %v3519_v5 }
 0xecc   :  { %v3449_v57 = vadd.f32 %v6907_v62, %v9669_v39  ;;  %v3443_v3 = vpop.f32.mrb[181].mxu1  ;;  %6926 = vmatpush3.bf16.msra.mxu1 %v3519_v5 }
 0xecd   :  { %v3444_v15 = vadd.f32 %v9669_v39, %v3443_v3 }
 0xece   :  { %v3507_v36 = vmax.f32 %v3449_v57, 0.0 }
 0xecf   :  { %v3506_v46 = vmax.f32 %v3444_v15, 0.0 }
 0xed1   :  { %v3520_v10 = vpack.c.bf16 %v3507_v36, %v3506_v46 }
 0xed3   :  { %v6910_v7 = vpop.f32.mrb[182].mxu1  ;;  %6927 = vmatprep.subr.bf16.mxu1 %v3520_v10 }
 0xed4   :  { %v3459_v52 = vadd.f32 %v6910_v7, %v9669_v39  ;;  %v3453_v20 = vpop.f32.mrb[183].mxu1  ;;  %6928 = vmatpush3.bf16.msra.mxu1 %v3520_v10 }
 0xed5   :  { %v3454_v58 = vadd.f32 %v9669_v39, %v3453_v20 }
 0xed6   :  { %v3509_v33 = vmax.f32 %v3459_v52, 0.0 }
 0xed7   :  { %v3508_v27 = vmax.f32 %v3454_v58, 0.0 }
 0xed9   :  { %v3521_v44 = vpack.c.bf16 %v3509_v33, %v3508_v27 }
 0xedb   :  { %v6913_v5 = vpop.f32.mrb[184].mxu1  ;;  %6929 = vmatprep.subr.bf16.mxu1 %v3521_v44 }
 0xedc   :  { %v3469_v9 = vadd.f32 %v6913_v5, %v9669_v39  ;;  %v3463_v37 = vpop.f32.mrb[185].mxu1  ;;  %6930 = vmatpush3.bf16.msra.mxu1 %v3521_v44 }
 0xedd   :  { %v3464_v32 = vadd.f32 %v9669_v39, %v3463_v37 }
 0xede   :  { %v3511_v62 = vmax.f32 %v3469_v9, 0.0 }
 0xedf   :  { %v3510_v57 = vmax.f32 %v3464_v32, 0.0 }
 0xee1   :  { %v3522_v3 = vpack.c.bf16 %v3511_v62, %v3510_v57 }
 0xee3   :  { %v6916_v15 = vpop.f32.mrb[186].mxu1  ;;  %6931 = vmatprep.subr.bf16.mxu1 %v3522_v3 }
 0xee4   :  { %v3479_v51 = vadd.f32 %v6916_v15, %v9669_v39  ;;  %v3473_v36 = vpop.f32.mrb[187].mxu1  ;;  %6932 = vmatpush3.bf16.msra.mxu1 %v3522_v3 }
 0xee5   :  { %v3474_v46 = vadd.f32 %v9669_v39, %v3473_v36  ;;  %v4155_v36 = vld [vmem:[#allocation14 + $0x240] sm:$0xff] }
 0xee6   :  { %v3513_v10 = vmax.f32 %v3479_v51, 0.0 }
 0xee7   :  { %v3512_v7 = vmax.f32 %v3474_v46, 0.0 }
 0xee9   :  { %v3523_v52 = vpack.c.bf16 %v3513_v10, %v3512_v7  ;;  %v4151_v7 = vld [vmem:[#allocation14 + $0x220] sm:$0xff]  ;;  %v4152_v10 = vld [vmem:[#allocation14 + $0x228] sm:$0xff] }
 0xeeb   :  { %v6919_v20 = vpop.f32.mrb[188].mxu1  ;;  %6933 = vmatprep.subr.bf16.mxu1 %v3523_v52 }
 0xeec   :  { %v3489_v58 = vadd.f32 %v6919_v20, %v9669_v39  ;;  %v3483_v33 = vpop.f32.mrb[189].mxu1  ;;  %6934 = vmatpush3.bf16.msra.mxu1 %v3523_v52 }
 0xeed   :  { %v3484_v27 = vadd.f32 %v9669_v39, %v3483_v33  ;;  %v10743_v33 = vld [vmem:[#allocation70_spill] sm:$0xff] }
 0xeee   :  { %v3515_v44 = vmax.f32 %v3489_v58, 0.0 }
 0xeef   :  { %v3514_v5 = vmax.f32 %v3484_v27, 0.0  ;;  %v10745_v27 = vld [vmem:[#allocation71_spill] sm:$0xff] }
 0xef1   :  { %v3524_v9 = vpack.c.bf16 %v3515_v44, %v3514_v5  ;;  %v10747_v44 = vld [vmem:[#allocation72_spill] sm:$0xff]  ;;  %v10749_v5 = vld [vmem:[#allocation73_spill] sm:$0xff] }
 0xef3   :  { %v6922_v37 = vpop.f32.mrb[190].mxu1  ;;  %6935 = vmatprep.subr.bf16.mxu1 %v3524_v9 }
 0xef4   :  { %v3499_v32 = vadd.f32 %v6922_v37, %v9669_v39  ;;  %v3493_v62 = vpop.f32.mrb[191].mxu1  ;;  %6936 = vmatpush3.bf16.msra.mxu1 %v3524_v9  ;;  %v10751_v9 = vld [vmem:[#allocation74_spill] sm:$0xff]  ;;  %v10753_v37 = vld [vmem:[#allocation75_spill] sm:$0xff] }
 0xef5   :  { %v3494_v57 = vadd.f32 %v9669_v39, %v3493_v62  ;;  %v10757_v62 = vld [vmem:[#allocation30_spill] sm:$0xff] }
 0xef6   :  { %v3517_v3 = vmax.f32 %v3499_v32, 0.0  ;;  %v10755_v32 = vld [vmem:[#allocation76_spill] sm:$0xff] }
 0xef7   :  { %v3516_v15 = vmax.f32 %v3494_v57, 0.0  ;;  %v3734_v57 = vld [vmem:[#allocation17 + $0x1f0] sm:$0xff] }
 0xef9   :  { %v3525_v51 = vpack.c.bf16 %v3517_v3, %v3516_v15  ;;  %v3735_v3 = vld [vmem:[#allocation17 + $0x1f8] sm:$0xff] }
 0xefa   :  { %v7487_v15 = vpack.c.bf16 %v3735_v3, %v3734_v57 }
 0xefb   :  { %6937 = vmatprep.subr.bf16.mxu1 %v3525_v51 }
 0xefc   :  { %6938 = vmatpush3.bf16.msra.mxu1 %v3525_v51  ;;  %7488 = vmatprep.subr.bf16.mxu0 %v7487_v15 }
 0xefd   :  { %7490 = vmatpush3.bf16.msra.mxu0 %v7487_v15 }
 0xeff   :  { %6940 = vmatmul.mubr.msk.bf16.vlgmr.msra.gmra.mrb[192].mxu1 %vm10669_vm14, %v10559_v53 }
 0xf00   :  { %6943 = vmatprep.mubr.msk.bf16.mxu1 %vm10671_vm6, %v10559_v53 }
 0xf07   :  { %6944 = vmatmul.mubr.msk.bf16.gmra.mrb[196].mxu1 %vm10673_vm9, %v10559_v53  ;;  %vm10744_vm9 = vnez %v10743_v33 }
 0xf08   :  { %6947 = vmatprep.mubr.msk.bf16.mxu1 %vm10675_vm0, %v10559_v53  ;;  %vm10746_vm0 = vnez %v10745_v27 }
 0xf0f   :  { %6948 = vmatmul.mubr.msk.bf16.gmra.mrb[200].mxu1 %vm10608_vm4, %v10559_v53  ;;  %vm10748_vm4 = vnez %v10747_v44 }
 0xf10   :  { %6951 = vmatprep.mubr.msk.bf16.mxu1 %vm10610_vm2, %v10559_v53  ;;  %vm10750_vm2 = vnez %v10749_v5 }
 0xf17   :  { %6952 = vmatmul.mubr.msk.bf16.gmra.mrb[204].mxu1 %vm10612_vm1, %v10559_v53  ;;  %vm10752_vm1 = vnez %v10751_v9 }
 0xf18   :  { %6955 = vmatprep.mubr.msk.bf16.mxu1 %vm10614_vm7, %v10559_v53  ;;  %vm10754_vm7 = vnez %v10753_v37 }
 0xf1f   :  { %6956 = vmatmul.mubr.msk.bf16.gmra.mrb[208].mxu1 %vm10744_vm9, %v10559_v53  ;;  %vm10756_vm9 = vnez %v10755_v32 }
 0xf20   :  { %6959 = vmatprep.mubr.msk.bf16.mxu1 %vm10746_vm0, %v10559_v53  ;;  %vm10758_vm0 = vnez %v10757_v62 }
 0xf27   :  { %6960 = vmatmul.mubr.msk.bf16.gmra.mrb[212].mxu1 %vm10748_vm4, %v10559_v53 }
 0xf28   :  { %6963 = vmatprep.mubr.msk.bf16.mxu1 %vm10750_vm2, %v10559_v53 }
 0xf2f   :  { %6964 = vmatmul.mubr.msk.bf16.gmra.mrb[216].mxu1 %vm10752_vm1, %v10559_v53 }
 0xf30   :  { %6967 = vmatprep.mubr.msk.bf16.mxu1 %vm10754_vm7, %v10559_v53 }
 0xf37   :  { %6968 = vmatmul.mubr.msk.bf16.gmra.mrb[220].mxu1 %vm10756_vm9, %v10559_v53 }
 0xf38   :  { %5331 = vmatprep.mubr.msk.bf16.mxu1 %vm10758_vm0, %v10559_v53  ;;  %vm10759_vm0 = vnez %v10454_v47  ;;  %v10768_v47 = vld [vmem:[#allocation35_spill] sm:$0xff] }
 0xfd2   :  { %v6941_v51 = vpop.f32.mrb[192].mxu1 }
 0xfd3   :  { %v3560_v9 = vpop.f32.mrb[193].mxu1  ;;  %v3689_v32 = vadd.f32 %v6941_v51, %v9465_v8 }
 0xfd4   :  { %v3687_v5 = vadd.f32 %v3560_v9, %v9449_v40  ;;  %v6942_v44 = vpop.f32.mrb[194].mxu1 }
 0xfd5   :  { %v3563_v37 = vpop.f32.mrb[195].mxu1  ;;  %v3690_v62 = vadd.f32 %v6942_v44, %v9462_v16 }
 0xfd6   :  { %v3688_v27 = vadd.f32 %v3563_v37, %v9445_v43  ;;  %7003 = vmatprep.mubr.f32.mxu0 %v3687_v5 }
 0xfd8   :  { %7004 = vmatmul.mubr.f32.vlgmr.msra.gmra.mrb[208].mxu0 %v3688_v27 }
 0xfd9   :  { %7006 = vmatprep.mubr.f32.mxu0 %v3689_v32 }
 0xfda   :  { %v6945_v33 = vpop.f32.mrb[196].mxu1 }
 0xfdb   :  { %v3576_v58 = vpop.f32.mrb[197].mxu1  ;;  %v3693_v20 = vadd.f32 %v6945_v33, %v9513_v23 }
 0xfdc   :  { %v3691_v57 = vadd.f32 %v3576_v58, %v9489_v54  ;;  %v6946_v3 = vpop.f32.mrb[198].mxu1  ;;  %7007 = vmatmul.mubr.f32.gmra.mrb[210].mxu0 %v3690_v62 }
 0xfdd   :  { %v3579_v15 = vpop.f32.mrb[199].mxu1  ;;  %v3694_v5 = vadd.f32 %v6946_v3, %v9510_v25 }
 0xfde   :  { %v3692_v9 = vadd.f32 %v3579_v15, %v9486_v63  ;;  %7009 = vmatprep.mubr.f32.mxu0 %v3691_v57 }
 0xfe0   :  { %7010 = vmatmul.mubr.f32.gmra.mrb[212].mxu0 %v3692_v9 }
 0xfe1   :  { %7012 = vmatprep.mubr.f32.mxu0 %v3693_v20 }
 0xfe2   :  { %v6949_v27 = vpop.f32.mrb[200].mxu1 }
 0xfe3   :  { %v3592_v37 = vpop.f32.mrb[201].mxu1  ;;  %v3697_v62 = vadd.f32 %v6949_v27, %v9549_v29 }
 0xfe4   :  { %v3695_v44 = vadd.f32 %v3592_v37, %v9527_v41  ;;  %v6950_v32 = vpop.f32.mrb[202].mxu1  ;;  %7013 = vmatmul.mubr.f32.gmra.mrb[214].mxu0 %v3694_v5 }
 0xfe5   :  { %v3595_v51 = vpop.f32.mrb[203].mxu1  ;;  %v3698_v33 = vadd.f32 %v6950_v32, %v9546_v61 }
 0xfe6   :  { %v3696_v58 = vadd.f32 %v3595_v51, %v9520_v30  ;;  %7015 = vmatprep.mubr.f32.mxu0 %v3695_v44 }
 0xfe8   :  { %7016 = vmatmul.mubr.f32.gmra.mrb[216].mxu0 %v3696_v58 }
 0xfe9   :  { %7018 = vmatprep.mubr.f32.mxu0 %v3697_v62 }
 0xfea   :  { %v6953_v57 = vpop.f32.mrb[204].mxu1 }
 0xfeb   :  { %v3608_v20 = vpop.f32.mrb[205].mxu1  ;;  %v3701_v5 = vadd.f32 %v6953_v57, %v9591_v35 }
 0xfec   :  { %v3699_v3 = vadd.f32 %v3608_v20, %v9573_v26  ;;  %v6954_v15 = vpop.f32.mrb[206].mxu1  ;;  %7019 = vmatmul.mubr.f32.gmra.mrb[218].mxu0 %v3698_v33 }
 0xfed   :  { %v3611_v9 = vpop.f32.mrb[207].mxu1  ;;  %v3702_v27 = vadd.f32 %v6954_v15, %v9588_v50 }
 0xfee   :  { %v3700_v37 = vadd.f32 %v3611_v9, %v9570_v6  ;;  %7021 = vmatprep.mubr.f32.mxu0 %v3699_v3 }
 0xff0   :  { %7022 = vmatmul.mubr.f32.gmra.mrb[220].mxu0 %v3700_v37 }
 0xff1   :  { %7024 = vmatprep.mubr.f32.mxu0 %v3701_v5 }
 0xff2   :  { %v6957_v44 = vpop.f32.mrb[208].mxu1 }
 0xff3   :  { %v3624_v51 = vpop.f32.mrb[209].mxu1  ;;  %v3705_v33 = vadd.f32 %v6957_v44, %v9479_v1 }
 0xff4   :  { %v3703_v32 = vadd.f32 %v3624_v51, %v9458_v60  ;;  %v6958_v58 = vpop.f32.mrb[210].mxu1  ;;  %7025 = vmatmul.mubr.f32.gmra.mrb[222].mxu0 %v3702_v27 }
 0xff5   :  { %v3627_v62 = vpop.f32.mrb[211].mxu1  ;;  %v3706_v57 = vadd.f32 %v6958_v58, %v9474_v38 }
 0xff6   :  { %v3704_v20 = vadd.f32 %v3627_v62, %v9454_v56  ;;  %7027 = vmatprep.mubr.f32.mxu0 %v3703_v32 }
 0xff8   :  { %7028 = vmatmul.mubr.f32.gmra.mrb[224].mxu0 %v3704_v20 }
 0xff9   :  { %7030 = vmatprep.mubr.f32.mxu0 %v3705_v33 }
 0xffa   :  { %v6961_v3 = vpop.f32.mrb[212].mxu1 }
 0xffb   :  { %v3640_v9 = vpop.f32.mrb[213].mxu1  ;;  %v3709_v27 = vadd.f32 %v6961_v3, %v9523_v49 }
 0xffc   :  { %v3707_v15 = vadd.f32 %v3640_v9, %v9498_v31  ;;  %v6962_v37 = vpop.f32.mrb[214].mxu1  ;;  %7031 = vmatmul.mubr.f32.gmra.mrb[226].mxu0 %v3706_v57 }
 0xffd   :  { %v3643_v5 = vpop.f32.mrb[215].mxu1  ;;  %v3710_v44 = vadd.f32 %v6962_v37, %v9516_v4 }
 0xffe   :  { %v3708_v51 = vadd.f32 %v3643_v5, %v9494_v19  ;;  %7033 = vmatprep.mubr.f32.mxu0 %v3707_v15 }
0x1000   :  { %7034 = vmatmul.mubr.f32.gmra.mrb[228].mxu0 %v3708_v51 }
0x1001   :  { %7036 = vmatprep.mubr.f32.mxu0 %v3709_v27 }
0x1002   :  { %v6965_v32 = vpop.f32.mrb[216].mxu1 }
0x1003   :  { %v3656_v62 = vpop.f32.mrb[217].mxu1  ;;  %v3713_v57 = vadd.f32 %v6965_v32, %v9564_v13 }
0x1004   :  { %v3711_v58 = vadd.f32 %v3656_v62, %v9542_v14  ;;  %v6966_v20 = vpop.f32.mrb[218].mxu1  ;;  %7037 = vmatmul.mubr.f32.gmra.mrb[230].mxu0 %v3710_v44 }
0x1005   :  { %v3659_v33 = vpop.f32.mrb[219].mxu1  ;;  %v3714_v3 = vadd.f32 %v6966_v20, %v9560_v11  ;;  %v4147_v20 = vld [vmem:[#allocation14 + $0x200] sm:$0xff] }
0x1006   :  { %v3712_v9 = vadd.f32 %v3659_v33, %v9536_v59  ;;  %7039 = vmatprep.mubr.f32.mxu0 %v3711_v58 }
0x1008   :  { %7040 = vmatmul.mubr.f32.gmra.mrb[232].mxu0 %v3712_v9  ;;  %v4148_v9 = vld [vmem:[#allocation14 + $0x208] sm:$0xff] }
0x1009   :  { %7042 = vmatprep.mubr.f32.mxu0 %v3713_v57  ;;  %v4149_v57 = vld [vmem:[#allocation14 + $0x210] sm:$0xff]  ;;  %v7491_v52 = vpack.c.bf16 %v4148_v9, %v4147_v20  ;;  %v4156_v20 = vld [vmem:[#allocation14 + $0x248] sm:$0xff] }
0x100a   :  { %v6969_v15 = vpop.f32.mrb[220].mxu1 }
0x100b   :  { %v3672_v5 = vpop.f32.mrb[221].mxu1  ;;  %v3717_v44 = vadd.f32 %v6969_v15, %v9599_v2  ;;  %7492 = vmatprep.subr.bf16.mxu0 %v7491_v52  ;;  %v7499_v15 = vpack.c.bf16 %v4152_v10, %v4151_v7  ;;  %v7511_v10 = vpack.c.bf16 %v4158_v45, %v4157_v42 }
0x100c   :  { %v3715_v37 = vadd.f32 %v3672_v5, %v9582_v55  ;;  %v6970_v51 = vpop.f32.mrb[222].mxu1  ;;  %7043 = vmatmul.mubr.f32.gmra.mrb[234].mxu0 %v3714_v3  ;;  %v4150_v5 = vld [vmem:[#allocation14 + $0x218] sm:$0xff] }
0x100d   :  { %v3675_v27 = vpop.f32.mrb[223].mxu1  ;;  %v3718_v32 = vadd.f32 %v6970_v51, %v9594_v0  ;;  %v7495_v3 = vpack.c.bf16 %v4150_v5, %v4149_v57  ;;  %7494 = vmatpush3.bf16.msra.mxu0 %v7491_v52  ;;  %v4154_v51 = vld [vmem:[#allocation14 + $0x238] sm:$0xff]  ;;  %v7507_v57 = vpack.c.bf16 %v4156_v20, %v4155_v36 }
0x100e   :  { %v3716_v62 = vadd.f32 %v3675_v27, %v9578_v22  ;;  %7045 = vmatprep.mubr.f32.mxu0 %v3715_v37 }
0x100f   :  { %7496 = vmatprep.subr.bf16.mxu0 %v7495_v3 }
0x1010   :  { %7046 = vmatmul.mubr.f32.gmra.mrb[236].mxu0 %v3716_v62  ;;  %v4153_v62 = vld [vmem:[#allocation14 + $0x230] sm:$0xff] }
0x1011   :  { %7048 = vmatprep.mubr.f32.mxu0 %v3717_v44  ;;  %7498 = vmatpush3.bf16.msra.mxu0 %v7495_v3  ;;  %v9771_v3 = vld [vmem:[#allocation18 + $0x3] ss:$0 sm:$0xff] }
0x1012   :  { %7500 = vmatprep.subr.bf16.mxu0 %v7499_v15 }
0x1014   :  { %7049 = vmatmul.mubr.f32.gmra.mrb[238].mxu0 %v3718_v32  ;;  %v7503_v32 = vpack.c.bf16 %v4154_v51, %v4153_v62 }
0x1015   :  { %7502 = vmatpush3.bf16.msra.mxu0 %v7499_v15 }
0x1016   :  { %7504 = vmatprep.subr.bf16.mxu0 %v7503_v32 }
0x1019   :  { %7506 = vmatpush3.bf16.msra.mxu0 %v7503_v32 }
0x101a   :  { %7508 = vmatprep.subr.bf16.mxu0 %v7507_v57 }
0x101d   :  { %7510 = vmatpush3.bf16.msra.mxu0 %v7507_v57 }
0x101e   :  { %7512 = vmatprep.subr.bf16.mxu0 %v7511_v10 }
0x1021   :  { %7514 = vmatpush3.bf16.msra.mxu0 %v7511_v10 }
0x10ab   :  { %v7005_v58 = vpop.f32.mrb[208].mxu0 }
0x10ac   :  { %v3810_v33 = vpop.f32.mrb[209].mxu0  ;;  %v3816_v36 = vadd.f32 %v7005_v58, %v9771_v3 }
0x10ad   :  { %v3811_v51 = vadd.f32 %v9771_v3, %v3810_v33 }
0x10ae   :  { %v3970_v42 = vmax.f32 %v3816_v36, 0.0 }
0x10af   :  { %v7008_v39 = vpop.f32.mrb[210].mxu0  ;;  %v3969_v20 = vmax.f32 %v3811_v51, 0.0 }
0x10b0   :  { %v3820_v27 = vpop.f32.mrb[211].mxu0  ;;  %v3826_v57 = vadd.f32 %v7008_v39, %v9771_v3  ;;  %v9787_v12 = vadd.f32 %v3970_v42, %v9445_v43 }
0x10b1   :  { %v3821_v17 = vadd.f32 %v9771_v3, %v3820_v27  ;;  %v9791_v33 = vadd.f32 %v3969_v20, %v9449_v40 }
0x10b2   :  { %v3972_v10 = vmax.f32 %v3826_v57, 0.0 }
0x10b3   :  { %v7011_v37 = vpop.f32.mrb[212].mxu0  ;;  %v3971_v18 = vmax.f32 %v3821_v17, 0.0 }
0x10b4   :  { %v3830_v44 = vpop.f32.mrb[213].mxu0  ;;  %v3836_v51 = vadd.f32 %v7011_v37, %v9771_v3  ;;  %v9804_v17 = vadd.f32 %v3972_v10, %v9462_v16 }
0x10b5   :  { %v3831_v39 = vadd.f32 %v9771_v3, %v3830_v44  ;;  %v4033_v44 = vpack.c.bf16 %v9787_v12, %v9791_v33 }
0x10b7   :  { %v7014_v46 = vpop.f32.mrb[214].mxu0  ;;  %v3973_v20 = vmax.f32 %v3831_v39, 0.0 }
0x10b8   :  { %v3840_v9 = vpop.f32.mrb[215].mxu0 }
0x10bb   :  { %v7017_v5 = vpop.f32.mrb[216].mxu0 }
0x10bc   :  { %v3850_v52 = vpop.f32.mrb[217].mxu0  ;;  %v3856_v10 = vadd.f32 %v7017_v5, %v9771_v3 }
0x10bf   :  { %v9767_v7 = vpop.f32.mrb[218].mxu0 }
0x10c0   :  { %v9769_v21 = vpop.f32.mrb[219].mxu0 }
0x10c3   :  { %v9773_v62 = vpop.f32.mrb[220].mxu0 }
0x10c4   :  { %v9775_v15 = vpop.f32.mrb[221].mxu0 }
0x10c7   :  { %v9779_v32 = vpop.f32.mrb[222].mxu0 }
0x10c8   :  { %v9781_v45 = vpop.f32.mrb[223].mxu0 }
0x10cb   :  { %v7029_v24 = vpop.f32.mrb[224].mxu0 }
0x10cc   :  { %v3896_v34 = vadd.f32 %v7029_v24, %v9771_v3  ;;  %v3890_v28 = vpop.f32.mrb[225].mxu0 }
0x10cd   :  { %v3891_v58 = vadd.f32 %v9771_v3, %v3890_v28 }
0x10ce   :  { %v3986_v36 = vmax.f32 %v3896_v34, 0.0  ;;  %v9807_v34 = vadd.f32 %v3971_v18, %v9465_v8 }
0x10cf   :  { %v3985_v27 = vmax.f32 %v3891_v58, 0.0  ;;  %v7032_v48 = vpop.f32.mrb[226].mxu0  ;;  %v3846_v58 = vadd.f32 %v7014_v46, %v9771_v3 }
0x10d0   :  { %v9796_v24 = vadd.f32 %v3986_v36, %v9454_v56  ;;  %v3906_v43 = vadd.f32 %v7032_v48, %v9771_v3  ;;  %v3900_v42 = vpop.f32.mrb[227].mxu0  ;;  %v3974_v56 = vmax.f32 %v3836_v51, 0.0  ;;  %v3841_v36 = vadd.f32 %v9771_v3, %v3840_v9 }
0x10d1   :  { %v9800_v28 = vadd.f32 %v3985_v27, %v9458_v60  ;;  %v3901_v40 = vadd.f32 %v9771_v3, %v3900_v42  ;;  %v3851_v27 = vadd.f32 %v9771_v3, %v3850_v52  ;;  %v4034_v46 = vpack.c.bf16 %v9804_v17, %v9807_v34 }
0x10d2   :  { %v3988_v37 = vmax.f32 %v3906_v43, 0.0  ;;  %v9831_v9 = vadd.f32 %v3973_v20, %v9489_v54  ;;  %v3866_v20 = vadd.f32 %v9767_v7, %v9771_v3 }
0x10d3   :  { %v3987_v57 = vmax.f32 %v3901_v40, 0.0  ;;  %v7035_v48 = vpop.f32.mrb[228].mxu0  ;;  %v4041_v60 = vpack.c.bf16 %v9796_v24, %v9800_v28  ;;  %v3976_v40 = vmax.f32 %v3846_v58, 0.0 }
0x10d4   :  { %v9816_v16 = vadd.f32 %v3988_v37, %v9474_v38  ;;  %v3916_v8 = vadd.f32 %v7035_v48, %v9771_v3  ;;  %v3910_v18 = vpop.f32.mrb[229].mxu0  ;;  %v9828_v38 = vadd.f32 %v3974_v56, %v9486_v63  ;;  %v3975_v37 = vmax.f32 %v3841_v36, 0.0 }
0x10d5   :  { %v9821_v51 = vadd.f32 %v3987_v57, %v9479_v1  ;;  %v3911_v39 = vadd.f32 %v9771_v3, %v3910_v18  ;;  %6087 = vmatprep.subr.bf16.mxu1 %v4041_v60  ;;  %v3978_v48 = vmax.f32 %v3856_v10, 0.0  ;;  %v3977_v56 = vmax.f32 %v3851_v27, 0.0 }
0x10d6   :  { %v3990_v43 = vmax.f32 %v3916_v8, 0.0  ;;  %6088 = vmatpush3.bf16.msra.mxu1 %v4033_v44  ;;  %v3861_v60 = vadd.f32 %v9771_v3, %v9769_v21  ;;  %v9852_v18 = vadd.f32 %v3976_v40, %v9510_v25  ;;  %v9855_v10 = vadd.f32 %v3975_v37, %v9513_v23 }
0x10d7   :  { %v3989_v5 = vmax.f32 %v3911_v39, 0.0  ;;  %v7038_v42 = vpop.f32.mrb[230].mxu0  ;;  %v4042_v1 = vpack.c.bf16 %v9816_v16, %v9821_v51  ;;  %v9862_v27 = vadd.f32 %v3978_v48, %v9520_v30  ;;  %v9869_v25 = vadd.f32 %v3977_v56, %v9527_v41 }
0x10d8   :  { %v9836_v52 = vadd.f32 %v3990_v43, %v9494_v19  ;;  %v3926_v44 = vadd.f32 %v7038_v42, %v9771_v3  ;;  %v3920_v57 = vpop.f32.mrb[231].mxu0  ;;  %v3980_v23 = vmax.f32 %v3866_v20, 0.0  ;;  %v3871_v30 = vadd.f32 %v9771_v3, %v9775_v15 }
0x10d9   :  { %v9840_v63 = vadd.f32 %v3989_v5, %v9498_v31  ;;  %v3921_v54 = vadd.f32 %v9771_v3, %v3920_v57  ;;  %6089 = vmatprep.subr.bf16.mxu1 %v4042_v1  ;;  %v4035_v31 = vpack.c.bf16 %v9828_v38, %v9831_v9  ;;  %v3979_v5 = vmax.f32 %v3861_v60, 0.0 }
0x10da   :  { %v3992_v58 = vmax.f32 %v3926_v44, 0.0  ;;  %6090 = vmatpush3.bf16.msra.mxu1 %v4034_v46  ;;  %v4036_v57 = vpack.c.bf16 %v9852_v18, %v9855_v10  ;;  %v9888_v15 = vadd.f32 %v3980_v23, %v9546_v61  ;;  %v4037_v56 = vpack.c.bf16 %v9862_v27, %v9869_v25 }
0x10db   :  { %v3991_v19 = vmax.f32 %v3921_v54, 0.0  ;;  %v7041_v36 = vpop.f32.mrb[232].mxu0  ;;  %v4043_v8 = vpack.c.bf16 %v9836_v52, %v9840_v63  ;;  %v9891_v54 = vadd.f32 %v3979_v5, %v9549_v29  ;;  %v3981_v60 = vmax.f32 %v3871_v30, 0.0 }
0x10dc   :  { %v9858_v7 = vadd.f32 %v3992_v58, %v9516_v4  ;;  %v3936_v21 = vadd.f32 %v7041_v36, %v9771_v3  ;;  %v3930_v39 = vpop.f32.mrb[233].mxu0  ;;  %v3876_v4 = vadd.f32 %v9773_v62, %v9771_v3  ;;  %v3886_v36 = vadd.f32 %v9779_v32, %v9771_v3 }
0x10dd   :  { %v9865_v43 = vadd.f32 %v3991_v19, %v9523_v49  ;;  %v3931_v46 = vadd.f32 %v9771_v3, %v3930_v39  ;;  %6091 = vmatprep.subr.bf16.mxu1 %v4043_v8  ;;  %v3881_v61 = vadd.f32 %v9771_v3, %v9781_v45  ;;  %v4038_v32 = vpack.c.bf16 %v9888_v15, %v9891_v54 }
0x10de   :  { %v3994_v42 = vmax.f32 %v3936_v21, 0.0  ;;  %6092 = vmatpush3.bf16.msra.mxu1 %v4035_v31  ;;  %v3982_v20 = vmax.f32 %v3876_v4, 0.0 }
0x10df   :  { %v3993_v1 = vmax.f32 %v3931_v46, 0.0  ;;  %v7044_v40 = vpop.f32.mrb[234].mxu0  ;;  %v4044_v49 = vpack.c.bf16 %v9858_v7, %v9865_v43  ;;  %v3983_v4 = vmax.f32 %v3881_v61, 0.0 }
0x10e0   :  { %v9878_v37 = vadd.f32 %v3994_v42, %v9536_v59  ;;  %v3946_v41 = vadd.f32 %v7044_v40, %v9771_v3  ;;  %v3940_v44 = vpop.f32.mrb[235].mxu0  ;;  %v9912_v23 = vadd.f32 %v3982_v20, %v9570_v6  ;;  %v3984_v42 = vmax.f32 %v3886_v36, 0.0  ;;  %v10766_v20 = vld [vmem:[#allocation34_spill] sm:$0xff] }
0x10e1   :  { %v9884_v48 = vadd.f32 %v3993_v1, %v9542_v14  ;;  %v3941_v62 = vadd.f32 %v9771_v3, %v3940_v44  ;;  %6093 = vmatprep.subr.bf16.mxu1 %v4044_v49  ;;  %vm10767_vm1 = vnez %v10766_v20  ;;  %v10783_v20 = vld [vmem:[#allocation46_spill] sm:$0xff] }
0x10e2   :  { %v3996_v59 = vmax.f32 %v3946_v41, 0.0  ;;  %6094 = vmatpush3.bf16.msra.mxu1 %v4036_v57  ;;  %v9930_v57 = vadd.f32 %v3984_v42, %v9588_v50 }
0x10e3   :  { %v3995_v58 = vmax.f32 %v3941_v62, 0.0  ;;  %v7047_v19 = vpop.f32.mrb[236].mxu0  ;;  %v4045_v14 = vpack.c.bf16 %v9878_v37, %v9884_v48 }
0x10e4   :  { %v9902_v29 = vadd.f32 %v3996_v59, %v9560_v11  ;;  %v3956_v8 = vadd.f32 %v7047_v19, %v9771_v3  ;;  %v3950_v31 = vpop.f32.mrb[237].mxu0  ;;  %v9915_v11 = vadd.f32 %v3981_v60, %v9573_v26  ;;  %v10770_v60 = vld [vmem:[#allocation36_spill] sm:$0xff] }
0x10e5   :  { %v9906_v21 = vadd.f32 %v3995_v58, %v9564_v13  ;;  %v3951_v39 = vadd.f32 %v9771_v3, %v3950_v31  ;;  %6095 = vmatprep.subr.bf16.mxu1 %v4045_v14  ;;  %v10772_v58 = vld [vmem:[#allocation37_spill] sm:$0xff]  ;;  %v10779_v31 = vld [vmem:[#allocation43_spill] sm:$0xff] }
0x10e6   :  { %v3998_v46 = vmax.f32 %v3956_v8, 0.0  ;;  %6096 = vmatpush3.bf16.msra.mxu1 %v4037_v56 }
0x10e7   :  { %v3997_v45 = vmax.f32 %v3951_v39, 0.0  ;;  %v7050_v5 = vpop.f32.mrb[238].mxu0  ;;  %v4046_v13 = vpack.c.bf16 %v9902_v29, %v9906_v21  ;;  %v4159_v39 = vld [vmem:[#allocation14 + $0x260] sm:$0xff] }
0x10e8   :  { %v9920_v30 = vadd.f32 %v3998_v46, %v9578_v22  ;;  %v3966_v1 = vadd.f32 %v7050_v5, %v9771_v3  ;;  %v3960_v40 = vpop.f32.mrb[239].mxu0  ;;  %v9933_v22 = vadd.f32 %v3983_v4, %v9591_v35  ;;  %v10760_v35 = vld [vmem:[#allocation29_spill] sm:$0xff]  ;;  %v4160_v46 = vld [vmem:[#allocation14 + $0x268] sm:$0xff]  ;;  %v4162_v5 = vld [vmem:[#allocation14 + $0x278] sm:$0xff] }
0x10e9   :  { %v9924_v49 = vadd.f32 %v3997_v45, %v9582_v55  ;;  %v3961_v6 = vadd.f32 %v9771_v3, %v3960_v40  ;;  %6097 = vmatprep.subr.bf16.mxu1 %v4046_v13  ;;  %v4039_v55 = vpack.c.bf16 %v9912_v23, %v9915_v11  ;;  %vm10761_vm9 = vnez %v10760_v35  ;;  %v4161_v45 = vld [vmem:[#allocation14 + $0x270] sm:$0xff] }
0x10ea   :  { %v4000_v26 = vmax.f32 %v3966_v1, 0.0  ;;  %6098 = vmatpush3.bf16.msra.mxu1 %v4038_v32  ;;  %v4040_v50 = vpack.c.bf16 %v9930_v57, %v9933_v22  ;;  %v7515_v32 = vpack.c.bf16 %v4160_v46, %v4159_v39  ;;  %v7519_v13 = vpack.c.bf16 %v4162_v5, %v4161_v45  ;;  %v10785_v39 = vld [vmem:[#allocation48_spill] sm:$0xff]  ;;  %v10786_v45 = vld [vmem:[#allocation49_spill] sm:$0xff] }
0x10eb   :  { %v3999_v41 = vmax.f32 %v3961_v6, 0.0  ;;  %v4047_v44 = vpack.c.bf16 %v9920_v30, %v9924_v49 }
0x10ec   :  { %v9936_v62 = vadd.f32 %v4000_v26, %v9594_v0  ;;  %v10762_v0 = vld [vmem:[#allocation31_spill] sm:$0xff]  ;;  %7516 = vmatprep.subr.bf16.mxu0 %v7515_v32  ;;  %v10781_v26 = vld [vmem:[#allocation44_spill] sm:$0xff] }
0x10ed   :  { %v9941_v3 = vadd.f32 %v3999_v41, %v9599_v2  ;;  %6099 = vmatprep.subr.bf16.mxu1 %v4047_v44  ;;  %vm10763_vm7 = vnez %v10762_v0  ;;  %7518 = vmatpush3.bf16.msra.mxu0 %v7515_v32 }
0x10ee   :  { %6100 = vmatpush3.bf16.msra.mxu1 %v4039_v55  ;;  %7520 = vmatprep.subr.bf16.mxu0 %v7519_v13  ;;  %v10782_v55 = vld [vmem:[#allocation45_spill] sm:$0xff] }
0x10ef   :  { %v4048_v59 = vpack.c.bf16 %v9936_v62, %v9941_v3 }
0x10f1   :  { %6101 = vmatprep.subr.bf16.mxu1 %v4048_v59  ;;  %7522 = vmatpush3.bf16.msra.mxu0 %v7519_v13 }
0x10f2   :  { %6102 = vmatpush3.bf16.msra.mxu1 %v4040_v50 }
0x10f5   :  { %5333 = vmatmul.mubr.msk.bf16.vlgmr.msra.gmra.mrb[224].mxu1 %vm10759_vm0, %v10559_v53  ;;  %vm10769_vm0 = vnez %v10768_v47 }
0x10f6   :  { %5335 = vmatprep.mubr.msk.bf16.mxu1 %vm10761_vm9, %v10559_v53  ;;  %vm10771_vm9 = vnez %v10770_v60 }
0x10fd   :  { %5337 = vmatmul.mubr.msk.bf16.gmra.mrb[228].mxu1 %vm10763_vm7, %v10559_v53  ;;  %vm10773_vm7 = vnez %v10772_v58  ;;  %v10784_v58 = vld [vmem:[#allocation47_spill] sm:$0xff] }
0x10fe   :  { %5339 = vmatprep.mubr.msk.bf16.mxu1 %vm10696_vm11, %v10559_v53 }
0x1105   :  { %5341 = vmatmul.mubr.msk.bf16.gmra.mrb[232].mxu1 %vm10698_vm3, %v10559_v53  ;;  %vm10780_vm3 = vnez %v10779_v31 }
0x1106   :  { %5343 = vmatprep.mubr.msk.bf16.mxu1 %vm10767_vm1, %v10559_v53 }
0x110d   :  { %5345 = vmatmul.mubr.msk.bf16.gmra.mrb[236].mxu1 %vm10769_vm0, %v10559_v53 }
0x110e   :  { %5347 = vmatprep.mubr.msk.bf16.mxu1 %vm10771_vm9, %v10559_v53 }
0x1115   :  { %5349 = vmatmul.mubr.msk.bf16.gmra.mrb[240].mxu1 %vm10773_vm7, %v10559_v53 }
0x1116   :  { %5351 = vmatprep.mubr.msk.bf16.mxu1 %vm10639_vm15, %v10559_v53 }
0x111d   :  { %5353 = vmatmul.mubr.msk.bf16.gmra.mrb[244].mxu1 %vm10641_vm8, %v10559_v53 }
0x111e   :  { %5355 = vmatprep.mubr.msk.bf16.mxu1 %vm10710_vm10, %v10559_v53 }
0x1125   :  { %5357 = vmatmul.mubr.msk.bf16.gmra.mrb[248].mxu1 %vm10712_vm5, %v10559_v53 }
0x1126   :  { %5359 = vmatprep.mubr.msk.bf16.mxu1 %vm10714_vm13, %v10559_v53 }
0x112d   :  { %5361 = vmatmul.mubr.msk.bf16.gmra.mrb[252].mxu1 %vm10780_vm3, %v10559_v53 }
0x11c8   :  { %v6103_v42 = vpop.f32.mrb[224].mxu1 }
0x11c9   :  { %v6104_v4 = vpop.f32.mrb[225].mxu1 }
0x11ca   :  { %v6105_v1 = vadd.f32 %v6104_v4, %v6103_v42  ;;  %v6106_v40 = vpop.f32.mrb[226].mxu1 }
0x11cb   :  { %v6107_v6 = vpop.f32.mrb[227].mxu1 }
0x11cc   :  { %v4084_v41 = vadd.f32 %v6105_v1, %v10781_v26  ;;  %v6108_v44 = vadd.f32 %v6107_v6, %v6106_v40  ;;  %v10787_v6 = vld [vmem:[#allocation50_spill] sm:$0xff] }
0x11ce   :  { %v4087_v59 = vadd.f32 %v6108_v44, %v10782_v55  ;;  %7083 = vmatprep.mubr.f32.mxu0 %v4084_v41  ;;  %v10788_v44 = vld [vmem:[#allocation51_spill] sm:$0xff] }
0x11d0   :  { %v6109_v50 = vpop.f32.mrb[228].mxu1  ;;  %7084 = vmatmul.mubr.f32.vlgmr.msra.gmra.mrb[240].mxu0 %v4087_v59 }
0x11d1   :  { %v6110_v35 = vpop.f32.mrb[229].mxu1 }
0x11d2   :  { %v6111_v0 = vadd.f32 %v6110_v35, %v6109_v50  ;;  %v6112_v2 = vpop.f32.mrb[230].mxu1 }
0x11d3   :  { %v6113_v56 = vpop.f32.mrb[231].mxu1 }
0x11d4   :  { %v4092_v47 = vadd.f32 %v6111_v0, %v10783_v20  ;;  %v6114_v60 = vadd.f32 %v6113_v56, %v6112_v2  ;;  %v10789_v56 = vld [vmem:[#allocation52_spill] sm:$0xff] }
0x11d6   :  { %v4095_v19 = vadd.f32 %v6114_v60, %v10784_v58  ;;  %7086 = vmatprep.mubr.f32.mxu0 %v4092_v47  ;;  %v10790_v60 = vld [vmem:[#allocation53_spill] sm:$0xff] }
0x11d8   :  { %v6115_v14 = vpop.f32.mrb[232].mxu1  ;;  %7087 = vmatmul.mubr.f32.gmra.mrb[242].mxu0 %v4095_v19 }
0x11d9   :  { %v6116_v36 = vpop.f32.mrb[233].mxu1 }
0x11da   :  { %v6117_v61 = vadd.f32 %v6116_v36, %v6115_v14  ;;  %v6118_v8 = vpop.f32.mrb[234].mxu1 }
0x11db   :  { %v6119_v31 = vpop.f32.mrb[235].mxu1 }
0x11dc   :  { %v4100_v46 = vadd.f32 %v6117_v61, %v10785_v39  ;;  %v6120_v32 = vadd.f32 %v6119_v31, %v6118_v8  ;;  %v10791_v31 = vld [vmem:[#allocation54_spill] sm:$0xff] }
0x11de   :  { %v4103_v5 = vadd.f32 %v6120_v32, %v10786_v45  ;;  %7089 = vmatprep.mubr.f32.mxu0 %v4100_v46  ;;  %v10792_v32 = vld [vmem:[#allocation55_spill] sm:$0xff] }
0x11e0   :  { %v6121_v13 = vpop.f32.mrb[236].mxu1  ;;  %7090 = vmatmul.mubr.f32.gmra.mrb[244].mxu0 %v4103_v5 }
0x11e1   :  { %v6122_v42 = vpop.f32.mrb[237].mxu1 }
0x11e2   :  { %v6123_v4 = vadd.f32 %v6122_v42, %v6121_v13  ;;  %v6124_v1 = vpop.f32.mrb[238].mxu1 }
0x11e3   :  { %v6125_v40 = vpop.f32.mrb[239].mxu1 }
0x11e4   :  { %v4108_v26 = vadd.f32 %v6123_v4, %v10787_v6  ;;  %v6126_v41 = vadd.f32 %v6125_v40, %v6124_v1  ;;  %v10793_v40 = vld [vmem:[#allocation56_spill] sm:$0xff] }
0x11e6   :  { %v4111_v55 = vadd.f32 %v6126_v41, %v10788_v44  ;;  %7092 = vmatprep.mubr.f32.mxu0 %v4108_v26  ;;  %v10794_v41 = vld [vmem:[#allocation57_spill] sm:$0xff] }
0x11e8   :  { %v6127_v59 = vpop.f32.mrb[240].mxu1  ;;  %7093 = vmatmul.mubr.f32.gmra.mrb[246].mxu0 %v4111_v55 }
0x11e9   :  { %v6128_v50 = vpop.f32.mrb[241].mxu1 }
0x11ea   :  { %v6129_v35 = vadd.f32 %v6128_v50, %v6127_v59  ;;  %v6130_v0 = vpop.f32.mrb[242].mxu1 }
0x11eb   :  { %v6131_v2 = vpop.f32.mrb[243].mxu1 }
0x11ec   :  { %v4116_v20 = vadd.f32 %v6129_v35, %v10789_v56  ;;  %v6132_v47 = vadd.f32 %v6131_v2, %v6130_v0  ;;  %v10795_v2 = vld [vmem:[#allocation58_spill] sm:$0xff] }
0x11ee   :  { %v4119_v58 = vadd.f32 %v6132_v47, %v10790_v60  ;;  %7095 = vmatprep.mubr.f32.mxu0 %v4116_v20  ;;  %v10796_v47 = vld [vmem:[#allocation59_spill] sm:$0xff] }
0x11f0   :  { %v6133_v19 = vpop.f32.mrb[244].mxu1  ;;  %7096 = vmatmul.mubr.f32.gmra.mrb[248].mxu0 %v4119_v58 }
0x11f1   :  { %v6134_v14 = vpop.f32.mrb[245].mxu1 }
0x11f2   :  { %v6135_v36 = vadd.f32 %v6134_v14, %v6133_v19  ;;  %v6136_v61 = vpop.f32.mrb[246].mxu1  ;;  %v4534_v19 = vld [vmem:[#allocation17 + $0x200] sm:$0xff]  ;;  %v4535_v14 = vld [vmem:[#allocation17 + $0x208] sm:$0xff] }
0x11f3   :  { %v6137_v8 = vpop.f32.mrb[247].mxu1 }
0x11f4   :  { %v4124_v39 = vadd.f32 %v6135_v36, %v10791_v31  ;;  %v6138_v46 = vadd.f32 %v6137_v8, %v6136_v61  ;;  %v4536_v36 = vld [vmem:[#allocation17 + $0x210] sm:$0xff]  ;;  %v7523_v61 = vpack.c.bf16 %v4535_v14, %v4534_v19  ;;  %v4537_v8 = vld [vmem:[#allocation17 + $0x218] sm:$0xff] }
0x11f5   :  { %v10011_v31 = vld [vmem:[#allocation15 + $0x4] ss:$0 sm:$0xff] }
0x11f6   :  { %v4127_v45 = vadd.f32 %v6138_v46, %v10792_v32  ;;  %7098 = vmatprep.mubr.f32.mxu0 %v4124_v39  ;;  %v7527_v39 = vpack.c.bf16 %v4537_v8, %v4536_v36  ;;  %v4538_v46 = vld [vmem:[#allocation17 + $0x220] sm:$0xff]  ;;  %v4539_v32 = vld [vmem:[#allocation17 + $0x228] sm:$0xff]  ;;  %7524 = vmatprep.subr.bf16.mxu1 %v7523_v61 }
0x11f7   :  { %7526 = vmatpush3.bf16.msra.mxu1 %v7523_v61  ;;  %v4546_v36 = vld [vmem:[#allocation17 + $0x260] sm:$0xff]  ;;  %v4547_v61 = vld [vmem:[#allocation17 + $0x268] sm:$0xff] }
0x11f8   :  { %v6139_v5 = vpop.f32.mrb[248].mxu1  ;;  %7099 = vmatmul.mubr.f32.gmra.mrb[250].mxu0 %v4127_v45  ;;  %7528 = vmatprep.subr.bf16.mxu1 %v7527_v39 }
0x11f9   :  { %v6140_v13 = vpop.f32.mrb[249].mxu1 }
0x11fa   :  { %v6141_v42 = vadd.f32 %v6140_v13, %v6139_v5  ;;  %v6142_v4 = vpop.f32.mrb[250].mxu1 }
0x11fb   :  { %v6143_v1 = vpop.f32.mrb[251].mxu1  ;;  %7530 = vmatpush3.bf16.msra.mxu1 %v7527_v39 }
0x11fc   :  { %v4132_v6 = vadd.f32 %v6141_v42, %v10793_v40  ;;  %v6144_v26 = vadd.f32 %v6143_v1, %v6142_v4  ;;  %v7531_v42 = vpack.c.bf16 %v4539_v32, %v4538_v46  ;;  %v4540_v1 = vld [vmem:[#allocation17 + $0x230] sm:$0xff]  ;;  %v4541_v40 = vld [vmem:[#allocation17 + $0x238] sm:$0xff]  ;;  %v7547_v32 = vpack.c.bf16 %v4547_v61, %v4546_v36 }
0x11fe   :  { %v4135_v44 = vadd.f32 %v6144_v26, %v10794_v41  ;;  %7101 = vmatprep.mubr.f32.mxu0 %v4132_v6  ;;  %7532 = vmatprep.subr.bf16.mxu1 %v7531_v42  ;;  %v7535_v41 = vpack.c.bf16 %v4541_v40, %v4540_v1 }
0x11ff   :  { %7534 = vmatpush3.bf16.msra.mxu1 %v7531_v42 }
0x1200   :  { %v6145_v55 = vpop.f32.mrb[252].mxu1  ;;  %7102 = vmatmul.mubr.f32.gmra.mrb[252].mxu0 %v4135_v44  ;;  %7536 = vmatprep.subr.bf16.mxu1 %v7535_v41 }
0x1201   :  { %v6146_v59 = vpop.f32.mrb[253].mxu1 }
0x1202   :  { %v6147_v50 = vadd.f32 %v6146_v59, %v6145_v55  ;;  %v6148_v35 = vpop.f32.mrb[254].mxu1  ;;  %v4542_v55 = vld [vmem:[#allocation17 + $0x240] sm:$0xff]  ;;  %v4543_v59 = vld [vmem:[#allocation17 + $0x248] sm:$0xff] }
0x1203   :  { %v6149_v0 = vpop.f32.mrb[255].mxu1  ;;  %7538 = vmatpush3.bf16.msra.mxu1 %v7535_v41 }
0x1204   :  { %v4140_v56 = vadd.f32 %v6147_v50, %v10795_v2  ;;  %v6150_v20 = vadd.f32 %v6149_v0, %v6148_v35  ;;  %v7539_v2 = vpack.c.bf16 %v4543_v59, %v4542_v55 }
0x1206   :  { %v4143_v60 = vadd.f32 %v6150_v20, %v10796_v47  ;;  %7104 = vmatprep.mubr.f32.mxu0 %v4140_v56  ;;  %v4544_v20 = vld [vmem:[#allocation17 + $0x250] sm:$0xff]  ;;  %v4545_v47 = vld [vmem:[#allocation17 + $0x258] sm:$0xff]  ;;  %7540 = vmatprep.subr.bf16.mxu1 %v7539_v2 }
0x1207   :  { %v7543_v19 = vpack.c.bf16 %v4545_v47, %v4544_v20  ;;  %7542 = vmatpush3.bf16.msra.mxu1 %v7539_v2 }
0x1208   :  { %7105 = vmatmul.mubr.f32.gmra.mrb[254].mxu0 %v4143_v60 }
0x1209   :  { %7123 = vmatprep.mubr.msk.bf16.mxu0 %vm10734_vm12, %v10559_v53  ;;  %7544 = vmatprep.subr.bf16.mxu1 %v7543_v19 }
0x120b   :  { %7546 = vmatpush3.bf16.msra.mxu1 %v7543_v19 }
0x120c   :  { %7548 = vmatprep.subr.bf16.mxu1 %v7547_v32 }
0x120f   :  { %7550 = vmatpush3.bf16.msra.mxu1 %v7547_v32 }
0x12a3   :  { %v7085_v45 = vpop.f32.mrb[240].mxu0 }
0x12a4   :  { %v4243_v5 = vadd.f32 %v7085_v45, %v10011_v31  ;;  %v4237_v13 = vpop.f32.mrb[241].mxu0 }
0x12a5   :  { %v4238_v4 = vadd.f32 %v10011_v31, %v4237_v13 }
0x12a6   :  { %v4317_v6 = vmax.f32 %v4243_v5, 0.0 }
0x12a7   :  { %v4316_v26 = vmax.f32 %v4238_v4, 0.0 }
0x12a9   :  { %v4332_v44 = vpack.c.bf16 %v4317_v6, %v4316_v26 }
0x12ab   :  { %v7088_v50 = vpop.f32.mrb[242].mxu0  ;;  %7107 = vmatprep.subr.bf16.mxu0 %v4332_v44 }
0x12ac   :  { %v4253_v35 = vadd.f32 %v7088_v50, %v10011_v31  ;;  %v4247_v0 = vpop.f32.mrb[243].mxu0  ;;  %7108 = vmatpush3.bf16.msra.mxu0 %v4332_v44 }
0x12ad   :  { %v4248_v56 = vadd.f32 %v10011_v31, %v4247_v0 }
0x12ae   :  { %v4319_v60 = vmax.f32 %v4253_v35, 0.0 }
0x12af   :  { %v4318_v58 = vmax.f32 %v4248_v56, 0.0 }
0x12b1   :  { %v4333_v14 = vpack.c.bf16 %v4319_v60, %v4318_v58 }
0x12b3   :  { %v7091_v8 = vpop.f32.mrb[244].mxu0  ;;  %7109 = vmatprep.subr.bf16.mxu0 %v4333_v14 }
0x12b4   :  { %v4263_v39 = vadd.f32 %v7091_v8, %v10011_v31  ;;  %v4257_v46 = vpop.f32.mrb[245].mxu0  ;;  %7110 = vmatpush3.bf16.msra.mxu0 %v4333_v14 }
0x12b5   :  { %v4258_v45 = vadd.f32 %v10011_v31, %v4257_v46 }
0x12b6   :  { %v4321_v5 = vmax.f32 %v4263_v39, 0.0 }
0x12b7   :  { %v4320_v13 = vmax.f32 %v4258_v45, 0.0 }
0x12b9   :  { %v4334_v42 = vpack.c.bf16 %v4321_v5, %v4320_v13 }
0x12bb   :  { %v7094_v4 = vpop.f32.mrb[246].mxu0  ;;  %7111 = vmatprep.subr.bf16.mxu0 %v4334_v42 }
0x12bc   :  { %v4273_v1 = vadd.f32 %v7094_v4, %v10011_v31  ;;  %v4267_v40 = vpop.f32.mrb[247].mxu0  ;;  %7112 = vmatpush3.bf16.msra.mxu0 %v4334_v42 }
0x12bd   :  { %v4268_v6 = vadd.f32 %v10011_v31, %v4267_v40 }
0x12be   :  { %v4323_v26 = vmax.f32 %v4273_v1, 0.0 }
0x12bf   :  { %v4322_v41 = vmax.f32 %v4268_v6, 0.0 }
0x12c1   :  { %v4335_v44 = vpack.c.bf16 %v4323_v26, %v4322_v41 }
0x12c3   :  { %v7097_v55 = vpop.f32.mrb[248].mxu0  ;;  %7113 = vmatprep.subr.bf16.mxu0 %v4335_v44 }
0x12c4   :  { %v4283_v59 = vadd.f32 %v7097_v55, %v10011_v31  ;;  %v4277_v50 = vpop.f32.mrb[249].mxu0  ;;  %7114 = vmatpush3.bf16.msra.mxu0 %v4335_v44  ;;  %v10800_v55 = vld [vmem:[#allocation64_spill] sm:$0xff] }
0x12c5   :  { %v4278_v35 = vadd.f32 %v10011_v31, %v4277_v50  ;;  %vm10801_vm8 = vnez %v10800_v55  ;;  %v10806_v50 = vld [vmem:[#allocation67_spill] sm:$0xff] }
0x12c6   :  { %v4325_v0 = vmax.f32 %v4283_v59, 0.0  ;;  %v10802_v59 = vld [vmem:[#allocation65_spill] sm:$0xff]  ;;  %vm10807_vm13 = vnez %v10806_v50 }
0x12c7   :  { %v4324_v2 = vmax.f32 %v4278_v35, 0.0  ;;  %vm10803_vm15 = vnez %v10802_v59  ;;  %v10808_v35 = vld [vmem:[#allocation68_spill] sm:$0xff] }
0x12c9   :  { %v4336_v56 = vpack.c.bf16 %v4325_v0, %v4324_v2  ;;  %v10810_v0 = vld [vmem:[#allocation69_spill] sm:$0xff]  ;;  %v10812_v2 = vld [vmem:[#allocation70_spill] sm:$0xff] }
0x12ca   :  { %vm10813_vm10 = vnez %v10812_v2 }
0x12cb   :  { %v7100_v20 = vpop.f32.mrb[250].mxu0  ;;  %7115 = vmatprep.subr.bf16.mxu0 %v4336_v56 }
0x12cc   :  { %v4293_v47 = vadd.f32 %v7100_v20, %v10011_v31  ;;  %v4287_v60 = vpop.f32.mrb[251].mxu0  ;;  %7116 = vmatpush3.bf16.msra.mxu0 %v4336_v56  ;;  %v10814_v56 = vld [vmem:[#allocation71_spill] sm:$0xff] }
0x12cd   :  { %v4288_v58 = vadd.f32 %v10011_v31, %v4287_v60  ;;  %vm10815_vm11 = vnez %v10814_v56  ;;  %v10818_v60 = vld [vmem:[#allocation74_spill] sm:$0xff] }
0x12ce   :  { %v4327_v19 = vmax.f32 %v4293_v47, 0.0  ;;  %vm10819_vm12 = vnez %v10818_v60 }
0x12cf   :  { %v4326_v14 = vmax.f32 %v4288_v58, 0.0  ;;  %v10820_v58 = vld [vmem:[#allocation75_spill] sm:$0xff] }
0x12d0   :  { %vm10821_vm1 = vnez %v10820_v58 }
0x12d1   :  { %v4337_v36 = vpack.c.bf16 %v4327_v19, %v4326_v14  ;;  %v10822_v19 = vld [vmem:[#allocation76_spill] sm:$0xff]  ;;  %v4548_v14 = vld [vmem:[#allocation17 + $0x270] sm:$0xff] }
0x12d2   :  { %vm10823_vm0 = vnez %v10822_v19 }
0x12d3   :  { %v7103_v61 = vpop.f32.mrb[252].mxu0  ;;  %7117 = vmatprep.subr.bf16.mxu0 %v4337_v36 }
0x12d4   :  { %v4303_v8 = vadd.f32 %v7103_v61, %v10011_v31  ;;  %v4297_v39 = vpop.f32.mrb[253].mxu0  ;;  %7118 = vmatpush3.bf16.msra.mxu0 %v4337_v36  ;;  %v4549_v36 = vld [vmem:[#allocation17 + $0x278] sm:$0xff] }
0x12d5   :  { %v4298_v46 = vadd.f32 %v10011_v31, %v4297_v39  ;;  %v7551_v61 = vpack.c.bf16 %v4549_v36, %v4548_v14 }
0x12d6   :  { %v4329_v32 = vmax.f32 %v4303_v8, 0.0 }
0x12d7   :  { %v4328_v45 = vmax.f32 %v4298_v46, 0.0  ;;  %7552 = vmatprep.subr.bf16.mxu1 %v7551_v61 }
0x12d8   :  { %7554 = vmatpush3.bf16.msra.mxu1 %v7551_v61 }
0x12d9   :  { %v4338_v5 = vpack.c.bf16 %v4329_v32, %v4328_v45 }
0x12db   :  { %v7106_v13 = vpop.f32.mrb[254].mxu0  ;;  %7119 = vmatprep.subr.bf16.mxu0 %v4338_v5 }
0x12dc   :  { %v4313_v42 = vadd.f32 %v7106_v13, %v10011_v31  ;;  %v4307_v4 = vpop.f32.mrb[255].mxu0  ;;  %7120 = vmatpush3.bf16.msra.mxu0 %v4338_v5 }
0x12dd   :  { %v4308_v1 = vadd.f32 %v10011_v31, %v4307_v4  ;;  %v10804_v31 = vld [vmem:[#allocation66_spill] sm:$0xff] }
0x12de   :  { %v4331_v40 = vmax.f32 %v4313_v42, 0.0  ;;  %vm10805_vm5 = vnez %v10804_v31 }
0x12df   :  { %v4330_v6 = vmax.f32 %v4308_v1, 0.0 }
0x12e1   :  { %v4339_v26 = vpack.c.bf16 %v4331_v40, %v4330_v6 }
0x12e3   :  { %7121 = vmatprep.subr.bf16.mxu0 %v4339_v26 }
0x12e4   :  { %7122 = vmatpush3.bf16.msra.mxu0 %v4339_v26 }
0x12e7   :  { %7124 = vmatmul.mubr.msk.bf16.vlgmr.msra.gmra.mrb[0].mxu0 %vm10669_vm14, %v10559_v53  ;;  %vm10809_vm14 = vnez %v10808_v35 }
0x12e8   :  { %7127 = vmatprep.mubr.msk.bf16.mxu0 %vm10671_vm6, %v10559_v53  ;;  %vm10811_vm6 = vnez %v10810_v0 }
0x12ef   :  { %7128 = vmatmul.mubr.msk.bf16.gmra.mrb[4].mxu0 %vm10801_vm8, %v10559_v53 }
0x12f0   :  { %7131 = vmatprep.mubr.msk.bf16.mxu0 %vm10803_vm15, %v10559_v53 }
0x12f7   :  { %7132 = vmatmul.mubr.msk.bf16.gmra.mrb[8].mxu0 %vm10805_vm5, %v10559_v53 }
0x12f8   :  { %7135 = vmatprep.mubr.msk.bf16.mxu0 %vm10807_vm13, %v10559_v53 }
0x12ff   :  { %7136 = vmatmul.mubr.msk.bf16.gmra.mrb[12].mxu0 %vm10809_vm14, %v10559_v53 }
0x1300   :  { %7139 = vmatprep.mubr.msk.bf16.mxu0 %vm10811_vm6, %v10559_v53 }
0x1307   :  { %7140 = vmatmul.mubr.msk.bf16.gmra.mrb[16].mxu0 %vm10813_vm10, %v10559_v53 }
0x1308   :  { %7143 = vmatprep.mubr.msk.bf16.mxu0 %vm10815_vm11, %v10559_v53 }
0x130f   :  { %7144 = vmatmul.mubr.msk.bf16.gmra.mrb[20].mxu0 %vm10748_vm4, %v10559_v53 }
0x1310   :  { %7147 = vmatprep.mubr.msk.bf16.mxu0 %vm10750_vm2, %v10559_v53 }
0x1317   :  { %7148 = vmatmul.mubr.msk.bf16.gmra.mrb[24].mxu0 %vm10819_vm12, %v10559_v53 }
0x1318   :  { %7151 = vmatprep.mubr.msk.bf16.mxu0 %vm10821_vm1, %v10559_v53 }
0x131f   :  { %7152 = vmatmul.mubr.msk.bf16.gmra.mrb[28].mxu0 %vm10823_vm0, %v10559_v53 }
0x13ba   :  { %v7125_v8 = vpop.f32.mrb[0].mxu0 }
0x13bb   :  { %v4374_v39 = vpop.f32.mrb[1].mxu0  ;;  %v4503_v13 = vadd.f32 %v7125_v8, %v9807_v34 }
0x13bc   :  { %v4501_v46 = vadd.f32 %v4374_v39, %v9791_v33  ;;  %v7126_v32 = vpop.f32.mrb[2].mxu0 }
0x13bd   :  { %v4377_v45 = vpop.f32.mrb[3].mxu0  ;;  %v4504_v53 = vadd.f32 %v7126_v32, %v9804_v17 }
0x13be   :  { %v4502_v5 = vadd.f32 %v4377_v45, %v9787_v12  ;;  %7187 = vmatprep.mubr.f32.mxu1 %v4501_v46 }
0x13c0   :  { %7188 = vmatmul.mubr.f32.vlgmr.msra.gmra.mrb[0].mxu1 %v4502_v5 }
0x13c1   :  { %7190 = vmatprep.mubr.f32.mxu1 %v4503_v13 }
0x13c2   :  { %v7129_v42 = vpop.f32.mrb[4].mxu0 }
0x13c3   :  { %v4390_v4 = vpop.f32.mrb[5].mxu0  ;;  %v4507_v41 = vadd.f32 %v7129_v42, %v9855_v10 }
0x13c4   :  { %v4505_v1 = vadd.f32 %v4390_v4, %v9831_v9  ;;  %v7130_v40 = vpop.f32.mrb[6].mxu0  ;;  %7191 = vmatmul.mubr.f32.gmra.mrb[2].mxu1 %v4504_v53 }
0x13c5   :  { %v4393_v6 = vpop.f32.mrb[7].mxu0  ;;  %v4508_v44 = vadd.f32 %v7130_v40, %v9852_v18 }
0x13c6   :  { %v4506_v26 = vadd.f32 %v4393_v6, %v9828_v38  ;;  %7193 = vmatprep.mubr.f32.mxu1 %v4505_v1 }
0x13c8   :  { %7194 = vmatmul.mubr.f32.gmra.mrb[4].mxu1 %v4506_v26 }
0x13c9   :  { %7196 = vmatprep.mubr.f32.mxu1 %v4507_v41 }
0x13ca   :  { %v7133_v55 = vpop.f32.mrb[8].mxu0 }
0x13cb   :  { %v4406_v59 = vpop.f32.mrb[9].mxu0  ;;  %v4511_v2 = vadd.f32 %v7133_v55, %v9891_v54 }
0x13cc   :  { %v4509_v31 = vadd.f32 %v4406_v59, %v9869_v25  ;;  %v7134_v50 = vpop.f32.mrb[10].mxu0  ;;  %7197 = vmatmul.mubr.f32.gmra.mrb[6].mxu1 %v4508_v44 }
0x13cd   :  { %v4409_v35 = vpop.f32.mrb[11].mxu0  ;;  %v4512_v56 = vadd.f32 %v7134_v50, %v9888_v15 }
0x13ce   :  { %v4510_v0 = vadd.f32 %v4409_v35, %v9862_v27  ;;  %7199 = vmatprep.mubr.f32.mxu1 %v4509_v31 }
0x13d0   :  { %7200 = vmatmul.mubr.f32.gmra.mrb[8].mxu1 %v4510_v0 }
0x13d1   :  { %7202 = vmatprep.mubr.f32.mxu1 %v4511_v2 }
0x13d2   :  { %v7137_v20 = vpop.f32.mrb[12].mxu0 }
0x13d3   :  { %v4422_v47 = vpop.f32.mrb[13].mxu0  ;;  %v4515_v36 = vadd.f32 %v7137_v20, %v9933_v22 }
0x13d4   :  { %v4513_v60 = vadd.f32 %v4422_v47, %v9915_v11  ;;  %v7138_v58 = vpop.f32.mrb[14].mxu0  ;;  %7203 = vmatmul.mubr.f32.gmra.mrb[10].mxu1 %v4512_v56 }
0x13d5   :  { %v4425_v19 = vpop.f32.mrb[15].mxu0  ;;  %v4516_v61 = vadd.f32 %v7138_v58, %v9930_v57 }
0x13d6   :  { %v4514_v14 = vadd.f32 %v4425_v19, %v9912_v23  ;;  %7205 = vmatprep.mubr.f32.mxu1 %v4513_v60 }
0x13d8   :  { %7206 = vmatmul.mubr.f32.gmra.mrb[12].mxu1 %v4514_v14 }
0x13d9   :  { %7208 = vmatprep.mubr.f32.mxu1 %v4515_v36 }
0x13da   :  { %v7141_v8 = vpop.f32.mrb[16].mxu0 }
0x13db   :  { %v4438_v39 = vpop.f32.mrb[17].mxu0  ;;  %v4519_v13 = vadd.f32 %v7141_v8, %v9821_v51  ;;  %v10106_v8 = vld [vmem:[#allocation20] sm:$0x1] }
0x13dc   :  { %v4517_v46 = vadd.f32 %v4438_v39, %v9800_v28  ;;  %v7142_v32 = vpop.f32.mrb[18].mxu0  ;;  %7209 = vmatmul.mubr.f32.gmra.mrb[14].mxu1 %v4516_v61  ;;  %6287 = vmatprep.mubr.f32.mxu0 %v10106_v8  ;;  %v10109_v39 = vld [vmem:[#allocation18 + $0x4] ss:$0 sm:$0xff] }
0x13dd   :  { %v4441_v45 = vpop.f32.mrb[19].mxu0  ;;  %v4520_v53 = vadd.f32 %v7142_v32, %v9816_v16 }
0x13de   :  { %v4518_v5 = vadd.f32 %v4441_v45, %v9796_v24  ;;  %7211 = vmatprep.mubr.f32.mxu1 %v4517_v46 }
0x13e0   :  { %7212 = vmatmul.mubr.f32.gmra.mrb[16].mxu1 %v4518_v5 }
0x13e1   :  { %7214 = vmatprep.mubr.f32.mxu1 %v4519_v13 }
0x13e2   :  { %v7145_v42 = vpop.f32.mrb[20].mxu0 }
0x13e3   :  { %v4454_v4 = vpop.f32.mrb[21].mxu0  ;;  %v4523_v41 = vadd.f32 %v7145_v42, %v9865_v43 }
0x13e4   :  { %v4521_v1 = vadd.f32 %v4454_v4, %v9840_v63  ;;  %v7146_v40 = vpop.f32.mrb[22].mxu0  ;;  %7215 = vmatmul.mubr.f32.gmra.mrb[18].mxu1 %v4520_v53 }
0x13e5   :  { %v4457_v6 = vpop.f32.mrb[23].mxu0  ;;  %v4524_v44 = vadd.f32 %v7146_v40, %v9858_v7 }
0x13e6   :  { %v4522_v26 = vadd.f32 %v4457_v6, %v9836_v52  ;;  %7217 = vmatprep.mubr.f32.mxu1 %v4521_v1 }
0x13e8   :  { %7218 = vmatmul.mubr.f32.gmra.mrb[20].mxu1 %v4522_v26 }
0x13e9   :  { %7220 = vmatprep.mubr.f32.mxu1 %v4523_v41 }
0x13ea   :  { %v7149_v55 = vpop.f32.mrb[24].mxu0 }
0x13eb   :  { %v4470_v59 = vpop.f32.mrb[25].mxu0  ;;  %v4527_v2 = vadd.f32 %v7149_v55, %v9906_v21 }
0x13ec   :  { %v4525_v31 = vadd.f32 %v4470_v59, %v9884_v48  ;;  %v7150_v50 = vpop.f32.mrb[26].mxu0  ;;  %7221 = vmatmul.mubr.f32.gmra.mrb[22].mxu1 %v4524_v44 }
0x13ed   :  { %v4473_v35 = vpop.f32.mrb[27].mxu0  ;;  %v4528_v56 = vadd.f32 %v7150_v50, %v9902_v29 }
0x13ee   :  { %v4526_v0 = vadd.f32 %v4473_v35, %v9878_v37  ;;  %7223 = vmatprep.mubr.f32.mxu1 %v4525_v31 }
0x13f0   :  { %7224 = vmatmul.mubr.f32.gmra.mrb[24].mxu1 %v4526_v0 }
0x13f1   :  { %7226 = vmatprep.mubr.f32.mxu1 %v4527_v2 }
0x13f2   :  { %v7153_v20 = vpop.f32.mrb[28].mxu0 }
0x13f3   :  { %v4486_v47 = vpop.f32.mrb[29].mxu0  ;;  %v4531_v36 = vadd.f32 %v7153_v20, %v9941_v3 }
0x13f4   :  { %v4529_v60 = vadd.f32 %v4486_v47, %v9924_v49  ;;  %v7154_v58 = vpop.f32.mrb[30].mxu0  ;;  %7227 = vmatmul.mubr.f32.gmra.mrb[26].mxu1 %v4528_v56 }
0x13f5   :  { %v4489_v19 = vpop.f32.mrb[31].mxu0  ;;  %v4532_v61 = vadd.f32 %v7154_v58, %v9936_v62 }
0x13f6   :  { %v4530_v14 = vadd.f32 %v4489_v19, %v9920_v30  ;;  %7229 = vmatprep.mubr.f32.mxu1 %v4529_v60 }
0x13f8   :  { %7230 = vmatmul.mubr.f32.gmra.mrb[28].mxu1 %v4530_v14 }
0x13f9   :  { %7232 = vmatprep.mubr.f32.mxu1 %v4531_v36 }
0x13fc   :  { %7233 = vmatmul.mubr.f32.gmra.mrb[30].mxu1 %v4532_v61 }
0x1493   :  { %v7189_v46 = vpop.f32.mrb[0].mxu1 }
0x1494   :  { %v4630_v32 = vadd.f32 %v7189_v46, %v10109_v39  ;;  %v4624_v45 = vpop.f32.mrb[1].mxu1 }
0x1495   :  { %v4625_v5 = vadd.f32 %v10109_v39, %v4624_v45 }
0x1496   :  { %v4784_v13 = vmax.f32 %v4630_v32, 0.0 }
0x1497   :  { %v4783_v53 = vmax.f32 %v4625_v5, 0.0  ;;  %v7192_v42 = vpop.f32.mrb[2].mxu1 }
0x1498   :  { %v10114_v4 = vadd.f32 %v4784_v13, %v9787_v12  ;;  %v4640_v1 = vadd.f32 %v7192_v42, %v10109_v39  ;;  %v4634_v40 = vpop.f32.mrb[3].mxu1 }
0x1499   :  { %v10118_v6 = vadd.f32 %v4783_v53, %v9791_v33  ;;  %v4635_v26 = vadd.f32 %v10109_v39, %v4634_v40 }
0x149a   :  { %v4786_v41 = vmax.f32 %v4640_v1, 0.0 }
0x149b   :  { %v7557_v44 = vpack.c.bf16 %v10114_v4, %v10118_v6  ;;  %v4785_v55 = vmax.f32 %v4635_v26, 0.0  ;;  %v7195_v59 = vpop.f32.mrb[4].mxu1 }
0x149c   :  { %v10124_v31 = vadd.f32 %v4786_v41, %v9804_v17  ;;  %v4650_v12 = vadd.f32 %v7195_v59, %v10109_v39  ;;  %v4644_v50 = vpop.f32.mrb[5].mxu1 }
0x149d   :  { %v10128_v35 = vadd.f32 %v4785_v55, %v9807_v34  ;;  %v4645_v33 = vadd.f32 %v10109_v39, %v4644_v50 }
0x149e   :  { %v4788_v0 = vmax.f32 %v4650_v12, 0.0 }
0x149f   :  { %v7561_v2 = vpack.c.bf16 %v10124_v31, %v10128_v35  ;;  %v4787_v56 = vmax.f32 %v4645_v33, 0.0  ;;  %v7198_v20 = vpop.f32.mrb[6].mxu1 }
0x14a0   :  { %v10134_v47 = vadd.f32 %v4788_v0, %v9828_v38  ;;  %v4660_v17 = vadd.f32 %v7198_v20, %v10109_v39  ;;  %v4654_v60 = vpop.f32.mrb[7].mxu1 }
0x14a1   :  { %v10138_v58 = vadd.f32 %v4787_v56, %v9831_v9  ;;  %v4655_v34 = vadd.f32 %v10109_v39, %v4654_v60 }
0x14a2   :  { %v4790_v19 = vmax.f32 %v4660_v17, 0.0 }
0x14a3   :  { %v7565_v14 = vpack.c.bf16 %v10134_v47, %v10138_v58  ;;  %v4789_v36 = vmax.f32 %v4655_v34, 0.0  ;;  %v7201_v61 = vpop.f32.mrb[8].mxu1 }
0x14a4   :  { %v10144_v46 = vadd.f32 %v4790_v19, %v9852_v18  ;;  %v4670_v38 = vadd.f32 %v7201_v61, %v10109_v39  ;;  %v4664_v32 = vpop.f32.mrb[9].mxu1 }
0x14a5   :  { %v10148_v45 = vadd.f32 %v4789_v36, %v9855_v10  ;;  %v4665_v9 = vadd.f32 %v10109_v39, %v4664_v32 }
0x14a6   :  { %v4792_v5 = vmax.f32 %v4670_v38, 0.0 }
0x14a7   :  { %v7569_v13 = vpack.c.bf16 %v10144_v46, %v10148_v45  ;;  %v4791_v53 = vmax.f32 %v4665_v9, 0.0  ;;  %v7204_v42 = vpop.f32.mrb[10].mxu1 }
0x14a8   :  { %v10154_v1 = vadd.f32 %v4792_v5, %v9862_v27  ;;  %v4680_v18 = vadd.f32 %v7204_v42, %v10109_v39  ;;  %v4674_v40 = vpop.f32.mrb[11].mxu1 }
0x14a9   :  { %v10158_v26 = vadd.f32 %v4791_v53, %v9869_v25  ;;  %v4675_v10 = vadd.f32 %v10109_v39, %v4674_v40 }
0x14aa   :  { %v4794_v41 = vmax.f32 %v4680_v18, 0.0 }
0x14ab   :  { %v7573_v55 = vpack.c.bf16 %v10154_v1, %v10158_v26  ;;  %v4793_v59 = vmax.f32 %v4675_v10, 0.0  ;;  %v7207_v12 = vpop.f32.mrb[12].mxu1 }
0x14ac   :  { %v10164_v50 = vadd.f32 %v4794_v41, %v9888_v15  ;;  %v4690_v27 = vadd.f32 %v7207_v12, %v10109_v39  ;;  %v4684_v33 = vpop.f32.mrb[13].mxu1 }
0x14ad   :  { %v10168_v0 = vadd.f32 %v4793_v59, %v9891_v54  ;;  %v4685_v25 = vadd.f32 %v10109_v39, %v4684_v33 }
0x14ae   :  { %v4796_v56 = vmax.f32 %v4690_v27, 0.0 }
0x14af   :  { %v7577_v20 = vpack.c.bf16 %v10164_v50, %v10168_v0  ;;  %v4795_v17 = vmax.f32 %v4685_v25, 0.0  ;;  %v7210_v60 = vpop.f32.mrb[14].mxu1 }
0x14b0   :  { %v10174_v34 = vadd.f32 %v4796_v56, %v9912_v23  ;;  %v4700_v15 = vadd.f32 %v7210_v60, %v10109_v39  ;;  %v4694_v19 = vpop.f32.mrb[15].mxu1 }
0x14b1   :  { %v10178_v36 = vadd.f32 %v4795_v17, %v9915_v11  ;;  %v4695_v54 = vadd.f32 %v10109_v39, %v4694_v19 }
0x14b2   :  { %v4798_v61 = vmax.f32 %v4700_v15, 0.0 }
0x14b3   :  { %v7581_v38 = vpack.c.bf16 %v10174_v34, %v10178_v36  ;;  %v4797_v32 = vmax.f32 %v4695_v54, 0.0  ;;  %v7213_v9 = vpop.f32.mrb[16].mxu1 }
0x14b4   :  { %v10184_v5 = vadd.f32 %v4798_v61, %v9930_v57  ;;  %v4710_v23 = vadd.f32 %v7213_v9, %v10109_v39  ;;  %v4704_v53 = vpop.f32.mrb[17].mxu1 }
0x14b5   :  { %v10188_v42 = vadd.f32 %v4797_v32, %v9933_v22  ;;  %v4705_v11 = vadd.f32 %v10109_v39, %v4704_v53 }
0x14b6   :  { %v4800_v18 = vmax.f32 %v4710_v23, 0.0 }
0x14b7   :  { %v7585_v40 = vpack.c.bf16 %v10184_v5, %v10188_v42  ;;  %v4799_v10 = vmax.f32 %v4705_v11, 0.0  ;;  %v7216_v41 = vpop.f32.mrb[18].mxu1 }
0x14b8   :  { %v4832_v59 = vadd.f32 %v4800_v18, %v9796_v24  ;;  %v4720_v12 = vadd.f32 %v7216_v41, %v10109_v39  ;;  %v4714_v57 = vpop.f32.mrb[19].mxu1 }
0x14b9   :  { %v4831_v27 = vadd.f32 %v4799_v10, %v9800_v28  ;;  %v4715_v33 = vadd.f32 %v10109_v39, %v4714_v57 }
0x14ba   :  { %v4802_v25 = vmax.f32 %v4720_v12, 0.0 }
0x14bb   :  { %v4801_v22 = vmax.f32 %v4715_v33, 0.0  ;;  %v7219_v56 = vpop.f32.mrb[20].mxu1  ;;  %v7555_v17 = vpack.c.bf16 %v4832_v59, %v4831_v27 }
0x14bc   :  { %v4834_v60 = vadd.f32 %v4802_v25, %v9816_v16  ;;  %v4730_v15 = vadd.f32 %v7219_v56, %v10109_v39  ;;  %v4724_v19 = vpop.f32.mrb[21].mxu1 }
0x14bd   :  { %v4833_v54 = vadd.f32 %v4801_v22, %v9821_v51  ;;  %v4725_v24 = vadd.f32 %v10109_v39, %v4724_v19  ;;  %7556 = vmatprep.subr.bf16.mxu0 %v7555_v17 }
0x14be   :  { %v4804_v61 = vmax.f32 %v4730_v15, 0.0  ;;  %7558 = vmatpush3.bf16.xpose.msra.mxu0 %v7557_v44 }
0x14bf   :  { %v4803_v28 = vmax.f32 %v4725_v24, 0.0  ;;  %v7222_v32 = vpop.f32.mrb[22].mxu1  ;;  %v7559_v9 = vpack.c.bf16 %v4834_v60, %v4833_v54 }
0x14c0   :  { %v4836_v23 = vadd.f32 %v4804_v61, %v9836_v52  ;;  %v4740_v16 = vadd.f32 %v7222_v32, %v10109_v39  ;;  %v4734_v53 = vpop.f32.mrb[23].mxu1 }
0x14c1   :  { %v4835_v11 = vadd.f32 %v4803_v28, %v9840_v63  ;;  %v4735_v51 = vadd.f32 %v10109_v39, %v4734_v53  ;;  %7560 = vmatprep.subr.bf16.mxu0 %v7559_v9 }
0x14c2   :  { %v4806_v18 = vmax.f32 %v4740_v16, 0.0 }
0x14c3   :  { %v4805_v10 = vmax.f32 %v4735_v51, 0.0  ;;  %v7225_v41 = vpop.f32.mrb[24].mxu1  ;;  %v7563_v59 = vpack.c.bf16 %v4836_v23, %v4835_v11 }
0x14c4   :  { %v4838_v4 = vadd.f32 %v4806_v18, %v9858_v7  ;;  %v4750_v6 = vadd.f32 %v7225_v41, %v10109_v39  ;;  %v4744_v44 = vpop.f32.mrb[25].mxu1  ;;  %v10825_v18 = vlaneseq }
0x14c5   :  { %v4837_v12 = vadd.f32 %v4805_v10, %v9865_v43  ;;  %v4745_v52 = vadd.f32 %v10109_v39, %v4744_v44 }
0x14c6   :  { %v4808_v57 = vmax.f32 %v4750_v6, 0.0  ;;  %7562 = vmatpush3.bf16.xpose.msra.mxu0 %v7561_v2  ;;  %vm4961_vm4 = vcmp.lt.s32.totalorder %v10825_v18, 256 }
0x14c7   :  { %v4807_v63 = vmax.f32 %v4745_v52, 0.0  ;;  %v7228_v27 = vpop.f32.mrb[26].mxu1  ;;  %7564 = vmatprep.subr.bf16.mxu0 %v7563_v59  ;;  %v7567_v33 = vpack.c.bf16 %v4838_v4, %v4837_v12 }
0x14c8   :  { %v4840_v25 = vadd.f32 %v4808_v57, %v9878_v37  ;;  %v4760_v7 = vadd.f32 %v7228_v27, %v10109_v39  ;;  %v4754_v22 = vpop.f32.mrb[27].mxu1 }
0x14c9   :  { %v4839_v56 = vadd.f32 %v4807_v63, %v9884_v48  ;;  %v4755_v43 = vadd.f32 %v10109_v39, %v4754_v22 }
0x14ca   :  { %v4810_v17 = vmax.f32 %v4760_v7, 0.0 }
0x14cb   :  { %v4809_v60 = vmax.f32 %v4755_v43, 0.0  ;;  %v7231_v15 = vpop.f32.mrb[28].mxu1  ;;  %v7571_v19 = vpack.c.bf16 %v4840_v25, %v4839_v56 }
0x14cc   :  { %v4842_v31 = vadd.f32 %v4810_v17, %v9902_v29  ;;  %v4770_v35 = vadd.f32 %v7231_v15, %v10109_v39  ;;  %v4764_v2 = vpop.f32.mrb[29].mxu1 }
0x14cd   :  { %v4841_v54 = vadd.f32 %v4809_v60, %v9906_v21  ;;  %v4765_v37 = vadd.f32 %v10109_v39, %v4764_v2 }
0x14ce   :  { %v4812_v24 = vmax.f32 %v4770_v35, 0.0  ;;  %7566 = vmatpush3.bf16.xpose.msra.mxu0 %v7565_v14 }
0x14cf   :  { %v4811_v48 = vmax.f32 %v4765_v37, 0.0  ;;  %v7234_v61 = vpop.f32.mrb[30].mxu1  ;;  %7568 = vmatprep.subr.bf16.mxu0 %v7567_v33  ;;  %v7575_v28 = vpack.c.bf16 %v4842_v31, %v4841_v54 }
0x14d0   :  { %v4844_v32 = vadd.f32 %v4812_v24, %v9920_v30  ;;  %v4780_v29 = vadd.f32 %v7234_v61, %v10109_v39  ;;  %v4774_v9 = vpop.f32.mrb[31].mxu1 }
0x14d1   :  { %v4843_v23 = vadd.f32 %v4811_v48, %v9924_v49  ;;  %v4775_v21 = vadd.f32 %v10109_v39, %v4774_v9  ;;  %v10824_v49 = vld [vmem:[#allocation60_spill] sm:$0xff] }
0x14d2   :  { %v4814_v16 = vmax.f32 %v4780_v29, 0.0 }
0x14d3   :  { %v4813_v53 = vmax.f32 %v4775_v21, 0.0  ;;  %v7579_v11 = vpack.c.bf16 %v4844_v32, %v4843_v23 }
0x14d4   :  { %v4846_v51 = vadd.f32 %v4814_v16, %v9936_v62  ;;  %v4856_v62 = vsub.s32 0, %v10824_v49 }
0x14d5   :  { %v4845_v47 = vadd.f32 %v4813_v53, %v9941_v3  ;;  %v4852_v3 = vpop.permute.xlu0 %4851 }
0x14d6   :  { %7570 = vmatpush3.bf16.xpose.msra.mxu0 %v7569_v13  ;;  %v4857_v39 = vrot.slane %v4852_v3, %v4856_v62 }
0x14d7   :  { %7572 = vmatprep.subr.bf16.mxu0 %v7571_v19  ;;  %v7583_v30 = vpack.c.bf16 %v4846_v51, %v4845_v47 }
0x14de   :  { %7574 = vmatpush3.bf16.xpose.msra.mxu0 %v7573_v55 }
0x14df   :  { %7576 = vmatprep.subr.bf16.mxu0 %v7575_v28 }
0x14e6   :  { %7578 = vmatpush3.bf16.xpose.msra.mxu0 %v7577_v20  ;;  %v7943_v20 = vmov 1966171168  }
0x14e7   :  { %7580 = vmatprep.subr.bf16.mxu0 %v7579_v11 }
0x14ee   :  { %7582 = vmatpush3.bf16.xpose.msra.mxu0 %v7581_v38 }
0x14ef   :  { %7584 = vmatprep.subr.bf16.mxu0 %v7583_v30 }
0x14f6   :  { %7586 = vmatpush3.bf16.xpose.msra.mxu0 %v7585_v40 }
0x14fd   :  { %6288 = vmatmul.mubr.f32.vlgmr.msra.gmra.mrb[32].mxu0 %v10106_v8  ;;  %v4945_v8 = vunpack.c.l.s4 %v7943_v20 }
0x14ff   :  { %v4946_v34 = vunpack.c.0.s8 %v4945_v8 }
0x1501   :  { %v4949_v38 = vsub.s32 %v4946_v34, %v10824_v49 }
0x15d0   :  { %v4924_v58 = vpop.f32.mrb[32].mxu0 }
0x15d1   :  { %v4925_v14 = vadd.f32 %v4924_v58, %v4857_v39  ;;  %v4926_v46 = vpop.f32.mrb[33].mxu0 }
0x15d2   :  { %v4927_v45 = vadd.f32 %v4926_v46, %v4857_v39 }
0x15d3   :  { %v5396_v13 = vmul.f32 -1.442695, %v4925_v14 }
0x15d4   :  { %v5397_v1 = vmul.f32 -1.442695, %v4927_v45 }
0x15d5   :  { %7608 = vpow2.f32 %v5396_v13 }
0x15d6   :  { %7610 = vpow2.f32 %v5397_v1 }
0x15df   :  { %v7609_v26 = vpop.eup %7608 }
0x15e0   :  { %v7611_v55 = vpop.eup %7610  ;;  %v4935_v50 = vadd.f32 1.0, %v7609_v26 }
0x15e1   :  { %v4936_v0 = vadd.f32 1.0, %v7611_v55 }
0x15e2   :  { %7612 = vrcp.f32 %v4935_v50 }
0x15e3   :  { %7614 = vrcp.f32 %v4936_v0 }
0x15ec   :  { %v7613_v36 = vpop.eup %7612 }
0x15ed   :  { %v7615_v5 = vpop.eup %7614 }
0x15ee   :  { %v4943_v42 = vcombine.low %v7613_v36, %v7615_v5 }
0x15f0   :  { %v4950_v40 = vrot.slane %v4943_v42, %v4949_v38 }
0x15f2   :  { %v4957_v10 = vrot.slane %v4950_v40, %v4949_v38 }
0x15f4   :  { %4963 = vst.msk [vmem:[#allocation21] sm:$0x3] %vm4961_vm4, %v4957_v10 }
0x15f5   :  { %7901 = shalt.err (!%p7898_p8)
}
0x15f6   :  { %s7902_s1 = scalar_lea.hbm %s10275_s12, 32 }
0x15f7   :  { %p7903_p9 = scmp.ne.s32.totalorder %s10275_s12, %s7902_s1  ;;  %p7906_p10 = scmp.lt.u32.totalorder %s7902_s1, %s10275_s12 }
0x15f9   :  { %p7908_p11 = pnand %p7906_p10, %p7903_p9 }
0x15fb   :  { %7911 = shalt.err (!%p7908_p11)
}
0x15fc   :  { %4973 = dma.vmem_to_hbm [thread:$0]  %s4971_s24, 32, %s10275_s12, [#allocation5]  }
0x15fd   :  { %7924 = dma.done.wait [#allocation5], 32  }
0x15fe   :  { %7925 = vsyncadd [#allocation5], 4294967264 }
0x15ff   :  { %4977 = vsyncpa [#allocation4], 1 }
0x1600   :  { %4978 = vsyncpa [#allocation7], 1 }
0x1601   :  { %4979 = vsyncpa [#allocation10], 1 }
0x1602   :  { %4980 = vsyncpa [#allocation13], 1 }
0x1603   :  { %4981 = vsyncpa [#allocation16], 1 }
0x1604   :  { %4982 = vsyncpa [#allocation19], 1 }
0x1605   :  { %4983 = vsyncpa [#allocation5], 1 }

</bundles_post_ra>
